<compile_context>
chip_gen: v7x
topology: tpu7x:2x2x1
jax: 0.10.0
libtpu: 0.0.40
codegen_flags: <defaults>
</compile_context>

<pallas_src>
import functools
import math

import jax
import jax.numpy as jnp
from jax.experimental import pallas as pl
from jax.experimental.pallas import tpu as pltpu

D_MODEL = 256
N_HEADS = 8
FFN_DIM = 4 * D_MODEL
FUTURE_LEN = 80
MODALITIES = 6
TRAJ_PAD = 384          # 80*4 = 320 padded to 3*128 lanes

# rows of the packed per-transformer-block parameter-vector slab
VEC_BQ, VEC_BK, VEC_BV, VEC_BO = 0, 1, 2, 3
VEC_LN1G, VEC_LN1B, VEC_LN2G, VEC_LN2B, VEC_FB2 = 4, 5, 6, 7, 8
VEC_ROWS = 16


def _round_up(x, m):
    return ((x + m - 1) // m) * m


def _ln(x, g, b):
    mu = jnp.mean(x, axis=-1, keepdims=True)
    var = jnp.mean(jnp.square(x - mu), axis=-1, keepdims=True)
    return (x - mu) * jax.lax.rsqrt(var + 1e-5) * g + b


def _gelu(x):
    # TODO(synk): tanh-approx GELU; torch nn.GELU() default is the exact erf form (~1e-3 diff).
    return jax.nn.gelu(x, approximate=True)


def _elu(x):
    return jnp.where(x > 0.0, x, jnp.exp(jnp.minimum(x, 0.0)) - 1.0)


# --------------------------------------------------------------------------
# Shared fused transformer body: full-width QKV/O projections + per-head
# softmax attention (context written into a VMEM scratch slab) + LN + FFN + LN
# --------------------------------------------------------------------------
def _attn_ffn(x, kv, mask_add, wq, wkv, wo, vecs, fw1, fb1, fw2, ctx_scr, *, self_residual):
    D = x.shape[-1]
    hd = D // N_HEADS
    scale = 1.0 / math.sqrt(hd)
    xb = x.astype(jnp.bfloat16)
    kvb = kv.astype(jnp.bfloat16)

    # Full-width projections (single wide MXU matmuls, f32 accumulation).
    qp = jnp.dot(xb, wq, preferred_element_type=jnp.float32) + vecs[VEC_BQ:VEC_BQ + 1]
    kvp = jnp.dot(kvb, wkv, preferred_element_type=jnp.float32)
    kp = kvp[:, :D] + vecs[VEC_BK:VEC_BK + 1]
    vp = kvp[:, D:] + vecs[VEC_BV:VEC_BV + 1]

    # Tiny per-head logits/softmax/context; context goes straight into VMEM scratch
    # (no 8-way concat / relayout).
    for h in range(N_HEADS):
        s0 = h * hd
        qh = qp[:, s0:s0 + hd]
        kh = kp[:, s0:s0 + hd]
        vh = vp[:, s0:s0 + hd]
        logits = jax.lax.dot_general(
            qh, kh, (((1,), (1,)), ((), ())),
            preferred_element_type=jnp.float32) * scale + mask_add
        lmax = jnp.max(logits, axis=-1, keepdims=True)
        p = jnp.exp(logits - lmax)
        probs = p / jnp.sum(p, axis=-1, keepdims=True)       # exact reciprocal (torch parity)
        ctx_scr[:, s0:s0 + hd] = jnp.dot(probs, vh, preferred_element_type=jnp.float32)

    attn = jnp.dot(ctx_scr[...].astype(jnp.bfloat16), wo,
                   preferred_element_type=jnp.float32) + vecs[VEC_BO:VEC_BO + 1]
    h1 = attn + x if self_residual else attn                  # SelfTransformer vs CrossTransformer
    h1 = _ln(h1, vecs[VEC_LN1G:VEC_LN1G + 1], vecs[VEC_LN1B:VEC_LN1B + 1])

    f = jnp.dot(h1.astype(jnp.bfloat16), fw1, preferred_element_type=jnp.float32) + fb1
    f = _gelu(f)
    f = jnp.dot(f.astype(jnp.bfloat16), fw2,
                preferred_element_type=jnp.float32) + vecs[VEC_FB2:VEC_FB2 + 1]
    return _ln(f + h1, vecs[VEC_LN2G:VEC_LN2G + 1], vecs[VEC_LN2B:VEC_LN2B + 1])


def _self_kernel(x_ref, m_ref, wq_ref, wkv_ref, wo_ref, vecs_ref, fw1_ref, fb1_ref, fw2_ref,
                 o_ref, ctx_scr):
    x = x_ref[...]
    o_ref[...] = _attn_ffn(x, x, m_ref[...], wq_ref[...], wkv_ref[...], wo_ref[...],
                           vecs_ref[...], fw1_ref[...], fb1_ref[...], fw2_ref[...],
                           ctx_scr, self_residual=True)


def _cross_kernel(q_ref, inter_ref, enc_ref, m_ref, wq_ref, wkv_ref, wo_ref, vecs_ref,
                  fw1_ref, fb1_ref, fw2_ref, o_ref, ctx_scr):
    # enc_cat = [interaction ; encoding] built in-kernel; K/V projected once per batch.
    kv = jnp.concatenate([inter_ref[...], enc_ref[...]], axis=0)
    o_ref[...] = _attn_ffn(q_ref[...], kv, m_ref[...], wq_ref[...], wkv_ref[...], wo_ref[...],
                           vecs_ref[...], fw1_ref[...], fb1_ref[...], fw2_ref[...],
                           ctx_scr, self_residual=False)


def _transformer_param_specs(index_map):
    D = D_MODEL
    return [
        pl.BlockSpec((D, D), index_map),            # wq
        pl.BlockSpec((D, 2 * D), index_map),        # wkv (packed K|V)
        pl.BlockSpec((D, D), index_map),            # wo
        pl.BlockSpec((VEC_ROWS, D), index_map),     # packed biases / LN params
        pl.BlockSpec((D, FFN_DIM), index_map),      # ffn w1
        pl.BlockSpec((1, FFN_DIM), index_map),      # ffn b1
        pl.BlockSpec((FFN_DIM, D), index_map),      # ffn w2
    ]


def self_transformer(x, mask_add, p):
    """x [L,D] (all B*N agent rows in one block); mask_add [L,L] block-diagonal additive mask."""
    L, D = x.shape
    im = lambda i: (0, 0)
    return pl.pallas_call(
        _self_kernel,
        out_shape=jax.ShapeDtypeStruct((L, D), jnp.float32),
        grid=(1,),
        in_specs=[pl.BlockSpec((L, D), im), pl.BlockSpec((L, L), im)]
                 + _transformer_param_specs(im),
        out_specs=pl.BlockSpec((L, D), im),
        scratch_shapes=[pltpu.VMEM((L, D), jnp.float32)],
        compiler_params=pltpu.CompilerParams(dimension_semantics=("arbitrary",)),
    )(x, mask_add, p["wq"], p["wkv"], p["wo"], p["vecs"],
      p["ffn_w1"], p["ffn_b1"], p["ffn_w2"])


def cross_transformer(q, inter, enc, mask_add, p):
    """q [B,Lq,D] (all N*M queries of a batch per grid step); inter [B,Li,D]; enc [B,S,D]."""
    B, Lq, D = q.shape
    Li, S = inter.shape[1], enc.shape[1]
    Lk = Li + S
    bm = lambda b: (b, 0, 0)
    wm = lambda b: (0, 0)
    return pl.pallas_call(
        _cross_kernel,
        out_shape=jax.ShapeDtypeStruct((B, Lq, D), jnp.float32),
        grid=(B,),
        in_specs=[
            pl.BlockSpec((None, Lq, D), bm),
            pl.BlockSpec((None, Li, D), bm),
            pl.BlockSpec((None, S, D), bm),
            pl.BlockSpec((None, Lq, Lk), bm),
        ] + _transformer_param_specs(wm),
        out_specs=pl.BlockSpec((None, Lq, D), bm),
        scratch_shapes=[pltpu.VMEM((Lq, D), jnp.float32)],
        compiler_params=pltpu.CompilerParams(dimension_semantics=("parallel",)),
    )(q, inter, enc, mask_add, p["wq"], p["wkv"], p["wo"], p["vecs"],
      p["ffn_w1"], p["ffn_b1"], p["ffn_w2"])


# --------------------------------------------------------------------------
# FutureEncoder MLP + time max-pool + softmax-weighted mean + residual add,
# all fused in one kernel (one grid step, sublane-aligned row slabs)
# --------------------------------------------------------------------------
def _future_kernel(x_ref, lc_ref, pw_ref, w1_ref, b1_ref, w2_ref, b2_ref,
                   q_ref, fut_ref, *, T, RP):
    x = x_ref[...]                                                       # (T*RP, 8)
    h = jnp.maximum(
        jnp.dot(x, w1_ref[...], preferred_element_type=jnp.float32) + b1_ref[...], 0.0)
    y = jnp.dot(h, w2_ref[...], preferred_element_type=jnp.float32) + b2_ref[...]
    acc = y[0:RP]                                                        # max-pool over time
    for t in range(1, T):
        acc = jnp.maximum(acc, y[t * RP:(t + 1) * RP])
    q_ref[...] = lc_ref[...] + acc                                       # last_content + multi_futures
    # futures = mean_m(softmax(scores) * multi_futures) as one tiny selection matmul
    fut_ref[...] = jnp.dot(pw_ref[...], acc, preferred_element_type=jnp.float32)


def future_encoder(feats_slab, lc_slab, p_w, p, *, T, RP, GP):
    im = lambda i: (0, 0)
    return pl.pallas_call(
        functools.partial(_future_kernel, T=T, RP=RP),
        out_shape=(jax.ShapeDtypeStruct((RP, D_MODEL), jnp.float32),
                   jax.ShapeDtypeStruct((GP, D_MODEL), jnp.float32)),
        grid=(1,),
        in_specs=[
            pl.BlockSpec((T * RP, 8), im),
            pl.BlockSpec((RP, D_MODEL), im),
            pl.BlockSpec((GP, RP), im),
            pl.BlockSpec((8, 64), im),
            pl.BlockSpec((1, 64), im),
            pl.BlockSpec((64, D_MODEL), im),
            pl.BlockSpec((1, D_MODEL), im),
        ],
        out_specs=(pl.BlockSpec((RP, D_MODEL), im),
                   pl.BlockSpec((GP, D_MODEL), im)),
        compiler_params=pltpu.CompilerParams(dimension_semantics=("arbitrary",)),
    )(feats_slab, lc_slab, p_w, p["w1"], p["b1"], p["w2"], p["b2"])


# --------------------------------------------------------------------------
# Fused GMM predictor (gaussian + score heads + anchor add), lane-dense outputs
# --------------------------------------------------------------------------
def _gmm_kernel(x_ref, anc_ref, gw1_ref, gb1_ref, gw2_ref, gb2_ref,
                sw1_ref, sb1_ref, sw2_ref, sb2_ref, traj_ref, score_ref):
    x = x_ref[...]
    xb = x.astype(jnp.bfloat16)

    # gaussian branch: 256 -> 512 (ELU) -> 384 lanes (320 real + pad)
    g = jnp.dot(xb, gw1_ref[...], preferred_element_type=jnp.float32) + gb1_ref[...]
    g = _elu(g)
    traj = jnp.dot(g.astype(jnp.bfloat16), gw2_ref[...],
                   preferred_element_type=jnp.float32) + gb2_ref[...]

    # anchor add: columns 4k += anchor_x, 4k+1 += anchor_y (free VPU work)
    col = jax.lax.broadcasted_iota(jnp.int32, traj.shape, 1)
    m4 = jnp.bitwise_and(col, 3)
    ax = anc_ref[:, 0:1]
    ay = anc_ref[:, 1:2]
    traj_ref[...] = traj + jnp.where(m4 == 0, ax, 0.0) + jnp.where(m4 == 1, ay, 0.0)

    # score branch: 256 -> 64 (ELU) -> 128 lanes (lane 0 is the real score)
    s = jnp.dot(xb, sw1_ref[...], preferred_element_type=jnp.float32) + sb1_ref[...]
    s = _elu(s)
    score_ref[...] = jnp.dot(s.astype(jnp.bfloat16), sw2_ref[...],
                             preferred_element_type=jnp.float32) + sb2_ref[...]


def gmm_predictor(x_slab, anchors, p):
    R, D = x_slab.shape
    im = lambda i: (0, 0)
    return pl.pallas_call(
        _gmm_kernel,
        out_shape=(jax.ShapeDtypeStruct((R, TRAJ_PAD), jnp.float32),
                   jax.ShapeDtypeStruct((R, 128), jnp.float32)),
        grid=(1,),
        in_specs=[
            pl.BlockSpec((R, D), im),
            pl.BlockSpec((R, 2), im),
            pl.BlockSpec((D, 512), im),
            pl.BlockSpec((1, 512), im),
            pl.BlockSpec((512, TRAJ_PAD), im),
            pl.BlockSpec((1, TRAJ_PAD), im),
            pl.BlockSpec((D, 64), im),
            pl.BlockSpec((1, 64), im),
            pl.BlockSpec((64, 128), im),
            pl.BlockSpec((1, 128), im),
        ],
        out_specs=(pl.BlockSpec((R, TRAJ_PAD), im),
                   pl.BlockSpec((R, 128), im)),
        compiler_params=pltpu.CompilerParams(dimension_semantics=("arbitrary",)),
    )(x_slab, anchors, p["g_w1"], p["g_b1"], p["g_w2"], p["g_b2"],
      p["s_w1"], p["s_b1"], p["s_w2"], p["s_b2"])


# --------------------------------------------------------------------------
# Full InteractionDecoder forward (4 pallas_calls total)
# --------------------------------------------------------------------------
def interaction_decoder_forward(params, current_states, actors, scores,
                                last_content, encoding, mask):
    B, N, M, T, _ = actors.shape
    S = encoding.shape[1]
    D = D_MODEL

    NP = _round_up(N, 4)          # padded agents per batch
    GP = B * NP                   # padded (batch, agent) groups
    QB = NP * M                   # padded queries per batch
    RP = B * QB                   # total padded (batch, agent, modality) rows

    # ---- FutureEncoder feature prep ----
    # TODO(synk): future_encoder is an injected dependency of InteractionDecoder; GameFormer's
    # FutureEncoder (x,y,theta,vx,vy -> MLP 5->64->256 -> max-pool over time, dx clamp >=1e-3)
    # is reproduced with synthetic weights; the tiny diff/arctan2 feature prep stays in XLA.
    trajs = actors[..., :2].astype(jnp.float32)
    cur = current_states[:, :N, :2].astype(jnp.float32)
    xy = jnp.concatenate(
        [jnp.broadcast_to(cur[:, :, None, None, :], (B, N, M, 1, 2)), trajs], axis=-2)
    dxy = jnp.diff(xy, axis=-2)
    vel = dxy / 0.1
    theta = jnp.arctan2(dxy[..., 1], jnp.maximum(dxy[..., 0], 1e-3))[..., None]
    feats = jnp.concatenate(
        [trajs, theta, vel, jnp.zeros((B, N, M, T, 3), jnp.float32)], axis=-1)  # K padded 5->8
    feats = jnp.pad(feats, ((0, 0), (0, NP - N), (0, 0), (0, 0), (0, 0)))
    feats_slab = jnp.transpose(feats, (3, 0, 1, 2, 4)).reshape(T * RP, 8)       # t-major rows

    lc_slab = jnp.pad(last_content.astype(jnp.float32),
                      ((0, 0), (0, NP - N), (0, 0), (0, 0))).reshape(RP, D)

    # softmax(scores)/M folded into a block-diagonal (GP, RP) selection matrix
    w = (jax.nn.softmax(scores, axis=-1) / M).astype(jnp.float32)
    w = jnp.pad(w, ((0, 0), (0, NP - N), (0, 0))).reshape(GP, M)
    p_w = (w[:, None, :] * jnp.eye(GP, dtype=jnp.float32)[:, :, None]).reshape(GP, RP)

    # fused: MLP + time max-pool + weighted mean + (last_content + multi_futures)
    query_slab, futures = future_encoder(feats_slab, lc_slab, p_w, params["future"],
                                         T=T, RP=RP, GP=GP)

    # ---- interaction encoder (SelfTransformer) over agents: one grid step ----
    gids = jnp.arange(GP)
    bi, ni = gids // NP, gids % NP
    agent_pad = jnp.pad(mask[:, :N], ((0, 0), (0, NP - N)), constant_values=True)   # (B, NP)
    key_bad = agent_pad[bi, ni]                                                      # (GP,)
    ok = (bi[:, None] == bi[None, :]) & jnp.logical_not(key_bad)[None, :]
    mask_self = jnp.where(ok, 0.0, -1e9).astype(jnp.float32)

    interaction = self_transformer(futures, mask_self, params["self"])               # (GP, D)

    # ---- cross attention over [interaction ; encoding]: one grid step per batch ----
    m_cat = jnp.concatenate([mask[:, :N], mask], axis=1)                             # (B, N+S)
    m_exp = jnp.broadcast_to(m_cat[:, None, :], (B, N, N + S))
    diag = jnp.pad(jnp.eye(N, dtype=bool), ((0, 0), (0, S)))                         # mask[:,i,i]=1
    m_exp = jnp.logical_or(m_exp, diag[None])
    m_keys = jnp.concatenate(
        [jnp.pad(m_exp[:, :, :N], ((0, 0), (0, 0), (0, NP - N)), constant_values=True),
         m_exp[:, :, N:]], axis=2)                                                   # (B, N, NP+S)
    m_q = jnp.pad(m_keys, ((0, 0), (0, NP - N), (0, 0)), constant_values=True)
    m_q = jnp.repeat(m_q, M, axis=1)                                                 # (B, QB, NP+S)
    mask_cross = jnp.where(m_q, -1e9, 0.0).astype(jnp.float32)

    qc = cross_transformer(query_slab.reshape(B, QB, D),
                           interaction.reshape(B, NP, D),
                           encoding.astype(jnp.float32),
                           mask_cross, params["cross"])                              # (B, QB, D)
    query_content = qc[:, :N * M].reshape(B, N, M, D)

    # ---- GMM decoder + anchor add on current (x, y) ----
    anchors = jnp.broadcast_to(
        jnp.pad(cur, ((0, 0), (0, NP - N), (0, 0)))[:, :, None, :],
        (B, NP, M, 2)).reshape(RP, 2)
    traj_pad, score_pad = gmm_predictor(qc.reshape(RP, D), anchors, params["gmm"])

    trajectories = traj_pad.reshape(B, QB, TRAJ_PAD)[:, :N * M, :FUTURE_LEN * 4]
    trajectories = trajectories.reshape(B, N, M, FUTURE_LEN, 4)
    out_scores = score_pad.reshape(B, QB, 128)[:, :N * M, 0].reshape(B, N, M)
    return query_content, trajectories, out_scores


# --------------------------------------------------------------------------
# Deterministic parameter init (synthetic weights; matmul weights in bf16)
# --------------------------------------------------------------------------
def init_params(key):
    keys = iter(jax.random.split(key, 64))

    def w(shape, scale=0.02):
        return scale * jax.random.normal(next(keys), shape, jnp.float32)

    def wb(shape, scale=0.02):
        return w(shape, scale).astype(jnp.bfloat16)

    def transformer_params():
        vec_rows = [
            w((D_MODEL,)),                          # bq
            w((D_MODEL,)),                          # bk
            w((D_MODEL,)),                          # bv
            w((D_MODEL,)),                          # bo
            jnp.ones((D_MODEL,), jnp.float32),      # ln1 gamma
            jnp.zeros((D_MODEL,), jnp.float32),     # ln1 beta
            jnp.ones((D_MODEL,), jnp.float32),      # ln2 gamma
            jnp.zeros((D_MODEL,), jnp.float32),     # ln2 beta
            w((D_MODEL,)),                          # ffn b2
        ]
        vecs = jnp.concatenate(
            [jnp.stack(vec_rows),
             jnp.zeros((VEC_ROWS - len(vec_rows), D_MODEL), jnp.float32)], axis=0)
        return dict(
            wq=wb((D_MODEL, D_MODEL)),
            wkv=wb((D_MODEL, 2 * D_MODEL)),         # packed K|V projection
            wo=wb((D_MODEL, D_MODEL)),
            vecs=vecs,
            ffn_w1=wb((D_MODEL, FFN_DIM)), ffn_b1=w((1, FFN_DIM)),
            ffn_w2=wb((FFN_DIM, D_MODEL)),
        )

    # FutureEncoder MLP (input feature dim padded 5 -> 8 with zero rows)
    fw1 = jnp.concatenate([w((5, 64)), jnp.zeros((3, 64), jnp.float32)], axis=0)

    # GMM heads: trajectory output padded 320 -> 384 lanes, score padded 1 -> 128 lanes
    g_w2 = jnp.pad(w((512, FUTURE_LEN * 4)),
                   ((0, 0), (0, TRAJ_PAD - FUTURE_LEN * 4))).astype(jnp.bfloat16)
    g_b2 = jnp.pad(w((1, FUTURE_LEN * 4)), ((0, 0), (0, TRAJ_PAD - FUTURE_LEN * 4)))
    s_w2 = jnp.pad(w((64, 1)), ((0, 0), (0, 127))).astype(jnp.bfloat16)
    s_b2 = jnp.pad(w((1, 1)), ((0, 0), (0, 127)))

    return dict(
        future=dict(w1=fw1, b1=w((1, 64)), w2=w((64, D_MODEL)), b2=w((1, D_MODEL))),
        self=transformer_params(),
        cross=transformer_params(),
        gmm=dict(
            g_w1=wb((D_MODEL, 512)), g_b1=w((1, 512)),
            g_w2=g_w2, g_b2=g_b2,
            s_w1=wb((D_MODEL, 64)), s_b1=w((1, 64)),
            s_w2=s_w2, s_b2=s_b2,
        ),
    )


# --------------------------------------------------------------------------
if __name__ == "__main__":
    B, N, M, T, S = 2, 3, MODALITIES, 10, 8

    key = jax.random.PRNGKey(0)
    k_par, k_cs, k_act, k_sc, k_lc, k_enc = jax.random.split(key, 6)
    params = init_params(k_par)

    current_states = jax.random.normal(k_cs, (B, N + 1, 5), jnp.float32)
    actors = jax.random.normal(k_act, (B, N, M, T, 3), jnp.float32)
    scores = jax.random.normal(k_sc, (B, N, M), jnp.float32)
    last_content = jax.random.normal(k_lc, (B, N, M, D_MODEL), jnp.float32)
    encoding = jax.random.normal(k_enc, (B, S, D_MODEL), jnp.float32)
    mask = jnp.zeros((B, S), dtype=bool).at[1, S - 1].set(True)

    fwd = jax.jit(interaction_decoder_forward)
    query_content, trajectories, out_scores = fwd(
        params, current_states, actors, scores, last_content, encoding, mask)
    jax.block_until_ready((query_content, trajectories, out_scores))

    assert query_content.shape == (B, N, M, D_MODEL)
    assert trajectories.shape == (B, N, M, FUTURE_LEN, 4)
    assert out_scores.shape == (B, N, M)
    assert bool(jnp.all(jnp.isfinite(query_content)))
    assert bool(jnp.all(jnp.isfinite(trajectories)))
    assert bool(jnp.all(jnp.isfinite(out_scores)))
    print("KERNEL_OK")
</pallas_src>

<mosaic_0001>
module attributes {stable_mosaic.version = 11 : i64} {
  func.func @_future_kernel(%arg0: i32, %arg1: memref<480x8xf32, #tpu.memory_space<vmem>>, %arg2: memref<48x256xf32, #tpu.memory_space<vmem>>, %arg3: memref<8x48xf32, #tpu.memory_space<vmem>>, %arg4: memref<8x64xf32, #tpu.memory_space<vmem>>, %arg5: memref<1x64xf32, #tpu.memory_space<vmem>>, %arg6: memref<64x256xf32, #tpu.memory_space<vmem>>, %arg7: memref<1x256xf32, #tpu.memory_space<vmem>>, %arg8: memref<48x256xf32, #tpu.memory_space<vmem>>, %arg9: memref<8x256xf32, #tpu.memory_space<vmem>>) attributes {dimension_semantics = [#tpu.dimension_semantics<arbitrary>], iteration_bounds = array<i64: 1>, scalar_prefetch = 0 : i64, scratch_operands = 0 : i64, tpu.core_type = #tpu.core_type<tc>, window_params = [{pipeline_mode = #tpu.pipeline_mode<synchronous>, transform_indices = @transform_0, window_bounds = array<i64: 480, 8>}, {pipeline_mode = #tpu.pipeline_mode<synchronous>, transform_indices = @transform_1, window_bounds = array<i64: 48, 256>}, {pipeline_mode = #tpu.pipeline_mode<synchronous>, transform_indices = @transform_2, window_bounds = array<i64: 8, 48>}, {pipeline_mode = #tpu.pipeline_mode<synchronous>, transform_indices = @transform_3, window_bounds = array<i64: 8, 64>}, {pipeline_mode = #tpu.pipeline_mode<synchronous>, transform_indices = @transform_4, window_bounds = array<i64: 1, 64>}, {pipeline_mode = #tpu.pipeline_mode<synchronous>, transform_indices = @transform_5, window_bounds = array<i64: 64, 256>}, {pipeline_mode = #tpu.pipeline_mode<synchronous>, transform_indices = @transform_6, window_bounds = array<i64: 1, 256>}, {pipeline_mode = #tpu.pipeline_mode<synchronous>, transform_indices = @transform_7, window_bounds = array<i64: 48, 256>}, {pipeline_mode = #tpu.pipeline_mode<synchronous>, transform_indices = @transform_8, window_bounds = array<i64: 8, 256>}]} {
    %c0 = arith.constant 0 : index
    %c0_0 = arith.constant 0 : index
    %0 = vector.load %arg1[%c0, %c0_0] : memref<480x8xf32, #tpu.memory_space<vmem>>, vector<480x8xf32>
    %c0_1 = arith.constant 0 : index
    %c0_2 = arith.constant 0 : index
    %1 = vector.load %arg4[%c0_1, %c0_2] : memref<8x64xf32, #tpu.memory_space<vmem>>, vector<8x64xf32>
    %cst = arith.constant dense<0.000000e+00> : vector<480x64xf32>
    %2 = tpu.matmul %0, %1, %cst {dimension_numbers = #tpu.dot_dimension_numbers<[1], [0], [0], [1], [0, 0, 1, 1], [], []>} : vector<480x8xf32>, vector<8x64xf32>, vector<480x64xf32> -> vector<480x64xf32>
    %c0_3 = arith.constant 0 : index
    %c0_4 = arith.constant 0 : index
    %3 = vector.load %arg5[%c0_3, %c0_4] : memref<1x64xf32, #tpu.memory_space<vmem>>, vector<1x64xf32>
    %4 = vector.broadcast %3 : vector<1x64xf32> to vector<480x64xf32>
    %5 = arith.addf %2, %4 : vector<480x64xf32>
    %cst_5 = arith.constant 0.000000e+00 : f32
    %6 = vector.broadcast %cst_5 : f32 to vector<480x64xf32>
    %7 = arith.maximumf %5, %6 : vector<480x64xf32>
    %c0_6 = arith.constant 0 : index
    %c0_7 = arith.constant 0 : index
    %8 = vector.load %arg6[%c0_6, %c0_7] : memref<64x256xf32, #tpu.memory_space<vmem>>, vector<64x256xf32>
    %cst_8 = arith.constant dense<0.000000e+00> : vector<480x256xf32>
    %9 = tpu.matmul %7, %8, %cst_8 {dimension_numbers = #tpu.dot_dimension_numbers<[1], [0], [0], [1], [0, 0, 1, 1], [], []>} : vector<480x64xf32>, vector<64x256xf32>, vector<480x256xf32> -> vector<480x256xf32>
    %c0_9 = arith.constant 0 : index
    %c0_10 = arith.constant 0 : index
    %10 = vector.load %arg7[%c0_9, %c0_10] : memref<1x256xf32, #tpu.memory_space<vmem>>, vector<1x256xf32>
    %11 = vector.broadcast %10 : vector<1x256xf32> to vector<480x256xf32>
    %12 = arith.addf %9, %11 : vector<480x256xf32>
    %13 = vector.extract_strided_slice %12 {offsets = [0, 0], sizes = [48, 256], strides = [1, 1]} : vector<480x256xf32> to vector<48x256xf32>
    %14 = vector.extract_strided_slice %12 {offsets = [48, 0], sizes = [48, 256], strides = [1, 1]} : vector<480x256xf32> to vector<48x256xf32>
    %15 = arith.maximumf %13, %14 : vector<48x256xf32>
    %16 = vector.extract_strided_slice %12 {offsets = [96, 0], sizes = [48, 256], strides = [1, 1]} : vector<480x256xf32> to vector<48x256xf32>
    %17 = arith.maximumf %15, %16 : vector<48x256xf32>
    %18 = vector.extract_strided_slice %12 {offsets = [144, 0], sizes = [48, 256], strides = [1, 1]} : vector<480x256xf32> to vector<48x256xf32>
    %19 = arith.maximumf %17, %18 : vector<48x256xf32>
    %20 = vector.extract_strided_slice %12 {offsets = [192, 0], sizes = [48, 256], strides = [1, 1]} : vector<480x256xf32> to vector<48x256xf32>
    %21 = arith.maximumf %19, %20 : vector<48x256xf32>
    %22 = vector.extract_strided_slice %12 {offsets = [240, 0], sizes = [48, 256], strides = [1, 1]} : vector<480x256xf32> to vector<48x256xf32>
    %23 = arith.maximumf %21, %22 : vector<48x256xf32>
    %24 = vector.extract_strided_slice %12 {offsets = [288, 0], sizes = [48, 256], strides = [1, 1]} : vector<480x256xf32> to vector<48x256xf32>
    %25 = arith.maximumf %23, %24 : vector<48x256xf32>
    %26 = vector.extract_strided_slice %12 {offsets = [336, 0], sizes = [48, 256], strides = [1, 1]} : vector<480x256xf32> to vector<48x256xf32>
    %27 = arith.maximumf %25, %26 : vector<48x256xf32>
    %28 = vector.extract_strided_slice %12 {offsets = [384, 0], sizes = [48, 256], strides = [1, 1]} : vector<480x256xf32> to vector<48x256xf32>
    %29 = arith.maximumf %27, %28 : vector<48x256xf32>
    %30 = vector.extract_strided_slice %12 {offsets = [432, 0], sizes = [48, 256], strides = [1, 1]} : vector<480x256xf32> to vector<48x256xf32>
    %31 = arith.maximumf %29, %30 : vector<48x256xf32>
    %c0_11 = arith.constant 0 : index
    %c0_12 = arith.constant 0 : index
    %32 = vector.load %arg2[%c0_11, %c0_12] : memref<48x256xf32, #tpu.memory_space<vmem>>, vector<48x256xf32>
    %33 = arith.addf %32, %31 : vector<48x256xf32>
    %c0_13 = arith.constant 0 : index
    %c0_14 = arith.constant 0 : index
    %34 = vector.load %arg8[%c0_13, %c0_14] : memref<48x256xf32, #tpu.memory_space<vmem>>, vector<48x256xf32>
    tpu.vector_store %arg8[%c0_13, %c0_14], %33 {strides = array<i32>} : memref<48x256xf32, #tpu.memory_space<vmem>>, vector<48x256xf32>,
    %c0_15 = arith.constant 0 : index
    %c0_16 = arith.constant 0 : index
    %35 = vector.load %arg3[%c0_15, %c0_16] : memref<8x48xf32, #tpu.memory_space<vmem>>, vector<8x48xf32>
    %cst_17 = arith.constant dense<0.000000e+00> : vector<8x256xf32>
    %36 = tpu.matmul %35, %31, %cst_17 {dimension_numbers = #tpu.dot_dimension_numbers<[1], [0], [0], [1], [0, 0, 1, 1], [], []>} : vector<8x48xf32>, vector<48x256xf32>, vector<8x256xf32> -> vector<8x256xf32>
    %c0_18 = arith.constant 0 : index
    %c0_19 = arith.constant 0 : index
    %37 = vector.load %arg9[%c0_18, %c0_19] : memref<8x256xf32, #tpu.memory_space<vmem>>, vector<8x256xf32>
    tpu.vector_store %arg9[%c0_18, %c0_19], %36 {strides = array<i32>} : memref<8x256xf32, #tpu.memory_space<vmem>>, vector<8x256xf32>,
    return
  }
  func.func @transform_0(%arg0: i32) -> (i32, i32) {
    %c0_i32 = arith.constant 0 : i32
    %c0_i32_0 = arith.constant 0 : i32
    %c0_i32_1 = arith.constant 0 : i32
    return %c0_i32, %c0_i32_0 : i32, i32
  }
  func.func @transform_1(%arg0: i32) -> (i32, i32) {
    %c0_i32 = arith.constant 0 : i32
    %c0_i32_0 = arith.constant 0 : i32
    %c0_i32_1 = arith.constant 0 : i32
    return %c0_i32, %c0_i32_0 : i32, i32
  }
  func.func @transform_2(%arg0: i32) -> (i32, i32) {
    %c0_i32 = arith.constant 0 : i32
    %c0_i32_0 = arith.constant 0 : i32
    %c0_i32_1 = arith.constant 0 : i32
    return %c0_i32, %c0_i32_0 : i32, i32
  }
  func.func @transform_3(%arg0: i32) -> (i32, i32) {
    %c0_i32 = arith.constant 0 : i32
    %c0_i32_0 = arith.constant 0 : i32
    %c0_i32_1 = arith.constant 0 : i32
    return %c0_i32, %c0_i32_0 : i32, i32
  }
  func.func @transform_4(%arg0: i32) -> (i32, i32) {
    %c0_i32 = arith.constant 0 : i32
    %c0_i32_0 = arith.constant 0 : i32
    %c0_i32_1 = arith.constant 0 : i32
    return %c0_i32, %c0_i32_0 : i32, i32
  }
  func.func @transform_5(%arg0: i32) -> (i32, i32) {
    %c0_i32 = arith.constant 0 : i32
    %c0_i32_0 = arith.constant 0 : i32
    %c0_i32_1 = arith.constant 0 : i32
    return %c0_i32, %c0_i32_0 : i32, i32
  }
  func.func @transform_6(%arg0: i32) -> (i32, i32) {
    %c0_i32 = arith.constant 0 : i32
    %c0_i32_0 = arith.constant 0 : i32
    %c0_i32_1 = arith.constant 0 : i32
    return %c0_i32, %c0_i32_0 : i32, i32
  }
  func.func @transform_7(%arg0: i32) -> (i32, i32) {
    %c0_i32 = arith.constant 0 : i32
    %c0_i32_0 = arith.constant 0 : i32
    %c0_i32_1 = arith.constant 0 : i32
    return %c0_i32, %c0_i32_0 : i32, i32
  }
  func.func @transform_8(%arg0: i32) -> (i32, i32) {
    %c0_i32 = arith.constant 0 : i32
    %c0_i32_0 = arith.constant 0 : i32
    %c0_i32_1 = arith.constant 0 : i32
    return %c0_i32, %c0_i32_0 : i32, i32
  }
}

module attributes {stable_mosaic.version = 11 : i64} {
  func.func @_self_kernel(%arg0: i32, %arg1: memref<8x256xf32, #tpu.memory_space<vmem>>, %arg2: memref<8x8xf32, #tpu.memory_space<vmem>>, %arg3: memref<256x256xbf16, #tpu.memory_space<vmem>>, %arg4: memref<256x512xbf16, #tpu.memory_space<vmem>>, %arg5: memref<256x256xbf16, #tpu.memory_space<vmem>>, %arg6: memref<16x256xf32, #tpu.memory_space<vmem>>, %arg7: memref<256x1024xbf16, #tpu.memory_space<vmem>>, %arg8: memref<1x1024xf32, #tpu.memory_space<vmem>>, %arg9: memref<1024x256xbf16, #tpu.memory_space<vmem>>, %arg10: memref<8x256xf32, #tpu.memory_space<vmem>>, %arg11: memref<8x256xf32, #tpu.memory_space<vmem>>) attributes {dimension_semantics = [#tpu.dimension_semantics<arbitrary>], iteration_bounds = array<i64: 1>, scalar_prefetch = 0 : i64, scratch_operands = 1 : i64, tpu.core_type = #tpu.core_type<tc>, window_params = [{pipeline_mode = #tpu.pipeline_mode<synchronous>, transform_indices = @transform_0, window_bounds = array<i64: 8, 256>}, {pipeline_mode = #tpu.pipeline_mode<synchronous>, transform_indices = @transform_1, window_bounds = array<i64: 8, 8>}, {pipeline_mode = #tpu.pipeline_mode<synchronous>, transform_indices = @transform_2, window_bounds = array<i64: 256, 256>}, {pipeline_mode = #tpu.pipeline_mode<synchronous>, transform_indices = @transform_3, window_bounds = array<i64: 256, 512>}, {pipeline_mode = #tpu.pipeline_mode<synchronous>, transform_indices = @transform_4, window_bounds = array<i64: 256, 256>}, {pipeline_mode = #tpu.pipeline_mode<synchronous>, transform_indices = @transform_5, window_bounds = array<i64: 16, 256>}, {pipeline_mode = #tpu.pipeline_mode<synchronous>, transform_indices = @transform_6, window_bounds = array<i64: 256, 1024>}, {pipeline_mode = #tpu.pipeline_mode<synchronous>, transform_indices = @transform_7, window_bounds = array<i64: 1, 1024>}, {pipeline_mode = #tpu.pipeline_mode<synchronous>, transform_indices = @transform_8, window_bounds = array<i64: 1024, 256>}, {pipeline_mode = #tpu.pipeline_mode<synchronous>, transform_indices = @transform_9, window_bounds = array<i64: 8, 256>}]} {
    %c0 = arith.constant 0 : index
    %c0_0 = arith.constant 0 : index
    %0 = vector.load %arg1[%c0, %c0_0] : memref<8x256xf32, #tpu.memory_space<vmem>>, vector<8x256xf32>
    %c0_1 = arith.constant 0 : index
    %c0_2 = arith.constant 0 : index
    %1 = vector.load %arg2[%c0_1, %c0_2] : memref<8x8xf32, #tpu.memory_space<vmem>>, vector<8x8xf32>
    %c0_3 = arith.constant 0 : index
    %c0_4 = arith.constant 0 : index
    %2 = vector.load %arg3[%c0_3, %c0_4] : memref<256x256xbf16, #tpu.memory_space<vmem>>, vector<256x256xbf16>
    %c0_5 = arith.constant 0 : index
    %c0_6 = arith.constant 0 : index
    %3 = vector.load %arg4[%c0_5, %c0_6] : memref<256x512xbf16, #tpu.memory_space<vmem>>, vector<256x512xbf16>
    %c0_7 = arith.constant 0 : index
    %c0_8 = arith.constant 0 : index
    %4 = vector.load %arg5[%c0_7, %c0_8] : memref<256x256xbf16, #tpu.memory_space<vmem>>, vector<256x256xbf16>
    %c0_9 = arith.constant 0 : index
    %c0_10 = arith.constant 0 : index
    %5 = vector.load %arg6[%c0_9, %c0_10] : memref<16x256xf32, #tpu.memory_space<vmem>>, vector<16x256xf32>
    %c0_11 = arith.constant 0 : index
    %c0_12 = arith.constant 0 : index
    %6 = vector.load %arg7[%c0_11, %c0_12] : memref<256x1024xbf16, #tpu.memory_space<vmem>>, vector<256x1024xbf16>
    %c0_13 = arith.constant 0 : index
    %c0_14 = arith.constant 0 : index
    %7 = vector.load %arg8[%c0_13, %c0_14] : memref<1x1024xf32, #tpu.memory_space<vmem>>, vector<1x1024xf32>
    %c0_15 = arith.constant 0 : index
    %c0_16 = arith.constant 0 : index
    %8 = vector.load %arg9[%c0_15, %c0_16] : memref<1024x256xbf16, #tpu.memory_space<vmem>>, vector<1024x256xbf16>
    %9 = arith.truncf %0 : vector<8x256xf32> to vector<8x256xbf16>
    %10 = arith.truncf %0 : vector<8x256xf32> to vector<8x256xbf16>
    %cst = arith.constant dense<0.000000e+00> : vector<8x256xf32>
    %11 = tpu.matmul %9, %2, %cst {dimension_numbers = #tpu.dot_dimension_numbers<[1], [0], [0], [1], [0, 0, 1, 1], [], []>} : vector<8x256xbf16>, vector<256x256xbf16>, vector<8x256xf32> -> vector<8x256xf32>
    %12 = vector.extract_strided_slice %5 {offsets = [0, 0], sizes = [1, 256], strides = [1, 1]} : vector<16x256xf32> to vector<1x256xf32>
    %13 = vector.broadcast %12 : vector<1x256xf32> to vector<8x256xf32>
    %14 = arith.addf %11, %13 : vector<8x256xf32>
    %cst_17 = arith.constant dense<0.000000e+00> : vector<8x512xf32>
    %15 = tpu.matmul %10, %3, %cst_17 {dimension_numbers = #tpu.dot_dimension_numbers<[1], [0], [0], [1], [0, 0, 1, 1], [], []>} : vector<8x256xbf16>, vector<256x512xbf16>, vector<8x512xf32> -> vector<8x512xf32>
    %16 = vector.extract_strided_slice %15 {offsets = [0, 0], sizes = [8, 256], strides = [1, 1]} : vector<8x512xf32> to vector<8x256xf32>
    %17 = vector.extract_strided_slice %5 {offsets = [1, 0], sizes = [1, 256], strides = [1, 1]} : vector<16x256xf32> to vector<1x256xf32>
    %18 = vector.broadcast %17 : vector<1x256xf32> to vector<8x256xf32>
    %19 = arith.addf %16, %18 : vector<8x256xf32>
    %20 = vector.extract_strided_slice %15 {offsets = [0, 256], sizes = [8, 256], strides = [1, 1]} : vector<8x512xf32> to vector<8x256xf32>
    %21 = vector.extract_strided_slice %5 {offsets = [2, 0], sizes = [1, 256], strides = [1, 1]} : vector<16x256xf32> to vector<1x256xf32>
    %22 = vector.broadcast %21 : vector<1x256xf32> to vector<8x256xf32>
    %23 = arith.addf %20, %22 : vector<8x256xf32>
    %24 = vector.extract_strided_slice %14 {offsets = [0, 0], sizes = [8, 32], strides = [1, 1]} : vector<8x256xf32> to vector<8x32xf32>
    %25 = vector.extract_strided_slice %19 {offsets = [0, 0], sizes = [8, 32], strides = [1, 1]} : vector<8x256xf32> to vector<8x32xf32>
    %26 = vector.extract_strided_slice %23 {offsets = [0, 0], sizes = [8, 32], strides = [1, 1]} : vector<8x256xf32> to vector<8x32xf32>
    %cst_18 = arith.constant dense<0.000000e+00> : vector<8x8xf32>
    %27 = tpu.matmul %24, %25, %cst_18 {dimension_numbers = #tpu.dot_dimension_numbers<[1], [1], [0], [0], [0, 0, 1, 0], [], []>} : vector<8x32xf32>, vector<8x32xf32>, vector<8x8xf32> -> vector<8x8xf32>
    %cst_19 = arith.constant 0.176776692 : f32
    %28 = vector.broadcast %cst_19 : f32 to vector<8x8xf32>
    %29 = arith.mulf %27, %28 : vector<8x8xf32>
    %30 = arith.addf %29, %1 : vector<8x8xf32>
    %cst_20 = arith.constant dense<0xFF800000> : vector<8xf32>
    %31 = vector.multi_reduction <maximumf>, %30, %cst_20 [1] : vector<8x8xf32> to vector<8xf32>
    %32 = vector.shape_cast %31 : vector<8xf32> to vector<8x1xf32>
    %33 = vector.broadcast %32 : vector<8x1xf32> to vector<8x8xf32>
    %34 = arith.subf %30, %33 : vector<8x8xf32>
    %35 = math.exp %34 : vector<8x8xf32>
    %cst_21 = arith.constant dense<0.000000e+00> : vector<8xf32>
    %36 = vector.multi_reduction <add>, %35, %cst_21 [1] : vector<8x8xf32> to vector<8xf32>
    %37 = vector.shape_cast %36 : vector<8xf32> to vector<8x1xf32>
    %38 = vector.broadcast %37 : vector<8x1xf32> to vector<8x8xf32>
    %39 = arith.divf %35, %38 : vector<8x8xf32>
    %cst_22 = arith.constant dense<0.000000e+00> : vector<8x32xf32>
    %40 = tpu.matmul %39, %26, %cst_22 {dimension_numbers = #tpu.dot_dimension_numbers<[1], [0], [0], [1], [0, 0, 1, 1], [], []>} : vector<8x8xf32>, vector<8x32xf32>, vector<8x32xf32> -> vector<8x32xf32>
    %c0_23 = arith.constant 0 : index
    %c0_24 = arith.constant 0 : index
    %41 = vector.load %arg11[%c0_23, %c0_24] : memref<8x256xf32, #tpu.memory_space<vmem>>, vector<8x32xf32>
    tpu.vector_store %arg11[%c0_23, %c0_24], %40 {strides = array<i32>} : memref<8x256xf32, #tpu.memory_space<vmem>>, vector<8x32xf32>,
    %42 = vector.extract_strided_slice %14 {offsets = [0, 32], sizes = [8, 32], strides = [1, 1]} : vector<8x256xf32> to vector<8x32xf32>
    %43 = vector.extract_strided_slice %19 {offsets = [0, 32], sizes = [8, 32], strides = [1, 1]} : vector<8x256xf32> to vector<8x32xf32>
    %44 = vector.extract_strided_slice %23 {offsets = [0, 32], sizes = [8, 32], strides = [1, 1]} : vector<8x256xf32> to vector<8x32xf32>
    %cst_25 = arith.constant dense<0.000000e+00> : vector<8x8xf32>
    %45 = tpu.matmul %42, %43, %cst_25 {dimension_numbers = #tpu.dot_dimension_numbers<[1], [1], [0], [0], [0, 0, 1, 0], [], []>} : vector<8x32xf32>, vector<8x32xf32>, vector<8x8xf32> -> vector<8x8xf32>
    %cst_26 = arith.constant 0.176776692 : f32
    %46 = vector.broadcast %cst_26 : f32 to vector<8x8xf32>
    %47 = arith.mulf %45, %46 : vector<8x8xf32>
    %48 = arith.addf %47, %1 : vector<8x8xf32>
    %cst_27 = arith.constant dense<0xFF800000> : vector<8xf32>
    %49 = vector.multi_reduction <maximumf>, %48, %cst_27 [1] : vector<8x8xf32> to vector<8xf32>
    %50 = vector.shape_cast %49 : vector<8xf32> to vector<8x1xf32>
    %51 = vector.broadcast %50 : vector<8x1xf32> to vector<8x8xf32>
    %52 = arith.subf %48, %51 : vector<8x8xf32>
    %53 = math.exp %52 : vector<8x8xf32>
    %cst_28 = arith.constant dense<0.000000e+00> : vector<8xf32>
    %54 = vector.multi_reduction <add>, %53, %cst_28 [1] : vector<8x8xf32> to vector<8xf32>
    %55 = vector.shape_cast %54 : vector<8xf32> to vector<8x1xf32>
    %56 = vector.broadcast %55 : vector<8x1xf32> to vector<8x8xf32>
    %57 = arith.divf %53, %56 : vector<8x8xf32>
    %cst_29 = arith.constant dense<0.000000e+00> : vector<8x32xf32>
    %58 = tpu.matmul %57, %44, %cst_29 {dimension_numbers = #tpu.dot_dimension_numbers<[1], [0], [0], [1], [0, 0, 1, 1], [], []>} : vector<8x8xf32>, vector<8x32xf32>, vector<8x32xf32> -> vector<8x32xf32>
    %c0_30 = arith.constant 0 : index
    %c32 = arith.constant 32 : index
    %59 = vector.load %arg11[%c0_30, %c32] : memref<8x256xf32, #tpu.memory_space<vmem>>, vector<8x32xf32>
    tpu.vector_store %arg11[%c0_30, %c32], %58 {strides = array<i32>} : memref<8x256xf32, #tpu.memory_space<vmem>>, vector<8x32xf32>,
    %60 = vector.extract_strided_slice %14 {offsets = [0, 64], sizes = [8, 32], strides = [1, 1]} : vector<8x256xf32> to vector<8x32xf32>
    %61 = vector.extract_strided_slice %19 {offsets = [0, 64], sizes = [8, 32], strides = [1, 1]} : vector<8x256xf32> to vector<8x32xf32>
    %62 = vector.extract_strided_slice %23 {offsets = [0, 64], sizes = [8, 32], strides = [1, 1]} : vector<8x256xf32> to vector<8x32xf32>
    %cst_31 = arith.constant dense<0.000000e+00> : vector<8x8xf32>
    %63 = tpu.matmul %60, %61, %cst_31 {dimension_numbers = #tpu.dot_dimension_numbers<[1], [1], [0], [0], [0, 0, 1, 0], [], []>} : vector<8x32xf32>, vector<8x32xf32>, vector<8x8xf32> -> vector<8x8xf32>
    %cst_32 = arith.constant 0.176776692 : f32
    %64 = vector.broadcast %cst_32 : f32 to vector<8x8xf32>
    %65 = arith.mulf %63, %64 : vector<8x8xf32>
    %66 = arith.addf %65, %1 : vector<8x8xf32>
    %cst_33 = arith.constant dense<0xFF800000> : vector<8xf32>
    %67 = vector.multi_reduction <maximumf>, %66, %cst_33 [1] : vector<8x8xf32> to vector<8xf32>
    %68 = vector.shape_cast %67 : vector<8xf32> to vector<8x1xf32>
    %69 = vector.broadcast %68 : vector<8x1xf32> to vector<8x8xf32>
    %70 = arith.subf %66, %69 : vector<8x8xf32>
    %71 = math.exp %70 : vector<8x8xf32>
    %cst_34 = arith.constant dense<0.000000e+00> : vector<8xf32>
    %72 = vector.multi_reduction <add>, %71, %cst_34 [1] : vector<8x8xf32> to vector<8xf32>
    %73 = vector.shape_cast %72 : vector<8xf32> to vector<8x1xf32>
    %74 = vector.broadcast %73 : vector<8x1xf32> to vector<8x8xf32>
    %75 = arith.divf %71, %74 : vector<8x8xf32>
    %cst_35 = arith.constant dense<0.000000e+00> : vector<8x32xf32>
    %76 = tpu.matmul %75, %62, %cst_35 {dimension_numbers = #tpu.dot_dimension_numbers<[1], [0], [0], [1], [0, 0, 1, 1], [], []>} : vector<8x8xf32>, vector<8x32xf32>, vector<8x32xf32> -> vector<8x32xf32>
    %c0_36 = arith.constant 0 : index
    %c64 = arith.constant 64 : index
    %77 = vector.load %arg11[%c0_36, %c64] : memref<8x256xf32, #tpu.memory_space<vmem>>, vector<8x32xf32>
    tpu.vector_store %arg11[%c0_36, %c64], %76 {strides = array<i32>} : memref<8x256xf32, #tpu.memory_space<vmem>>, vector<8x32xf32>,
    %78 = vector.extract_strided_slice %14 {offsets = [0, 96], sizes = [8, 32], strides = [1, 1]} : vector<8x256xf32> to vector<8x32xf32>
    %79 = vector.extract_strided_slice %19 {offsets = [0, 96], sizes = [8, 32], strides = [1, 1]} : vector<8x256xf32> to vector<8x32xf32>
    %80 = vector.extract_strided_slice %23 {offsets = [0, 96], sizes = [8, 32], strides = [1, 1]} : vector<8x256xf32> to vector<8x32xf32>
    %cst_37 = arith.constant dense<0.000000e+00> : vector<8x8xf32>
    %81 = tpu.matmul %78, %79, %cst_37 {dimension_numbers = #tpu.dot_dimension_numbers<[1], [1], [0], [0], [0, 0, 1, 0], [], []>} : vector<8x32xf32>, vector<8x32xf32>, vector<8x8xf32> -> vector<8x8xf32>
    %cst_38 = arith.constant 0.176776692 : f32
    %82 = vector.broadcast %cst_38 : f32 to vector<8x8xf32>
    %83 = arith.mulf %81, %82 : vector<8x8xf32>
    %84 = arith.addf %83, %1 : vector<8x8xf32>
    %cst_39 = arith.constant dense<0xFF800000> : vector<8xf32>
    %85 = vector.multi_reduction <maximumf>, %84, %cst_39 [1] : vector<8x8xf32> to vector<8xf32>
    %86 = vector.shape_cast %85 : vector<8xf32> to vector<8x1xf32>
    %87 = vector.broadcast %86 : vector<8x1xf32> to vector<8x8xf32>
    %88 = arith.subf %84, %87 : vector<8x8xf32>
    %89 = math.exp %88 : vector<8x8xf32>
    %cst_40 = arith.constant dense<0.000000e+00> : vector<8xf32>
    %90 = vector.multi_reduction <add>, %89, %cst_40 [1] : vector<8x8xf32> to vector<8xf32>
    %91 = vector.shape_cast %90 : vector<8xf32> to vector<8x1xf32>
    %92 = vector.broadcast %91 : vector<8x1xf32> to vector<8x8xf32>
    %93 = arith.divf %89, %92 : vector<8x8xf32>
    %cst_41 = arith.constant dense<0.000000e+00> : vector<8x32xf32>
    %94 = tpu.matmul %93, %80, %cst_41 {dimension_numbers = #tpu.dot_dimension_numbers<[1], [0], [0], [1], [0, 0, 1, 1], [], []>} : vector<8x8xf32>, vector<8x32xf32>, vector<8x32xf32> -> vector<8x32xf32>
    %c0_42 = arith.constant 0 : index
    %c96 = arith.constant 96 : index
    %95 = vector.load %arg11[%c0_42, %c96] : memref<8x256xf32, #tpu.memory_space<vmem>>, vector<8x32xf32>
    tpu.vector_store %arg11[%c0_42, %c96], %94 {strides = array<i32>} : memref<8x256xf32, #tpu.memory_space<vmem>>, vector<8x32xf32>,
    %96 = vector.extract_strided_slice %14 {offsets = [0, 128], sizes = [8, 32], strides = [1, 1]} : vector<8x256xf32> to vector<8x32xf32>
    %97 = vector.extract_strided_slice %19 {offsets = [0, 128], sizes = [8, 32], strides = [1, 1]} : vector<8x256xf32> to vector<8x32xf32>
    %98 = vector.extract_strided_slice %23 {offsets = [0, 128], sizes = [8, 32], strides = [1, 1]} : vector<8x256xf32> to vector<8x32xf32>
    %cst_43 = arith.constant dense<0.000000e+00> : vector<8x8xf32>
    %99 = tpu.matmul %96, %97, %cst_43 {dimension_numbers = #tpu.dot_dimension_numbers<[1], [1], [0], [0], [0, 0, 1, 0], [], []>} : vector<8x32xf32>, vector<8x32xf32>, vector<8x8xf32> -> vector<8x8xf32>
    %cst_44 = arith.constant 0.176776692 : f32
    %100 = vector.broadcast %cst_44 : f32 to vector<8x8xf32>
    %101 = arith.mulf %99, %100 : vector<8x8xf32>
    %102 = arith.addf %101, %1 : vector<8x8xf32>
    %cst_45 = arith.constant dense<0xFF800000> : vector<8xf32>
    %103 = vector.multi_reduction <maximumf>, %102, %cst_45 [1] : vector<8x8xf32> to vector<8xf32>
    %104 = vector.shape_cast %103 : vector<8xf32> to vector<8x1xf32>
    %105 = vector.broadcast %104 : vector<8x1xf32> to vector<8x8xf32>
    %106 = arith.subf %102, %105 : vector<8x8xf32>
    %107 = math.exp %106 : vector<8x8xf32>
    %cst_46 = arith.constant dense<0.000000e+00> : vector<8xf32>
    %108 = vector.multi_reduction <add>, %107, %cst_46 [1] : vector<8x8xf32> to vector<8xf32>
    %109 = vector.shape_cast %108 : vector<8xf32> to vector<8x1xf32>
    %110 = vector.broadcast %109 : vector<8x1xf32> to vector<8x8xf32>
    %111 = arith.divf %107, %110 : vector<8x8xf32>
    %cst_47 = arith.constant dense<0.000000e+00> : vector<8x32xf32>
    %112 = tpu.matmul %111, %98, %cst_47 {dimension_numbers = #tpu.dot_dimension_numbers<[1], [0], [0], [1], [0, 0, 1, 1], [], []>} : vector<8x8xf32>, vector<8x32xf32>, vector<8x32xf32> -> vector<8x32xf32>
    %c0_48 = arith.constant 0 : index
    %c128 = arith.constant 128 : index
    %113 = vector.load %arg11[%c0_48, %c128] : memref<8x256xf32, #tpu.memory_space<vmem>>, vector<8x32xf32>
    tpu.vector_store %arg11[%c0_48, %c128], %112 {strides = array<i32>} : memref<8x256xf32, #tpu.memory_space<vmem>>, vector<8x32xf32>,
    %114 = vector.extract_strided_slice %14 {offsets = [0, 160], sizes = [8, 32], strides = [1, 1]} : vector<8x256xf32> to vector<8x32xf32>
    %115 = vector.extract_strided_slice %19 {offsets = [0, 160], sizes = [8, 32], strides = [1, 1]} : vector<8x256xf32> to vector<8x32xf32>
    %116 = vector.extract_strided_slice %23 {offsets = [0, 160], sizes = [8, 32], strides = [1, 1]} : vector<8x256xf32> to vector<8x32xf32>
    %cst_49 = arith.constant dense<0.000000e+00> : vector<8x8xf32>
    %117 = tpu.matmul %114, %115, %cst_49 {dimension_numbers = #tpu.dot_dimension_numbers<[1], [1], [0], [0], [0, 0, 1, 0], [], []>} : vector<8x32xf32>, vector<8x32xf32>, vector<8x8xf32> -> vector<8x8xf32>
    %cst_50 = arith.constant 0.176776692 : f32
    %118 = vector.broadcast %cst_50 : f32 to vector<8x8xf32>
    %119 = arith.mulf %117, %118 : vector<8x8xf32>
    %120 = arith.addf %119, %1 : vector<8x8xf32>
    %cst_51 = arith.constant dense<0xFF800000> : vector<8xf32>
    %121 = vector.multi_reduction <maximumf>, %120, %cst_51 [1] : vector<8x8xf32> to vector<8xf32>
    %122 = vector.shape_cast %121 : vector<8xf32> to vector<8x1xf32>
    %123 = vector.broadcast %122 : vector<8x1xf32> to vector<8x8xf32>
    %124 = arith.subf %120, %123 : vector<8x8xf32>
    %125 = math.exp %124 : vector<8x8xf32>
    %cst_52 = arith.constant dense<0.000000e+00> : vector<8xf32>
    %126 = vector.multi_reduction <add>, %125, %cst_52 [1] : vector<8x8xf32> to vector<8xf32>
    %127 = vector.shape_cast %126 : vector<8xf32> to vector<8x1xf32>
    %128 = vector.broadcast %127 : vector<8x1xf32> to vector<8x8xf32>
    %129 = arith.divf %125, %128 : vector<8x8xf32>
    %cst_53 = arith.constant dense<0.000000e+00> : vector<8x32xf32>
    %130 = tpu.matmul %129, %116, %cst_53 {dimension_numbers = #tpu.dot_dimension_numbers<[1], [0], [0], [1], [0, 0, 1, 1], [], []>} : vector<8x8xf32>, vector<8x32xf32>, vector<8x32xf32> -> vector<8x32xf32>
    %c0_54 = arith.constant 0 : index
    %c160 = arith.constant 160 : index
    %131 = vector.load %arg11[%c0_54, %c160] : memref<8x256xf32, #tpu.memory_space<vmem>>, vector<8x32xf32>
    tpu.vector_store %arg11[%c0_54, %c160], %130 {strides = array<i32>} : memref<8x256xf32, #tpu.memory_space<vmem>>, vector<8x32xf32>,
    %132 = vector.extract_strided_slice %14 {offsets = [0, 192], sizes = [8, 32], strides = [1, 1]} : vector<8x256xf32> to vector<8x32xf32>
    %133 = vector.extract_strided_slice %19 {offsets = [0, 192], sizes = [8, 32], strides = [1, 1]} : vector<8x256xf32> to vector<8x32xf32>
    %134 = vector.extract_strided_slice %23 {offsets = [0, 192], sizes = [8, 32], strides = [1, 1]} : vector<8x256xf32> to vector<8x32xf32>
    %cst_55 = arith.constant dense<0.000000e+00> : vector<8x8xf32>
    %135 = tpu.matmul %132, %133, %cst_55 {dimension_numbers = #tpu.dot_dimension_numbers<[1], [1], [0], [0], [0, 0, 1, 0], [], []>} : vector<8x32xf32>, vector<8x32xf32>, vector<8x8xf32> -> vector<8x8xf32>
    %cst_56 = arith.constant 0.176776692 : f32
    %136 = vector.broadcast %cst_56 : f32 to vector<8x8xf32>
    %137 = arith.mulf %135, %136 : vector<8x8xf32>
    %138 = arith.addf %137, %1 : vector<8x8xf32>
    %cst_57 = arith.constant dense<0xFF800000> : vector<8xf32>
    %139 = vector.multi_reduction <maximumf>, %138, %cst_57 [1] : vector<8x8xf32> to vector<8xf32>
    %140 = vector.shape_cast %139 : vector<8xf32> to vector<8x1xf32>
    %141 = vector.broadcast %140 : vector<8x1xf32> to vector<8x8xf32>
    %142 = arith.subf %138, %141 : vector<8x8xf32>
    %143 = math.exp %142 : vector<8x8xf32>
    %cst_58 = arith.constant dense<0.000000e+00> : vector<8xf32>
    %144 = vector.multi_reduction <add>, %143, %cst_58 [1] : vector<8x8xf32> to vector<8xf32>
    %145 = vector.shape_cast %144 : vector<8xf32> to vector<8x1xf32>
    %146 = vector.broadcast %145 : vector<8x1xf32> to vector<8x8xf32>
    %147 = arith.divf %143, %146 : vector<8x8xf32>
    %cst_59 = arith.constant dense<0.000000e+00> : vector<8x32xf32>
    %148 = tpu.matmul %147, %134, %cst_59 {dimension_numbers = #tpu.dot_dimension_numbers<[1], [0], [0], [1], [0, 0, 1, 1], [], []>} : vector<8x8xf32>, vector<8x32xf32>, vector<8x32xf32> -> vector<8x32xf32>
    %c0_60 = arith.constant 0 : index
    %c192 = arith.constant 192 : index
    %149 = vector.load %arg11[%c0_60, %c192] : memref<8x256xf32, #tpu.memory_space<vmem>>, vector<8x32xf32>
    tpu.vector_store %arg11[%c0_60, %c192], %148 {strides = array<i32>} : memref<8x256xf32, #tpu.memory_space<vmem>>, vector<8x32xf32>,
    %150 = vector.extract_strided_slice %14 {offsets = [0, 224], sizes = [8, 32], strides = [1, 1]} : vector<8x256xf32> to vector<8x32xf32>
    %151 = vector.extract_strided_slice %19 {offsets = [0, 224], sizes = [8, 32], strides = [1, 1]} : vector<8x256xf32> to vector<8x32xf32>
    %152 = vector.extract_strided_slice %23 {offsets = [0, 224], sizes = [8, 32], strides = [1, 1]} : vector<8x256xf32> to vector<8x32xf32>
    %cst_61 = arith.constant dense<0.000000e+00> : vector<8x8xf32>
    %153 = tpu.matmul %150, %151, %cst_61 {dimension_numbers = #tpu.dot_dimension_numbers<[1], [1], [0], [0], [0, 0, 1, 0], [], []>} : vector<8x32xf32>, vector<8x32xf32>, vector<8x8xf32> -> vector<8x8xf32>
    %cst_62 = arith.constant 0.176776692 : f32
    %154 = vector.broadcast %cst_62 : f32 to vector<8x8xf32>
    %155 = arith.mulf %153, %154 : vector<8x8xf32>
    %156 = arith.addf %155, %1 : vector<8x8xf32>
    %cst_63 = arith.constant dense<0xFF800000> : vector<8xf32>
    %157 = vector.multi_reduction <maximumf>, %156, %cst_63 [1] : vector<8x8xf32> to vector<8xf32>
    %158 = vector.shape_cast %157 : vector<8xf32> to vector<8x1xf32>
    %159 = vector.broadcast %158 : vector<8x1xf32> to vector<8x8xf32>
    %160 = arith.subf %156, %159 : vector<8x8xf32>
    %161 = math.exp %160 : vector<8x8xf32>
    %cst_64 = arith.constant dense<0.000000e+00> : vector<8xf32>
    %162 = vector.multi_reduction <add>, %161, %cst_64 [1] : vector<8x8xf32> to vector<8xf32>
    %163 = vector.shape_cast %162 : vector<8xf32> to vector<8x1xf32>
    %164 = vector.broadcast %163 : vector<8x1xf32> to vector<8x8xf32>
    %165 = arith.divf %161, %164 : vector<8x8xf32>
    %cst_65 = arith.constant dense<0.000000e+00> : vector<8x32xf32>
    %166 = tpu.matmul %165, %152, %cst_65 {dimension_numbers = #tpu.dot_dimension_numbers<[1], [0], [0], [1], [0, 0, 1, 1], [], []>} : vector<8x8xf32>, vector<8x32xf32>, vector<8x32xf32> -> vector<8x32xf32>
    %c0_66 = arith.constant 0 : index
    %c224 = arith.constant 224 : index
    %167 = vector.load %arg11[%c0_66, %c224] : memref<8x256xf32, #tpu.memory_space<vmem>>, vector<8x32xf32>
    tpu.vector_store %arg11[%c0_66, %c224], %166 {strides = array<i32>} : memref<8x256xf32, #tpu.memory_space<vmem>>, vector<8x32xf32>,
    %c0_67 = arith.constant 0 : index
    %c0_68 = arith.constant 0 : index
    %168 = vector.load %arg11[%c0_67, %c0_68] : memref<8x256xf32, #tpu.memory_space<vmem>>, vector<8x256xf32>
    %169 = arith.truncf %168 : vector<8x256xf32> to vector<8x256xbf16>
    %cst_69 = arith.constant dense<0.000000e+00> : vector<8x256xf32>
    %170 = tpu.matmul %169, %4, %cst_69 {dimension_numbers = #tpu.dot_dimension_numbers<[1], [0], [0], [1], [0, 0, 1, 1], [], []>} : vector<8x256xbf16>, vector<256x256xbf16>, vector<8x256xf32> -> vector<8x256xf32>
    %171 = vector.extract_strided_slice %5 {offsets = [3, 0], sizes = [1, 256], strides = [1, 1]} : vector<16x256xf32> to vector<1x256xf32>
    %172 = vector.broadcast %171 : vector<1x256xf32> to vector<8x256xf32>
    %173 = arith.addf %170, %172 : vector<8x256xf32>
    %174 = arith.addf %173, %0 : vector<8x256xf32>
    %175 = vector.extract_strided_slice %5 {offsets = [4, 0], sizes = [1, 256], strides = [1, 1]} : vector<16x256xf32> to vector<1x256xf32>
    %176 = vector.extract_strided_slice %5 {offsets = [5, 0], sizes = [1, 256], strides = [1, 1]} : vector<16x256xf32> to vector<1x256xf32>
    %cst_70 = arith.constant dense<0.000000e+00> : vector<8xf32>
    %177 = vector.multi_reduction <add>, %174, %cst_70 [1] : vector<8x256xf32> to vector<8xf32>
    %178 = vector.shape_cast %177 : vector<8xf32> to vector<8x1xf32>
    %cst_71 = arith.constant 2.560000e+02 : f32
    %179 = vector.broadcast %cst_71 : f32 to vector<8x1xf32>
    %180 = arith.divf %178, %179 : vector<8x1xf32>
    %181 = vector.broadcast %180 : vector<8x1xf32> to vector<8x256xf32>
    %182 = arith.subf %174, %181 : vector<8x256xf32>
    %183 = arith.mulf %182, %182 : vector<8x256xf32>
    %cst_72 = arith.constant dense<0.000000e+00> : vector<8xf32>
    %184 = vector.multi_reduction <add>, %183, %cst_72 [1] : vector<8x256xf32> to vector<8xf32>
    %185 = vector.shape_cast %184 : vector<8xf32> to vector<8x1xf32>
    %cst_73 = arith.constant 2.560000e+02 : f32
    %186 = vector.broadcast %cst_73 : f32 to vector<8x1xf32>
    %187 = arith.divf %185, %186 : vector<8x1xf32>
    %188 = vector.broadcast %180 : vector<8x1xf32> to vector<8x256xf32>
    %189 = arith.subf %174, %188 : vector<8x256xf32>
    %cst_74 = arith.constant 9.99999974E-6 : f32
    %190 = vector.broadcast %cst_74 : f32 to vector<8x1xf32>
    %191 = arith.addf %187, %190 : vector<8x1xf32>
    %192 = math.rsqrt %191 : vector<8x1xf32>
    %193 = vector.broadcast %192 : vector<8x1xf32> to vector<8x256xf32>
    %194 = arith.mulf %189, %193 : vector<8x256xf32>
    %195 = vector.broadcast %175 : vector<1x256xf32> to vector<8x256xf32>
    %196 = arith.mulf %194, %195 : vector<8x256xf32>
    %197 = vector.broadcast %176 : vector<1x256xf32> to vector<8x256xf32>
    %198 = arith.addf %196, %197 : vector<8x256xf32>
    %199 = arith.truncf %198 : vector<8x256xf32> to vector<8x256xbf16>
    %cst_75 = arith.constant dense<0.000000e+00> : vector<8x1024xf32>
    %200 = tpu.matmul %199, %6, %cst_75 {dimension_numbers = #tpu.dot_dimension_numbers<[1], [0], [0], [1], [0, 0, 1, 1], [], []>} : vector<8x256xbf16>, vector<256x1024xbf16>, vector<8x1024xf32> -> vector<8x1024xf32>
    %201 = vector.broadcast %7 : vector<1x1024xf32> to vector<8x1024xf32>
    %202 = arith.addf %200, %201 : vector<8x1024xf32>
    %203 = arith.mulf %202, %202 : vector<8x1024xf32>
    %204 = arith.mulf %202, %203 : vector<8x1024xf32>
    %cst_76 = arith.constant 4.471500e-02 : f32
    %205 = vector.broadcast %cst_76 : f32 to vector<8x1024xf32>
    %206 = arith.mulf %205, %204 : vector<8x1024xf32>
    %207 = arith.addf %202, %206 : vector<8x1024xf32>
    %cst_77 = arith.constant 0.797884583 : f32
    %208 = vector.broadcast %cst_77 : f32 to vector<8x1024xf32>
    %209 = arith.mulf %208, %207 : vector<8x1024xf32>
    %210 = math.tanh %209 : vector<8x1024xf32>
    %cst_78 = arith.constant 1.000000e+00 : f32
    %211 = vector.broadcast %cst_78 : f32 to vector<8x1024xf32>
    %212 = arith.addf %211, %210 : vector<8x1024xf32>
    %cst_79 = arith.constant 5.000000e-01 : f32
    %213 = vector.broadcast %cst_79 : f32 to vector<8x1024xf32>
    %214 = arith.mulf %213, %212 : vector<8x1024xf32>
    %215 = arith.mulf %202, %214 : vector<8x1024xf32>
    %216 = arith.truncf %215 : vector<8x1024xf32> to vector<8x1024xbf16>
    %cst_80 = arith.constant dense<0.000000e+00> : vector<8x256xf32>
    %217 = tpu.matmul %216, %8, %cst_80 {dimension_numbers = #tpu.dot_dimension_numbers<[1], [0], [0], [1], [0, 0, 1, 1], [], []>} : vector<8x1024xbf16>, vector<1024x256xbf16>, vector<8x256xf32> -> vector<8x256xf32>
    %218 = vector.extract_strided_slice %5 {offsets = [8, 0], sizes = [1, 256], strides = [1, 1]} : vector<16x256xf32> to vector<1x256xf32>
    %219 = vector.broadcast %218 : vector<1x256xf32> to vector<8x256xf32>
    %220 = arith.addf %217, %219 : vector<8x256xf32>
    %221 = arith.addf %220, %198 : vector<8x256xf32>
    %222 = vector.extract_strided_slice %5 {offsets = [6, 0], sizes = [1, 256], strides = [1, 1]} : vector<16x256xf32> to vector<1x256xf32>
    %223 = vector.extract_strided_slice %5 {offsets = [7, 0], sizes = [1, 256], strides = [1, 1]} : vector<16x256xf32> to vector<1x256xf32>
    %cst_81 = arith.constant dense<0.000000e+00> : vector<8xf32>
    %224 = vector.multi_reduction <add>, %221, %cst_81 [1] : vector<8x256xf32> to vector<8xf32>
    %225 = vector.shape_cast %224 : vector<8xf32> to vector<8x1xf32>
    %cst_82 = arith.constant 2.560000e+02 : f32
    %226 = vector.broadcast %cst_82 : f32 to vector<8x1xf32>
    %227 = arith.divf %225, %226 : vector<8x1xf32>
    %228 = vector.broadcast %227 : vector<8x1xf32> to vector<8x256xf32>
    %229 = arith.subf %221, %228 : vector<8x256xf32>
    %230 = arith.mulf %229, %229 : vector<8x256xf32>
    %cst_83 = arith.constant dense<0.000000e+00> : vector<8xf32>
    %231 = vector.multi_reduction <add>, %230, %cst_83 [1] : vector<8x256xf32> to vector<8xf32>
    %232 = vector.shape_cast %231 : vector<8xf32> to vector<8x1xf32>
    %cst_84 = arith.constant 2.560000e+02 : f32
    %233 = vector.broadcast %cst_84 : f32 to vector<8x1xf32>
    %234 = arith.divf %232, %233 : vector<8x1xf32>
    %235 = vector.broadcast %227 : vector<8x1xf32> to vector<8x256xf32>
    %236 = arith.subf %221, %235 : vector<8x256xf32>
    %cst_85 = arith.constant 9.99999974E-6 : f32
    %237 = vector.broadcast %cst_85 : f32 to vector<8x1xf32>
    %238 = arith.addf %234, %237 : vector<8x1xf32>
    %239 = math.rsqrt %238 : vector<8x1xf32>
    %240 = vector.broadcast %239 : vector<8x1xf32> to vector<8x256xf32>
    %241 = arith.mulf %236, %240 : vector<8x256xf32>
    %242 = vector.broadcast %222 : vector<1x256xf32> to vector<8x256xf32>
    %243 = arith.mulf %241, %242 : vector<8x256xf32>
    %244 = vector.broadcast %223 : vector<1x256xf32> to vector<8x256xf32>
    %245 = arith.addf %243, %244 : vector<8x256xf32>
    %c0_86 = arith.constant 0 : index
    %c0_87 = arith.constant 0 : index
    %246 = vector.load %arg10[%c0_86, %c0_87] : memref<8x256xf32, #tpu.memory_space<vmem>>, vector<8x256xf32>
    tpu.vector_store %arg10[%c0_86, %c0_87], %245 {strides = array<i32>} : memref<8x256xf32, #tpu.memory_space<vmem>>, vector<8x256xf32>,
    return
  }
  func.func @transform_0(%arg0: i32) -> (i32, i32) {
    %c0_i32 = arith.constant 0 : i32
    %c0_i32_0 = arith.constant 0 : i32
    %c0_i32_1 = arith.constant 0 : i32
    return %c0_i32, %c0_i32_0 : i32, i32
  }
  func.func @transform_1(%arg0: i32) -> (i32, i32) {
    %c0_i32 = arith.constant 0 : i32
    %c0_i32_0 = arith.constant 0 : i32
    %c0_i32_1 = arith.constant 0 : i32
    return %c0_i32, %c0_i32_0 : i32, i32
  }
  func.func @transform_2(%arg0: i32) -> (i32, i32) {
    %c0_i32 = arith.constant 0 : i32
    %c0_i32_0 = arith.constant 0 : i32
    %c0_i32_1 = arith.constant 0 : i32
    return %c0_i32, %c0_i32_0 : i32, i32
  }
  func.func @transform_3(%arg0: i32) -> (i32, i32) {
    %c0_i32 = arith.constant 0 : i32
    %c0_i32_0 = arith.constant 0 : i32
    %c0_i32_1 = arith.constant 0 : i32
    return %c0_i32, %c0_i32_0 : i32, i32
  }
  func.func @transform_4(%arg0: i32) -> (i32, i32) {
    %c0_i32 = arith.constant 0 : i32
    %c0_i32_0 = arith.constant 0 : i32
    %c0_i32_1 = arith.constant 0 : i32
    return %c0_i32, %c0_i32_0 : i32, i32
  }
  func.func @transform_5(%arg0: i32) -> (i32, i32) {
    %c0_i32 = arith.constant 0 : i32
    %c0_i32_0 = arith.constant 0 : i32
    %c0_i32_1 = arith.constant 0 : i32
    return %c0_i32, %c0_i32_0 : i32, i32
  }
  func.func @transform_6(%arg0: i32) -> (i32, i32) {
    %c0_i32 = arith.constant 0 : i32
    %c0_i32_0 = arith.constant 0 : i32
    %c0_i32_1 = arith.constant 0 : i32
    return %c0_i32, %c0_i32_0 : i32, i32
  }
  func.func @transform_7(%arg0: i32) -> (i32, i32) {
    %c0_i32 = arith.constant 0 : i32
    %c0_i32_0 = arith.constant 0 : i32
    %c0_i32_1 = arith.constant 0 : i32
    return %c0_i32, %c0_i32_0 : i32, i32
  }
  func.func @transform_8(%arg0: i32) -> (i32, i32) {
    %c0_i32 = arith.constant 0 : i32
    %c0_i32_0 = arith.constant 0 : i32
    %c0_i32_1 = arith.constant 0 : i32
    return %c0_i32, %c0_i32_0 : i32, i32
  }
  func.func @transform_9(%arg0: i32) -> (i32, i32) {
    %c0_i32 = arith.constant 0 : i32
    %c0_i32_0 = arith.constant 0 : i32
    %c0_i32_1 = arith.constant 0 : i32
    return %c0_i32, %c0_i32_0 : i32, i32
  }
}

module attributes {stable_mosaic.version = 11 : i64} {
  func.func @_cross_kernel(%arg0: i32, %arg1: memref<1x24x256xf32, #tpu.memory_space<vmem>>, %arg2: memref<1x4x256xf32, #tpu.memory_space<vmem>>, %arg3: memref<1x8x256xf32, #tpu.memory_space<vmem>>, %arg4: memref<1x24x12xf32, #tpu.memory_space<vmem>>, %arg5: memref<256x256xbf16, #tpu.memory_space<vmem>>, %arg6: memref<256x512xbf16, #tpu.memory_space<vmem>>, %arg7: memref<256x256xbf16, #tpu.memory_space<vmem>>, %arg8: memref<16x256xf32, #tpu.memory_space<vmem>>, %arg9: memref<256x1024xbf16, #tpu.memory_space<vmem>>, %arg10: memref<1x1024xf32, #tpu.memory_space<vmem>>, %arg11: memref<1024x256xbf16, #tpu.memory_space<vmem>>, %arg12: memref<1x24x256xf32, #tpu.memory_space<vmem>>, %arg13: memref<24x256xf32, #tpu.memory_space<vmem>>) attributes {dimension_semantics = [#tpu.dimension_semantics<parallel>], iteration_bounds = array<i64: 2>, scalar_prefetch = 0 : i64, scratch_operands = 1 : i64, tpu.core_type = #tpu.core_type<tc>, window_params = [{transform_indices = @transform_0, window_bounds = array<i64: 1, 24, 256>}, {transform_indices = @transform_1, window_bounds = array<i64: 1, 4, 256>}, {transform_indices = @transform_2, window_bounds = array<i64: 1, 8, 256>}, {transform_indices = @transform_3, window_bounds = array<i64: 1, 24, 12>}, {pipeline_mode = #tpu.pipeline_mode<synchronous>, transform_indices = @transform_4, window_bounds = array<i64: 256, 256>}, {pipeline_mode = #tpu.pipeline_mode<synchronous>, transform_indices = @transform_5, window_bounds = array<i64: 256, 512>}, {pipeline_mode = #tpu.pipeline_mode<synchronous>, transform_indices = @transform_6, window_bounds = array<i64: 256, 256>}, {pipeline_mode = #tpu.pipeline_mode<synchronous>, transform_indices = @transform_7, window_bounds = array<i64: 16, 256>}, {pipeline_mode = #tpu.pipeline_mode<synchronous>, transform_indices = @transform_8, window_bounds = array<i64: 256, 1024>}, {pipeline_mode = #tpu.pipeline_mode<synchronous>, transform_indices = @transform_9, window_bounds = array<i64: 1, 1024>}, {pipeline_mode = #tpu.pipeline_mode<synchronous>, transform_indices = @transform_10, window_bounds = array<i64: 1024, 256>}, {transform_indices = @transform_11, window_bounds = array<i64: 1, 24, 256>}]} {
    %c0 = arith.constant 0 : index
    %c0_0 = arith.constant 0 : index
    %c0_1 = arith.constant 0 : index
    %0 = vector.load %arg2[%c0, %c0_0, %c0_1] : memref<1x4x256xf32, #tpu.memory_space<vmem>>, vector<1x4x256xf32>
    %1 = vector.shape_cast %0 : vector<1x4x256xf32> to vector<4x256xf32>
    %c0_2 = arith.constant 0 : index
    %c0_3 = arith.constant 0 : index
    %c0_4 = arith.constant 0 : index
    %2 = vector.load %arg3[%c0_2, %c0_3, %c0_4] : memref<1x8x256xf32, #tpu.memory_space<vmem>>, vector<1x8x256xf32>
    %3 = vector.shape_cast %2 : vector<1x8x256xf32> to vector<8x256xf32>
    %4 = tpu.concatenate %1, %3 in 0 : vector<4x256xf32>, vector<8x256xf32> -> vector<12x256xf32>
    %c0_5 = arith.constant 0 : index
    %c0_6 = arith.constant 0 : index
    %c0_7 = arith.constant 0 : index
    %5 = vector.load %arg1[%c0_5, %c0_6, %c0_7] : memref<1x24x256xf32, #tpu.memory_space<vmem>>, vector<1x24x256xf32>
    %6 = vector.shape_cast %5 : vector<1x24x256xf32> to vector<24x256xf32>
    %c0_8 = arith.constant 0 : index
    %c0_9 = arith.constant 0 : index
    %c0_10 = arith.constant 0 : index
    %7 = vector.load %arg4[%c0_8, %c0_9, %c0_10] : memref<1x24x12xf32, #tpu.memory_space<vmem>>, vector<1x24x12xf32>
    %8 = vector.shape_cast %7 : vector<1x24x12xf32> to vector<24x12xf32>
    %c0_11 = arith.constant 0 : index
    %c0_12 = arith.constant 0 : index
    %9 = vector.load %arg5[%c0_11, %c0_12] : memref<256x256xbf16, #tpu.memory_space<vmem>>, vector<256x256xbf16>
    %c0_13 = arith.constant 0 : index
    %c0_14 = arith.constant 0 : index
    %10 = vector.load %arg6[%c0_13, %c0_14] : memref<256x512xbf16, #tpu.memory_space<vmem>>, vector<256x512xbf16>
    %c0_15 = arith.constant 0 : index
    %c0_16 = arith.constant 0 : index
    %11 = vector.load %arg7[%c0_15, %c0_16] : memref<256x256xbf16, #tpu.memory_space<vmem>>, vector<256x256xbf16>
    %c0_17 = arith.constant 0 : index
    %c0_18 = arith.constant 0 : index
    %12 = vector.load %arg8[%c0_17, %c0_18] : memref<16x256xf32, #tpu.memory_space<vmem>>, vector<16x256xf32>
    %c0_19 = arith.constant 0 : index
    %c0_20 = arith.constant 0 : index
    %13 = vector.load %arg9[%c0_19, %c0_20] : memref<256x1024xbf16, #tpu.memory_space<vmem>>, vector<256x1024xbf16>
    %c0_21 = arith.constant 0 : index
    %c0_22 = arith.constant 0 : index
    %14 = vector.load %arg10[%c0_21, %c0_22] : memref<1x1024xf32, #tpu.memory_space<vmem>>, vector<1x1024xf32>
    %c0_23 = arith.constant 0 : index
    %c0_24 = arith.constant 0 : index
    %15 = vector.load %arg11[%c0_23, %c0_24] : memref<1024x256xbf16, #tpu.memory_space<vmem>>, vector<1024x256xbf16>
    %16 = arith.truncf %6 : vector<24x256xf32> to vector<24x256xbf16>
    %17 = arith.truncf %4 : vector<12x256xf32> to vector<12x256xbf16>
    %cst = arith.constant dense<0.000000e+00> : vector<24x256xf32>
    %18 = tpu.matmul %16, %9, %cst {dimension_numbers = #tpu.dot_dimension_numbers<[1], [0], [0], [1], [0, 0, 1, 1], [], []>} : vector<24x256xbf16>, vector<256x256xbf16>, vector<24x256xf32> -> vector<24x256xf32>
    %19 = vector.extract_strided_slice %12 {offsets = [0, 0], sizes = [1, 256], strides = [1, 1]} : vector<16x256xf32> to vector<1x256xf32>
    %20 = vector.broadcast %19 : vector<1x256xf32> to vector<24x256xf32>
    %21 = arith.addf %18, %20 : vector<24x256xf32>
    %cst_25 = arith.constant dense<0.000000e+00> : vector<12x512xf32>
    %22 = tpu.matmul %17, %10, %cst_25 {dimension_numbers = #tpu.dot_dimension_numbers<[1], [0], [0], [1], [0, 0, 1, 1], [], []>} : vector<12x256xbf16>, vector<256x512xbf16>, vector<12x512xf32> -> vector<12x512xf32>
    %23 = vector.extract_strided_slice %22 {offsets = [0, 0], sizes = [12, 256], strides = [1, 1]} : vector<12x512xf32> to vector<12x256xf32>
    %24 = vector.extract_strided_slice %12 {offsets = [1, 0], sizes = [1, 256], strides = [1, 1]} : vector<16x256xf32> to vector<1x256xf32>
    %25 = vector.broadcast %24 : vector<1x256xf32> to vector<12x256xf32>
    %26 = arith.addf %23, %25 : vector<12x256xf32>
    %27 = vector.extract_strided_slice %22 {offsets = [0, 256], sizes = [12, 256], strides = [1, 1]} : vector<12x512xf32> to vector<12x256xf32>
    %28 = vector.extract_strided_slice %12 {offsets = [2, 0], sizes = [1, 256], strides = [1, 1]} : vector<16x256xf32> to vector<1x256xf32>
    %29 = vector.broadcast %28 : vector<1x256xf32> to vector<12x256xf32>
    %30 = arith.addf %27, %29 : vector<12x256xf32>
    %31 = vector.extract_strided_slice %21 {offsets = [0, 0], sizes = [24, 32], strides = [1, 1]} : vector<24x256xf32> to vector<24x32xf32>
    %32 = vector.extract_strided_slice %26 {offsets = [0, 0], sizes = [12, 32], strides = [1, 1]} : vector<12x256xf32> to vector<12x32xf32>
    %33 = vector.extract_strided_slice %30 {offsets = [0, 0], sizes = [12, 32], strides = [1, 1]} : vector<12x256xf32> to vector<12x32xf32>
    %cst_26 = arith.constant dense<0.000000e+00> : vector<24x12xf32>
    %34 = tpu.matmul %31, %32, %cst_26 {dimension_numbers = #tpu.dot_dimension_numbers<[1], [1], [0], [0], [0, 0, 1, 0], [], []>} : vector<24x32xf32>, vector<12x32xf32>, vector<24x12xf32> -> vector<24x12xf32>
    %cst_27 = arith.constant 0.176776692 : f32
    %35 = vector.broadcast %cst_27 : f32 to vector<24x12xf32>
    %36 = arith.mulf %34, %35 : vector<24x12xf32>
    %37 = arith.addf %36, %8 : vector<24x12xf32>
    %cst_28 = arith.constant dense<0xFF800000> : vector<24xf32>
    %38 = vector.multi_reduction <maximumf>, %37, %cst_28 [1] : vector<24x12xf32> to vector<24xf32>
    %39 = vector.shape_cast %38 : vector<24xf32> to vector<24x1xf32>
    %40 = vector.broadcast %39 : vector<24x1xf32> to vector<24x12xf32>
    %41 = arith.subf %37, %40 : vector<24x12xf32>
    %42 = math.exp %41 : vector<24x12xf32>
    %cst_29 = arith.constant dense<0.000000e+00> : vector<24xf32>
    %43 = vector.multi_reduction <add>, %42, %cst_29 [1] : vector<24x12xf32> to vector<24xf32>
    %44 = vector.shape_cast %43 : vector<24xf32> to vector<24x1xf32>
    %45 = vector.broadcast %44 : vector<24x1xf32> to vector<24x12xf32>
    %46 = arith.divf %42, %45 : vector<24x12xf32>
    %cst_30 = arith.constant dense<0.000000e+00> : vector<24x32xf32>
    %47 = tpu.matmul %46, %33, %cst_30 {dimension_numbers = #tpu.dot_dimension_numbers<[1], [0], [0], [1], [0, 0, 1, 1], [], []>} : vector<24x12xf32>, vector<12x32xf32>, vector<24x32xf32> -> vector<24x32xf32>
    %c0_31 = arith.constant 0 : index
    %c0_32 = arith.constant 0 : index
    %48 = vector.load %arg13[%c0_31, %c0_32] : memref<24x256xf32, #tpu.memory_space<vmem>>, vector<24x32xf32>
    tpu.vector_store %arg13[%c0_31, %c0_32], %47 {strides = array<i32>} : memref<24x256xf32, #tpu.memory_space<vmem>>, vector<24x32xf32>,
    %49 = vector.extract_strided_slice %21 {offsets = [0, 32], sizes = [24, 32], strides = [1, 1]} : vector<24x256xf32> to vector<24x32xf32>
    %50 = vector.extract_strided_slice %26 {offsets = [0, 32], sizes = [12, 32], strides = [1, 1]} : vector<12x256xf32> to vector<12x32xf32>
    %51 = vector.extract_strided_slice %30 {offsets = [0, 32], sizes = [12, 32], strides = [1, 1]} : vector<12x256xf32> to vector<12x32xf32>
    %cst_33 = arith.constant dense<0.000000e+00> : vector<24x12xf32>
    %52 = tpu.matmul %49, %50, %cst_33 {dimension_numbers = #tpu.dot_dimension_numbers<[1], [1], [0], [0], [0, 0, 1, 0], [], []>} : vector<24x32xf32>, vector<12x32xf32>, vector<24x12xf32> -> vector<24x12xf32>
    %cst_34 = arith.constant 0.176776692 : f32
    %53 = vector.broadcast %cst_34 : f32 to vector<24x12xf32>
    %54 = arith.mulf %52, %53 : vector<24x12xf32>
    %55 = arith.addf %54, %8 : vector<24x12xf32>
    %cst_35 = arith.constant dense<0xFF800000> : vector<24xf32>
    %56 = vector.multi_reduction <maximumf>, %55, %cst_35 [1] : vector<24x12xf32> to vector<24xf32>
    %57 = vector.shape_cast %56 : vector<24xf32> to vector<24x1xf32>
    %58 = vector.broadcast %57 : vector<24x1xf32> to vector<24x12xf32>
    %59 = arith.subf %55, %58 : vector<24x12xf32>
    %60 = math.exp %59 : vector<24x12xf32>
    %cst_36 = arith.constant dense<0.000000e+00> : vector<24xf32>
    %61 = vector.multi_reduction <add>, %60, %cst_36 [1] : vector<24x12xf32> to vector<24xf32>
    %62 = vector.shape_cast %61 : vector<24xf32> to vector<24x1xf32>
    %63 = vector.broadcast %62 : vector<24x1xf32> to vector<24x12xf32>
    %64 = arith.divf %60, %63 : vector<24x12xf32>
    %cst_37 = arith.constant dense<0.000000e+00> : vector<24x32xf32>
    %65 = tpu.matmul %64, %51, %cst_37 {dimension_numbers = #tpu.dot_dimension_numbers<[1], [0], [0], [1], [0, 0, 1, 1], [], []>} : vector<24x12xf32>, vector<12x32xf32>, vector<24x32xf32> -> vector<24x32xf32>
    %c0_38 = arith.constant 0 : index
    %c32 = arith.constant 32 : index
    %66 = vector.load %arg13[%c0_38, %c32] : memref<24x256xf32, #tpu.memory_space<vmem>>, vector<24x32xf32>
    tpu.vector_store %arg13[%c0_38, %c32], %65 {strides = array<i32>} : memref<24x256xf32, #tpu.memory_space<vmem>>, vector<24x32xf32>,
    %67 = vector.extract_strided_slice %21 {offsets = [0, 64], sizes = [24, 32], strides = [1, 1]} : vector<24x256xf32> to vector<24x32xf32>
    %68 = vector.extract_strided_slice %26 {offsets = [0, 64], sizes = [12, 32], strides = [1, 1]} : vector<12x256xf32> to vector<12x32xf32>
    %69 = vector.extract_strided_slice %30 {offsets = [0, 64], sizes = [12, 32], strides = [1, 1]} : vector<12x256xf32> to vector<12x32xf32>
    %cst_39 = arith.constant dense<0.000000e+00> : vector<24x12xf32>
    %70 = tpu.matmul %67, %68, %cst_39 {dimension_numbers = #tpu.dot_dimension_numbers<[1], [1], [0], [0], [0, 0, 1, 0], [], []>} : vector<24x32xf32>, vector<12x32xf32>, vector<24x12xf32> -> vector<24x12xf32>
    %cst_40 = arith.constant 0.176776692 : f32
    %71 = vector.broadcast %cst_40 : f32 to vector<24x12xf32>
    %72 = arith.mulf %70, %71 : vector<24x12xf32>
    %73 = arith.addf %72, %8 : vector<24x12xf32>
    %cst_41 = arith.constant dense<0xFF800000> : vector<24xf32>
    %74 = vector.multi_reduction <maximumf>, %73, %cst_41 [1] : vector<24x12xf32> to vector<24xf32>
    %75 = vector.shape_cast %74 : vector<24xf32> to vector<24x1xf32>
    %76 = vector.broadcast %75 : vector<24x1xf32> to vector<24x12xf32>
    %77 = arith.subf %73, %76 : vector<24x12xf32>
    %78 = math.exp %77 : vector<24x12xf32>
    %cst_42 = arith.constant dense<0.000000e+00> : vector<24xf32>
    %79 = vector.multi_reduction <add>, %78, %cst_42 [1] : vector<24x12xf32> to vector<24xf32>
    %80 = vector.shape_cast %79 : vector<24xf32> to vector<24x1xf32>
    %81 = vector.broadcast %80 : vector<24x1xf32> to vector<24x12xf32>
    %82 = arith.divf %78, %81 : vector<24x12xf32>
    %cst_43 = arith.constant dense<0.000000e+00> : vector<24x32xf32>
    %83 = tpu.matmul %82, %69, %cst_43 {dimension_numbers = #tpu.dot_dimension_numbers<[1], [0], [0], [1], [0, 0, 1, 1], [], []>} : vector<24x12xf32>, vector<12x32xf32>, vector<24x32xf32> -> vector<24x32xf32>
    %c0_44 = arith.constant 0 : index
    %c64 = arith.constant 64 : index
    %84 = vector.load %arg13[%c0_44, %c64] : memref<24x256xf32, #tpu.memory_space<vmem>>, vector<24x32xf32>
    tpu.vector_store %arg13[%c0_44, %c64], %83 {strides = array<i32>} : memref<24x256xf32, #tpu.memory_space<vmem>>, vector<24x32xf32>,
    %85 = vector.extract_strided_slice %21 {offsets = [0, 96], sizes = [24, 32], strides = [1, 1]} : vector<24x256xf32> to vector<24x32xf32>
    %86 = vector.extract_strided_slice %26 {offsets = [0, 96], sizes = [12, 32], strides = [1, 1]} : vector<12x256xf32> to vector<12x32xf32>
    %87 = vector.extract_strided_slice %30 {offsets = [0, 96], sizes = [12, 32], strides = [1, 1]} : vector<12x256xf32> to vector<12x32xf32>
    %cst_45 = arith.constant dense<0.000000e+00> : vector<24x12xf32>
    %88 = tpu.matmul %85, %86, %cst_45 {dimension_numbers = #tpu.dot_dimension_numbers<[1], [1], [0], [0], [0, 0, 1, 0], [], []>} : vector<24x32xf32>, vector<12x32xf32>, vector<24x12xf32> -> vector<24x12xf32>
    %cst_46 = arith.constant 0.176776692 : f32
    %89 = vector.broadcast %cst_46 : f32 to vector<24x12xf32>
    %90 = arith.mulf %88, %89 : vector<24x12xf32>
    %91 = arith.addf %90, %8 : vector<24x12xf32>
    %cst_47 = arith.constant dense<0xFF800000> : vector<24xf32>
    %92 = vector.multi_reduction <maximumf>, %91, %cst_47 [1] : vector<24x12xf32> to vector<24xf32>
    %93 = vector.shape_cast %92 : vector<24xf32> to vector<24x1xf32>
    %94 = vector.broadcast %93 : vector<24x1xf32> to vector<24x12xf32>
    %95 = arith.subf %91, %94 : vector<24x12xf32>
    %96 = math.exp %95 : vector<24x12xf32>
    %cst_48 = arith.constant dense<0.000000e+00> : vector<24xf32>
    %97 = vector.multi_reduction <add>, %96, %cst_48 [1] : vector<24x12xf32> to vector<24xf32>
    %98 = vector.shape_cast %97 : vector<24xf32> to vector<24x1xf32>
    %99 = vector.broadcast %98 : vector<24x1xf32> to vector<24x12xf32>
    %100 = arith.divf %96, %99 : vector<24x12xf32>
    %cst_49 = arith.constant dense<0.000000e+00> : vector<24x32xf32>
    %101 = tpu.matmul %100, %87, %cst_49 {dimension_numbers = #tpu.dot_dimension_numbers<[1], [0], [0], [1], [0, 0, 1, 1], [], []>} : vector<24x12xf32>, vector<12x32xf32>, vector<24x32xf32> -> vector<24x32xf32>
    %c0_50 = arith.constant 0 : index
    %c96 = arith.constant 96 : index
    %102 = vector.load %arg13[%c0_50, %c96] : memref<24x256xf32, #tpu.memory_space<vmem>>, vector<24x32xf32>
    tpu.vector_store %arg13[%c0_50, %c96], %101 {strides = array<i32>} : memref<24x256xf32, #tpu.memory_space<vmem>>, vector<24x32xf32>,
    %103 = vector.extract_strided_slice %21 {offsets = [0, 128], sizes = [24, 32], strides = [1, 1]} : vector<24x256xf32> to vector<24x32xf32>
    %104 = vector.extract_strided_slice %26 {offsets = [0, 128], sizes = [12, 32], strides = [1, 1]} : vector<12x256xf32> to vector<12x32xf32>
    %105 = vector.extract_strided_slice %30 {offsets = [0, 128], sizes = [12, 32], strides = [1, 1]} : vector<12x256xf32> to vector<12x32xf32>
    %cst_51 = arith.constant dense<0.000000e+00> : vector<24x12xf32>
    %106 = tpu.matmul %103, %104, %cst_51 {dimension_numbers = #tpu.dot_dimension_numbers<[1], [1], [0], [0], [0, 0, 1, 0], [], []>} : vector<24x32xf32>, vector<12x32xf32>, vector<24x12xf32> -> vector<24x12xf32>
    %cst_52 = arith.constant 0.176776692 : f32
    %107 = vector.broadcast %cst_52 : f32 to vector<24x12xf32>
    %108 = arith.mulf %106, %107 : vector<24x12xf32>
    %109 = arith.addf %108, %8 : vector<24x12xf32>
    %cst_53 = arith.constant dense<0xFF800000> : vector<24xf32>
    %110 = vector.multi_reduction <maximumf>, %109, %cst_53 [1] : vector<24x12xf32> to vector<24xf32>
    %111 = vector.shape_cast %110 : vector<24xf32> to vector<24x1xf32>
    %112 = vector.broadcast %111 : vector<24x1xf32> to vector<24x12xf32>
    %113 = arith.subf %109, %112 : vector<24x12xf32>
    %114 = math.exp %113 : vector<24x12xf32>
    %cst_54 = arith.constant dense<0.000000e+00> : vector<24xf32>
    %115 = vector.multi_reduction <add>, %114, %cst_54 [1] : vector<24x12xf32> to vector<24xf32>
    %116 = vector.shape_cast %115 : vector<24xf32> to vector<24x1xf32>
    %117 = vector.broadcast %116 : vector<24x1xf32> to vector<24x12xf32>
    %118 = arith.divf %114, %117 : vector<24x12xf32>
    %cst_55 = arith.constant dense<0.000000e+00> : vector<24x32xf32>
    %119 = tpu.matmul %118, %105, %cst_55 {dimension_numbers = #tpu.dot_dimension_numbers<[1], [0], [0], [1], [0, 0, 1, 1], [], []>} : vector<24x12xf32>, vector<12x32xf32>, vector<24x32xf32> -> vector<24x32xf32>
    %c0_56 = arith.constant 0 : index
    %c128 = arith.constant 128 : index
    %120 = vector.load %arg13[%c0_56, %c128] : memref<24x256xf32, #tpu.memory_space<vmem>>, vector<24x32xf32>
    tpu.vector_store %arg13[%c0_56, %c128], %119 {strides = array<i32>} : memref<24x256xf32, #tpu.memory_space<vmem>>, vector<24x32xf32>,
    %121 = vector.extract_strided_slice %21 {offsets = [0, 160], sizes = [24, 32], strides = [1, 1]} : vector<24x256xf32> to vector<24x32xf32>
    %122 = vector.extract_strided_slice %26 {offsets = [0, 160], sizes = [12, 32], strides = [1, 1]} : vector<12x256xf32> to vector<12x32xf32>
    %123 = vector.extract_strided_slice %30 {offsets = [0, 160], sizes = [12, 32], strides = [1, 1]} : vector<12x256xf32> to vector<12x32xf32>
    %cst_57 = arith.constant dense<0.000000e+00> : vector<24x12xf32>
    %124 = tpu.matmul %121, %122, %cst_57 {dimension_numbers = #tpu.dot_dimension_numbers<[1], [1], [0], [0], [0, 0, 1, 0], [], []>} : vector<24x32xf32>, vector<12x32xf32>, vector<24x12xf32> -> vector<24x12xf32>
    %cst_58 = arith.constant 0.176776692 : f32
    %125 = vector.broadcast %cst_58 : f32 to vector<24x12xf32>
    %126 = arith.mulf %124, %125 : vector<24x12xf32>
    %127 = arith.addf %126, %8 : vector<24x12xf32>
    %cst_59 = arith.constant dense<0xFF800000> : vector<24xf32>
    %128 = vector.multi_reduction <maximumf>, %127, %cst_59 [1] : vector<24x12xf32> to vector<24xf32>
    %129 = vector.shape_cast %128 : vector<24xf32> to vector<24x1xf32>
    %130 = vector.broadcast %129 : vector<24x1xf32> to vector<24x12xf32>
    %131 = arith.subf %127, %130 : vector<24x12xf32>
    %132 = math.exp %131 : vector<24x12xf32>
    %cst_60 = arith.constant dense<0.000000e+00> : vector<24xf32>
    %133 = vector.multi_reduction <add>, %132, %cst_60 [1] : vector<24x12xf32> to vector<24xf32>
    %134 = vector.shape_cast %133 : vector<24xf32> to vector<24x1xf32>
    %135 = vector.broadcast %134 : vector<24x1xf32> to vector<24x12xf32>
    %136 = arith.divf %132, %135 : vector<24x12xf32>
    %cst_61 = arith.constant dense<0.000000e+00> : vector<24x32xf32>
    %137 = tpu.matmul %136, %123, %cst_61 {dimension_numbers = #tpu.dot_dimension_numbers<[1], [0], [0], [1], [0, 0, 1, 1], [], []>} : vector<24x12xf32>, vector<12x32xf32>, vector<24x32xf32> -> vector<24x32xf32>
    %c0_62 = arith.constant 0 : index
    %c160 = arith.constant 160 : index
    %138 = vector.load %arg13[%c0_62, %c160] : memref<24x256xf32, #tpu.memory_space<vmem>>, vector<24x32xf32>
    tpu.vector_store %arg13[%c0_62, %c160], %137 {strides = array<i32>} : memref<24x256xf32, #tpu.memory_space<vmem>>, vector<24x32xf32>,
    %139 = vector.extract_strided_slice %21 {offsets = [0, 192], sizes = [24, 32], strides = [1, 1]} : vector<24x256xf32> to vector<24x32xf32>
    %140 = vector.extract_strided_slice %26 {offsets = [0, 192], sizes = [12, 32], strides = [1, 1]} : vector<12x256xf32> to vector<12x32xf32>
    %141 = vector.extract_strided_slice %30 {offsets = [0, 192], sizes = [12, 32], strides = [1, 1]} : vector<12x256xf32> to vector<12x32xf32>
    %cst_63 = arith.constant dense<0.000000e+00> : vector<24x12xf32>
    %142 = tpu.matmul %139, %140, %cst_63 {dimension_numbers = #tpu.dot_dimension_numbers<[1], [1], [0], [0], [0, 0, 1, 0], [], []>} : vector<24x32xf32>, vector<12x32xf32>, vector<24x12xf32> -> vector<24x12xf32>
    %cst_64 = arith.constant 0.176776692 : f32
    %143 = vector.broadcast %cst_64 : f32 to vector<24x12xf32>
    %144 = arith.mulf %142, %143 : vector<24x12xf32>
    %145 = arith.addf %144, %8 : vector<24x12xf32>
    %cst_65 = arith.constant dense<0xFF800000> : vector<24xf32>
    %146 = vector.multi_reduction <maximumf>, %145, %cst_65 [1] : vector<24x12xf32> to vector<24xf32>
    %147 = vector.shape_cast %146 : vector<24xf32> to vector<24x1xf32>
    %148 = vector.broadcast %147 : vector<24x1xf32> to vector<24x12xf32>
    %149 = arith.subf %145, %148 : vector<24x12xf32>
    %150 = math.exp %149 : vector<24x12xf32>
    %cst_66 = arith.constant dense<0.000000e+00> : vector<24xf32>
    %151 = vector.multi_reduction <add>, %150, %cst_66 [1] : vector<24x12xf32> to vector<24xf32>
    %152 = vector.shape_cast %151 : vector<24xf32> to vector<24x1xf32>
    %153 = vector.broadcast %152 : vector<24x1xf32> to vector<24x12xf32>
    %154 = arith.divf %150, %153 : vector<24x12xf32>
    %cst_67 = arith.constant dense<0.000000e+00> : vector<24x32xf32>
    %155 = tpu.matmul %154, %141, %cst_67 {dimension_numbers = #tpu.dot_dimension_numbers<[1], [0], [0], [1], [0, 0, 1, 1], [], []>} : vector<24x12xf32>, vector<12x32xf32>, vector<24x32xf32> -> vector<24x32xf32>
    %c0_68 = arith.constant 0 : index
    %c192 = arith.constant 192 : index
    %156 = vector.load %arg13[%c0_68, %c192] : memref<24x256xf32, #tpu.memory_space<vmem>>, vector<24x32xf32>
    tpu.vector_store %arg13[%c0_68, %c192], %155 {strides = array<i32>} : memref<24x256xf32, #tpu.memory_space<vmem>>, vector<24x32xf32>,
    %157 = vector.extract_strided_slice %21 {offsets = [0, 224], sizes = [24, 32], strides = [1, 1]} : vector<24x256xf32> to vector<24x32xf32>
    %158 = vector.extract_strided_slice %26 {offsets = [0, 224], sizes = [12, 32], strides = [1, 1]} : vector<12x256xf32> to vector<12x32xf32>
    %159 = vector.extract_strided_slice %30 {offsets = [0, 224], sizes = [12, 32], strides = [1, 1]} : vector<12x256xf32> to vector<12x32xf32>
    %cst_69 = arith.constant dense<0.000000e+00> : vector<24x12xf32>
    %160 = tpu.matmul %157, %158, %cst_69 {dimension_numbers = #tpu.dot_dimension_numbers<[1], [1], [0], [0], [0, 0, 1, 0], [], []>} : vector<24x32xf32>, vector<12x32xf32>, vector<24x12xf32> -> vector<24x12xf32>
    %cst_70 = arith.constant 0.176776692 : f32
    %161 = vector.broadcast %cst_70 : f32 to vector<24x12xf32>
    %162 = arith.mulf %160, %161 : vector<24x12xf32>
    %163 = arith.addf %162, %8 : vector<24x12xf32>
    %cst_71 = arith.constant dense<0xFF800000> : vector<24xf32>
    %164 = vector.multi_reduction <maximumf>, %163, %cst_71 [1] : vector<24x12xf32> to vector<24xf32>
    %165 = vector.shape_cast %164 : vector<24xf32> to vector<24x1xf32>
    %166 = vector.broadcast %165 : vector<24x1xf32> to vector<24x12xf32>
    %167 = arith.subf %163, %166 : vector<24x12xf32>
    %168 = math.exp %167 : vector<24x12xf32>
    %cst_72 = arith.constant dense<0.000000e+00> : vector<24xf32>
    %169 = vector.multi_reduction <add>, %168, %cst_72 [1] : vector<24x12xf32> to vector<24xf32>
    %170 = vector.shape_cast %169 : vector<24xf32> to vector<24x1xf32>
    %171 = vector.broadcast %170 : vector<24x1xf32> to vector<24x12xf32>
    %172 = arith.divf %168, %171 : vector<24x12xf32>
    %cst_73 = arith.constant dense<0.000000e+00> : vector<24x32xf32>
    %173 = tpu.matmul %172, %159, %cst_73 {dimension_numbers = #tpu.dot_dimension_numbers<[1], [0], [0], [1], [0, 0, 1, 1], [], []>} : vector<24x12xf32>, vector<12x32xf32>, vector<24x32xf32> -> vector<24x32xf32>
    %c0_74 = arith.constant 0 : index
    %c224 = arith.constant 224 : index
    %174 = vector.load %arg13[%c0_74, %c224] : memref<24x256xf32, #tpu.memory_space<vmem>>, vector<24x32xf32>
    tpu.vector_store %arg13[%c0_74, %c224], %173 {strides = array<i32>} : memref<24x256xf32, #tpu.memory_space<vmem>>, vector<24x32xf32>,
    %c0_75 = arith.constant 0 : index
    %c0_76 = arith.constant 0 : index
    %175 = vector.load %arg13[%c0_75, %c0_76] : memref<24x256xf32, #tpu.memory_space<vmem>>, vector<24x256xf32>
    %176 = arith.truncf %175 : vector<24x256xf32> to vector<24x256xbf16>
    %cst_77 = arith.constant dense<0.000000e+00> : vector<24x256xf32>
    %177 = tpu.matmul %176, %11, %cst_77 {dimension_numbers = #tpu.dot_dimension_numbers<[1], [0], [0], [1], [0, 0, 1, 1], [], []>} : vector<24x256xbf16>, vector<256x256xbf16>, vector<24x256xf32> -> vector<24x256xf32>
    %178 = vector.extract_strided_slice %12 {offsets = [3, 0], sizes = [1, 256], strides = [1, 1]} : vector<16x256xf32> to vector<1x256xf32>
    %179 = vector.broadcast %178 : vector<1x256xf32> to vector<24x256xf32>
    %180 = arith.addf %177, %179 : vector<24x256xf32>
    %181 = vector.extract_strided_slice %12 {offsets = [4, 0], sizes = [1, 256], strides = [1, 1]} : vector<16x256xf32> to vector<1x256xf32>
    %182 = vector.extract_strided_slice %12 {offsets = [5, 0], sizes = [1, 256], strides = [1, 1]} : vector<16x256xf32> to vector<1x256xf32>
    %cst_78 = arith.constant dense<0.000000e+00> : vector<24xf32>
    %183 = vector.multi_reduction <add>, %180, %cst_78 [1] : vector<24x256xf32> to vector<24xf32>
    %184 = vector.shape_cast %183 : vector<24xf32> to vector<24x1xf32>
    %cst_79 = arith.constant 2.560000e+02 : f32
    %185 = vector.broadcast %cst_79 : f32 to vector<24x1xf32>
    %186 = arith.divf %184, %185 : vector<24x1xf32>
    %187 = vector.broadcast %186 : vector<24x1xf32> to vector<24x256xf32>
    %188 = arith.subf %180, %187 : vector<24x256xf32>
    %189 = arith.mulf %188, %188 : vector<24x256xf32>
    %cst_80 = arith.constant dense<0.000000e+00> : vector<24xf32>
    %190 = vector.multi_reduction <add>, %189, %cst_80 [1] : vector<24x256xf32> to vector<24xf32>
    %191 = vector.shape_cast %190 : vector<24xf32> to vector<24x1xf32>
    %cst_81 = arith.constant 2.560000e+02 : f32
    %192 = vector.broadcast %cst_81 : f32 to vector<24x1xf32>
    %193 = arith.divf %191, %192 : vector<24x1xf32>
    %194 = vector.broadcast %186 : vector<24x1xf32> to vector<24x256xf32>
    %195 = arith.subf %180, %194 : vector<24x256xf32>
    %cst_82 = arith.constant 9.99999974E-6 : f32
    %196 = vector.broadcast %cst_82 : f32 to vector<24x1xf32>
    %197 = arith.addf %193, %196 : vector<24x1xf32>
    %198 = math.rsqrt %197 : vector<24x1xf32>
    %199 = vector.broadcast %198 : vector<24x1xf32> to vector<24x256xf32>
    %200 = arith.mulf %195, %199 : vector<24x256xf32>
    %201 = vector.broadcast %181 : vector<1x256xf32> to vector<24x256xf32>
    %202 = arith.mulf %200, %201 : vector<24x256xf32>
    %203 = vector.broadcast %182 : vector<1x256xf32> to vector<24x256xf32>
    %204 = arith.addf %202, %203 : vector<24x256xf32>
    %205 = arith.truncf %204 : vector<24x256xf32> to vector<24x256xbf16>
    %cst_83 = arith.constant dense<0.000000e+00> : vector<24x1024xf32>
    %206 = tpu.matmul %205, %13, %cst_83 {dimension_numbers = #tpu.dot_dimension_numbers<[1], [0], [0], [1], [0, 0, 1, 1], [], []>} : vector<24x256xbf16>, vector<256x1024xbf16>, vector<24x1024xf32> -> vector<24x1024xf32>
    %207 = vector.broadcast %14 : vector<1x1024xf32> to vector<24x1024xf32>
    %208 = arith.addf %206, %207 : vector<24x1024xf32>
    %209 = arith.mulf %208, %208 : vector<24x1024xf32>
    %210 = arith.mulf %208, %209 : vector<24x1024xf32>
    %cst_84 = arith.constant 4.471500e-02 : f32
    %211 = vector.broadcast %cst_84 : f32 to vector<24x1024xf32>
    %212 = arith.mulf %211, %210 : vector<24x1024xf32>
    %213 = arith.addf %208, %212 : vector<24x1024xf32>
    %cst_85 = arith.constant 0.797884583 : f32
    %214 = vector.broadcast %cst_85 : f32 to vector<24x1024xf32>
    %215 = arith.mulf %214, %213 : vector<24x1024xf32>
    %216 = math.tanh %215 : vector<24x1024xf32>
    %cst_86 = arith.constant 1.000000e+00 : f32
    %217 = vector.broadcast %cst_86 : f32 to vector<24x1024xf32>
    %218 = arith.addf %217, %216 : vector<24x1024xf32>
    %cst_87 = arith.constant 5.000000e-01 : f32
    %219 = vector.broadcast %cst_87 : f32 to vector<24x1024xf32>
    %220 = arith.mulf %219, %218 : vector<24x1024xf32>
    %221 = arith.mulf %208, %220 : vector<24x1024xf32>
    %222 = arith.truncf %221 : vector<24x1024xf32> to vector<24x1024xbf16>
    %cst_88 = arith.constant dense<0.000000e+00> : vector<24x256xf32>
    %223 = tpu.matmul %222, %15, %cst_88 {dimension_numbers = #tpu.dot_dimension_numbers<[1], [0], [0], [1], [0, 0, 1, 1], [], []>} : vector<24x1024xbf16>, vector<1024x256xbf16>, vector<24x256xf32> -> vector<24x256xf32>
    %224 = vector.extract_strided_slice %12 {offsets = [8, 0], sizes = [1, 256], strides = [1, 1]} : vector<16x256xf32> to vector<1x256xf32>
    %225 = vector.broadcast %224 : vector<1x256xf32> to vector<24x256xf32>
    %226 = arith.addf %223, %225 : vector<24x256xf32>
    %227 = arith.addf %226, %204 : vector<24x256xf32>
    %228 = vector.extract_strided_slice %12 {offsets = [6, 0], sizes = [1, 256], strides = [1, 1]} : vector<16x256xf32> to vector<1x256xf32>
    %229 = vector.extract_strided_slice %12 {offsets = [7, 0], sizes = [1, 256], strides = [1, 1]} : vector<16x256xf32> to vector<1x256xf32>
    %cst_89 = arith.constant dense<0.000000e+00> : vector<24xf32>
    %230 = vector.multi_reduction <add>, %227, %cst_89 [1] : vector<24x256xf32> to vector<24xf32>
    %231 = vector.shape_cast %230 : vector<24xf32> to vector<24x1xf32>
    %cst_90 = arith.constant 2.560000e+02 : f32
    %232 = vector.broadcast %cst_90 : f32 to vector<24x1xf32>
    %233 = arith.divf %231, %232 : vector<24x1xf32>
    %234 = vector.broadcast %233 : vector<24x1xf32> to vector<24x256xf32>
    %235 = arith.subf %227, %234 : vector<24x256xf32>
    %236 = arith.mulf %235, %235 : vector<24x256xf32>
    %cst_91 = arith.constant dense<0.000000e+00> : vector<24xf32>
    %237 = vector.multi_reduction <add>, %236, %cst_91 [1] : vector<24x256xf32> to vector<24xf32>
    %238 = vector.shape_cast %237 : vector<24xf32> to vector<24x1xf32>
    %cst_92 = arith.constant 2.560000e+02 : f32
    %239 = vector.broadcast %cst_92 : f32 to vector<24x1xf32>
    %240 = arith.divf %238, %239 : vector<24x1xf32>
    %241 = vector.broadcast %233 : vector<24x1xf32> to vector<24x256xf32>
    %242 = arith.subf %227, %241 : vector<24x256xf32>
    %cst_93 = arith.constant 9.99999974E-6 : f32
    %243 = vector.broadcast %cst_93 : f32 to vector<24x1xf32>
    %244 = arith.addf %240, %243 : vector<24x1xf32>
    %245 = math.rsqrt %244 : vector<24x1xf32>
    %246 = vector.broadcast %245 : vector<24x1xf32> to vector<24x256xf32>
    %247 = arith.mulf %242, %246 : vector<24x256xf32>
    %248 = vector.broadcast %228 : vector<1x256xf32> to vector<24x256xf32>
    %249 = arith.mulf %247, %248 : vector<24x256xf32>
    %250 = vector.broadcast %229 : vector<1x256xf32> to vector<24x256xf32>
    %251 = arith.addf %249, %250 : vector<24x256xf32>
    %c0_94 = arith.constant 0 : index
    %c0_95 = arith.constant 0 : index
    %c0_96 = arith.constant 0 : index
    %252 = vector.load %arg12[%c0_94, %c0_95, %c0_96] : memref<1x24x256xf32, #tpu.memory_space<vmem>>, vector<1x24x256xf32>
    %253 = vector.shape_cast %252 : vector<1x24x256xf32> to vector<24x256xf32>
    %254 = vector.shape_cast %251 : vector<24x256xf32> to vector<1x24x256xf32>
    tpu.vector_store %arg12[%c0_94, %c0_95, %c0_96], %254 {strides = array<i32>} : memref<1x24x256xf32, #tpu.memory_space<vmem>>, vector<1x24x256xf32>,
    return
  }
  func.func @transform_0(%arg0: i32) -> (i32, i32, i32) {
    %c0_i32 = arith.constant 0 : i32
    %c0_i32_0 = arith.constant 0 : i32
    %c0_i32_1 = arith.constant 0 : i32
    return %arg0, %c0_i32, %c0_i32_0 : i32, i32, i32
  }
  func.func @transform_1(%arg0: i32) -> (i32, i32, i32) {
    %c0_i32 = arith.constant 0 : i32
    %c0_i32_0 = arith.constant 0 : i32
    %c0_i32_1 = arith.constant 0 : i32
    return %arg0, %c0_i32, %c0_i32_0 : i32, i32, i32
  }
  func.func @transform_2(%arg0: i32) -> (i32, i32, i32) {
    %c0_i32 = arith.constant 0 : i32
    %c0_i32_0 = arith.constant 0 : i32
    %c0_i32_1 = arith.constant 0 : i32
    return %arg0, %c0_i32, %c0_i32_0 : i32, i32, i32
  }
  func.func @transform_3(%arg0: i32) -> (i32, i32, i32) {
    %c0_i32 = arith.constant 0 : i32
    %c0_i32_0 = arith.constant 0 : i32
    %c0_i32_1 = arith.constant 0 : i32
    return %arg0, %c0_i32, %c0_i32_0 : i32, i32, i32
  }
  func.func @transform_4(%arg0: i32) -> (i32, i32) {
    %c0_i32 = arith.constant 0 : i32
    %c0_i32_0 = arith.constant 0 : i32
    %c0_i32_1 = arith.constant 0 : i32
    return %c0_i32, %c0_i32_0 : i32, i32
  }
  func.func @transform_5(%arg0: i32) -> (i32, i32) {
    %c0_i32 = arith.constant 0 : i32
    %c0_i32_0 = arith.constant 0 : i32
    %c0_i32_1 = arith.constant 0 : i32
    return %c0_i32, %c0_i32_0 : i32, i32
  }
  func.func @transform_6(%arg0: i32) -> (i32, i32) {
    %c0_i32 = arith.constant 0 : i32
    %c0_i32_0 = arith.constant 0 : i32
    %c0_i32_1 = arith.constant 0 : i32
    return %c0_i32, %c0_i32_0 : i32, i32
  }
  func.func @transform_7(%arg0: i32) -> (i32, i32) {
    %c0_i32 = arith.constant 0 : i32
    %c0_i32_0 = arith.constant 0 : i32
    %c0_i32_1 = arith.constant 0 : i32
    return %c0_i32, %c0_i32_0 : i32, i32
  }
  func.func @transform_8(%arg0: i32) -> (i32, i32) {
    %c0_i32 = arith.constant 0 : i32
    %c0_i32_0 = arith.constant 0 : i32
    %c0_i32_1 = arith.constant 0 : i32
    return %c0_i32, %c0_i32_0 : i32, i32
  }
  func.func @transform_9(%arg0: i32) -> (i32, i32) {
    %c0_i32 = arith.constant 0 : i32
    %c0_i32_0 = arith.constant 0 : i32
    %c0_i32_1 = arith.constant 0 : i32
    return %c0_i32, %c0_i32_0 : i32, i32
  }
  func.func @transform_10(%arg0: i32) -> (i32, i32) {
    %c0_i32 = arith.constant 0 : i32
    %c0_i32_0 = arith.constant 0 : i32
    %c0_i32_1 = arith.constant 0 : i32
    return %c0_i32, %c0_i32_0 : i32, i32
  }
  func.func @transform_11(%arg0: i32) -> (i32, i32, i32) {
    %c0_i32 = arith.constant 0 : i32
    %c0_i32_0 = arith.constant 0 : i32
    %c0_i32_1 = arith.constant 0 : i32
    return %arg0, %c0_i32, %c0_i32_0 : i32, i32, i32
  }
}

module attributes {stable_mosaic.version = 11 : i64} {
  func.func @_gmm_kernel(%arg0: i32, %arg1: memref<48x256xf32, #tpu.memory_space<vmem>>, %arg2: memref<48x2xf32, #tpu.memory_space<vmem>>, %arg3: memref<256x512xbf16, #tpu.memory_space<vmem>>, %arg4: memref<1x512xf32, #tpu.memory_space<vmem>>, %arg5: memref<512x384xbf16, #tpu.memory_space<vmem>>, %arg6: memref<1x384xf32, #tpu.memory_space<vmem>>, %arg7: memref<256x64xbf16, #tpu.memory_space<vmem>>, %arg8: memref<1x64xf32, #tpu.memory_space<vmem>>, %arg9: memref<64x128xbf16, #tpu.memory_space<vmem>>, %arg10: memref<1x128xf32, #tpu.memory_space<vmem>>, %arg11: memref<48x384xf32, #tpu.memory_space<vmem>>, %arg12: memref<48x128xf32, #tpu.memory_space<vmem>>) attributes {dimension_semantics = [#tpu.dimension_semantics<arbitrary>], iteration_bounds = array<i64: 1>, scalar_prefetch = 0 : i64, scratch_operands = 0 : i64, tpu.core_type = #tpu.core_type<tc>, window_params = [{pipeline_mode = #tpu.pipeline_mode<synchronous>, transform_indices = @transform_0, window_bounds = array<i64: 48, 256>}, {pipeline_mode = #tpu.pipeline_mode<synchronous>, transform_indices = @transform_1, window_bounds = array<i64: 48, 2>}, {pipeline_mode = #tpu.pipeline_mode<synchronous>, transform_indices = @transform_2, window_bounds = array<i64: 256, 512>}, {pipeline_mode = #tpu.pipeline_mode<synchronous>, transform_indices = @transform_3, window_bounds = array<i64: 1, 512>}, {pipeline_mode = #tpu.pipeline_mode<synchronous>, transform_indices = @transform_4, window_bounds = array<i64: 512, 384>}, {pipeline_mode = #tpu.pipeline_mode<synchronous>, transform_indices = @transform_5, window_bounds = array<i64: 1, 384>}, {pipeline_mode = #tpu.pipeline_mode<synchronous>, transform_indices = @transform_6, window_bounds = array<i64: 256, 64>}, {pipeline_mode = #tpu.pipeline_mode<synchronous>, transform_indices = @transform_7, window_bounds = array<i64: 1, 64>}, {pipeline_mode = #tpu.pipeline_mode<synchronous>, transform_indices = @transform_8, window_bounds = array<i64: 64, 128>}, {pipeline_mode = #tpu.pipeline_mode<synchronous>, transform_indices = @transform_9, window_bounds = array<i64: 1, 128>}, {pipeline_mode = #tpu.pipeline_mode<synchronous>, transform_indices = @transform_10, window_bounds = array<i64: 48, 384>}, {pipeline_mode = #tpu.pipeline_mode<synchronous>, transform_indices = @transform_11, window_bounds = array<i64: 48, 128>}]} {
    %c0 = arith.constant 0 : index
    %c0_0 = arith.constant 0 : index
    %0 = vector.load %arg1[%c0, %c0_0] : memref<48x256xf32, #tpu.memory_space<vmem>>, vector<48x256xf32>
    %1 = arith.truncf %0 : vector<48x256xf32> to vector<48x256xbf16>
    %c0_1 = arith.constant 0 : index
    %c0_2 = arith.constant 0 : index
    %2 = vector.load %arg3[%c0_1, %c0_2] : memref<256x512xbf16, #tpu.memory_space<vmem>>, vector<256x512xbf16>
    %cst = arith.constant dense<0.000000e+00> : vector<48x512xf32>
    %3 = tpu.matmul %1, %2, %cst {dimension_numbers = #tpu.dot_dimension_numbers<[1], [0], [0], [1], [0, 0, 1, 1], [], []>} : vector<48x256xbf16>, vector<256x512xbf16>, vector<48x512xf32> -> vector<48x512xf32>
    %c0_3 = arith.constant 0 : index
    %c0_4 = arith.constant 0 : index
    %4 = vector.load %arg4[%c0_3, %c0_4] : memref<1x512xf32, #tpu.memory_space<vmem>>, vector<1x512xf32>
    %5 = vector.broadcast %4 : vector<1x512xf32> to vector<48x512xf32>
    %6 = arith.addf %3, %5 : vector<48x512xf32>
    %cst_5 = arith.constant 0.000000e+00 : f32
    %7 = vector.broadcast %cst_5 : f32 to vector<48x512xf32>
    %8 = arith.cmpf ogt, %6, %7 : vector<48x512xf32>
    %cst_6 = arith.constant 0.000000e+00 : f32
    %9 = vector.broadcast %cst_6 : f32 to vector<48x512xf32>
    %10 = arith.minimumf %6, %9 : vector<48x512xf32>
    %11 = math.exp %10 : vector<48x512xf32>
    %cst_7 = arith.constant 1.000000e+00 : f32
    %12 = vector.broadcast %cst_7 : f32 to vector<48x512xf32>
    %13 = arith.subf %11, %12 : vector<48x512xf32>
    %14 = arith.select %8, %6, %13 : vector<48x512xi1>, vector<48x512xf32>
    %15 = arith.truncf %14 : vector<48x512xf32> to vector<48x512xbf16>
    %c0_8 = arith.constant 0 : index
    %c0_9 = arith.constant 0 : index
    %16 = vector.load %arg5[%c0_8, %c0_9] : memref<512x384xbf16, #tpu.memory_space<vmem>>, vector<512x384xbf16>
    %cst_10 = arith.constant dense<0.000000e+00> : vector<48x384xf32>
    %17 = tpu.matmul %15, %16, %cst_10 {dimension_numbers = #tpu.dot_dimension_numbers<[1], [0], [0], [1], [0, 0, 1, 1], [], []>} : vector<48x512xbf16>, vector<512x384xbf16>, vector<48x384xf32> -> vector<48x384xf32>
    %c0_11 = arith.constant 0 : index
    %c0_12 = arith.constant 0 : index
    %18 = vector.load %arg6[%c0_11, %c0_12] : memref<1x384xf32, #tpu.memory_space<vmem>>, vector<1x384xf32>
    %19 = vector.broadcast %18 : vector<1x384xf32> to vector<48x384xf32>
    %20 = arith.addf %17, %19 : vector<48x384xf32>
    %21 = tpu.iota {dimensions = array<i32: 1>} : vector<48x384xi32>
    %c3_i32 = arith.constant 3 : i32
    %22 = vector.broadcast %c3_i32 : i32 to vector<48x384xi32>
    %23 = arith.andi %21, %22 : vector<48x384xi32>
    %c0_13 = arith.constant 0 : index
    %c0_14 = arith.constant 0 : index
    %24 = vector.load %arg2[%c0_13, %c0_14] : memref<48x2xf32, #tpu.memory_space<vmem>>, vector<48x1xf32>
    %c0_15 = arith.constant 0 : index
    %c1 = arith.constant 1 : index
    %25 = vector.load %arg2[%c0_15, %c1] : memref<48x2xf32, #tpu.memory_space<vmem>>, vector<48x1xf32>
    %c0_i32 = arith.constant 0 : i32
    %26 = vector.broadcast %c0_i32 : i32 to vector<48x384xi32>
    %27 = arith.cmpi eq, %23, %26 : vector<48x384xi32>
    %cst_16 = arith.constant 0.000000e+00 : f32
    %28 = vector.shape_cast %24 : vector<48x1xf32> to vector<48x1xf32>
    %29 = vector.broadcast %28 : vector<48x1xf32> to vector<48x384xf32>
    %30 = vector.broadcast %cst_16 : f32 to vector<48x384xf32>
    %31 = arith.select %27, %29, %30 : vector<48x384xi1>, vector<48x384xf32>
    %32 = arith.addf %20, %31 : vector<48x384xf32>
    %c1_i32 = arith.constant 1 : i32
    %33 = vector.broadcast %c1_i32 : i32 to vector<48x384xi32>
    %34 = arith.cmpi eq, %23, %33 : vector<48x384xi32>
    %cst_17 = arith.constant 0.000000e+00 : f32
    %35 = vector.shape_cast %25 : vector<48x1xf32> to vector<48x1xf32>
    %36 = vector.broadcast %35 : vector<48x1xf32> to vector<48x384xf32>
    %37 = vector.broadcast %cst_17 : f32 to vector<48x384xf32>
    %38 = arith.select %34, %36, %37 : vector<48x384xi1>, vector<48x384xf32>
    %39 = arith.addf %32, %38 : vector<48x384xf32>
    %c0_18 = arith.constant 0 : index
    %c0_19 = arith.constant 0 : index
    %40 = vector.load %arg11[%c0_18, %c0_19] : memref<48x384xf32, #tpu.memory_space<vmem>>, vector<48x384xf32>
    tpu.vector_store %arg11[%c0_18, %c0_19], %39 {strides = array<i32>} : memref<48x384xf32, #tpu.memory_space<vmem>>, vector<48x384xf32>,
    %c0_20 = arith.constant 0 : index
    %c0_21 = arith.constant 0 : index
    %41 = vector.load %arg7[%c0_20, %c0_21] : memref<256x64xbf16, #tpu.memory_space<vmem>>, vector<256x64xbf16>
    %cst_22 = arith.constant dense<0.000000e+00> : vector<48x64xf32>
    %42 = tpu.matmul %1, %41, %cst_22 {dimension_numbers = #tpu.dot_dimension_numbers<[1], [0], [0], [1], [0, 0, 1, 1], [], []>} : vector<48x256xbf16>, vector<256x64xbf16>, vector<48x64xf32> -> vector<48x64xf32>
    %c0_23 = arith.constant 0 : index
    %c0_24 = arith.constant 0 : index
    %43 = vector.load %arg8[%c0_23, %c0_24] : memref<1x64xf32, #tpu.memory_space<vmem>>, vector<1x64xf32>
    %44 = vector.broadcast %43 : vector<1x64xf32> to vector<48x64xf32>
    %45 = arith.addf %42, %44 : vector<48x64xf32>
    %cst_25 = arith.constant 0.000000e+00 : f32
    %46 = vector.broadcast %cst_25 : f32 to vector<48x64xf32>
    %47 = arith.cmpf ogt, %45, %46 : vector<48x64xf32>
    %cst_26 = arith.constant 0.000000e+00 : f32
    %48 = vector.broadcast %cst_26 : f32 to vector<48x64xf32>
    %49 = arith.minimumf %45, %48 : vector<48x64xf32>
    %50 = math.exp %49 : vector<48x64xf32>
    %cst_27 = arith.constant 1.000000e+00 : f32
    %51 = vector.broadcast %cst_27 : f32 to vector<48x64xf32>
    %52 = arith.subf %50, %51 : vector<48x64xf32>
    %53 = arith.select %47, %45, %52 : vector<48x64xi1>, vector<48x64xf32>
    %54 = arith.truncf %53 : vector<48x64xf32> to vector<48x64xbf16>
    %c0_28 = arith.constant 0 : index
    %c0_29 = arith.constant 0 : index
    %55 = vector.load %arg9[%c0_28, %c0_29] : memref<64x128xbf16, #tpu.memory_space<vmem>>, vector<64x128xbf16>
    %cst_30 = arith.constant dense<0.000000e+00> : vector<48x128xf32>
    %56 = tpu.matmul %54, %55, %cst_30 {dimension_numbers = #tpu.dot_dimension_numbers<[1], [0], [0], [1], [0, 0, 1, 1], [], []>} : vector<48x64xbf16>, vector<64x128xbf16>, vector<48x128xf32> -> vector<48x128xf32>
    %c0_31 = arith.constant 0 : index
    %c0_32 = arith.constant 0 : index
    %57 = vector.load %arg10[%c0_31, %c0_32] : memref<1x128xf32, #tpu.memory_space<vmem>>, vector<1x128xf32>
    %58 = vector.broadcast %57 : vector<1x128xf32> to vector<48x128xf32>
    %59 = arith.addf %56, %58 : vector<48x128xf32>
    %c0_33 = arith.constant 0 : index
    %c0_34 = arith.constant 0 : index
    %60 = vector.load %arg12[%c0_33, %c0_34] : memref<48x128xf32, #tpu.memory_space<vmem>>, vector<48x128xf32>
    tpu.vector_store %arg12[%c0_33, %c0_34], %59 {strides = array<i32>} : memref<48x128xf32, #tpu.memory_space<vmem>>, vector<48x128xf32>,
    return
  }
  func.func @transform_0(%arg0: i32) -> (i32, i32) {
    %c0_i32 = arith.constant 0 : i32
    %c0_i32_0 = arith.constant 0 : i32
    %c0_i32_1 = arith.constant 0 : i32
    return %c0_i32, %c0_i32_0 : i32, i32
  }
  func.func @transform_1(%arg0: i32) -> (i32, i32) {
    %c0_i32 = arith.constant 0 : i32
    %c0_i32_0 = arith.constant 0 : i32
    %c0_i32_1 = arith.constant 0 : i32
    return %c0_i32, %c0_i32_0 : i32, i32
  }
  func.func @transform_2(%arg0: i32) -> (i32, i32) {
    %c0_i32 = arith.constant 0 : i32
    %c0_i32_0 = arith.constant 0 : i32
    %c0_i32_1 = arith.constant 0 : i32
    return %c0_i32, %c0_i32_0 : i32, i32
  }
  func.func @transform_3(%arg0: i32) -> (i32, i32) {
    %c0_i32 = arith.constant 0 : i32
    %c0_i32_0 = arith.constant 0 : i32
    %c0_i32_1 = arith.constant 0 : i32
    return %c0_i32, %c0_i32_0 : i32, i32
  }
  func.func @transform_4(%arg0: i32) -> (i32, i32) {
    %c0_i32 = arith.constant 0 : i32
    %c0_i32_0 = arith.constant 0 : i32
    %c0_i32_1 = arith.constant 0 : i32
    return %c0_i32, %c0_i32_0 : i32, i32
  }
  func.func @transform_5(%arg0: i32) -> (i32, i32) {
    %c0_i32 = arith.constant 0 : i32
    %c0_i32_0 = arith.constant 0 : i32
    %c0_i32_1 = arith.constant 0 : i32
    return %c0_i32, %c0_i32_0 : i32, i32
  }
  func.func @transform_6(%arg0: i32) -> (i32, i32) {
    %c0_i32 = arith.constant 0 : i32
    %c0_i32_0 = arith.constant 0 : i32
    %c0_i32_1 = arith.constant 0 : i32
    return %c0_i32, %c0_i32_0 : i32, i32
  }
  func.func @transform_7(%arg0: i32) -> (i32, i32) {
    %c0_i32 = arith.constant 0 : i32
    %c0_i32_0 = arith.constant 0 : i32
    %c0_i32_1 = arith.constant 0 : i32
    return %c0_i32, %c0_i32_0 : i32, i32
  }
  func.func @transform_8(%arg0: i32) -> (i32, i32) {
    %c0_i32 = arith.constant 0 : i32
    %c0_i32_0 = arith.constant 0 : i32
    %c0_i32_1 = arith.constant 0 : i32
    return %c0_i32, %c0_i32_0 : i32, i32
  }
  func.func @transform_9(%arg0: i32) -> (i32, i32) {
    %c0_i32 = arith.constant 0 : i32
    %c0_i32_0 = arith.constant 0 : i32
    %c0_i32_1 = arith.constant 0 : i32
    return %c0_i32, %c0_i32_0 : i32, i32
  }
  func.func @transform_10(%arg0: i32) -> (i32, i32) {
    %c0_i32 = arith.constant 0 : i32
    %c0_i32_0 = arith.constant 0 : i32
    %c0_i32_1 = arith.constant 0 : i32
    return %c0_i32, %c0_i32_0 : i32, i32
  }
  func.func @transform_11(%arg0: i32) -> (i32, i32) {
    %c0_i32 = arith.constant 0 : i32
    %c0_i32_0 = arith.constant 0 : i32
    %c0_i32_1 = arith.constant 0 : i32
    return %c0_i32, %c0_i32_0 : i32, i32
  }
}

</mosaic_0001>

<bundles_post_ra>
// kernel: interaction_decoder_forward.4
= control target key start
LH: loop header
LB: loop body
LE: loop exit
PB: predicated region body
PF: predicated region fallthrough
CT: control target
= control target key end

     0   :  { %vm96_vm0 = vcmask 64512   ;;  %vm730_vm1 = vcmask 523264   ;;  %vm1481_vm2 = vcmask 392192   ;;  %s2846_s3 = inlined_call_operand.vmem [shape: f32[8,64], index: 3, kind: input, shape index: {}]   ;;  %s2847_s0 = inlined_call_operand.vmem [shape: f32[480,8], index: 0, kind: input, shape index: {}]   ;;  %s2848_s5 = inlined_call_operand.vmem [shape: f32[64,256], index: 5, kind: input, shape index: {}]   ;;  %s2849_s4 = inlined_call_operand.vmem [shape: f32[1,64], index: 4, kind: input, shape index: {}]   ;;  %s2850_s6 = inlined_call_operand.vmem [shape: f32[1,256], index: 6, kind: input, shape index: {}]   ;;  %s2851_s1 = inlined_call_operand.vmem [shape: f32[48,256], index: 1, kind: input, shape index: {}]   ;;  %s2852_s7 = inlined_call_operand.vmem [shape: f32[48,256], index: 7, kind: output, shape index: {0}]   ;;  %s2853_s2 = inlined_call_operand.vmem [shape: f32[8,48], index: 2, kind: input, shape index: {}]   ;;  %s2854_s8 = inlined_call_operand.vmem [shape: f32[8,256], index: 8, kind: output, shape index: {1}]  }
   0x1   :  { %v88_v0 = vld [vmem:[%s2846_s3] sm:$0xff]  ;;  %v29_v2 = vld [vmem:[%s2847_s0 + $0x8] sm:$0xff]  ;;  %v30_v3 = vld [vmem:[%s2847_s0 + $0x10] sm:$0xff] }
   0x2   :  { %v28_v1 = vld [vmem:[%s2847_s0] sm:$0xff]  ;;  %1749 = vmatprep.subr.mxu0 %v88_v0  ;;  %v31_v4 = vld [vmem:[%s2847_s0 + $0x18] sm:$0xff]  ;;  %v33_v6 = vld [vmem:[%s2847_s0 + $0x28] sm:$0xff] }
   0x3   :  { %1751 = vmatprep.mubr.msk.f32.mxu0 %vm96_vm0, %v28_v1  ;;  %1750 = vmatpush3.msra.mxu0 %v88_v0  ;;  %v32_v5 = vld [vmem:[%s2847_s0 + $0x20] sm:$0xff]  ;;  %v34_v7 = vld [vmem:[%s2847_s0 + $0x30] sm:$0xff]  ;;  %v35_v8 = vld [vmem:[%s2847_s0 + $0x38] sm:$0xff] }
   0x4   :  { %1752 = vmatmul.mubr.msk.f32.vlgmr.msra.gmra.mrb[0].mxu0 %vm96_vm0, %v29_v2  ;;  %v36_v9 = vld [vmem:[%s2847_s0 + $0x40] sm:$0xff]  ;;  %v37_v10 = vld [vmem:[%s2847_s0 + $0x48] sm:$0xff]  ;;  %v38_v11 = vld [vmem:[%s2847_s0 + $0x50] sm:$0xff] }
   0x5   :  { %1754 = vmatprep.mubr.msk.f32.mxu0 %vm96_vm0, %v30_v3  ;;  %v39_v12 = vld [vmem:[%s2847_s0 + $0x58] sm:$0xff]  ;;  %v40_v13 = vld [vmem:[%s2847_s0 + $0x60] sm:$0xff]  ;;  %v703_v14 = vld [vmem:[%s2848_s5 + $0x8] sm:$0xff] }
   0x6   :  { %v705_v15 = vld [vmem:[%s2848_s5 + $0x18] sm:$0xff]  ;;  %v702_v17 = vld [vmem:[%s2848_s5] sm:$0xff]  ;;  %v704_v18 = vld [vmem:[%s2848_s5 + $0x10] sm:$0xff] }
   0x7   :  { %v1841_v16 = vpack.c.bf16 %v705_v15, %v703_v14  ;;  %v707_v19 = vld [vmem:[%s2848_s5 + $0x28] sm:$0xff]  ;;  %v1843_v20 = vpack.c.bf16 %v704_v18, %v702_v17  ;;  %v709_v21 = vld [vmem:[%s2848_s5 + $0x38] sm:$0xff]  ;;  %v706_v22 = vld [vmem:[%s2848_s5 + $0x20] sm:$0xff] }
   0x8   :  { %1755 = vmatmul.mubr.msk.f32.gmra.mrb[2].mxu0 %vm96_vm0, %v31_v4  ;;  %v708_v23 = vld [vmem:[%s2848_s5 + $0x30] sm:$0xff]  ;;  %v1845_v24 = vpack.c.bf16 %v709_v21, %v707_v19  ;;  %v711_v25 = vld [vmem:[%s2848_s5 + $0x48] sm:$0xff]  ;;  %v713_v26 = vld [vmem:[%s2848_s5 + $0x58] sm:$0xff] }
   0x9   :  { %1757 = vmatprep.mubr.msk.f32.mxu0 %vm96_vm0, %v32_v5  ;;  %1842 = vmatprep.subr.bf16.mxu0 %v1841_v16  ;;  %v41_v27 = vld [vmem:[%s2847_s0 + $0x68] sm:$0xff]  ;;  %v1847_v28 = vpack.c.bf16 %v708_v23, %v706_v22  ;;  %v42_v29 = vld [vmem:[%s2847_s0 + $0x70] sm:$0xff]  ;;  %v1849_v30 = vpack.c.bf16 %v713_v26, %v711_v25  ;;  %v710_v31 = vld [vmem:[%s2848_s5 + $0x40] sm:$0xff] }
   0xa   :  { %1844 = vmatpush1.bf16.msra.mxu0 %v1843_v20  ;;  %v712_v32 = vld [vmem:[%s2848_s5 + $0x50] sm:$0xff]  ;;  %1869 = vmatprep.subr.bf16.mxu1 %v1841_v16  ;;  %v43_v33 = vld [vmem:[%s2847_s0 + $0x78] sm:$0xff]  ;;  %v44_v35 = vld [vmem:[%s2847_s0 + $0x80] sm:$0xff] }
   0xb   :  { %1846 = vmatprep.subr.bf16.mxu0 %v1845_v24  ;;  %1873 = vmatpush1.bf16.msra.mxu1 %v1843_v20  ;;  %v1851_v34 = vpack.c.bf16 %v712_v32, %v710_v31  ;;  %v45_v36 = vld [vmem:[%s2847_s0 + $0x88] sm:$0xff]  ;;  %v46_v37 = vld [vmem:[%s2847_s0 + $0x90] sm:$0xff]  ;;  %v47_v38 = vld [vmem:[%s2847_s0 + $0x98] sm:$0xff] }
   0xc   :  { %1758 = vmatmul.mubr.msk.f32.gmra.mrb[4].mxu0 %vm96_vm0, %v33_v6  ;;  %1870 = vmatprep.subr.bf16.mxu1 %v1845_v24  ;;  %v48_v39 = vld [vmem:[%s2847_s0 + $0xa0] sm:$0xff]  ;;  %v49_v40 = vld [vmem:[%s2847_s0 + $0xa8] sm:$0xff]  ;;  %v50_v41 = vld [vmem:[%s2847_s0 + $0xb0] sm:$0xff] }
   0xd   :  { %1760 = vmatprep.mubr.msk.f32.mxu0 %vm96_vm0, %v34_v7  ;;  %v51_v42 = vld [vmem:[%s2847_s0 + $0xb8] sm:$0xff]  ;;  %v52_v43 = vld [vmem:[%s2847_s0 + $0xc0] sm:$0xff]  ;;  %v53_v44 = vld [vmem:[%s2847_s0 + $0xc8] sm:$0xff] }
   0xe   :  { %1848 = vmatpush1.bf16.msra.mxu0 %v1847_v28  ;;  %v54_v45 = vld [vmem:[%s2847_s0 + $0xd0] sm:$0xff]  ;;  %v55_v46 = vld [vmem:[%s2847_s0 + $0xd8] sm:$0xff]  ;;  %v56_v47 = vld [vmem:[%s2847_s0 + $0xe0] sm:$0xff] }
   0xf   :  { %1850 = vmatprep.subr.bf16.mxu0 %v1849_v30  ;;  %1874 = vmatpush1.bf16.msra.mxu1 %v1847_v28  ;;  %v57_v48 = vld [vmem:[%s2847_s0 + $0xe8] sm:$0xff]  ;;  %v58_v49 = vld [vmem:[%s2847_s0 + $0xf0] sm:$0xff]  ;;  %v59_v50 = vld [vmem:[%s2847_s0 + $0xf8] sm:$0xff] }
  0x10   :  { %1761 = vmatmul.mubr.msk.f32.gmra.mrb[6].mxu0 %vm96_vm0, %v35_v8  ;;  %1871 = vmatprep.subr.bf16.mxu1 %v1849_v30  ;;  %v60_v51 = vld [vmem:[%s2847_s0 + $0x100] sm:$0xff]  ;;  %v61_v52 = vld [vmem:[%s2847_s0 + $0x108] sm:$0xff]  ;;  %v62_v53 = vld [vmem:[%s2847_s0 + $0x110] sm:$0xff]  ;;  %v1878_v8 = vmov 0.0  }
  0x11   :  { %1763 = vmatprep.mubr.msk.f32.mxu0 %vm96_vm0, %v36_v9  ;;  %v63_v54 = vld [vmem:[%s2847_s0 + $0x118] sm:$0xff]  ;;  %v64_v55 = vld [vmem:[%s2847_s0 + $0x120] sm:$0xff]  ;;  %v65_v56 = vld [vmem:[%s2847_s0 + $0x128] sm:$0xff]  ;;  %1071 = vmatprep.mubr.f32.mxu1 %v1878_v8 }
  0x12   :  { %1852 = vmatpush1.bf16.msra.mxu0 %v1851_v34  ;;  %v66_v57 = vld [vmem:[%s2847_s0 + $0x130] sm:$0xff]  ;;  %v67_v58 = vld [vmem:[%s2847_s0 + $0x138] sm:$0xff]  ;;  %v68_v59 = vld [vmem:[%s2847_s0 + $0x140] sm:$0xff] }
  0x13   :  { %1875 = vmatpush1.bf16.msra.mxu1 %v1851_v34  ;;  %v69_v60 = vld [vmem:[%s2847_s0 + $0x148] sm:$0xff]  ;;  %v70_v61 = vld [vmem:[%s2847_s0 + $0x150] sm:$0xff]  ;;  %v71_v62 = vld [vmem:[%s2847_s0 + $0x158] sm:$0xff] }
  0x14   :  { %1764 = vmatmul.mubr.msk.f32.gmra.mrb[8].mxu0 %vm96_vm0, %v37_v10  ;;  %v72_v63 = vld [vmem:[%s2847_s0 + $0x160] sm:$0xff]  ;;  %v715_v0 = vld [vmem:[%s2848_s5 + $0x68] sm:$0xff]  ;;  %v717_v1 = vld [vmem:[%s2848_s5 + $0x78] sm:$0xff] }
  0x15   :  { %1766 = vmatprep.mubr.msk.f32.mxu0 %vm96_vm0, %v38_v11  ;;  %v1853_v2 = vpack.c.bf16 %v717_v1, %v715_v0  ;;  %v714_v3 = vld [vmem:[%s2848_s5 + $0x60] sm:$0xff]  ;;  %v716_v4 = vld [vmem:[%s2848_s5 + $0x70] sm:$0xff]  ;;  %v73_v6 = vld [vmem:[%s2847_s0 + $0x168] sm:$0xff] }
  0x16   :  { %v1855_v5 = vpack.c.bf16 %v716_v4, %v714_v3  ;;  %v74_v7 = vld [vmem:[%s2847_s0 + $0x170] sm:$0xff]  ;;  %v75_v9 = vld [vmem:[%s2847_s0 + $0x178] sm:$0xff]  ;;  %v76_v10 = vld [vmem:[%s2847_s0 + $0x180] sm:$0xff] }
  0x17   :  { %1854 = vmatprep.subr.bf16.mxu0 %v1853_v2  ;;  %1872 = vmatprep.subr.bf16.mxu1 %v1853_v2  ;;  %v77_v11 = vld [vmem:[%s2847_s0 + $0x188] sm:$0xff]  ;;  %v80_v14 = vld [vmem:[%s2847_s0 + $0x1a0] sm:$0xff]  ;;  %v82_v16 = vld [vmem:[%s2847_s0 + $0x1b0] sm:$0xff] }
  0x18   :  { %1767 = vmatmul.mubr.msk.f32.gmra.mrb[10].mxu0 %vm96_vm0, %v39_v12  ;;  %1876 = vmatpush1.bf16.msra.mxu1 %v1855_v5  ;;  %v78_v12 = vld [vmem:[%s2847_s0 + $0x190] sm:$0xff]  ;;  %v81_v15 = vld [vmem:[%s2847_s0 + $0x1a8] sm:$0xff]  ;;  %v83_v17 = vld [vmem:[%s2847_s0 + $0x1b8] sm:$0xff] }
  0x19   :  { %1769 = vmatprep.mubr.msk.f32.mxu0 %vm96_vm0, %v40_v13  ;;  %1856 = vmatpush1.bf16.msra.mxu0 %v1855_v5  ;;  %v79_v13 = vld [vmem:[%s2847_s0 + $0x198] sm:$0xff]  ;;  %v84_v18 = vld [vmem:[%s2847_s0 + $0x1c0] sm:$0xff]  ;;  %v85_v19 = vld [vmem:[%s2847_s0 + $0x1c8] sm:$0xff] }
  0x1a   :  { %v86_v20 = vld [vmem:[%s2847_s0 + $0x1d0] sm:$0xff]  ;;  %v87_v21 = vld [vmem:[%s2847_s0 + $0x1d8] sm:$0xff]  ;;  %v2220_v22 = vld [vmem:[%s2849_s4] ss:$0 sm:$0xff] }
  0x1c   :  { %1770 = vmatmul.mubr.msk.f32.gmra.mrb[12].mxu0 %vm96_vm0, %v41_v27 }
  0x1d   :  { %1772 = vmatprep.mubr.msk.f32.mxu0 %vm96_vm0, %v42_v29 }
  0x20   :  { %1773 = vmatmul.mubr.msk.f32.gmra.mrb[14].mxu0 %vm96_vm0, %v43_v33 }
  0x21   :  { %1775 = vmatprep.mubr.msk.f32.mxu0 %vm96_vm0, %v44_v35 }
  0x24   :  { %1776 = vmatmul.mubr.msk.f32.gmra.mrb[16].mxu0 %vm96_vm0, %v45_v36 }
  0x25   :  { %1778 = vmatprep.mubr.msk.f32.mxu0 %vm96_vm0, %v46_v37 }
  0x28   :  { %1779 = vmatmul.mubr.msk.f32.gmra.mrb[18].mxu0 %vm96_vm0, %v47_v38 }
  0x29   :  { %1781 = vmatprep.mubr.msk.f32.mxu0 %vm96_vm0, %v48_v39 }
  0x2c   :  { %1782 = vmatmul.mubr.msk.f32.gmra.mrb[20].mxu0 %vm96_vm0, %v49_v40 }
  0x2d   :  { %1784 = vmatprep.mubr.msk.f32.mxu0 %vm96_vm0, %v50_v41 }
  0x30   :  { %1785 = vmatmul.mubr.msk.f32.gmra.mrb[22].mxu0 %vm96_vm0, %v51_v42 }
  0x31   :  { %1787 = vmatprep.mubr.msk.f32.mxu0 %vm96_vm0, %v52_v43 }
  0x34   :  { %1788 = vmatmul.mubr.msk.f32.gmra.mrb[24].mxu0 %vm96_vm0, %v53_v44 }
  0x35   :  { %1790 = vmatprep.mubr.msk.f32.mxu0 %vm96_vm0, %v54_v45 }
  0x38   :  { %1791 = vmatmul.mubr.msk.f32.gmra.mrb[26].mxu0 %vm96_vm0, %v55_v46 }
  0x39   :  { %1793 = vmatprep.mubr.msk.f32.mxu0 %vm96_vm0, %v56_v47 }
  0x3c   :  { %1794 = vmatmul.mubr.msk.f32.gmra.mrb[28].mxu0 %vm96_vm0, %v57_v48 }
  0x3d   :  { %1796 = vmatprep.mubr.msk.f32.mxu0 %vm96_vm0, %v58_v49 }
  0x40   :  { %1797 = vmatmul.mubr.msk.f32.gmra.mrb[30].mxu0 %vm96_vm0, %v59_v50 }
  0x41   :  { %1799 = vmatprep.mubr.msk.f32.mxu0 %vm96_vm0, %v60_v51 }
  0x44   :  { %1800 = vmatmul.mubr.msk.f32.gmra.mrb[32].mxu0 %vm96_vm0, %v61_v52 }
  0x45   :  { %1802 = vmatprep.mubr.msk.f32.mxu0 %vm96_vm0, %v62_v53 }
  0x48   :  { %1803 = vmatmul.mubr.msk.f32.gmra.mrb[34].mxu0 %vm96_vm0, %v63_v54 }
  0x49   :  { %1805 = vmatprep.mubr.msk.f32.mxu0 %vm96_vm0, %v64_v55 }
  0x4c   :  { %1806 = vmatmul.mubr.msk.f32.gmra.mrb[36].mxu0 %vm96_vm0, %v65_v56 }
  0x4d   :  { %1808 = vmatprep.mubr.msk.f32.mxu0 %vm96_vm0, %v66_v57 }
  0x50   :  { %1809 = vmatmul.mubr.msk.f32.gmra.mrb[38].mxu0 %vm96_vm0, %v67_v58 }
  0x51   :  { %1811 = vmatprep.mubr.msk.f32.mxu0 %vm96_vm0, %v68_v59 }
  0x54   :  { %1812 = vmatmul.mubr.msk.f32.gmra.mrb[40].mxu0 %vm96_vm0, %v69_v60 }
  0x55   :  { %1814 = vmatprep.mubr.msk.f32.mxu0 %vm96_vm0, %v70_v61 }
  0x58   :  { %1815 = vmatmul.mubr.msk.f32.gmra.mrb[42].mxu0 %vm96_vm0, %v71_v62 }
  0x59   :  { %1817 = vmatprep.mubr.msk.f32.mxu0 %vm96_vm0, %v72_v63 }
  0x5c   :  { %1818 = vmatmul.mubr.msk.f32.gmra.mrb[44].mxu0 %vm96_vm0, %v73_v6 }
  0x5d   :  { %1820 = vmatprep.mubr.msk.f32.mxu0 %vm96_vm0, %v74_v7 }
  0x60   :  { %1821 = vmatmul.mubr.msk.f32.gmra.mrb[46].mxu0 %vm96_vm0, %v75_v9 }
  0x61   :  { %1823 = vmatprep.mubr.msk.f32.mxu0 %vm96_vm0, %v76_v10 }
  0x64   :  { %1824 = vmatmul.mubr.msk.f32.gmra.mrb[48].mxu0 %vm96_vm0, %v77_v11 }
  0x65   :  { %1826 = vmatprep.mubr.msk.f32.mxu0 %vm96_vm0, %v78_v12 }
  0x68   :  { %1827 = vmatmul.mubr.msk.f32.gmra.mrb[50].mxu0 %vm96_vm0, %v79_v13 }
  0x69   :  { %1829 = vmatprep.mubr.msk.f32.mxu0 %vm96_vm0, %v80_v14 }
  0x6c   :  { %1830 = vmatmul.mubr.msk.f32.gmra.mrb[52].mxu0 %vm96_vm0, %v81_v15 }
  0x6d   :  { %1832 = vmatprep.mubr.msk.f32.mxu0 %vm96_vm0, %v82_v16 }
  0x70   :  { %1833 = vmatmul.mubr.msk.f32.gmra.mrb[54].mxu0 %vm96_vm0, %v83_v17 }
  0x71   :  { %1835 = vmatprep.mubr.msk.f32.mxu0 %vm96_vm0, %v84_v18 }
  0x74   :  { %1836 = vmatmul.mubr.msk.f32.gmra.mrb[56].mxu0 %vm96_vm0, %v85_v19 }
  0x75   :  { %1838 = vmatprep.mubr.msk.f32.mxu0 %vm96_vm0, %v86_v20 }
  0x78   :  { %1839 = vmatmul.mubr.msk.f32.gmra.mrb[58].mxu0 %vm96_vm0, %v87_v21 }
  0x79   :  { %975 = vmatprep.mubr.f32.mxu0 %v1878_v8 }
  0xd7   :  { %v1753_v23 = vpop.f32.mrb[0].mxu0 }
  0xd8   :  { %v343_v24 = vpop.f32.mrb[1].mxu0  ;;  %v349_v26 = vadd.f32 %v1753_v23, %v2220_v22 }
  0xd9   :  { %v344_v25 = vadd.f32 %v2220_v22, %v343_v24 }
  0xda   :  { %v643_v30 = vmax.f32 %v349_v26, 0.0 }
  0xdb   :  { %v642_v27 = vmax.f32 %v344_v25, 0.0  ;;  %v1756_v28 = vpop.f32.mrb[2].mxu0 }
  0xdc   :  { %v353_v29 = vpop.f32.mrb[3].mxu0  ;;  %v359_v34 = vadd.f32 %v1756_v28, %v2220_v22 }
  0xdd   :  { %1627 = vmatmul.mubr.msk.f32.vlgmr.msra.gmra.mrb[60].mxu0 %vm730_vm1, %v642_v27  ;;  %v354_v31 = vadd.f32 %v2220_v22, %v353_v29 }
  0xde   :  { %981 = vmatprep.mubr.f32.mxu0 %v1878_v8  ;;  %v645_v38 = vmax.f32 %v359_v34, 0.0 }
  0xdf   :  { %v1759_v32 = vpop.f32.mrb[4].mxu0  ;;  %v644_v35 = vmax.f32 %v354_v31, 0.0 }
  0xe0   :  { %v363_v33 = vpop.f32.mrb[5].mxu0  ;;  %v369_v42 = vadd.f32 %v1759_v32, %v2220_v22 }
  0xe1   :  { %1628 = vmatmul.mubr.msk.f32.gmra.mrb[62].mxu0 %vm730_vm1, %v643_v30  ;;  %v364_v39 = vadd.f32 %v2220_v22, %v363_v33 }
  0xe2   :  { %987 = vmatprep.mubr.f32.mxu0 %v1878_v8  ;;  %v647_v46 = vmax.f32 %v369_v42, 0.0 }
  0xe3   :  { %v1762_v36 = vpop.f32.mrb[6].mxu0  ;;  %v646_v43 = vmax.f32 %v364_v39, 0.0 }
  0xe4   :  { %v373_v37 = vpop.f32.mrb[7].mxu0  ;;  %v379_v50 = vadd.f32 %v1762_v36, %v2220_v22 }
  0xe5   :  { %1629 = vmatmul.mubr.msk.f32.gmra.mrb[64].mxu0 %vm730_vm1, %v644_v35  ;;  %v374_v47 = vadd.f32 %v2220_v22, %v373_v37 }
  0xe6   :  { %993 = vmatprep.mubr.f32.mxu0 %v1878_v8  ;;  %v649_v54 = vmax.f32 %v379_v50, 0.0 }
  0xe7   :  { %v1765_v40 = vpop.f32.mrb[8].mxu0  ;;  %v648_v51 = vmax.f32 %v374_v47, 0.0 }
  0xe8   :  { %v383_v41 = vpop.f32.mrb[9].mxu0  ;;  %v389_v59 = vadd.f32 %v1765_v40, %v2220_v22 }
  0xe9   :  { %1630 = vmatmul.mubr.msk.f32.gmra.mrb[66].mxu0 %vm730_vm1, %v645_v38  ;;  %v384_v55 = vadd.f32 %v2220_v22, %v383_v41 }
  0xea   :  { %999 = vmatprep.mubr.f32.mxu0 %v1878_v8  ;;  %v651_v2 = vmax.f32 %v389_v59, 0.0 }
  0xeb   :  { %v1768_v44 = vpop.f32.mrb[10].mxu0  ;;  %v650_v60 = vmax.f32 %v384_v55, 0.0 }
  0xec   :  { %v393_v45 = vpop.f32.mrb[11].mxu0  ;;  %v399_v9 = vadd.f32 %v1768_v44, %v2220_v22 }
  0xed   :  { %1631 = vmatmul.mubr.msk.f32.gmra.mrb[68].mxu0 %vm730_vm1, %v646_v43  ;;  %v394_v3 = vadd.f32 %v2220_v22, %v393_v45 }
  0xee   :  { %1005 = vmatprep.mubr.f32.mxu0 %v1878_v8  ;;  %v653_v15 = vmax.f32 %v399_v9, 0.0 }
  0xef   :  { %v1771_v48 = vpop.f32.mrb[12].mxu0  ;;  %v652_v10 = vmax.f32 %v394_v3, 0.0 }
  0xf0   :  { %v403_v49 = vpop.f32.mrb[13].mxu0  ;;  %v409_v21 = vadd.f32 %v1771_v48, %v2220_v22 }
  0xf1   :  { %1632 = vmatmul.mubr.msk.f32.gmra.mrb[70].mxu0 %vm730_vm1, %v647_v46  ;;  %v404_v16 = vadd.f32 %v2220_v22, %v403_v49 }
  0xf2   :  { %1011 = vmatprep.mubr.f32.mxu0 %v1878_v8  ;;  %v655_v28 = vmax.f32 %v409_v21, 0.0 }
  0xf3   :  { %v2242_v52 = vpop.f32.mrb[14].mxu0  ;;  %v654_v23 = vmax.f32 %v404_v16, 0.0 }
  0xf4   :  { %v413_v53 = vpop.f32.mrb[15].mxu0  ;;  %v419_v34 = vadd.f32 %v2242_v52, %v2220_v22 }
  0xf5   :  { %1633 = vmatmul.mubr.msk.f32.gmra.mrb[72].mxu0 %vm730_vm1, %v648_v51  ;;  %v414_v29 = vadd.f32 %v2220_v22, %v413_v53 }
  0xf6   :  { %1017 = vmatprep.mubr.f32.mxu0 %v1878_v8  ;;  %v657_v40 = vmax.f32 %v419_v34, 0.0 }
  0xf7   :  { %v1777_v56 = vpop.f32.mrb[16].mxu0  ;;  %v656_v35 = vmax.f32 %v414_v29, 0.0 }
  0xf8   :  { %v423_v57 = vpop.f32.mrb[17].mxu0  ;;  %v429_v61 = vadd.f32 %v1777_v56, %v2220_v22 }
  0xf9   :  { %v424_v58 = vadd.f32 %v2220_v22, %v423_v57  ;;  %1634 = vmatmul.mubr.msk.f32.gmra.mrb[74].mxu0 %vm730_vm1, %v649_v54 }
  0xfa   :  { %1023 = vmatprep.mubr.f32.mxu0 %v1878_v8  ;;  %v659_v4 = vmax.f32 %v429_v61, 0.0 }
  0xfb   :  { %v658_v62 = vmax.f32 %v424_v58, 0.0  ;;  %v1780_v63 = vpop.f32.mrb[18].mxu0 }
  0xfc   :  { %v433_v0 = vpop.f32.mrb[19].mxu0  ;;  %v439_v11 = vadd.f32 %v1780_v63, %v2220_v22 }
  0xfd   :  { %1635 = vmatmul.mubr.msk.f32.gmra.mrb[76].mxu0 %vm730_vm1, %v650_v60  ;;  %1643 = vmatmul.mubr.msk.f32.vlgmr.msra.gmra.mrb[0].mxu1 %vm730_vm1, %v658_v62  ;;  %v434_v1 = vadd.f32 %v2220_v22, %v433_v0 }
  0xfe   :  { %1029 = vmatprep.mubr.f32.mxu0 %v1878_v8  ;;  %1077 = vmatprep.mubr.f32.mxu1 %v1878_v8  ;;  %v661_v17 = vmax.f32 %v439_v11, 0.0 }
  0xff   :  { %v1783_v5 = vpop.f32.mrb[20].mxu0  ;;  %v660_v7 = vmax.f32 %v434_v1, 0.0 }
 0x100   :  { %v443_v6 = vpop.f32.mrb[21].mxu0  ;;  %v449_v24 = vadd.f32 %v1783_v5, %v2220_v22 }
 0x101   :  { %1636 = vmatmul.mubr.msk.f32.gmra.mrb[78].mxu0 %vm730_vm1, %v651_v2  ;;  %1644 = vmatmul.mubr.msk.f32.gmra.mrb[2].mxu1 %vm730_vm1, %v659_v4  ;;  %v444_v14 = vadd.f32 %v2220_v22, %v443_v6 }
 0x102   :  { %1035 = vmatprep.mubr.f32.mxu0 %v1878_v8  ;;  %1083 = vmatprep.mubr.f32.mxu1 %v1878_v8  ;;  %v663_v30 = vmax.f32 %v449_v24, 0.0 }
 0x103   :  { %v1786_v12 = vpop.f32.mrb[22].mxu0  ;;  %v662_v20 = vmax.f32 %v444_v14, 0.0 }
 0x104   :  { %v453_v13 = vpop.f32.mrb[23].mxu0  ;;  %v459_v36 = vadd.f32 %v1786_v12, %v2220_v22 }
 0x105   :  { %1637 = vmatmul.mubr.msk.f32.gmra.mrb[80].mxu0 %vm730_vm1, %v652_v10  ;;  %1645 = vmatmul.mubr.msk.f32.gmra.mrb[4].mxu1 %vm730_vm1, %v660_v7  ;;  %v454_v27 = vadd.f32 %v2220_v22, %v453_v13 }
 0x106   :  { %1041 = vmatprep.mubr.f32.mxu0 %v1878_v8  ;;  %1089 = vmatprep.mubr.f32.mxu1 %v1878_v8  ;;  %v665_v41 = vmax.f32 %v459_v36, 0.0 }
 0x107   :  { %v1789_v18 = vpop.f32.mrb[24].mxu0  ;;  %v664_v33 = vmax.f32 %v454_v27, 0.0 }
 0x108   :  { %v463_v19 = vpop.f32.mrb[25].mxu0  ;;  %v469_v45 = vadd.f32 %v1789_v18, %v2220_v22 }
 0x109   :  { %1638 = vmatmul.mubr.msk.f32.gmra.mrb[82].mxu0 %vm730_vm1, %v653_v15  ;;  %1646 = vmatmul.mubr.msk.f32.gmra.mrb[6].mxu1 %vm730_vm1, %v661_v17  ;;  %v464_v39 = vadd.f32 %v2220_v22, %v463_v19 }
 0x10a   :  { %1047 = vmatprep.mubr.f32.mxu0 %v1878_v8  ;;  %1095 = vmatprep.mubr.f32.mxu1 %v1878_v8  ;;  %v667_v49 = vmax.f32 %v469_v45, 0.0 }
 0x10b   :  { %v1792_v25 = vpop.f32.mrb[26].mxu0  ;;  %v666_v44 = vmax.f32 %v464_v39, 0.0 }
 0x10c   :  { %v473_v26 = vpop.f32.mrb[27].mxu0  ;;  %v479_v53 = vadd.f32 %v1792_v25, %v2220_v22 }
 0x10d   :  { %1639 = vmatmul.mubr.msk.f32.gmra.mrb[84].mxu0 %vm730_vm1, %v654_v23  ;;  %1647 = vmatmul.mubr.msk.f32.gmra.mrb[8].mxu1 %vm730_vm1, %v662_v20  ;;  %v474_v48 = vadd.f32 %v2220_v22, %v473_v26 }
 0x10e   :  { %1053 = vmatprep.mubr.f32.mxu0 %v1878_v8  ;;  %1101 = vmatprep.mubr.f32.mxu1 %v1878_v8  ;;  %v669_v57 = vmax.f32 %v479_v53, 0.0 }
 0x10f   :  { %v1795_v31 = vpop.f32.mrb[28].mxu0  ;;  %v668_v52 = vmax.f32 %v474_v48, 0.0 }
 0x110   :  { %v483_v32 = vpop.f32.mrb[29].mxu0  ;;  %v489_v61 = vadd.f32 %v1795_v31, %v2220_v22 }
 0x111   :  { %1640 = vmatmul.mubr.msk.f32.gmra.mrb[86].mxu0 %vm730_vm1, %v655_v28  ;;  %1648 = vmatmul.mubr.msk.f32.gmra.mrb[10].mxu1 %vm730_vm1, %v663_v30  ;;  %v484_v56 = vadd.f32 %v2220_v22, %v483_v32 }
 0x112   :  { %1059 = vmatprep.mubr.f32.mxu0 %v1878_v8  ;;  %1107 = vmatprep.mubr.f32.mxu1 %v1878_v8  ;;  %v671_v1 = vmax.f32 %v489_v61, 0.0 }
 0x113   :  { %v1798_v37 = vpop.f32.mrb[30].mxu0  ;;  %v670_v60 = vmax.f32 %v484_v56, 0.0 }
 0x114   :  { %v493_v38 = vpop.f32.mrb[31].mxu0  ;;  %v499_v5 = vadd.f32 %v1798_v37, %v2220_v22 }
 0x115   :  { %1641 = vmatmul.mubr.msk.f32.gmra.mrb[88].mxu0 %vm730_vm1, %v656_v35  ;;  %1649 = vmatmul.mubr.msk.f32.gmra.mrb[12].mxu1 %vm730_vm1, %v664_v33  ;;  %v494_v0 = vadd.f32 %v2220_v22, %v493_v38 }
 0x116   :  { %1065 = vmatprep.mubr.f32.mxu0 %v1878_v8  ;;  %1113 = vmatprep.mubr.f32.mxu1 %v1878_v8  ;;  %v673_v10 = vmax.f32 %v499_v5, 0.0 }
 0x117   :  { %v1801_v42 = vpop.f32.mrb[32].mxu0  ;;  %v672_v4 = vmax.f32 %v494_v0, 0.0 }
 0x118   :  { %v503_v43 = vpop.f32.mrb[33].mxu0  ;;  %v509_v14 = vadd.f32 %v1801_v42, %v2220_v22 }
 0x119   :  { %1642 = vmatmul.mubr.msk.f32.gmra.mrb[90].mxu0 %vm730_vm1, %v657_v40  ;;  %1650 = vmatmul.mubr.msk.f32.gmra.mrb[14].mxu1 %vm730_vm1, %v665_v41  ;;  %v504_v9 = vadd.f32 %v2220_v22, %v503_v43 }
 0x11a   :  { %1119 = vmatprep.mubr.f32.mxu1 %v1878_v8  ;;  %1549 = vmatprep.mubr.f32.mxu0 %v1878_v8  ;;  %v675_v18 = vmax.f32 %v509_v14, 0.0 }
 0x11b   :  { %v1804_v46 = vpop.f32.mrb[34].mxu0  ;;  %v674_v13 = vmax.f32 %v504_v9, 0.0 }
 0x11c   :  { %v513_v47 = vpop.f32.mrb[35].mxu0  ;;  %v519_v23 = vadd.f32 %v1804_v46, %v2220_v22 }
 0x11d   :  { %1651 = vmatmul.mubr.msk.f32.gmra.mrb[16].mxu1 %vm730_vm1, %v666_v44  ;;  %v514_v17 = vadd.f32 %v2220_v22, %v513_v47 }
 0x11e   :  { %1125 = vmatprep.mubr.f32.mxu1 %v1878_v8  ;;  %v677_v27 = vmax.f32 %v519_v23, 0.0 }
 0x11f   :  { %v2302_v50 = vpop.f32.mrb[36].mxu0  ;;  %v676_v21 = vmax.f32 %v514_v17, 0.0 }
 0x120   :  { %v523_v51 = vpop.f32.mrb[37].mxu0  ;;  %v529_v31 = vadd.f32 %v2302_v50, %v2220_v22 }
 0x121   :  { %1652 = vmatmul.mubr.msk.f32.gmra.mrb[18].mxu1 %vm730_vm1, %v667_v49  ;;  %v524_v26 = vadd.f32 %v2220_v22, %v523_v51 }
 0x122   :  { %1131 = vmatprep.mubr.f32.mxu1 %v1878_v8  ;;  %v679_v35 = vmax.f32 %v529_v31, 0.0 }
 0x123   :  { %v2307_v54 = vpop.f32.mrb[38].mxu0  ;;  %v678_v30 = vmax.f32 %v524_v26, 0.0 }
 0x124   :  { %v533_v55 = vpop.f32.mrb[39].mxu0  ;;  %v539_v37 = vadd.f32 %v2307_v54, %v2220_v22 }
 0x125   :  { %1653 = vmatmul.mubr.msk.f32.gmra.mrb[20].mxu1 %vm730_vm1, %v668_v52  ;;  %v534_v34 = vadd.f32 %v2220_v22, %v533_v55 }
 0x126   :  { %1137 = vmatprep.mubr.f32.mxu1 %v1878_v8  ;;  %v681_v39 = vmax.f32 %v539_v37, 0.0 }
 0x127   :  { %v2312_v58 = vpop.f32.mrb[40].mxu0  ;;  %v680_v36 = vmax.f32 %v534_v34, 0.0 }
 0x128   :  { %v2314_v59 = vpop.f32.mrb[41].mxu0  ;;  %v549_v41 = vadd.f32 %v2312_v58, %v2220_v22 }
 0x129   :  { %1654 = vmatmul.mubr.msk.f32.gmra.mrb[22].mxu1 %vm730_vm1, %v669_v57  ;;  %v544_v38 = vadd.f32 %v2220_v22, %v2314_v59 }
 0x12a   :  { %1143 = vmatprep.mubr.f32.mxu1 %v1878_v8  ;;  %v683_v43 = vmax.f32 %v549_v41, 0.0 }
 0x12b   :  { %v2319_v62 = vpop.f32.mrb[42].mxu0  ;;  %v682_v40 = vmax.f32 %v544_v38, 0.0 }
 0x12c   :  { %v2321_v63 = vpop.f32.mrb[43].mxu0  ;;  %v559_v45 = vadd.f32 %v2319_v62, %v2220_v22 }
 0x12d   :  { %1655 = vmatmul.mubr.msk.f32.gmra.mrb[24].mxu1 %vm730_vm1, %v670_v60  ;;  %v554_v42 = vadd.f32 %v2220_v22, %v2321_v63 }
 0x12e   :  { %1149 = vmatprep.mubr.f32.mxu1 %v1878_v8  ;;  %v685_v47 = vmax.f32 %v559_v45, 0.0 }
 0x12f   :  { %v2326_v2 = vpop.f32.mrb[44].mxu0  ;;  %v684_v44 = vmax.f32 %v554_v42, 0.0 }
 0x130   :  { %v2328_v3 = vpop.f32.mrb[45].mxu0  ;;  %v569_v49 = vadd.f32 %v2326_v2, %v2220_v22 }
 0x131   :  { %1656 = vmatmul.mubr.msk.f32.gmra.mrb[26].mxu1 %vm730_vm1, %v671_v1  ;;  %v564_v46 = vadd.f32 %v2220_v22, %v2328_v3 }
 0x132   :  { %1155 = vmatprep.mubr.f32.mxu1 %v1878_v8  ;;  %v687_v51 = vmax.f32 %v569_v49, 0.0 }
 0x133   :  { %v2333_v6 = vpop.f32.mrb[46].mxu0  ;;  %v686_v48 = vmax.f32 %v564_v46, 0.0 }
 0x134   :  { %v2335_v7 = vpop.f32.mrb[47].mxu0  ;;  %v579_v53 = vadd.f32 %v2333_v6, %v2220_v22 }
 0x135   :  { %1657 = vmatmul.mubr.msk.f32.gmra.mrb[28].mxu1 %vm730_vm1, %v672_v4  ;;  %v574_v50 = vadd.f32 %v2220_v22, %v2335_v7 }
 0x136   :  { %1161 = vmatprep.mubr.f32.mxu1 %v1878_v8  ;;  %v689_v55 = vmax.f32 %v579_v53, 0.0 }
 0x137   :  { %v2340_v11 = vpop.f32.mrb[48].mxu0  ;;  %v688_v52 = vmax.f32 %v574_v50, 0.0 }
 0x138   :  { %v2342_v12 = vpop.f32.mrb[49].mxu0  ;;  %v589_v57 = vadd.f32 %v2340_v11, %v2220_v22 }
 0x139   :  { %1658 = vmatmul.mubr.msk.f32.gmra.mrb[30].mxu1 %vm730_vm1, %v673_v10  ;;  %v584_v54 = vadd.f32 %v2220_v22, %v2342_v12 }
 0x13a   :  { %1167 = vmatprep.mubr.f32.mxu1 %v1878_v8  ;;  %v691_v59 = vmax.f32 %v589_v57, 0.0 }
 0x13b   :  { %v2347_v15 = vpop.f32.mrb[50].mxu0  ;;  %v690_v56 = vmax.f32 %v584_v54, 0.0 }
 0x13c   :  { %v2349_v16 = vpop.f32.mrb[51].mxu0  ;;  %v599_v61 = vadd.f32 %v2347_v15, %v2220_v22 }
 0x13d   :  { %1659 = vmatmul.mubr.msk.f32.gmra.mrb[32].mxu1 %vm730_vm1, %v674_v13  ;;  %v594_v58 = vadd.f32 %v2220_v22, %v2349_v16 }
 0x13e   :  { %1173 = vmatprep.mubr.f32.mxu1 %v1878_v8  ;;  %v693_v63 = vmax.f32 %v599_v61, 0.0 }
 0x13f   :  { %v2354_v19 = vpop.f32.mrb[52].mxu0  ;;  %v692_v60 = vmax.f32 %v594_v58, 0.0 }
 0x140   :  { %v2356_v20 = vpop.f32.mrb[53].mxu0  ;;  %v609_v1 = vadd.f32 %v2354_v19, %v2220_v22 }
 0x141   :  { %1660 = vmatmul.mubr.msk.f32.gmra.mrb[34].mxu1 %vm730_vm1, %v675_v18  ;;  %v604_v62 = vadd.f32 %v2220_v22, %v2356_v20 }
 0x142   :  { %1179 = vmatprep.mubr.f32.mxu1 %v1878_v8  ;;  %v695_v3 = vmax.f32 %v609_v1, 0.0 }
 0x143   :  { %v2361_v24 = vpop.f32.mrb[54].mxu0  ;;  %v694_v0 = vmax.f32 %v604_v62, 0.0 }
 0x144   :  { %v2363_v25 = vpop.f32.mrb[55].mxu0  ;;  %v619_v5 = vadd.f32 %v2361_v24, %v2220_v22 }
 0x145   :  { %1661 = vmatmul.mubr.msk.f32.gmra.mrb[36].mxu1 %vm730_vm1, %v676_v21  ;;  %v614_v2 = vadd.f32 %v2220_v22, %v2363_v25  ;;  %v720_v21 = vlaneseq }
 0x146   :  { %1185 = vmatprep.mubr.f32.mxu1 %v1878_v8  ;;  %v697_v7 = vmax.f32 %v619_v5, 0.0 }
 0x147   :  { %v2368_v28 = vpop.f32.mrb[56].mxu0  ;;  %v696_v4 = vmax.f32 %v614_v2, 0.0  ;;  %v721_v25 = vshrl.u32 %v720_v21, 7 }
 0x148   :  { %v2370_v29 = vpop.f32.mrb[57].mxu0  ;;  %v629_v10 = vadd.f32 %v2368_v28, %v2220_v22 }
 0x149   :  { %1662 = vmatmul.mubr.msk.f32.gmra.mrb[38].mxu1 %vm730_vm1, %v677_v27  ;;  %v624_v6 = vadd.f32 %v2220_v22, %v2370_v29  ;;  %v722_v28 = vsub.s32 0, %v721_v25  ;;  %v726_v29 = vsub.s32 1, %v721_v25 }
 0x14a   :  { %1191 = vmatprep.mubr.f32.mxu1 %v1878_v8  ;;  %v699_v12 = vmax.f32 %v629_v10, 0.0 }
 0x14b   :  { %v2376_v32 = vpop.f32.mrb[58].mxu0  ;;  %v698_v9 = vmax.f32 %v624_v6, 0.0 }
 0x14c   :  { %v2378_v33 = vpop.f32.mrb[59].mxu0  ;;  %v639_v14 = vadd.f32 %v2376_v32, %v2220_v22 }
 0x14d   :  { %1663 = vmatmul.mubr.msk.f32.gmra.mrb[40].mxu1 %vm730_vm1, %v678_v30  ;;  %v634_v11 = vadd.f32 %v2220_v22, %v2378_v33 }
 0x14e   :  { %1197 = vmatprep.mubr.f32.mxu1 %v1878_v8  ;;  %v701_v15 = vmax.f32 %v639_v14, 0.0 }
 0x14f   :  { %v700_v13 = vmax.f32 %v634_v11, 0.0 }
 0x151   :  { %1664 = vmatmul.mubr.msk.f32.gmra.mrb[42].mxu1 %vm730_vm1, %v679_v35 }
 0x152   :  { %1203 = vmatprep.mubr.f32.mxu1 %v1878_v8 }
 0x155   :  { %1665 = vmatmul.mubr.msk.f32.gmra.mrb[44].mxu1 %vm730_vm1, %v680_v36 }
 0x156   :  { %1209 = vmatprep.mubr.f32.mxu1 %v1878_v8 }
 0x159   :  { %1666 = vmatmul.mubr.msk.f32.gmra.mrb[46].mxu1 %vm730_vm1, %v681_v39 }
 0x15a   :  { %1215 = vmatprep.mubr.f32.mxu1 %v1878_v8 }
 0x15d   :  { %1667 = vmatmul.mubr.msk.f32.gmra.mrb[48].mxu1 %vm730_vm1, %v682_v40 }
 0x15e   :  { %1221 = vmatprep.mubr.f32.mxu1 %v1878_v8 }
 0x161   :  { %1668 = vmatmul.mubr.msk.f32.gmra.mrb[50].mxu1 %vm730_vm1, %v683_v43 }
 0x162   :  { %1227 = vmatprep.mubr.f32.mxu1 %v1878_v8 }
 0x165   :  { %1669 = vmatmul.mubr.msk.f32.gmra.mrb[52].mxu1 %vm730_vm1, %v684_v44 }
 0x166   :  { %1233 = vmatprep.mubr.f32.mxu1 %v1878_v8 }
 0x169   :  { %1670 = vmatmul.mubr.msk.f32.gmra.mrb[54].mxu1 %vm730_vm1, %v685_v47 }
 0x16a   :  { %1239 = vmatprep.mubr.f32.mxu1 %v1878_v8 }
 0x16d   :  { %1671 = vmatmul.mubr.msk.f32.gmra.mrb[56].mxu1 %vm730_vm1, %v686_v48 }
 0x16e   :  { %1245 = vmatprep.mubr.f32.mxu1 %v1878_v8 }
 0x171   :  { %1672 = vmatmul.mubr.msk.f32.gmra.mrb[58].mxu1 %vm730_vm1, %v687_v51 }
 0x172   :  { %1251 = vmatprep.mubr.f32.mxu1 %v1878_v8 }
 0x175   :  { %1673 = vmatmul.mubr.msk.f32.gmra.mrb[60].mxu1 %vm730_vm1, %v688_v52 }
 0x176   :  { %1257 = vmatprep.mubr.f32.mxu1 %v1878_v8 }
 0x179   :  { %1674 = vmatmul.mubr.msk.f32.gmra.mrb[62].mxu1 %vm730_vm1, %v689_v55 }
 0x17a   :  { %1263 = vmatprep.mubr.f32.mxu1 %v1878_v8 }
 0x17d   :  { %1675 = vmatmul.mubr.msk.f32.gmra.mrb[64].mxu1 %vm730_vm1, %v690_v56 }
 0x17e   :  { %1269 = vmatprep.mubr.f32.mxu1 %v1878_v8 }
 0x181   :  { %1676 = vmatmul.mubr.msk.f32.gmra.mrb[66].mxu1 %vm730_vm1, %v691_v59 }
 0x182   :  { %1275 = vmatprep.mubr.f32.mxu1 %v1878_v8 }
 0x185   :  { %1677 = vmatmul.mubr.msk.f32.gmra.mrb[68].mxu1 %vm730_vm1, %v692_v60 }
 0x186   :  { %1281 = vmatprep.mubr.f32.mxu1 %v1878_v8 }
 0x189   :  { %1678 = vmatmul.mubr.msk.f32.gmra.mrb[70].mxu1 %vm730_vm1, %v693_v63 }
 0x18a   :  { %1287 = vmatprep.mubr.f32.mxu1 %v1878_v8 }
 0x18d   :  { %1679 = vmatmul.mubr.msk.f32.gmra.mrb[72].mxu1 %vm730_vm1, %v694_v0 }
 0x18e   :  { %1293 = vmatprep.mubr.f32.mxu1 %v1878_v8 }
 0x191   :  { %1680 = vmatmul.mubr.msk.f32.gmra.mrb[74].mxu1 %vm730_vm1, %v695_v3 }
 0x192   :  { %1299 = vmatprep.mubr.f32.mxu1 %v1878_v8 }
 0x195   :  { %1681 = vmatmul.mubr.msk.f32.gmra.mrb[76].mxu1 %vm730_vm1, %v696_v4 }
 0x196   :  { %1305 = vmatprep.mubr.f32.mxu1 %v1878_v8 }
 0x199   :  { %1682 = vmatmul.mubr.msk.f32.gmra.mrb[78].mxu1 %vm730_vm1, %v697_v7 }
 0x19a   :  { %1311 = vmatprep.mubr.f32.mxu1 %v1878_v8 }
 0x19d   :  { %1683 = vmatmul.mubr.msk.f32.gmra.mrb[80].mxu1 %vm730_vm1, %v698_v9 }
 0x19e   :  { %1317 = vmatprep.mubr.f32.mxu1 %v1878_v8 }
 0x1a1   :  { %1684 = vmatmul.mubr.msk.f32.gmra.mrb[82].mxu1 %vm730_vm1, %v699_v12 }
 0x1a2   :  { %1323 = vmatprep.mubr.f32.mxu1 %v1878_v8 }
 0x1a5   :  { %1685 = vmatmul.mubr.msk.f32.gmra.mrb[84].mxu1 %vm730_vm1, %v700_v13 }
 0x1a6   :  { %1329 = vmatprep.mubr.f32.mxu1 %v1878_v8  ;;  %v718_v8 = vld [vmem:[%s2850_s6] sm:$0x3] }
 0x1a7   :  { %v2473_v31 = vrot.slane %v718_v8, %v722_v28  ;;  %v2475_v33 = vrot.slane %v718_v8, %v726_v29 }
 0x1a9   :  { %1686 = vmatmul.mubr.msk.f32.gmra.mrb[86].mxu1 %vm730_vm1, %v701_v15 }
 0x1b0   :  { %v977_v16 = vpop.f32.mrb[60].mxu0 }
 0x1b1   :  { %v979_v17 = vpop.f32.mrb[61].mxu0  ;;  %v2478_v35 = vadd.f32 %v977_v16, %v2473_v31 }
 0x1b2   :  { %v2484_v38 = vadd.f32 %v979_v17, %v2475_v33 }
 0x1b4   :  { %v983_v18 = vpop.f32.mrb[62].mxu0 }
 0x1b5   :  { %v985_v19 = vpop.f32.mrb[63].mxu0  ;;  %v2494_v43 = vadd.f32 %v983_v18, %v2473_v31 }
 0x1b6   :  { %v2500_v46 = vadd.f32 %v985_v19, %v2475_v33 }
 0x1b8   :  { %v989_v20 = vpop.f32.mrb[64].mxu0 }
 0x1b9   :  { %v991_v23 = vpop.f32.mrb[65].mxu0  ;;  %v2510_v52 = vadd.f32 %v989_v20, %v2473_v31 }
 0x1ba   :  { %v2516_v56 = vadd.f32 %v991_v23, %v2475_v33 }
 0x1bc   :  { %v995_v24 = vpop.f32.mrb[66].mxu0 }
 0x1bd   :  { %v997_v26 = vpop.f32.mrb[67].mxu0  ;;  %v2526_v62 = vadd.f32 %v995_v24, %v2473_v31 }
 0x1be   :  { %v2532_v2 = vadd.f32 %v997_v26, %v2475_v33 }
 0x1c0   :  { %v1001_v27 = vpop.f32.mrb[68].mxu0 }
 0x1c1   :  { %v1003_v22 = vpop.f32.mrb[69].mxu0  ;;  %v1002_v9 = vadd.f32 %v1001_v27, %v2473_v31 }
 0x1c2   :  { %v1004_v13 = vadd.f32 %v1003_v22, %v2475_v33 }
 0x1c4   :  { %v1007_v30 = vpop.f32.mrb[70].mxu0 }
 0x1c5   :  { %v1009_v32 = vpop.f32.mrb[71].mxu0  ;;  %v1008_v21 = vadd.f32 %v1007_v30, %v2473_v31 }
 0x1c6   :  { %v1010_v27 = vadd.f32 %v1009_v32, %v2475_v33 }
 0x1c8   :  { %v1013_v34 = vpop.f32.mrb[72].mxu0 }
 0x1c9   :  { %v2481_v36 = vadd.f32 %v1013_v34, %v2473_v31  ;;  %v1015_v37 = vpop.f32.mrb[73].mxu0 }
 0x1ca   :  { %v2487_v39 = vadd.f32 %v1015_v37, %v2475_v33 }
 0x1cb   :  { %v1336_v40 = vmax.f32 %v2478_v35, %v2481_v36 }
 0x1cc   :  { %v1337_v41 = vmax.f32 %v2484_v38, %v2487_v39  ;;  %v1019_v42 = vpop.f32.mrb[74].mxu0 }
 0x1cd   :  { %v2497_v44 = vadd.f32 %v1019_v42, %v2473_v31  ;;  %v1021_v45 = vpop.f32.mrb[75].mxu0 }
 0x1ce   :  { %v2503_v47 = vadd.f32 %v1021_v45, %v2475_v33 }
 0x1cf   :  { %v1338_v48 = vmax.f32 %v2494_v43, %v2497_v44 }
 0x1d0   :  { %v1339_v49 = vmax.f32 %v2500_v46, %v2503_v47  ;;  %v1025_v50 = vpop.f32.mrb[76].mxu0  ;;  %v1073_v51 = vpop.f32.mrb[0].mxu1 }
 0x1d1   :  { %v2513_v53 = vadd.f32 %v1025_v50, %v2473_v31  ;;  %v1027_v54 = vpop.f32.mrb[77].mxu0  ;;  %v1075_v55 = vpop.f32.mrb[1].mxu1  ;;  %v1074_v15 = vadd.f32 %v1073_v51, %v2473_v31 }
 0x1d2   :  { %v2519_v57 = vadd.f32 %v1027_v54, %v2475_v33  ;;  %v1076_v17 = vadd.f32 %v1075_v55, %v2475_v33 }
 0x1d3   :  { %v1340_v58 = vmax.f32 %v2510_v52, %v2513_v53 }
 0x1d4   :  { %v1341_v59 = vmax.f32 %v2516_v56, %v2519_v57  ;;  %v1031_v60 = vpop.f32.mrb[78].mxu0  ;;  %v1079_v61 = vpop.f32.mrb[2].mxu1 }
 0x1d5   :  { %v2529_v63 = vadd.f32 %v1031_v60, %v2473_v31  ;;  %v1033_v0 = vpop.f32.mrb[79].mxu0  ;;  %v1081_v1 = vpop.f32.mrb[3].mxu1  ;;  %v1080_v8 = vadd.f32 %v1079_v61, %v2473_v31 }
 0x1d6   :  { %v2535_v3 = vadd.f32 %v1033_v0, %v2475_v33  ;;  %v1082_v34 = vadd.f32 %v1081_v1, %v2475_v33 }
 0x1d7   :  { %v1342_v4 = vmax.f32 %v2526_v62, %v2529_v63 }
 0x1d8   :  { %v1343_v5 = vmax.f32 %v2532_v2, %v2535_v3  ;;  %v1037_v6 = vpop.f32.mrb[80].mxu0  ;;  %v1085_v7 = vpop.f32.mrb[4].mxu1 }
 0x1d9   :  { %v1038_v10 = vadd.f32 %v1037_v6, %v2473_v31  ;;  %v1039_v11 = vpop.f32.mrb[81].mxu0  ;;  %v1087_v12 = vpop.f32.mrb[5].mxu1  ;;  %v1086_v60 = vadd.f32 %v1085_v7, %v2473_v31 }
 0x1da   :  { %v1040_v14 = vadd.f32 %v1039_v11, %v2475_v33  ;;  %v1088_v0 = vadd.f32 %v1087_v12, %v2475_v33 }
 0x1db   :  { %v1344_v16 = vmax.f32 %v1002_v9, %v1038_v10 }
 0x1dc   :  { %v1345_v18 = vmax.f32 %v1004_v13, %v1040_v14  ;;  %v1043_v19 = vpop.f32.mrb[82].mxu0  ;;  %v1091_v20 = vpop.f32.mrb[6].mxu1 }
 0x1dd   :  { %v1044_v23 = vadd.f32 %v1043_v19, %v2473_v31  ;;  %v1045_v24 = vpop.f32.mrb[83].mxu0  ;;  %v1093_v25 = vpop.f32.mrb[7].mxu1  ;;  %v2549_v26 = vmax.f32 %v1344_v16, %v1074_v15  ;;  %v1092_v16 = vadd.f32 %v1091_v20, %v2473_v31 }
 0x1de   :  { %v1046_v28 = vadd.f32 %v1045_v24, %v2475_v33  ;;  %v2553_v22 = vmax.f32 %v1345_v18, %v1076_v17  ;;  %v1094_v36 = vadd.f32 %v1093_v25, %v2475_v33 }
 0x1df   :  { %v1346_v29 = vmax.f32 %v1008_v21, %v1044_v23 }
 0x1e0   :  { %v1347_v37 = vmax.f32 %v1010_v27, %v1046_v28  ;;  %v1049_v42 = vpop.f32.mrb[84].mxu0  ;;  %v1097_v30 = vpop.f32.mrb[8].mxu1 }
 0x1e1   :  { %v1050_v45 = vadd.f32 %v1049_v42, %v2473_v31  ;;  %v1051_v50 = vpop.f32.mrb[85].mxu0  ;;  %v1099_v51 = vpop.f32.mrb[9].mxu1  ;;  %v2558_v54 = vmax.f32 %v1346_v29, %v1080_v8 }
 0x1e2   :  { %v1052_v32 = vadd.f32 %v1051_v50, %v2475_v33  ;;  %v2561_v55 = vmax.f32 %v1347_v37, %v1082_v34 }
 0x1e3   :  { %v1348_v61 = vmax.f32 %v1336_v40, %v1050_v45 }
 0x1e4   :  { %v1349_v1 = vmax.f32 %v1337_v41, %v1052_v32  ;;  %v1055_v6 = vpop.f32.mrb[86].mxu0  ;;  %v1103_v9 = vpop.f32.mrb[10].mxu1 }
 0x1e5   :  { %v1056_v10 = vadd.f32 %v1055_v6, %v2473_v31  ;;  %v1057_v11 = vpop.f32.mrb[87].mxu0  ;;  %v1105_v13 = vpop.f32.mrb[11].mxu1  ;;  %v1360_v14 = vmax.f32 %v1348_v61, %v1086_v60  ;;  %v1104_v34 = vadd.f32 %v1103_v9, %v2473_v31 }
 0x1e6   :  { %v1058_v15 = vadd.f32 %v1057_v11, %v2475_v33  ;;  %v1361_v7 = vmax.f32 %v1349_v1, %v1088_v0 }
 0x1e7   :  { %v1350_v35 = vmax.f32 %v1338_v48, %v1056_v10  ;;  %v1098_v48 = vadd.f32 %v1097_v30, %v2473_v31 }
 0x1e8   :  { %v1351_v38 = vmax.f32 %v1339_v49, %v1058_v15  ;;  %v1061_v39 = vpop.f32.mrb[88].mxu0  ;;  %v1109_v40 = vpop.f32.mrb[12].mxu1  ;;  %v1100_v49 = vadd.f32 %v1099_v51, %v2475_v33 }
 0x1e9   :  { %v1062_v41 = vadd.f32 %v1061_v39, %v2473_v31  ;;  %v1110_v12 = vadd.f32 %v1109_v40, %v2473_v31  ;;  %v1063_v17 = vpop.f32.mrb[89].mxu0  ;;  %v1111_v18 = vpop.f32.mrb[13].mxu1  ;;  %v1362_v19 = vmax.f32 %v1350_v35, %v1092_v16 }
 0x1ea   :  { %v1064_v20 = vadd.f32 %v1063_v17, %v2475_v33  ;;  %v1112_v43 = vadd.f32 %v1111_v18, %v2475_v33  ;;  %v1363_v44 = vmax.f32 %v1351_v38, %v1094_v36 }
 0x1eb   :  { %v1352_v46 = vmax.f32 %v1340_v58, %v1062_v41  ;;  %v1368_v47 = vmax.f32 %v2549_v26, %v1110_v12 }
 0x1ec   :  { %v1353_v21 = vmax.f32 %v1341_v59, %v1064_v20  ;;  %v1369_v23 = vmax.f32 %v2553_v22, %v1112_v43  ;;  %v1067_v24 = vpop.f32.mrb[90].mxu0  ;;  %v1115_v25 = vpop.f32.mrb[14].mxu1  ;;  %v1106_v59 = vadd.f32 %v1105_v13, %v2475_v33 }
 0x1ed   :  { %v1068_v27 = vadd.f32 %v1067_v24, %v2473_v31  ;;  %v1116_v28 = vadd.f32 %v1115_v25, %v2473_v31  ;;  %v1069_v8 = vpop.f32.mrb[91].mxu0  ;;  %v1117_v29 = vpop.f32.mrb[15].mxu1  ;;  %v1364_v52 = vmax.f32 %v1352_v46, %v1098_v48 }
 0x1ee   :  { %v1070_v53 = vadd.f32 %v1069_v8, %v2475_v33  ;;  %v1118_v58 = vadd.f32 %v1117_v29, %v2475_v33  ;;  %v1365_v26 = vmax.f32 %v1353_v21, %v1100_v49 }
 0x1ef   :  { %v1354_v56 = vmax.f32 %v1342_v4, %v1068_v27  ;;  %v1370_v57 = vmax.f32 %v2558_v54, %v1116_v28 }
 0x1f0   :  { %v1355_v22 = vmax.f32 %v1343_v5, %v1070_v53  ;;  %v1371_v37 = vmax.f32 %v2561_v55, %v1118_v58  ;;  %v1121_v42 = vpop.f32.mrb[16].mxu1 }
 0x1f1   :  { %v1122_v30 = vadd.f32 %v1121_v42, %v2473_v31  ;;  %v1123_v45 = vpop.f32.mrb[17].mxu1  ;;  %v1366_v50 = vmax.f32 %v1354_v56, %v1104_v34 }
 0x1f2   :  { %v1124_v51 = vadd.f32 %v1123_v45, %v2475_v33  ;;  %v1367_v32 = vmax.f32 %v1355_v22, %v1106_v59 }
 0x1f3   :  { %v2611_v62 = vmax.f32 %v1360_v14, %v1122_v30 }
 0x1f4   :  { %v2613_v63 = vmax.f32 %v1361_v7, %v1124_v51  ;;  %v1127_v4 = vpop.f32.mrb[18].mxu1 }
 0x1f5   :  { %v1128_v54 = vadd.f32 %v1127_v4, %v2473_v31  ;;  %v1129_v60 = vpop.f32.mrb[19].mxu1 }
 0x1f6   :  { %v1130_v2 = vadd.f32 %v1129_v60, %v2475_v33 }
 0x1f7   :  { %v2617_v3 = vmax.f32 %v1362_v19, %v1128_v54 }
 0x1f8   :  { %v2619_v5 = vmax.f32 %v1363_v44, %v1130_v2  ;;  %v1133_v55 = vpop.f32.mrb[20].mxu1 }
 0x1f9   :  { %v1134_v61 = vadd.f32 %v1133_v55, %v2473_v31  ;;  %v1135_v0 = vpop.f32.mrb[21].mxu1 }
 0x1fa   :  { %v1136_v1 = vadd.f32 %v1135_v0, %v2475_v33 }
 0x1fb   :  { %v2623_v6 = vmax.f32 %v1364_v52, %v1134_v61 }
 0x1fc   :  { %v2625_v9 = vmax.f32 %v1365_v26, %v1136_v1  ;;  %v1139_v10 = vpop.f32.mrb[22].mxu1 }
 0x1fd   :  { %v1140_v11 = vadd.f32 %v1139_v10, %v2473_v31  ;;  %v1141_v13 = vpop.f32.mrb[23].mxu1 }
 0x1fe   :  { %v1142_v14 = vadd.f32 %v1141_v13, %v2475_v33 }
 0x1ff   :  { %v2629_v15 = vmax.f32 %v1366_v50, %v1140_v11 }
 0x200   :  { %v2631_v7 = vmax.f32 %v1367_v32, %v1142_v14  ;;  %v1145_v16 = vpop.f32.mrb[24].mxu1 }
 0x201   :  { %v1146_v35 = vadd.f32 %v1145_v16, %v2473_v31  ;;  %v1147_v36 = vpop.f32.mrb[25].mxu1 }
 0x202   :  { %v1148_v38 = vadd.f32 %v1147_v36, %v2475_v33 }
 0x203   :  { %v2635_v39 = vmax.f32 %v1368_v47, %v1146_v35 }
 0x204   :  { %v2637_v40 = vmax.f32 %v1369_v23, %v1148_v38  ;;  %v1151_v41 = vpop.f32.mrb[26].mxu1 }
 0x205   :  { %v1152_v12 = vadd.f32 %v1151_v41, %v2473_v31  ;;  %v1153_v17 = vpop.f32.mrb[27].mxu1 }
 0x206   :  { %v1154_v18 = vadd.f32 %v1153_v17, %v2475_v33 }
 0x207   :  { %v2641_v19 = vmax.f32 %v1370_v57, %v1152_v12 }
 0x208   :  { %v2643_v20 = vmax.f32 %v1371_v37, %v1154_v18  ;;  %v1157_v43 = vpop.f32.mrb[28].mxu1 }
 0x209   :  { %v1158_v44 = vadd.f32 %v1157_v43, %v2473_v31  ;;  %v1159_v48 = vpop.f32.mrb[29].mxu1 }
 0x20a   :  { %v1160_v46 = vadd.f32 %v1159_v48, %v2475_v33 }
 0x20b   :  { %v1384_v47 = vmax.f32 %v2611_v62, %v1158_v44 }
 0x20c   :  { %v1385_v49 = vmax.f32 %v2613_v63, %v1160_v46  ;;  %v1163_v21 = vpop.f32.mrb[30].mxu1 }
 0x20d   :  { %v1164_v23 = vadd.f32 %v1163_v21, %v2473_v31  ;;  %v1165_v24 = vpop.f32.mrb[31].mxu1 }
 0x20e   :  { %v1166_v25 = vadd.f32 %v1165_v24, %v2475_v33 }
 0x20f   :  { %v1386_v27 = vmax.f32 %v2617_v3, %v1164_v23 }
 0x210   :  { %v1387_v28 = vmax.f32 %v2619_v5, %v1166_v25  ;;  %v1169_v8 = vpop.f32.mrb[32].mxu1 }
 0x211   :  { %v1170_v29 = vadd.f32 %v1169_v8, %v2473_v31  ;;  %v1171_v52 = vpop.f32.mrb[33].mxu1 }
 0x212   :  { %v1172_v53 = vadd.f32 %v1171_v52, %v2475_v33 }
 0x213   :  { %v1388_v58 = vmax.f32 %v2623_v6, %v1170_v29 }
 0x214   :  { %v1389_v26 = vmax.f32 %v2625_v9, %v1172_v53  ;;  %v1175_v34 = vpop.f32.mrb[34].mxu1 }
 0x215   :  { %v1176_v56 = vadd.f32 %v1175_v34, %v2473_v31  ;;  %v1177_v57 = vpop.f32.mrb[35].mxu1 }
 0x216   :  { %v1178_v59 = vadd.f32 %v1177_v57, %v2475_v33 }
 0x217   :  { %v1390_v22 = vmax.f32 %v2629_v15, %v1176_v56 }
 0x218   :  { %v1391_v37 = vmax.f32 %v2631_v7, %v1178_v59  ;;  %v1181_v42 = vpop.f32.mrb[36].mxu1 }
 0x219   :  { %v1182_v30 = vadd.f32 %v1181_v42, %v2473_v31  ;;  %v1183_v45 = vpop.f32.mrb[37].mxu1 }
 0x21a   :  { %v1184_v50 = vadd.f32 %v1183_v45, %v2475_v33 }
 0x21b   :  { %v1392_v51 = vmax.f32 %v2635_v39, %v1182_v30 }
 0x21c   :  { %v1393_v32 = vmax.f32 %v2637_v40, %v1184_v50  ;;  %v1187_v62 = vpop.f32.mrb[38].mxu1 }
 0x21d   :  { %v1188_v63 = vadd.f32 %v1187_v62, %v2473_v31  ;;  %v1189_v4 = vpop.f32.mrb[39].mxu1 }
 0x21e   :  { %v1190_v54 = vadd.f32 %v1189_v4, %v2475_v33 }
 0x21f   :  { %v1394_v60 = vmax.f32 %v2641_v19, %v1188_v63 }
 0x220   :  { %v1395_v2 = vmax.f32 %v2643_v20, %v1190_v54  ;;  %v1193_v3 = vpop.f32.mrb[40].mxu1 }
 0x221   :  { %v1194_v5 = vadd.f32 %v1193_v3, %v2473_v31  ;;  %v1195_v55 = vpop.f32.mrb[41].mxu1 }
 0x222   :  { %v1196_v61 = vadd.f32 %v1195_v55, %v2475_v33 }
 0x223   :  { %v2671_v0 = vmax.f32 %v1384_v47, %v1194_v5 }
 0x224   :  { %v2673_v1 = vmax.f32 %v1385_v49, %v1196_v61  ;;  %v1199_v6 = vpop.f32.mrb[42].mxu1 }
 0x225   :  { %v1200_v9 = vadd.f32 %v1199_v6, %v2473_v31  ;;  %v1201_v10 = vpop.f32.mrb[43].mxu1 }
 0x226   :  { %v1202_v11 = vadd.f32 %v1201_v10, %v2475_v33 }
 0x227   :  { %v2677_v13 = vmax.f32 %v1386_v27, %v1200_v9 }
 0x228   :  { %v2679_v14 = vmax.f32 %v1387_v28, %v1202_v11  ;;  %v1205_v15 = vpop.f32.mrb[44].mxu1 }
 0x229   :  { %v1206_v7 = vadd.f32 %v1205_v15, %v2473_v31  ;;  %v1207_v16 = vpop.f32.mrb[45].mxu1 }
 0x22a   :  { %v1208_v35 = vadd.f32 %v1207_v16, %v2475_v33 }
 0x22b   :  { %v2683_v36 = vmax.f32 %v1388_v58, %v1206_v7 }
 0x22c   :  { %v2685_v38 = vmax.f32 %v1389_v26, %v1208_v35  ;;  %v1211_v39 = vpop.f32.mrb[46].mxu1 }
 0x22d   :  { %v1212_v40 = vadd.f32 %v1211_v39, %v2473_v31  ;;  %v1213_v41 = vpop.f32.mrb[47].mxu1 }
 0x22e   :  { %v1214_v12 = vadd.f32 %v1213_v41, %v2475_v33 }
 0x22f   :  { %v2689_v17 = vmax.f32 %v1390_v22, %v1212_v40 }
 0x230   :  { %v2691_v18 = vmax.f32 %v1391_v37, %v1214_v12  ;;  %v1217_v19 = vpop.f32.mrb[48].mxu1 }
 0x231   :  { %v1218_v20 = vadd.f32 %v1217_v19, %v2473_v31  ;;  %v1219_v43 = vpop.f32.mrb[49].mxu1 }
 0x232   :  { %v1220_v44 = vadd.f32 %v1219_v43, %v2475_v33 }
 0x233   :  { %v2695_v48 = vmax.f32 %v1392_v51, %v1218_v20 }
 0x234   :  { %v2697_v46 = vmax.f32 %v1393_v32, %v1220_v44  ;;  %v1223_v47 = vpop.f32.mrb[50].mxu1 }
 0x235   :  { %v1224_v49 = vadd.f32 %v1223_v47, %v2473_v31  ;;  %v1225_v21 = vpop.f32.mrb[51].mxu1 }
 0x236   :  { %v1226_v23 = vadd.f32 %v1225_v21, %v2475_v33 }
 0x237   :  { %v2701_v24 = vmax.f32 %v1394_v60, %v1224_v49 }
 0x238   :  { %v2703_v25 = vmax.f32 %v1395_v2, %v1226_v23  ;;  %v1229_v27 = vpop.f32.mrb[52].mxu1 }
 0x239   :  { %v1230_v28 = vadd.f32 %v1229_v27, %v2473_v31  ;;  %v1231_v8 = vpop.f32.mrb[53].mxu1 }
 0x23a   :  { %v1232_v29 = vadd.f32 %v1231_v8, %v2475_v33 }
 0x23b   :  { %v1408_v52 = vmax.f32 %v2671_v0, %v1230_v28 }
 0x23c   :  { %v1409_v53 = vmax.f32 %v2673_v1, %v1232_v29  ;;  %v1235_v58 = vpop.f32.mrb[54].mxu1 }
 0x23d   :  { %v1236_v26 = vadd.f32 %v1235_v58, %v2473_v31  ;;  %v1237_v34 = vpop.f32.mrb[55].mxu1 }
 0x23e   :  { %v1238_v56 = vadd.f32 %v1237_v34, %v2475_v33 }
 0x23f   :  { %v1410_v57 = vmax.f32 %v2677_v13, %v1236_v26 }
 0x240   :  { %v1411_v59 = vmax.f32 %v2679_v14, %v1238_v56  ;;  %v1241_v22 = vpop.f32.mrb[56].mxu1 }
 0x241   :  { %v1242_v37 = vadd.f32 %v1241_v22, %v2473_v31  ;;  %v1243_v42 = vpop.f32.mrb[57].mxu1 }
 0x242   :  { %v1244_v30 = vadd.f32 %v1243_v42, %v2475_v33 }
 0x243   :  { %v1412_v45 = vmax.f32 %v2683_v36, %v1242_v37  ;;  %v1444_v37 = vld [vmem:[%s2851_s1] sm:$0xff] }
 0x244   :  { %v1413_v50 = vmax.f32 %v2685_v38, %v1244_v30  ;;  %v1247_v51 = vpop.f32.mrb[58].mxu1 }
 0x245   :  { %v1248_v32 = vadd.f32 %v1247_v51, %v2473_v31  ;;  %v1249_v62 = vpop.f32.mrb[59].mxu1 }
 0x246   :  { %v1250_v63 = vadd.f32 %v1249_v62, %v2475_v33 }
 0x247   :  { %v1414_v4 = vmax.f32 %v2689_v17, %v1248_v32 }
 0x248   :  { %v1415_v54 = vmax.f32 %v2691_v18, %v1250_v63  ;;  %v1253_v60 = vpop.f32.mrb[60].mxu1 }
 0x249   :  { %v1254_v2 = vadd.f32 %v1253_v60, %v2473_v31  ;;  %v1255_v3 = vpop.f32.mrb[61].mxu1 }
 0x24a   :  { %v1256_v5 = vadd.f32 %v1255_v3, %v2475_v33  ;;  %v1447_v3 = vld [vmem:[%s2851_s1 + $0x18] sm:$0xff] }
 0x24b   :  { %v1416_v55 = vmax.f32 %v2695_v48, %v1254_v2 }
 0x24c   :  { %v1417_v61 = vmax.f32 %v2697_v46, %v1256_v5  ;;  %v1259_v0 = vpop.f32.mrb[62].mxu1 }
 0x24d   :  { %v1260_v1 = vadd.f32 %v1259_v0, %v2473_v31  ;;  %v1261_v6 = vpop.f32.mrb[63].mxu1 }
 0x24e   :  { %v1262_v9 = vadd.f32 %v1261_v6, %v2475_v33 }
 0x24f   :  { %v1418_v10 = vmax.f32 %v2701_v24, %v1260_v1 }
 0x250   :  { %v1419_v11 = vmax.f32 %v2703_v25, %v1262_v9  ;;  %v1265_v13 = vpop.f32.mrb[64].mxu1 }
 0x251   :  { %v1266_v14 = vadd.f32 %v1265_v13, %v2473_v31  ;;  %v1267_v15 = vpop.f32.mrb[65].mxu1 }
 0x252   :  { %v1268_v7 = vadd.f32 %v1267_v15, %v2475_v33  ;;  %v1449_v15 = vld [vmem:[%s2851_s1 + $0x28] sm:$0xff] }
 0x253   :  { %v1420_v16 = vmax.f32 %v1408_v52, %v1266_v14 }
 0x254   :  { %v1421_v35 = vmax.f32 %v1409_v53, %v1268_v7  ;;  %v1271_v36 = vpop.f32.mrb[66].mxu1 }
 0x255   :  { %v1272_v38 = vadd.f32 %v1271_v36, %v2473_v31  ;;  %v1273_v39 = vpop.f32.mrb[67].mxu1 }
 0x256   :  { %v1274_v40 = vadd.f32 %v1273_v39, %v2475_v33 }
 0x257   :  { %v1422_v41 = vmax.f32 %v1410_v57, %v1272_v38 }
 0x258   :  { %v1423_v12 = vmax.f32 %v1411_v59, %v1274_v40  ;;  %v1277_v17 = vpop.f32.mrb[68].mxu1  ;;  %v1450_v40 = vld [vmem:[%s2851_s1 + $0x30] sm:$0xff] }
 0x259   :  { %v1278_v18 = vadd.f32 %v1277_v17, %v2473_v31  ;;  %v1279_v19 = vpop.f32.mrb[69].mxu1  ;;  %v1451_v17 = vld [vmem:[%s2851_s1 + $0x38] sm:$0xff] }
 0x25a   :  { %v1280_v20 = vadd.f32 %v1279_v19, %v2475_v33 }
 0x25b   :  { %v1424_v43 = vmax.f32 %v1412_v45, %v1278_v18  ;;  %v1445_v45 = vld [vmem:[%s2851_s1 + $0x8] sm:$0xff] }
 0x25c   :  { %v1425_v44 = vmax.f32 %v1413_v50, %v1280_v20  ;;  %v1283_v48 = vpop.f32.mrb[70].mxu1 }
 0x25d   :  { %v1284_v46 = vadd.f32 %v1283_v48, %v2473_v31  ;;  %v1285_v47 = vpop.f32.mrb[71].mxu1 }
 0x25e   :  { %v1286_v49 = vadd.f32 %v1285_v47, %v2475_v33  ;;  %v1452_v47 = vld [vmem:[%s2851_s1 + $0x40] sm:$0xff] }
 0x25f   :  { %v1426_v21 = vmax.f32 %v1414_v4, %v1284_v46 }
 0x260   :  { %v1427_v23 = vmax.f32 %v1415_v54, %v1286_v49  ;;  %v1289_v24 = vpop.f32.mrb[72].mxu1  ;;  %v1446_v54 = vld [vmem:[%s2851_s1 + $0x10] sm:$0xff] }
 0x261   :  { %v1290_v25 = vadd.f32 %v1289_v24, %v2473_v31  ;;  %v1291_v27 = vpop.f32.mrb[73].mxu1  ;;  %v1453_v24 = vld [vmem:[%s2851_s1 + $0x48] sm:$0xff] }
 0x262   :  { %v1292_v28 = vadd.f32 %v1291_v27, %v2475_v33 }
 0x263   :  { %v2739_v8 = vmax.f32 %v1416_v55, %v1290_v25 }
 0x264   :  { %v2741_v29 = vmax.f32 %v1417_v61, %v1292_v28  ;;  %v1295_v52 = vpop.f32.mrb[74].mxu1 }
 0x265   :  { %v1296_v53 = vadd.f32 %v1295_v52, %v2473_v31  ;;  %v1297_v58 = vpop.f32.mrb[75].mxu1 }
 0x266   :  { %v1298_v26 = vadd.f32 %v1297_v58, %v2475_v33 }
 0x267   :  { %v2745_v34 = vmax.f32 %v1418_v10, %v1296_v53  ;;  %v1448_v10 = vld [vmem:[%s2851_s1 + $0x20] sm:$0xff] }
 0x268   :  { %v2747_v56 = vmax.f32 %v1419_v11, %v1298_v26  ;;  %v1301_v57 = vpop.f32.mrb[76].mxu1 }
 0x269   :  { %v1302_v59 = vadd.f32 %v1301_v57, %v2473_v31  ;;  %v1303_v22 = vpop.f32.mrb[77].mxu1  ;;  %v1455_v57 = vld [vmem:[%s2851_s1 + $0x58] sm:$0xff] }
 0x26a   :  { %v1304_v42 = vadd.f32 %v1303_v22, %v2475_v33 }
 0x26b   :  { %v1432_v30 = vmax.f32 %v1420_v16, %v1302_v59 }
 0x26c   :  { %v1433_v50 = vmax.f32 %v1421_v35, %v1304_v42  ;;  %v1307_v51 = vpop.f32.mrb[78].mxu1 }
 0x26d   :  { %v1456_v32 = vadd.f32 %v1444_v37, %v1432_v30  ;;  %v1308_v62 = vadd.f32 %v1307_v51, %v2473_v31  ;;  %v1309_v63 = vpop.f32.mrb[79].mxu1 }
 0x26e   :  { %v1457_v4 = vadd.f32 %v1445_v45, %v1433_v50  ;;  %v1310_v60 = vadd.f32 %v1309_v63, %v2475_v33 }
 0x26f   :  { %1468 = vst [vmem:[%s2852_s7] sm:$0xff] %v1456_v32  ;;  %v1434_v2 = vmax.f32 %v1422_v41, %v1308_v62 }
 0x270   :  { %1469 = vst [vmem:[%s2852_s7 + $0x8] sm:$0xff] %v1457_v4  ;;  %v1435_v5 = vmax.f32 %v1423_v12, %v1310_v60  ;;  %v1313_v55 = vpop.f32.mrb[80].mxu1 }
 0x271   :  { %v1458_v61 = vadd.f32 %v1446_v54, %v1434_v2  ;;  %v1859_v0 = vpack.c.bf16 %v1434_v2, %v1432_v30  ;;  %v1314_v1 = vadd.f32 %v1313_v55, %v2473_v31  ;;  %v1315_v6 = vpop.f32.mrb[81].mxu1 }
 0x272   :  { %v1459_v9 = vadd.f32 %v1447_v3, %v1435_v5  ;;  %v1316_v11 = vadd.f32 %v1315_v6, %v2475_v33  ;;  %v1857_v13 = vpack.c.bf16 %v1435_v5, %v1433_v50 }
 0x273   :  { %1470 = vst [vmem:[%s2852_s7 + $0x10] sm:$0xff] %v1458_v61  ;;  %v1436_v14 = vmax.f32 %v1424_v43, %v1314_v1 }
 0x274   :  { %1471 = vst [vmem:[%s2852_s7 + $0x18] sm:$0xff] %v1459_v9  ;;  %v1437_v7 = vmax.f32 %v1425_v44, %v1316_v11  ;;  %v1319_v16 = vpop.f32.mrb[82].mxu1  ;;  %1858 = vmatprep.subr.bf16.mxu0 %v1857_v13 }
 0x275   :  { %v1460_v35 = vadd.f32 %v1448_v10, %v1436_v14  ;;  %v1320_v36 = vadd.f32 %v1319_v16, %v2473_v31  ;;  %v1321_v38 = vpop.f32.mrb[83].mxu1  ;;  %1860 = vmatpush1.bf16.msra.mxu0 %v1859_v0 }
 0x276   :  { %v1461_v39 = vadd.f32 %v1449_v15, %v1437_v7  ;;  %v1322_v41 = vadd.f32 %v1321_v38, %v2475_v33 }
 0x277   :  { %1472 = vst [vmem:[%s2852_s7 + $0x20] sm:$0xff] %v1460_v35  ;;  %v1438_v12 = vmax.f32 %v1426_v21, %v1320_v36 }
 0x278   :  { %1473 = vst [vmem:[%s2852_s7 + $0x28] sm:$0xff] %v1461_v39  ;;  %v1439_v18 = vmax.f32 %v1427_v23, %v1322_v41  ;;  %v1325_v19 = vpop.f32.mrb[84].mxu1 }
 0x279   :  { %v1462_v20 = vadd.f32 %v1450_v40, %v1438_v12  ;;  %v1863_v43 = vpack.c.bf16 %v1438_v12, %v1436_v14  ;;  %v1326_v44 = vadd.f32 %v1325_v19, %v2473_v31  ;;  %v1327_v48 = vpop.f32.mrb[85].mxu1 }
 0x27a   :  { %v1463_v46 = vadd.f32 %v1451_v17, %v1439_v18  ;;  %v1328_v49 = vadd.f32 %v1327_v48, %v2475_v33  ;;  %v1861_v21 = vpack.c.bf16 %v1439_v18, %v1437_v7 }
 0x27b   :  { %1474 = vst [vmem:[%s2852_s7 + $0x30] sm:$0xff] %v1462_v20  ;;  %v1440_v23 = vmax.f32 %v2739_v8, %v1326_v44  ;;  %v1454_v8 = vld [vmem:[%s2851_s1 + $0x50] sm:$0xff] }
 0x27c   :  { %1475 = vst [vmem:[%s2852_s7 + $0x38] sm:$0xff] %v1463_v46  ;;  %v1441_v25 = vmax.f32 %v2741_v29, %v1328_v49  ;;  %v1331_v27 = vpop.f32.mrb[86].mxu1  ;;  %1862 = vmatprep.subr.bf16.mxu0 %v1861_v21 }
 0x27d   :  { %v1464_v28 = vadd.f32 %v1452_v47, %v1440_v23  ;;  %v1332_v52 = vadd.f32 %v1331_v27, %v2473_v31  ;;  %v1333_v53 = vpop.f32.mrb[87].mxu1  ;;  %1864 = vmatpush1.bf16.msra.mxu0 %v1863_v43 }
 0x27e   :  { %v1465_v58 = vadd.f32 %v1453_v24, %v1441_v25  ;;  %v1334_v26 = vadd.f32 %v1333_v53, %v2475_v33 }
 0x27f   :  { %1476 = vst [vmem:[%s2852_s7 + $0x40] sm:$0xff] %v1464_v28  ;;  %v1442_v29 = vmax.f32 %v2745_v34, %v1332_v52  ;;  %v1480_v34 = vld [vmem:[%s2853_s2] sm:$0xff] }
 0x280   :  { %1477 = vst [vmem:[%s2852_s7 + $0x48] sm:$0xff] %v1465_v58  ;;  %v1443_v31 = vmax.f32 %v2747_v56, %v1334_v26 }
 0x281   :  { %v1466_v59 = vadd.f32 %v1454_v8, %v1442_v29  ;;  %v1867_v22 = vpack.c.bf16 %v1442_v29, %v1440_v23 }
 0x282   :  { %v1467_v37 = vadd.f32 %v1455_v57, %v1443_v31  ;;  %v1865_v33 = vpack.c.bf16 %v1443_v31, %v1441_v25 }
 0x283   :  { %1478 = vst [vmem:[%s2852_s7 + $0x50] sm:$0xff] %v1466_v59 }
 0x284   :  { %1479 = vst [vmem:[%s2852_s7 + $0x58] sm:$0xff] %v1467_v37  ;;  %1866 = vmatprep.subr.bf16.mxu0 %v1865_v33 }
 0x285   :  { %1868 = vmatpush1.bf16.msra.mxu0 %v1867_v22 }
 0x288   :  { %1687 = vmatmul.mubr.msk.f32.vlgmr.msra.gmra.mrb[92].mxu0 %vm1481_vm2, %v1480_v34 }
 0x35b   :  { %v1551_v56 = vpop.f32.mrb[92].mxu0 }
 0x35c   :  { %1556 = vst [vmem:[%s2854_s8] sm:$0xff] %v1551_v56  ;;  %v1553_v42 = vpop.f32.mrb[93].mxu0 }
 0x35d   :  { %1557 = vst [vmem:[%s2854_s8 + $0x8] sm:$0xff] %v1553_v42 }

// kernel: squeeze.5
= control target key start
LH: loop header
LB: loop body
LE: loop exit
PB: predicated region body
PF: predicated region fallthrough
CT: control target
= control target key end

     0   :  { %vm7_vm0 = vcmask 48128   ;;  %s36_s8 = smov 116   ;;  %s56_s0 = inlined_call_operand.vmem [shape: f32[2,18], index: 0, kind: input, shape index: {}]   ;;  %s57_s1 = inlined_call_operand.vmem [shape: f32[2,3,6], index: 1, kind: output, shape index: {}]  }
   0x1   :  { %v4_v0 = vld [vmem:[%s56_s0] sm:$0x3]  ;;  %s35_s0 = smov 122  }
   0x2   :  { %5 = vst [vmem:[#allocation1] sm:$0x3] %v4_v0 }
   0x9   :  { %v9_v1 = vld [vmem:[#allocation1] sm:$0x3]  }
   0xa   :  { %v6_v2 = vld [vmem:[#allocation1] sm:$0x3]   ;;  %10 = vrot.lane.b32.xlu0 %v9_v1, %s35_s0 }
   0xb   :  { %8 = vst.msk [vmem:[#allocation0] ss:$8 sm:$0x3] %vm7_vm0, %v6_v2   ;;  %v15_v3 = vld [vmem:[#allocation1] sm:$0x3]  }
   0xe   :  { %16 = vrot.lane.b32.xlu0 %v15_v3, %s36_s8 }
  0x7c   :  { %v11_v4 = vpop.permute.xlu0 %10  }
  0x7d   :  { %14 = vst.msk [vmem:[#allocation0 + $0x1] ss:$8 sm:$0x3] %vm7_vm0, %v11_v4  }
  0x80   :  { %v17_v5 = vpop.permute.xlu0 %16  }
  0x81   :  { %20 = vst.msk [vmem:[#allocation0 + $0x2] ss:$8 sm:$0x3] %vm7_vm0, %v17_v5  }
  0x88   :  { %v24_v6 = vld [vmem:[#allocation0] sm:$0xf]  ;;  %v28_v7 = vld [vmem:[#allocation0 + $0x8] sm:$0xf] }
  0x89   :  { %26 = vst [vmem:[%s57_s1] sm:$0xf] %v24_v6  ;;  %32 = vst [vmem:[%s57_s1 + $0x4] sm:$0xf] %v28_v7 }

// kernel: interaction_decoder_forward.7
= control target key start
LH: loop header
LB: loop body
LE: loop exit
PB: predicated region body
PF: predicated region fallthrough
CT: control target
= control target key end

     0   :  { %s4087_s2 = inlined_call_operand.vmem [shape: bf16[256,512], index: 2, kind: input, shape index: {}]   ;;  %s4088_s0 = inlined_call_operand.vmem [shape: f32[48,256], index: 0, kind: input, shape index: {}]   ;;  %s4089_s4 = inlined_call_operand.vmem [shape: bf16[512,384], index: 4, kind: input, shape index: {}]   ;;  %s4090_s6 = inlined_call_operand.vmem [shape: bf16[256,64], index: 6, kind: input, shape index: {}]   ;;  %s4091_s1 = inlined_call_operand.vmem [shape: f32[48,2], index: 1, kind: input, shape index: {}]   ;;  %s4092_s3 = inlined_call_operand.vmem [shape: f32[1,512], index: 3, kind: input, shape index: {}]   ;;  %s4093_s8 = inlined_call_operand.vmem [shape: bf16[64,128], index: 8, kind: input, shape index: {}]   ;;  %s4094_s5 = inlined_call_operand.vmem [shape: f32[1,384], index: 5, kind: input, shape index: {}]   ;;  %s4095_s10 = inlined_call_operand.vmem [shape: f32[48,384], index: 10, kind: output, shape index: {0}]   ;;  %s4096_s7 = inlined_call_operand.vmem [shape: f32[1,64], index: 7, kind: input, shape index: {}]   ;;  %s4097_s9 = inlined_call_operand.vmem [shape: f32[1,128], index: 9, kind: input, shape index: {}]   ;;  %s4098_s11 = inlined_call_operand.vmem [shape: f32[48,128], index: 11, kind: output, shape index: {1}]  }
   0x1   :  { %v2531_v0 = vld [vmem:[%s4087_s2 + $0x4] ss:$16 sps:$4 sm:$0xff]   ;;  %v2533_v1 = vld [vmem:[%s4087_s2] ss:$16 sps:$4 sm:$0xff]   ;;  %v2542_v5 = vld [vmem:[%s4087_s2 + $0xc] ss:$16 sps:$4 sm:$0xff]  }
   0x2   :  { %462 = vmatprep.subr.bf16.mxu0 %v2531_v0  ;;  %v2534_v2 = vld [vmem:[%s4087_s2 + $0x24] ss:$16 sps:$4 sm:$0xff]   ;;  %v2536_v3 = vld [vmem:[%s4087_s2 + $0x20] ss:$16 sps:$4 sm:$0xff]   ;;  %v2545_v6 = vld [vmem:[%s4087_s2 + $0x8] ss:$16 sps:$4 sm:$0xff]   ;;  %525 = vmatprep.subr.bf16.mxu1 %v2542_v5 }
   0x3   :  { %463 = vmatpush1.bf16.msra.mxu0 %v2533_v1  ;;  %v2537_v4 = vld [vmem:[%s4087_s2 + $0x44] ss:$16 sps:$4 sm:$0xff]   ;;  %v2539_v7 = vld [vmem:[%s4087_s2 + $0x40] ss:$16 sps:$4 sm:$0xff]   ;;  %526 = vmatpush1.bf16.msra.mxu1 %v2545_v6  ;;  %v2548_v9 = vld [vmem:[%s4087_s2 + $0x2c] ss:$16 sps:$4 sm:$0xff]  }
   0x4   :  { %464 = vmatprep.subr.bf16.mxu0 %v2534_v2  ;;  %v2540_v8 = vld [vmem:[%s4087_s2 + $0x64] ss:$16 sps:$4 sm:$0xff]   ;;  %v2551_v10 = vld [vmem:[%s4087_s2 + $0x28] ss:$16 sps:$4 sm:$0xff]   ;;  %527 = vmatprep.subr.bf16.mxu1 %v2548_v9  ;;  %v2544_v11 = vld [vmem:[%s4087_s2 + $0x60] ss:$16 sps:$4 sm:$0xff]  }
   0x5   :  { %v2546_v12 = vld [vmem:[%s4087_s2 + $0x84] ss:$16 sps:$4 sm:$0xff]   ;;  %v2554_v13 = vld [vmem:[%s4087_s2 + $0x4c] ss:$16 sps:$4 sm:$0xff]   ;;  %v2557_v14 = vld [vmem:[%s4087_s2 + $0x48] ss:$16 sps:$4 sm:$0xff]  }
   0x6   :  { %v2560_v15 = vld [vmem:[%s4087_s2 + $0x6c] ss:$16 sps:$4 sm:$0xff]   ;;  %v2550_v16 = vld [vmem:[%s4087_s2 + $0x80] ss:$16 sps:$4 sm:$0xff]   ;;  %v2552_v17 = vld [vmem:[%s4087_s2 + $0xa4] ss:$16 sps:$4 sm:$0xff]  }
   0x7   :  { %465 = vmatpush1.bf16.msra.mxu0 %v2536_v3  ;;  %528 = vmatpush1.bf16.msra.mxu1 %v2551_v10  ;;  %v2563_v18 = vld [vmem:[%s4087_s2 + $0x68] ss:$16 sps:$4 sm:$0xff]   ;;  %v2566_v19 = vld [vmem:[%s4087_s2 + $0x8c] ss:$16 sps:$4 sm:$0xff]   ;;  %v2556_v20 = vld [vmem:[%s4087_s2 + $0xa0] ss:$16 sps:$4 sm:$0xff]  }
   0x8   :  { %466 = vmatprep.subr.bf16.mxu0 %v2537_v4  ;;  %529 = vmatprep.subr.bf16.mxu1 %v2554_v13  ;;  %v2558_v21 = vld [vmem:[%s4087_s2 + $0xc4] ss:$16 sps:$4 sm:$0xff]   ;;  %v2569_v22 = vld [vmem:[%s4087_s2 + $0x88] ss:$16 sps:$4 sm:$0xff]   ;;  %v2572_v23 = vld [vmem:[%s4087_s2 + $0xac] ss:$16 sps:$4 sm:$0xff]  }
   0x9   :  { %v2562_v24 = vld [vmem:[%s4087_s2 + $0xc0] ss:$16 sps:$4 sm:$0xff]   ;;  %v2564_v25 = vld [vmem:[%s4087_s2 + $0xe4] ss:$16 sps:$4 sm:$0xff]   ;;  %v2575_v26 = vld [vmem:[%s4087_s2 + $0xa8] ss:$16 sps:$4 sm:$0xff]  }
   0xa   :  { %v2578_v27 = vld [vmem:[%s4087_s2 + $0xcc] ss:$16 sps:$4 sm:$0xff]   ;;  %v2568_v28 = vld [vmem:[%s4087_s2 + $0xe0] ss:$16 sps:$4 sm:$0xff]   ;;  %v2570_v29 = vld [vmem:[%s4087_s2 + $0x104] ss:$16 sps:$4 sm:$0xff]  }
   0xb   :  { %467 = vmatpush1.bf16.msra.mxu0 %v2539_v7  ;;  %530 = vmatpush1.bf16.msra.mxu1 %v2557_v14  ;;  %v2581_v30 = vld [vmem:[%s4087_s2 + $0xc8] ss:$16 sps:$4 sm:$0xff]   ;;  %v2584_v31 = vld [vmem:[%s4087_s2 + $0xec] ss:$16 sps:$4 sm:$0xff]   ;;  %v2574_v32 = vld [vmem:[%s4087_s2 + $0x100] ss:$16 sps:$4 sm:$0xff]  }
   0xc   :  { %468 = vmatprep.subr.bf16.mxu0 %v2540_v8  ;;  %531 = vmatprep.subr.bf16.mxu1 %v2560_v15  ;;  %v2576_v33 = vld [vmem:[%s4087_s2 + $0x124] ss:$16 sps:$4 sm:$0xff]   ;;  %v2587_v34 = vld [vmem:[%s4087_s2 + $0xe8] ss:$16 sps:$4 sm:$0xff]   ;;  %v2590_v35 = vld [vmem:[%s4087_s2 + $0x10c] ss:$16 sps:$4 sm:$0xff]  }
   0xd   :  { %v2580_v36 = vld [vmem:[%s4087_s2 + $0x120] ss:$16 sps:$4 sm:$0xff]   ;;  %v2582_v37 = vld [vmem:[%s4087_s2 + $0x144] ss:$16 sps:$4 sm:$0xff]   ;;  %v2593_v38 = vld [vmem:[%s4087_s2 + $0x108] ss:$16 sps:$4 sm:$0xff]  }
   0xe   :  { %v2596_v39 = vld [vmem:[%s4087_s2 + $0x12c] ss:$16 sps:$4 sm:$0xff]   ;;  %v2586_v41 = vld [vmem:[%s4087_s2 + $0x140] ss:$16 sps:$4 sm:$0xff]   ;;  %v2588_v42 = vld [vmem:[%s4087_s2 + $0x164] ss:$16 sps:$4 sm:$0xff]  }
   0xf   :  { %469 = vmatpush1.bf16.msra.mxu0 %v2544_v11  ;;  %532 = vmatpush1.bf16.msra.mxu1 %v2563_v18  ;;  %v39_v40 = vld [vmem:[%s4088_s0 + $0x8] sm:$0xff]  ;;  %v41_v43 = vld [vmem:[%s4088_s0 + $0x18] sm:$0xff]  ;;  %v2592_v47 = vld [vmem:[%s4087_s2 + $0x160] ss:$16 sps:$4 sm:$0xff]  }
  0x10   :  { %470 = vmatprep.subr.bf16.mxu0 %v2546_v12  ;;  %533 = vmatprep.subr.bf16.mxu1 %v2566_v19  ;;  %v2599_v44 = vld [vmem:[%s4087_s2 + $0x128] ss:$16 sps:$4 sm:$0xff]   ;;  %v3034_v45 = vpack.c.bf16 %v41_v43, %v39_v40  ;;  %v2602_v46 = vld [vmem:[%s4087_s2 + $0x14c] ss:$16 sps:$4 sm:$0xff]   ;;  %v2594_v48 = vld [vmem:[%s4087_s2 + $0x184] ss:$16 sps:$4 sm:$0xff]  }
  0x11   :  { %v2605_v49 = vld [vmem:[%s4087_s2 + $0x148] ss:$16 sps:$4 sm:$0xff]   ;;  %v2608_v50 = vld [vmem:[%s4087_s2 + $0x16c] ss:$16 sps:$4 sm:$0xff]   ;;  %v2598_v51 = vld [vmem:[%s4087_s2 + $0x180] ss:$16 sps:$4 sm:$0xff]  }
  0x12   :  { %494 = vmatprep.mubr.bf16.mxu0 %v3034_v45  ;;  %557 = vmatprep.mubr.bf16.mxu1 %v3034_v45  ;;  %v2600_v52 = vld [vmem:[%s4087_s2 + $0x1a4] ss:$16 sps:$4 sm:$0xff]   ;;  %v2611_v53 = vld [vmem:[%s4087_s2 + $0x168] ss:$16 sps:$4 sm:$0xff]   ;;  %v2614_v54 = vld [vmem:[%s4087_s2 + $0x18c] ss:$16 sps:$4 sm:$0xff]  }
  0x13   :  { %471 = vmatpush1.bf16.msra.mxu0 %v2550_v16  ;;  %534 = vmatpush1.bf16.msra.mxu1 %v2569_v22  ;;  %v2604_v55 = vld [vmem:[%s4087_s2 + $0x1a0] ss:$16 sps:$4 sm:$0xff]   ;;  %v2606_v56 = vld [vmem:[%s4087_s2 + $0x1c4] ss:$16 sps:$4 sm:$0xff]   ;;  %v2617_v57 = vld [vmem:[%s4087_s2 + $0x188] ss:$16 sps:$4 sm:$0xff]  }
  0x14   :  { %472 = vmatprep.subr.bf16.mxu0 %v2552_v17  ;;  %535 = vmatprep.subr.bf16.mxu1 %v2572_v23  ;;  %v2618_v58 = vld [vmem:[%s4087_s2 + $0x1ac] ss:$16 sps:$4 sm:$0xff]   ;;  %v2610_v59 = vld [vmem:[%s4087_s2 + $0x1c0] ss:$16 sps:$4 sm:$0xff]   ;;  %v2612_v60 = vld [vmem:[%s4087_s2 + $0x1e4] ss:$16 sps:$4 sm:$0xff]  }
  0x15   :  { %v2620_v61 = vld [vmem:[%s4087_s2 + $0x1a8] ss:$16 sps:$4 sm:$0xff]   ;;  %v2616_v62 = vld [vmem:[%s4087_s2 + $0x1e0] ss:$16 sps:$4 sm:$0xff]   ;;  %v2621_v1 = vld [vmem:[%s4087_s2 + $0x1cc] ss:$16 sps:$4 sm:$0xff]  }
  0x16   :  { %v38_v63 = vld [vmem:[%s4088_s0] sm:$0xff]  ;;  %v40_v0 = vld [vmem:[%s4088_s0 + $0x10] sm:$0xff]  ;;  %v2623_v2 = vld [vmem:[%s4087_s2 + $0x1c8] ss:$16 sps:$4 sm:$0xff]  }
  0x17   :  { %473 = vmatpush1.bf16.msra.mxu0 %v2556_v20  ;;  %536 = vmatpush1.bf16.msra.mxu1 %v2575_v26  ;;  %v43_v3 = vld [vmem:[%s4088_s0 + $0x28] sm:$0xff]  ;;  %v45_v4 = vld [vmem:[%s4088_s0 + $0x38] sm:$0xff]  ;;  %v2629_v5 = vld [vmem:[%s4089_s4 + $0x4] ss:$12 sps:$4 sm:$0xff]   ;;  %v3113_v7 = vpack.c.bf16 %v40_v0, %v38_v63 }
  0x18   :  { %474 = vmatprep.subr.bf16.mxu0 %v2558_v21  ;;  %537 = vmatprep.subr.bf16.mxu1 %v2578_v27  ;;  %v2624_v6 = vld [vmem:[%s4087_s2 + $0x1ec] ss:$16 sps:$4 sm:$0xff]   ;;  %v2626_v8 = vld [vmem:[%s4087_s2 + $0x1e8] ss:$16 sps:$4 sm:$0xff]   ;;  %v3121_v10 = vpack.c.bf16 %v45_v4, %v43_v3  ;;  %v42_v13 = vld [vmem:[%s4088_s0 + $0x20] sm:$0xff] }
  0x19   :  { %v2627_v9 = vld [vmem:[%s4089_s4] ss:$12 sps:$4 sm:$0xff]   ;;  %v2632_v11 = vld [vmem:[%s4089_s4 + $0x1c] ss:$12 sps:$4 sm:$0xff]   ;;  %v44_v14 = vld [vmem:[%s4088_s0 + $0x30] sm:$0xff] }
  0x1a   :  { %v2654_v12 = vld [vmem:[%s4089_s4 + $0xc8] ss:$12 sps:$4 sm:$0xff]   ;;  %v2630_v15 = vld [vmem:[%s4089_s4 + $0x18] ss:$12 sps:$4 sm:$0xff]   ;;  %v2659_v20 = vld [vmem:[%s4089_s4 + $0xe0] ss:$12 sps:$4 sm:$0xff]   ;;  %v3158_v22 = vpack.c.bf16 %v44_v14, %v42_v13 }
  0x1b   :  { %475 = vmatpush1.bf16.msra.mxu0 %v2562_v24  ;;  %538 = vmatpush1.bf16.msra.mxu1 %v2581_v30  ;;  %v47_v16 = vld [vmem:[%s4088_s0 + $0x48] sm:$0xff]  ;;  %v49_v17 = vld [vmem:[%s4088_s0 + $0x58] sm:$0xff]  ;;  %v2635_v18 = vld [vmem:[%s4089_s4 + $0x34] ss:$12 sps:$4 sm:$0xff]  }
  0x1c   :  { %476 = vmatprep.subr.bf16.mxu0 %v2564_v25  ;;  %539 = vmatprep.subr.bf16.mxu1 %v2584_v31  ;;  %v2655_v19 = vld [vmem:[%s4089_s4 + $0x8] ss:$12 sps:$4 sm:$0xff]   ;;  %v2633_v21 = vld [vmem:[%s4089_s4 + $0x30] ss:$12 sps:$4 sm:$0xff]   ;;  %v2638_v23 = vld [vmem:[%s4089_s4 + $0x4c] ss:$12 sps:$4 sm:$0xff]   ;;  %v3164_v24 = vpack.c.bf16 %v49_v17, %v47_v16 }
  0x1d   :  { %v2660_v25 = vld [vmem:[%s4089_s4 + $0x20] ss:$12 sps:$4 sm:$0xff]   ;;  %v48_v27 = vld [vmem:[%s4088_s0 + $0x50] sm:$0xff]  ;;  %v2658_v40 = vld [vmem:[%s4089_s4 + $0xdc] ss:$12 sps:$4 sm:$0xff]  }
  0x1e   :  { %v46_v26 = vld [vmem:[%s4088_s0 + $0x40] sm:$0xff]  ;;  %v2688_v63 = vld [vmem:[%s4089_s4 + $0x16c] ss:$12 sps:$4 sm:$0xff]   ;;  %v2689_v0 = vld [vmem:[%s4089_s4 + $0x170] ss:$12 sps:$4 sm:$0xff]  }
  0x1f   :  { %477 = vmatpush1.bf16.msra.mxu0 %v2568_v28  ;;  %540 = vmatpush1.bf16.msra.mxu1 %v2587_v34  ;;  %v2636_v28 = vld [vmem:[%s4089_s4 + $0x48] ss:$12 sps:$4 sm:$0xff]   ;;  %v2639_v30 = vld [vmem:[%s4089_s4 + $0x60] ss:$12 sps:$4 sm:$0xff]   ;;  %v3187_v31 = vpack.c.bf16 %v48_v27, %v46_v26  ;;  %v2664_v43 = vld [vmem:[%s4089_s4 + $0xf8] ss:$12 sps:$4 sm:$0xff]  }
  0x20   :  { %478 = vmatprep.subr.bf16.mxu0 %v2570_v29  ;;  %541 = vmatprep.subr.bf16.mxu1 %v2590_v35  ;;  %v2641_v29 = vld [vmem:[%s4089_s4 + $0x64] ss:$12 sps:$4 sm:$0xff]   ;;  %v2647_v34 = vld [vmem:[%s4089_s4 + $0x94] ss:$12 sps:$4 sm:$0xff]  }
  0x21   :  { %v2645_v35 = vld [vmem:[%s4089_s4 + $0x90] ss:$12 sps:$4 sm:$0xff]   ;;  %v2694_v4 = vld [vmem:[%s4089_s4 + $0x248] ss:$12 sps:$4 sm:$0xff]   ;;  %v1652_v14 = vld [vmem:[%s4091_s1 + $0x20] sm:$0xff] }
  0x22   :  { %v2693_v3 = vld [vmem:[%s4089_s4 + $0x184] ss:$12 sps:$4 sm:$0xff]   ;;  %v120_v17 = vld [vmem:[%s4092_s3] sm:$0xf] }
  0x23   :  { %479 = vmatpush1.bf16.msra.mxu0 %v2574_v32  ;;  %542 = vmatpush1.bf16.msra.mxu1 %v2593_v38  ;;  %v2644_v32 = vld [vmem:[%s4089_s4 + $0x7c] ss:$12 sps:$4 sm:$0xff]   ;;  %v2653_v38 = vld [vmem:[%s4089_s4 + $0xc4] ss:$12 sps:$4 sm:$0xff]  }
  0x24   :  { %480 = vmatprep.subr.bf16.mxu0 %v2576_v33  ;;  %543 = vmatprep.subr.bf16.mxu1 %v2596_v39  ;;  %v2642_v33 = vld [vmem:[%s4089_s4 + $0x78] ss:$12 sps:$4 sm:$0xff]   ;;  %v2651_v39 = vld [vmem:[%s4089_s4 + $0xc0] ss:$12 sps:$4 sm:$0xff]  }
  0x27   :  { %481 = vmatpush1.bf16.msra.mxu0 %v2580_v36  ;;  %544 = vmatpush1.bf16.msra.mxu1 %v2599_v44  ;;  %v2650_v36 = vld [vmem:[%s4089_s4 + $0xac] ss:$12 sps:$4 sm:$0xff]   ;;  %v2661_v44 = vld [vmem:[%s4089_s4 + $0xf0] ss:$12 sps:$4 sm:$0xff]  }
  0x28   :  { %482 = vmatprep.subr.bf16.mxu0 %v2582_v37  ;;  %545 = vmatprep.subr.bf16.mxu1 %v2602_v46  ;;  %v2648_v37 = vld [vmem:[%s4089_s4 + $0xa8] ss:$12 sps:$4 sm:$0xff]   ;;  %v2665_v46 = vld [vmem:[%s4089_s4 + $0x38] ss:$12 sps:$4 sm:$0xff]  }
  0x2b   :  { %483 = vmatpush1.bf16.msra.mxu0 %v2586_v41  ;;  %546 = vmatpush1.bf16.msra.mxu1 %v2605_v49  ;;  %v2656_v41 = vld [vmem:[%s4089_s4 + $0xd8] ss:$12 sps:$4 sm:$0xff]   ;;  %v2666_v49 = vld [vmem:[%s4089_s4 + $0x108] ss:$12 sps:$4 sm:$0xff]  }
  0x2c   :  { %484 = vmatprep.subr.bf16.mxu0 %v2588_v42  ;;  %547 = vmatprep.subr.bf16.mxu1 %v2608_v50  ;;  %v2663_v42 = vld [vmem:[%s4089_s4 + $0xf4] ss:$12 sps:$4 sm:$0xff]   ;;  %v2670_v50 = vld [vmem:[%s4089_s4 + $0x50] ss:$12 sps:$4 sm:$0xff]  }
  0x2f   :  { %485 = vmatpush1.bf16.msra.mxu0 %v2592_v47  ;;  %548 = vmatpush1.bf16.msra.mxu1 %v2611_v53  ;;  %v2668_v47 = vld [vmem:[%s4089_s4 + $0x10c] ss:$12 sps:$4 sm:$0xff]  }
  0x30   :  { %486 = vmatprep.subr.bf16.mxu0 %v2594_v48  ;;  %549 = vmatprep.subr.bf16.mxu1 %v2614_v54  ;;  %v2669_v48 = vld [vmem:[%s4089_s4 + $0x110] ss:$12 sps:$4 sm:$0xff]   ;;  %v2671_v53 = vld [vmem:[%s4089_s4 + $0x120] ss:$12 sps:$4 sm:$0xff]   ;;  %v2675_v54 = vld [vmem:[%s4089_s4 + $0x68] ss:$12 sps:$4 sm:$0xff]  }
  0x33   :  { %487 = vmatpush1.bf16.msra.mxu0 %v2598_v51  ;;  %550 = vmatpush1.bf16.msra.mxu1 %v2617_v57  ;;  %v2673_v51 = vld [vmem:[%s4089_s4 + $0x124] ss:$12 sps:$4 sm:$0xff]  }
  0x34   :  { %488 = vmatprep.subr.bf16.mxu0 %v2600_v52  ;;  %551 = vmatprep.subr.bf16.mxu1 %v2618_v58  ;;  %v2674_v52 = vld [vmem:[%s4089_s4 + $0x128] ss:$12 sps:$4 sm:$0xff]   ;;  %v2676_v57 = vld [vmem:[%s4089_s4 + $0x138] ss:$12 sps:$4 sm:$0xff]   ;;  %v2680_v58 = vld [vmem:[%s4089_s4 + $0x80] ss:$12 sps:$4 sm:$0xff]  }
  0x37   :  { %489 = vmatpush1.bf16.msra.mxu0 %v2604_v55  ;;  %552 = vmatpush1.bf16.msra.mxu1 %v2620_v61  ;;  %v2678_v55 = vld [vmem:[%s4089_s4 + $0x13c] ss:$12 sps:$4 sm:$0xff]  }
  0x38   :  { %490 = vmatprep.subr.bf16.mxu0 %v2606_v56  ;;  %553 = vmatprep.subr.bf16.mxu1 %v2621_v1  ;;  %v2679_v56 = vld [vmem:[%s4089_s4 + $0x140] ss:$12 sps:$4 sm:$0xff]   ;;  %v2681_v61 = vld [vmem:[%s4089_s4 + $0x150] ss:$12 sps:$4 sm:$0xff]   ;;  %v2686_v1 = vld [vmem:[%s4089_s4 + $0x168] ss:$12 sps:$4 sm:$0xff]  }
  0x3b   :  { %491 = vmatpush1.bf16.msra.mxu0 %v2610_v59  ;;  %554 = vmatpush1.bf16.msra.mxu1 %v2623_v2  ;;  %v2683_v59 = vld [vmem:[%s4089_s4 + $0x154] ss:$12 sps:$4 sm:$0xff]   ;;  %v2690_v2 = vld [vmem:[%s4089_s4 + $0xb0] ss:$12 sps:$4 sm:$0xff]  }
  0x3c   :  { %492 = vmatprep.subr.bf16.mxu0 %v2612_v60  ;;  %555 = vmatprep.subr.bf16.mxu1 %v2624_v6  ;;  %v2684_v60 = vld [vmem:[%s4089_s4 + $0x158] ss:$12 sps:$4 sm:$0xff]  }
  0x3d   :  { %v1648_v6 = vld [vmem:[%s4091_s1] sm:$0xff] }
  0x3f   :  { %493 = vmatpush1.bf16.msra.mxu0 %v2616_v62  ;;  %556 = vmatpush1.bf16.msra.mxu1 %v2626_v8  ;;  %v2685_v62 = vld [vmem:[%s4089_s4 + $0x98] ss:$12 sps:$4 sm:$0xff]   ;;  %v1650_v8 = vld [vmem:[%s4091_s1 + $0x10] sm:$0xff] }
  0x40   :  { %1401 = vmatprep.subr.bf16.mxu0 %v2629_v5  ;;  %2370 = vmatprep.subr.bf16.mxu1 %v2654_v12  ;;  %v2835_v5 = vmov 0   ;;  %v1651_v12 = vld [vmem:[%s4091_s1 + $0x18] sm:$0xff] }
  0x41   :  { %2527 = vset.pattern.permute.xlu0 %v2835_v5  ;;  %2528 = vset.pattern.permute.xlu1 %v2835_v5 }
  0x42   :  { %495 = vmatmul.mubr.bf16.vlgmr.msra.gmra.mrb[0].mxu0 %v3113_v7  ;;  %558 = vmatmul.mubr.bf16.vlgmr.msra.gmra.mrb[0].mxu1 %v3113_v7 }
  0x43   :  { %504 = vmatprep.mubr.bf16.mxu0 %v3121_v10  ;;  %1402 = vmatpush1.bf16.msra.mxu0 %v2627_v9  ;;  %v122_v9 = vlaneseq }
  0x44   :  { %1403 = vmatprep.subr.bf16.mxu0 %v2632_v11  ;;  %567 = vmatprep.mubr.bf16.mxu1 %v3121_v10  ;;  %v1649_v11 = vld [vmem:[%s4091_s1 + $0x8] sm:$0xff] }
  0x45   :  { %2371 = vmatpush3.bf16.msra.mxu1 %v2655_v19  ;;  %1659 = vperm.xlu0 %2527, %v1648_v6   ;;  %v3314_v13 = vshrl.u32 %v122_v9, 7 }
  0x46   :  { %2372 = vmatprep.subr.bf16.mxu1 %v2659_v20  ;;  %1669 = vperm.xlu1 %2528, %v1650_v8   ;;  %v2836_v20 = vmov 1  }
  0x47   :  { %1404 = vmatpush1.bf16.msra.mxu0 %v2630_v15  ;;  %v1653_v15 = vld [vmem:[%s4091_s1 + $0x28] sm:$0xff]  ;;  %v124_v16 = vsub.s32 0, %v3314_v13  ;;  %v136_v26 = vsub.s32 3, %v3314_v13 }
  0x48   :  { %1405 = vmatprep.subr.bf16.mxu0 %v2635_v18  ;;  %v128_v18 = vsub.s32 1, %v3314_v13 }
  0x49   :  { %2373 = vmatpush3.bf16.msra.mxu1 %v2660_v25  ;;  %1664 = vperm.xlu0 %2527, %v1649_v11   ;;  %v3329_v19 = vrot.slane %v120_v17, %v124_v16 }
  0x4a   :  { %505 = vmatmul.mubr.bf16.gmra.mrb[4].mxu0 %v3158_v22  ;;  %568 = vmatmul.mubr.bf16.gmra.mrb[4].mxu1 %v3158_v22 }
  0x4b   :  { %514 = vmatprep.mubr.bf16.mxu0 %v3164_v24  ;;  %1406 = vmatpush1.bf16.msra.mxu0 %v2633_v21  ;;  %v3333_v21 = vrot.slane %v120_v17, %v128_v18 }
  0x4c   :  { %1407 = vmatprep.subr.bf16.mxu0 %v2638_v23  ;;  %577 = vmatprep.mubr.bf16.mxu1 %v3164_v24  ;;  %v132_v23 = vsub.s32 2, %v3314_v13 }
  0x4d   :  { %2374 = vmatprep.subr.bf16.mxu1 %v2664_v43  ;;  %1674 = vperm.xlu1 %2528, %v1651_v12  }
  0x4e   :  { %2375 = vmatpush3.bf16.msra.mxu1 %v2665_v46  ;;  %1679 = vperm.xlu0 %2527, %v1652_v14  }
  0x4f   :  { %1408 = vmatpush1.bf16.msra.mxu0 %v2636_v28  ;;  %2376 = vmatprep.subr.bf16.mxu1 %v2669_v48 }
  0x50   :  { %1409 = vmatprep.subr.bf16.mxu0 %v2641_v29 }
  0x51   :  { %1684 = vperm.xlu1 %2528, %v1653_v15  }
  0x52   :  { %515 = vmatmul.mubr.bf16.gmra.mrb[8].mxu0 %v3187_v31  ;;  %578 = vmatmul.mubr.bf16.gmra.mrb[8].mxu1 %v3187_v31 }
  0x53   :  { %1410 = vmatpush1.bf16.msra.mxu0 %v2639_v30  ;;  %2377 = vmatpush3.bf16.msra.mxu1 %v2670_v50 }
  0x54   :  { %1411 = vmatprep.subr.bf16.mxu0 %v2644_v32  ;;  %2378 = vmatprep.subr.bf16.mxu1 %v2674_v52  ;;  %v3345_v32 = vrot.slane %v120_v17, %v132_v23 }
  0x55   :  { %2529 = vset.pattern.permute.xlu0 %v2836_v20  ;;  %2530 = vset.pattern.permute.xlu1 %v2836_v20 }
  0x56   :  { %1727 = vperm.xlu0 %2529, %v1648_v6   ;;  %1731 = vperm.xlu1 %2530, %v1649_v11  }
  0x57   :  { %1412 = vmatpush1.bf16.msra.mxu0 %v2642_v33  ;;  %2379 = vmatpush3.bf16.msra.mxu1 %v2675_v54 }
  0x58   :  { %1413 = vmatprep.subr.bf16.mxu0 %v2647_v34  ;;  %2380 = vmatprep.subr.bf16.mxu1 %v2679_v56 }
  0x5a   :  { %1735 = vperm.xlu1 %2530, %v1650_v8   ;;  %1739 = vperm.xlu0 %2529, %v1651_v12  }
  0x5b   :  { %1414 = vmatpush1.bf16.msra.mxu0 %v2645_v35  ;;  %2381 = vmatpush3.bf16.msra.mxu1 %v2680_v58 }
  0x5c   :  { %1415 = vmatprep.subr.bf16.mxu0 %v2650_v36  ;;  %2382 = vmatprep.subr.bf16.mxu1 %v2684_v60 }
  0x5e   :  { %1743 = vperm.xlu1 %2530, %v1652_v14   ;;  %1747 = vperm.xlu0 %2529, %v1653_v15  }
  0x5f   :  { %1416 = vmatpush1.bf16.msra.mxu0 %v2648_v37  ;;  %2383 = vmatpush3.bf16.msra.mxu1 %v2685_v62 }
  0x60   :  { %1417 = vmatprep.subr.bf16.mxu0 %v2653_v38  ;;  %2384 = vmatprep.subr.bf16.mxu1 %v2689_v0  ;;  %v3355_v38 = vrot.slane %v120_v17, %v136_v26 }
  0x63   :  { %1418 = vmatpush1.bf16.msra.mxu0 %v2651_v39  ;;  %2385 = vmatpush3.bf16.msra.mxu1 %v2690_v2 }
  0x64   :  { %1419 = vmatprep.subr.bf16.mxu0 %v2658_v40  ;;  %2404 = vmatprep.subr.bf16.mxu1 %v2694_v4 }
  0x67   :  { %1420 = vmatpush1.bf16.msra.mxu0 %v2656_v41 }
  0x68   :  { %1421 = vmatprep.subr.bf16.mxu0 %v2663_v42 }
  0x6b   :  { %1422 = vmatpush1.bf16.msra.mxu0 %v2661_v44 }
  0x6c   :  { %1423 = vmatprep.subr.bf16.mxu0 %v2668_v47 }
  0x6f   :  { %1424 = vmatpush1.bf16.msra.mxu0 %v2666_v49 }
  0x70   :  { %1425 = vmatprep.subr.bf16.mxu0 %v2673_v51 }
  0x73   :  { %1426 = vmatpush1.bf16.msra.mxu0 %v2671_v53 }
  0x74   :  { %1427 = vmatprep.subr.bf16.mxu0 %v2678_v55 }
  0x77   :  { %1428 = vmatpush1.bf16.msra.mxu0 %v2676_v57 }
  0x78   :  { %1429 = vmatprep.subr.bf16.mxu0 %v2683_v59 }
  0x7b   :  { %1430 = vmatpush1.bf16.msra.mxu0 %v2681_v61 }
  0x7c   :  { %1431 = vmatprep.subr.bf16.mxu0 %v2688_v63 }
  0x7f   :  { %1432 = vmatpush1.bf16.msra.mxu0 %v2686_v1 }
  0x80   :  { %1464 = vmatprep.subr.bf16.mxu0 %v2693_v3 }
 0x115   :  { %v496_v25 = vpop.f32.mrb[0].mxu0  ;;  %v559_v41 = vpop.f32.mrb[0].mxu1 }
 0x116   :  { %v3338_v27 = vadd.f32 %v496_v25, %v3329_v19  ;;  %v498_v28 = vpop.f32.mrb[1].mxu0  ;;  %v3360_v44 = vadd.f32 %v559_v41, %v3345_v32  ;;  %v561_v46 = vpop.f32.mrb[1].mxu1 }
 0x117   :  { %v3341_v29 = vadd.f32 %v498_v28, %v3333_v21  ;;  %v500_v30 = vpop.f32.mrb[2].mxu0  ;;  %v563_v48 = vpop.f32.mrb[2].mxu1  ;;  %v3364_v52 = vadd.f32 %v561_v46, %v3355_v38 }
 0x118   :  { %v612_v33 = vmin.f32 %v3338_v27, 0.0  ;;  %v3349_v34 = vadd.f32 %v500_v30, %v3329_v19  ;;  %v502_v35 = vpop.f32.mrb[3].mxu0  ;;  %v614_v51 = vmin.f32 %v3360_v44, 0.0  ;;  %v565_v53 = vpop.f32.mrb[3].mxu1  ;;  %v3377_v62 = vadd.f32 %v563_v48, %v3345_v32 }
 0x119   :  { %v613_v36 = vmin.f32 %v3341_v29, 0.0  ;;  %v3353_v37 = vadd.f32 %v502_v35, %v3333_v21  ;;  %v615_v1 = vmin.f32 %v3364_v52, 0.0  ;;  %vm588_vm0 = vcmp.gt.f32.partialorder %v3338_v27, 0.0 }
 0x11a   :  { %v636_v39 = vmul.f32 1.442695, %v612_v33  ;;  %v616_v40 = vmin.f32 %v3349_v34, 0.0  ;;  %v640_v58 = vmul.f32 1.442695, %v614_v51  ;;  %v618_v12 = vmin.f32 %v3377_v62, 0.0 }
 0x11b   :  { %v638_v42 = vmul.f32 1.442695, %v613_v36  ;;  %v617_v43 = vmin.f32 %v3353_v37, 0.0  ;;  %v3389_v14 = vadd.f32 %v565_v53, %v3355_v38  ;;  %v642_v20 = vmul.f32 1.442695, %v615_v1 }
 0x11c   :  { %2775 = vpow2.f32 %v636_v39  ;;  %v644_v47 = vmul.f32 1.442695, %v616_v40  ;;  %vm589_vm1 = vcmp.gt.f32.partialorder %v3341_v29, 0.0  ;;  %vm592_vm2 = vcmp.gt.f32.partialorder %v3349_v34, 0.0 }
 0x11d   :  { %2777 = vpow2.f32 %v638_v42  ;;  %v646_v49 = vmul.f32 1.442695, %v617_v43  ;;  %v506_v50 = vpop.f32.mrb[4].mxu0  ;;  %v569_v4 = vpop.f32.mrb[4].mxu1  ;;  %v648_v30 = vmul.f32 1.442695, %v618_v12 }
 0x11e   :  { %2779 = vpow2.f32 %v644_v47  ;;  %v3367_v54 = vadd.f32 %v506_v50, %v3329_v19  ;;  %v508_v55 = vpop.f32.mrb[5].mxu0  ;;  %v571_v8 = vpop.f32.mrb[5].mxu1  ;;  %v619_v33 = vmin.f32 %v3389_v14, 0.0  ;;  %vm593_vm3 = vcmp.gt.f32.partialorder %v3353_v37, 0.0 }
 0x11f   :  { %2781 = vpow2.f32 %v646_v49  ;;  %v3370_v56 = vadd.f32 %v508_v55, %v3333_v21  ;;  %v510_v57 = vpop.f32.mrb[6].mxu0  ;;  %v3391_v15 = vpop.f32.mrb[6].mxu1  ;;  %vm590_vm4 = vcmp.gt.f32.partialorder %v3360_v44, 0.0  ;;  %vm594_vm9 = vcmp.gt.f32.partialorder %v3377_v62, 0.0 }
 0x120   :  { %v620_v59 = vmin.f32 %v3367_v54, 0.0  ;;  %v3374_v60 = vadd.f32 %v510_v57, %v3329_v19  ;;  %v512_v61 = vpop.f32.mrb[7].mxu0  ;;  %2783 = vpow2.f32 %v640_v58  ;;  %v3393_v26 = vpop.f32.mrb[7].mxu1  ;;  %v650_v46 = vmul.f32 1.442695, %v619_v33 }
 0x121   :  { %v621_v63 = vmin.f32 %v3370_v56, 0.0  ;;  %v3381_v0 = vadd.f32 %v512_v61, %v3333_v21  ;;  %v3415_v58 = vadd.f32 %v569_v4, %v3345_v32  ;;  %vm597_vm5 = vcmp.gt.f32.partialorder %v3370_v56, 0.0 }
 0x122   :  { %v652_v2 = vmul.f32 1.442695, %v620_v59  ;;  %v624_v3 = vmin.f32 %v3374_v60, 0.0  ;;  %vm600_vm6 = vcmp.gt.f32.partialorder %v3374_v60, 0.0  ;;  %vm596_vm7 = vcmp.gt.f32.partialorder %v3367_v54, 0.0 }
 0x123   :  { %v654_v5 = vmul.f32 1.442695, %v621_v63  ;;  %v625_v6 = vmin.f32 %v3381_v0, 0.0  ;;  %vm601_vm8 = vcmp.gt.f32.partialorder %v3381_v0, 0.0  ;;  %vm591_vm10 = vcmp.gt.f32.partialorder %v3364_v52, 0.0 }
 0x124   :  { %2785 = vpow2.f32 %v652_v2  ;;  %v660_v11 = vmul.f32 1.442695, %v624_v3  ;;  %vm595_vm11 = vcmp.gt.f32.partialorder %v3389_v14, 0.0 }
 0x125   :  { %2787 = vpow2.f32 %v654_v5  ;;  %v662_v17 = vmul.f32 1.442695, %v625_v6  ;;  %v516_v25 = vpop.f32.mrb[8].mxu0 }
 0x126   :  { %v2776_v28 = vpop.eup %2775  ;;  %2789 = vpow2.f32 %v660_v11  ;;  %v518_v35 = vpop.f32.mrb[9].mxu0  ;;  %v3399_v40 = vadd.f32 %v516_v25, %v3329_v19 }
 0x127   :  { %v2778_v36 = vpop.eup %2777  ;;  %v2219_v39 = vadd.f32 -1.0, %v2776_v28  ;;  %2791 = vpow2.f32 %v662_v17  ;;  %v3402_v41 = vadd.f32 %v518_v35, %v3333_v21  ;;  %v520_v42 = vpop.f32.mrb[10].mxu0  ;;  %v3431_v17 = vadd.f32 %v571_v8, %v3355_v38 }
 0x128   :  { %v2780_v43 = vpop.eup %2779  ;;  %2793 = vpow2.f32 %v648_v30  ;;  %v3406_v47 = vadd.f32 %v520_v42, %v3329_v19  ;;  %v522_v48 = vpop.f32.mrb[11].mxu0  ;;  %v628_v51 = vmin.f32 %v3399_v40, 0.0  ;;  %v2220_v55 = vadd.f32 -1.0, %v2778_v36  ;;  %v2691_v30 = vld [vmem:[%s4089_s4 + $0x180] ss:$12 sps:$4 sm:$0xff]  }
 0x129   :  { %v2782_v49 = vpop.eup %2781  ;;  %v2223_v50 = vadd.f32 -1.0, %v2780_v43  ;;  %2795 = vpow2.f32 %v642_v20  ;;  %v708_v53 = vsel %vm588_vm0, %v3338_v27, %v2219_v39  ;;  %v629_v57 = vmin.f32 %v3402_v41, 0.0  ;;  %v3417_v19 = vpop.f32.mrb[8].mxu1  ;;  %v2695_v42 = vld [vmem:[%s4089_s4 + $0x188] ss:$12 sps:$4 sm:$0xff]  }
 0x12a   :  { %v2784_v59 = vpop.eup %2783  ;;  %v2224_v63 = vadd.f32 -1.0, %v2782_v49  ;;  %v668_v1 = vmul.f32 1.442695, %v628_v51  ;;  %v632_v2 = vmin.f32 %v3406_v47, 0.0  ;;  %v3423_v3 = vpop.f32.mrb[9].mxu1  ;;  %2797 = vpow2.f32 %v650_v46 }
 0x12b   :  { %v712_v61 = vsel %vm592_vm2, %v3349_v34, %v2223_v50  ;;  %v670_v5 = vmul.f32 1.442695, %v629_v57  ;;  %v3426_v6 = vadd.f32 %v522_v48, %v3333_v21  ;;  %v3428_v4 = vpop.f32.mrb[10].mxu1  ;;  %v2221_v11 = vadd.f32 -1.0, %v2784_v59  ;;  %v2698_v49 = vld [vmem:[%s4089_s4 + $0x19c] ss:$12 sps:$4 sm:$0xff]  }
 0x12c   :  { %v732_v27 = vpack.c.bf16 %v712_v61, %v708_v53  ;;  %2799 = vpow2.f32 %v668_v1  ;;  %v676_v12 = vmul.f32 1.442695, %v632_v2  ;;  %v3433_v34 = vpop.f32.mrb[11].mxu1  ;;  %v709_v8 = vsel %vm589_vm1, %v3341_v29, %v2220_v55  ;;  %v2699_v50 = vld [vmem:[%s4089_s4 + $0x260] ss:$12 sps:$4 sm:$0xff]  }
 0x12d   :  { %2801 = vpow2.f32 %v670_v5  ;;  %v633_v25 = vmin.f32 %v3426_v6, 0.0  ;;  %v713_v28 = vsel %vm593_vm3, %v3353_v37, %v2224_v63  ;;  %v622_v39 = vmin.f32 %v3415_v58, 0.0  ;;  %v2700_v5 = vld [vmem:[%s4089_s4 + $0x1a0] ss:$12 sps:$4 sm:$0xff]  }
 0x12e   :  { %v2786_v20 = vpop.eup %2785  ;;  %2803 = vpow2.f32 %v676_v12  ;;  %v733_v36 = vpack.c.bf16 %v713_v28, %v709_v8  ;;  %v710_v37 = vsel %vm590_vm4, %v3360_v44, %v2221_v11  ;;  %v623_v46 = vmin.f32 %v3431_v17, 0.0  ;;  %v2704_v28 = vld [vmem:[%s4089_s4 + $0x278] ss:$12 sps:$4 sm:$0xff]  }
 0x12f   :  { %v2788_v21 = vpop.eup %2787  ;;  %v678_v35 = vmul.f32 1.442695, %v633_v25  ;;  %v3460_v48 = vadd.f32 %v3391_v15, %v3345_v32  ;;  %v656_v44 = vmul.f32 1.442695, %v622_v39  ;;  %v3470_v55 = vadd.f32 %v3393_v26, %v3355_v38  ;;  %v2696_v15 = vld [vmem:[%s4089_s4 + $0x198] ss:$12 sps:$4 sm:$0xff]  }
 0x130   :  { %v2790_v33 = vpop.eup %2789  ;;  %v2228_v43 = vadd.f32 -1.0, %v2788_v21  ;;  %1433 = vmatprep.mubr.bf16.mxu0 %v733_v36  ;;  %1559 = vmatprep.mubr.bf16.mxu1 %v733_v36  ;;  %vm604_vm12 = vcmp.gt.f32.partialorder %v3399_v40, 0.0  ;;  %vm605_vm13 = vcmp.gt.f32.partialorder %v3402_v41, 0.0  ;;  %v658_v63 = vmul.f32 1.442695, %v623_v46 }
 0x131   :  { %v2792_v29 = vpop.eup %2791  ;;  %2805 = vpow2.f32 %v678_v35  ;;  %v2231_v59 = vadd.f32 -1.0, %v2790_v33  ;;  %1434 = vmatmul.mubr.bf16.vlgmr.msra.gmra.mrb[12].mxu0 %v732_v27  ;;  %1560 = vmatmul.mubr.bf16.vlgmr.msra.gmra.mrb[12].mxu1 %v732_v27  ;;  %v626_v26 = vmin.f32 %v3460_v48, 0.0  ;;  %v2227_v1 = vadd.f32 -1.0, %v2786_v20  ;;  %v2703_v20 = vld [vmem:[%s4089_s4 + $0x1b4] ss:$12 sps:$4 sm:$0xff]  }
 0x132   :  { %v2794_v51 = vpop.eup %2793  ;;  %v2232_v53 = vadd.f32 -1.0, %v2792_v29  ;;  %vm608_vm14 = vcmp.gt.f32.partialorder %v3406_v47, 0.0  ;;  %2807 = vpow2.f32 %v656_v44  ;;  %1465 = vmatpush1.bf16.msra.mxu0 %v2691_v30  ;;  %2405 = vmatpush3.bf16.msra.mxu1 %v2695_v42  ;;  %v627_v2 = vmin.f32 %v3470_v55, 0.0 }
 0x133   :  { %v2796_v57 = vpop.eup %2795  ;;  %v2225_v61 = vadd.f32 -1.0, %v2794_v51  ;;  %2809 = vpow2.f32 %v658_v63  ;;  %v664_v27 = vmul.f32 1.442695, %v626_v26  ;;  %1466 = vmatprep.subr.bf16.mxu0 %v2698_v49  ;;  %2406 = vmatprep.subr.bf16.mxu1 %v2699_v50  ;;  %v717_v12 = vsel %vm597_vm5, %v3370_v56, %v2228_v43  ;;  %v2705_v43 = vld [vmem:[%s4089_s4 + $0x1b8] ss:$12 sps:$4 sm:$0xff]  }
 0x134   :  { %v2798_v25 = vpop.eup %2797  ;;  %v666_v8 = vmul.f32 1.442695, %v627_v2  ;;  %v3504_v30 = vadd.f32 %v3417_v19, %v3345_v32  ;;  %v2222_v33 = vadd.f32 -1.0, %v2796_v57  ;;  %v720_v36 = vsel %vm600_vm6, %v3374_v60, %v2231_v59  ;;  %v2709_v51 = vld [vmem:[%s4089_s4 + $0x290] ss:$12 sps:$4 sm:$0xff]  }
 0x135   :  { %v714_v11 = vsel %vm594_vm9, %v3377_v62, %v2225_v61  ;;  %v721_v62 = vsel %vm601_vm8, %v3381_v0, %v2232_v53  ;;  %2811 = vpow2.f32 %v664_v27  ;;  %v2701_v0 = vld [vmem:[%s4089_s4 + $0x1b0] ss:$12 sps:$4 sm:$0xff]   ;;  %v716_v29 = vsel %vm596_vm7, %v3367_v54, %v2227_v1  ;;  %v2708_v54 = vld [vmem:[%s4089_s4 + $0x1cc] ss:$12 sps:$4 sm:$0xff]   ;;  %v2714_v26 = vld [vmem:[%s4089_s4 + $0x2a8] ss:$12 sps:$4 sm:$0xff]  }
 0x136   :  { %v3494_v21 = vpack.c.bf16 %v714_v11, %v710_v37  ;;  %v2800_v56 = vpop.eup %2799  ;;  %v737_v35 = vpack.c.bf16 %v721_v62, %v717_v12  ;;  %2813 = vpow2.f32 %v666_v8  ;;  %1467 = vmatpush1.bf16.msra.mxu0 %v2696_v15  ;;  %2407 = vmatpush3.bf16.msra.mxu1 %v2700_v5  ;;  %v630_v19 = vmin.f32 %v3504_v30, 0.0  ;;  %v2710_v59 = vld [vmem:[%s4089_s4 + $0x1d0] ss:$12 sps:$4 sm:$0xff]  }
 0x137   :  { %v2802_v39 = vpop.eup %2801  ;;  %v2235_v42 = vadd.f32 -1.0, %v2800_v56  ;;  %1468 = vmatprep.subr.bf16.mxu0 %v2703_v20  ;;  %v736_v46 = vpack.c.bf16 %v720_v36, %v716_v29  ;;  %v3521_v49 = vadd.f32 %v3423_v3, %v3355_v38  ;;  %v3525_v50 = vadd.f32 %v3428_v4, %v3345_v32  ;;  %2408 = vmatprep.subr.bf16.mxu1 %v2704_v28  ;;  %v2706_v32 = vld [vmem:[%s4089_s4 + $0x1c8] ss:$12 sps:$4 sm:$0xff]   ;;  %v2713_v63 = vld [vmem:[%s4089_s4 + $0x1e4] ss:$12 sps:$4 sm:$0xff]  }
 0x138   :  { %v2804_v60 = vpop.eup %2803  ;;  %v2236_v37 = vadd.f32 -1.0, %v2802_v39  ;;  %1443 = vmatprep.mubr.bf16.mxu0 %v737_v35  ;;  %v2226_v53 = vadd.f32 -1.0, %v2798_v25  ;;  %1567 = vmatprep.mubr.bf16.mxu1 %v737_v35  ;;  %v672_v15 = vmul.f32 1.442695, %v630_v19  ;;  %v3535_v3 = vadd.f32 %v3433_v34, %v3355_v38  ;;  %v2718_v39 = vld [vmem:[%s4089_s4 + $0x1fc] ss:$12 sps:$4 sm:$0xff]  }
 0x139   :  { %v2239_v44 = vadd.f32 -1.0, %v2804_v60  ;;  %vm609_vm15 = vcmp.gt.f32.partialorder %v3426_v6, 0.0  ;;  %vm598_vm0 = vcmp.gt.f32.partialorder %v3415_v58, 0.0  ;;  %1444 = vmatmul.mubr.bf16.gmra.mrb[16].mxu0 %v736_v46  ;;  %1568 = vmatmul.mubr.bf16.gmra.mrb[16].mxu1 %v736_v46  ;;  %v631_v4 = vmin.f32 %v3521_v49, 0.0  ;;  %v2720_v60 = vld [vmem:[%s4089_s4 + $0x200] ss:$12 sps:$4 sm:$0xff]  }
 0x13a   :  { %v634_v57 = vmin.f32 %v3525_v50, 0.0  ;;  %2815 = vpow2.f32 %v672_v15  ;;  %1469 = vmatpush1.bf16.msra.mxu0 %v2701_v0  ;;  %2409 = vmatpush3.bf16.msra.mxu1 %v2705_v43  ;;  %v635_v34 = vmin.f32 %v3535_v3, 0.0  ;;  %v725_v61 = vsel %vm605_vm13, %v3402_v41, %v2236_v37  ;;  %v2716_v43 = vld [vmem:[%s4089_s4 + $0x1f8] ss:$12 sps:$4 sm:$0xff]  }
 0x13b   :  { %v2806_v38 = vpop.eup %2805  ;;  %v724_v1 = vsel %vm604_vm12, %v3399_v40, %v2235_v42  ;;  %v674_v5 = vmul.f32 1.442695, %v631_v4  ;;  %1470 = vmatprep.subr.bf16.mxu0 %v2708_v54  ;;  %2410 = vmatprep.subr.bf16.mxu1 %v2709_v51  ;;  %v728_v41 = vsel %vm608_vm14, %v3406_v47, %v2239_v44  ;;  %v711_v25 = vsel %vm591_vm10, %v3364_v52, %v2222_v33  ;;  %v2711_v52 = vld [vmem:[%s4089_s4 + $0x1e0] ss:$12 sps:$4 sm:$0xff]   ;;  %v2724_v37 = vld [vmem:[%s4089_s4 + $0x2d8] ss:$12 sps:$4 sm:$0xff]  }
 0x13c   :  { %v2240_v2 = vadd.f32 -1.0, %v2806_v38  ;;  %v680_v11 = vmul.f32 1.442695, %v634_v57  ;;  %v2808_v27 = vpop.eup %2807  ;;  %v682_v12 = vmul.f32 1.442695, %v635_v34  ;;  %v740_v20 = vpack.c.bf16 %v728_v41, %v724_v1 }
 0x13d   :  { %v715_v40 = vsel %vm595_vm11, %v3389_v14, %v2226_v53  ;;  %v2810_v8 = vpop.eup %2809  ;;  %v2229_v62 = vadd.f32 -1.0, %v2808_v27  ;;  %2817 = vpow2.f32 %v674_v5  ;;  %vm599_vm1 = vcmp.gt.f32.partialorder %v3431_v17, 0.0  ;;  %v2715_v14 = vld [vmem:[%s4089_s4 + $0x1e8] ss:$12 sps:$4 sm:$0xff]   ;;  %v2719_v42 = vld [vmem:[%s4089_s4 + $0x2c0] ss:$12 sps:$4 sm:$0xff]  }
 0x13e   :  { %v729_v28 = vsel %vm609_vm15, %v3426_v6, %v2240_v2  ;;  %v735_v56 = vpack.c.bf16 %v715_v40, %v711_v25  ;;  %v2230_v47 = vadd.f32 -1.0, %v2810_v8  ;;  %2819 = vpow2.f32 %v680_v11  ;;  %1471 = vmatpush1.bf16.msra.mxu0 %v2706_v32  ;;  %2411 = vmatpush3.bf16.msra.mxu1 %v2710_v59  ;;  %v2721_v44 = vld [vmem:[%s4089_s4 + $0x210] ss:$12 sps:$4 sm:$0xff]   ;;  %v2728_v32 = vld [vmem:[%s4089_s4 + $0x22c] ss:$12 sps:$4 sm:$0xff]   ;;  %v2734_v5 = vld [vmem:[%s4090_s6 + $0x40] sm:$0xff]  }
 0x13f   :  { %v741_v35 = vpack.c.bf16 %v729_v28, %v725_v61  ;;  %v2812_v33 = vpop.eup %2811  ;;  %vm602_vm2 = vcmp.gt.f32.partialorder %v3460_v48, 0.0  ;;  %2821 = vpow2.f32 %v682_v12  ;;  %1472 = vmatprep.subr.bf16.mxu0 %v2713_v63  ;;  %2412 = vmatprep.subr.bf16.mxu1 %v2714_v26  ;;  %vm603_vm3 = vcmp.gt.f32.partialorder %v3470_v55, 0.0  ;;  %v2729_v4 = vld [vmem:[%s4089_s4 + $0x2f0] ss:$12 sps:$4 sm:$0xff]   ;;  %v2726_v26 = vld [vmem:[%s4089_s4 + $0x228] ss:$12 sps:$4 sm:$0xff]  }
 0x140   :  { %v2814_v6 = vpop.eup %2813  ;;  %v2233_v36 = vadd.f32 -1.0, %v2812_v33  ;;  %v718_v0 = vsel %vm598_vm0, %v3415_v58, %v2229_v62  ;;  %v719_v29 = vsel %vm599_vm1, %v3431_v17, %v2230_v47  ;;  %v2723_v17 = vld [vmem:[%s4089_s4 + $0x214] ss:$12 sps:$4 sm:$0xff]   ;;  %vm606_vm4 = vcmp.gt.f32.partialorder %v3504_v30, 0.0  ;;  %v2730_v1 = vld [vmem:[%s4089_s4 + $0x230] ss:$12 sps:$4 sm:$0xff]  }
 0x141   :  { %1453 = vmatprep.mubr.bf16.mxu0 %v741_v35  ;;  %1575 = vmatprep.mubr.bf16.mxu1 %v741_v35  ;;  %v2234_v19 = vadd.f32 -1.0, %v2814_v6  ;;  %vm607_vm5 = vcmp.gt.f32.partialorder %v3521_v49, 0.0  ;;  %vm610_vm6 = vcmp.gt.f32.partialorder %v3525_v50, 0.0  ;;  %vm611_vm7 = vcmp.gt.f32.partialorder %v3535_v3, 0.0  ;;  %v2736_v25 = vld [vmem:[%s4089_s4 + $0x258] ss:$12 sps:$4 sm:$0xff]  }
 0x142   :  { %1454 = vmatmul.mubr.bf16.gmra.mrb[20].mxu0 %v740_v20  ;;  %1576 = vmatmul.mubr.bf16.gmra.mrb[20].mxu1 %v740_v20  ;;  %v722_v58 = vsel %vm602_vm2, %v3460_v48, %v2233_v36  ;;  %v2735_v20 = vld [vmem:[%s4090_s6] sm:$0xff]   ;;  %v2740_v40 = vld [vmem:[%s4090_s6 + $0x8] sm:$0xff]   ;;  %v2744_v62 = vld [vmem:[%s4090_s6 + $0x50] sm:$0xff]   ;;  %vm2838_vm8 = vmmov 0   ;;  %vm2074_vm1 = vcmask 523264  }
 0x143   :  { %1473 = vmatpush1.bf16.msra.mxu0 %v2711_v52  ;;  %2413 = vmatpush3.bf16.msra.mxu1 %v2715_v14  ;;  %v723_v46 = vsel %vm603_vm3, %v3470_v55, %v2234_v19  ;;  %v3611_v54 = vpack.c.bf16 %v722_v58, %v718_v0  ;;  %v2725_v55 = vld [vmem:[%s4089_s4 + $0x218] ss:$12 sps:$4 sm:$0xff]   ;;  %v2743_v8 = vld [vmem:[%s4089_s4 + $0x274] ss:$12 sps:$4 sm:$0xff]   ;;  %v2741_v28 = vld [vmem:[%s4089_s4 + $0x270] ss:$12 sps:$4 sm:$0xff]  }
 0x144   :  { %1496 = vmatprep.mubr.bf16.mxu0 %v735_v56  ;;  %1616 = vmatprep.mubr.bf16.mxu1 %v735_v56  ;;  %v2816_v51 = vpop.eup %2815  ;;  %v3613_v48 = vpack.c.bf16 %v723_v46, %v719_v29  ;;  %v2745_v56 = vld [vmem:[%s4090_s6 + $0x10] sm:$0xff]   ;;  %v2748_v47 = vld [vmem:[%s4089_s4 + $0x28c] ss:$12 sps:$4 sm:$0xff]   ;;  %v2754_v6 = vld [vmem:[%s4090_s6 + $0x60] sm:$0xff]  }
 0x145   :  { %1474 = vmatprep.subr.bf16.mxu0 %v2718_v39  ;;  %2414 = vmatprep.subr.bf16.mxu1 %v2719_v42  ;;  %v2237_v53 = vadd.f32 -1.0, %v2816_v51  ;;  %v2749_v35 = vld [vmem:[%s4090_s6 + $0x58] sm:$0xff]   ;;  %v2746_v52 = vld [vmem:[%s4089_s4 + $0x288] ss:$12 sps:$4 sm:$0xff]   ;;  %v2753_v33 = vld [vmem:[%s4089_s4 + $0x2a4] ss:$12 sps:$4 sm:$0xff]  }
 0x146   :  { %v2750_v14 = vld [vmem:[%s4090_s6 + $0x18] sm:$0xff]   ;;  %v2751_v36 = vld [vmem:[%s4089_s4 + $0x2a0] ss:$12 sps:$4 sm:$0xff]   ;;  %v2765_v58 = vld [vmem:[%s4090_s6 + $0x30] sm:$0xff]  }
 0x147   :  { %1475 = vmatpush1.bf16.msra.mxu0 %v2716_v43  ;;  %2415 = vmatpush3.bf16.msra.mxu1 %v2720_v60  ;;  %v2818_v15 = vpop.eup %2817  ;;  %v726_v61 = vsel %vm606_vm4, %v3504_v30, %v2237_v53  ;;  %v2733_v30 = vld [vmem:[%s4089_s4 + $0x244] ss:$12 sps:$4 sm:$0xff]   ;;  %v2758_v42 = vld [vmem:[%s4089_s4 + $0x2bc] ss:$12 sps:$4 sm:$0xff]   ;;  %v2763_v43 = vld [vmem:[%s4089_s4 + $0x2d4] ss:$12 sps:$4 sm:$0xff]  }
 0x148   :  { %1476 = vmatprep.subr.bf16.mxu0 %v2723_v17  ;;  %2416 = vmatprep.subr.bf16.mxu1 %v2724_v37  ;;  %v2820_v57 = vpop.eup %2819  ;;  %v2238_v59 = vadd.f32 -1.0, %v2818_v15  ;;  %v2755_v39 = vld [vmem:[%s4090_s6 + $0x20] sm:$0xff]   ;;  %v2759_v0 = vld [vmem:[%s4090_s6 + $0x68] sm:$0xff]   ;;  %v2764_v60 = vld [vmem:[%s4090_s6 + $0x70] sm:$0xff]  }
 0x149   :  { %v2822_v38 = vpop.eup %2821  ;;  %v2241_v34 = vadd.f32 -1.0, %v2820_v57  ;;  %v2756_v19 = vld [vmem:[%s4089_s4 + $0x2b8] ss:$12 sps:$4 sm:$0xff]   ;;  %v2760_v29 = vld [vmem:[%s4090_s6 + $0x28] sm:$0xff]  }
 0x14a   :  { %v2242_v63 = vadd.f32 -1.0, %v2822_v38  ;;  %v727_v2 = vsel %vm607_vm5, %v3521_v49, %v2238_v59  ;;  %v2731_v49 = vld [vmem:[%s4089_s4 + $0x240] ss:$12 sps:$4 sm:$0xff]   ;;  %v2769_v37 = vld [vmem:[%s4090_s6 + $0x78] sm:$0xff]   ;;  %v2766_v46 = vld [vmem:[%s4089_s4 + $0x2e8] ss:$12 sps:$4 sm:$0xff]  }
 0x14b   :  { %1477 = vmatpush1.bf16.msra.mxu0 %v2721_v44  ;;  %2417 = vmatpush3.bf16.msra.mxu1 %v2725_v55  ;;  %v730_v11 = vsel %vm610_vm6, %v3525_v50, %v2241_v34  ;;  %v2738_v50 = vld [vmem:[%s4089_s4 + $0x25c] ss:$12 sps:$4 sm:$0xff]   ;;  %v2768_v17 = vld [vmem:[%s4089_s4 + $0x2ec] ss:$12 sps:$4 sm:$0xff]  }
 0x14c   :  { %1478 = vmatprep.subr.bf16.mxu0 %v2728_v32  ;;  %2418 = vmatprep.subr.bf16.mxu1 %v2729_v4  ;;  %v731_v41 = vsel %vm611_vm7, %v3535_v3, %v2242_v63  ;;  %v3651_v27 = vpack.c.bf16 %v730_v11, %v726_v61  ;;  %v2739_v3 = vld [vmem:[%s4090_s6 + $0x48] sm:$0xff]   ;;  %v2770_v51 = vld [vmem:[%s4090_s6 + $0x38] sm:$0xff]   ;;  %v3779_v61 = vpop.permute.xlu0 %1659  ;;  %v3786_v11 = vand.u32 127, %v122_v9 }
 0x14d   :  { %v3653_v12 = vpack.c.bf16 %v731_v41, %v727_v2  ;;  %v3781_v2 = vpop.permute.xlu1 %1669 }
 0x14f   :  { %1479 = vmatpush1.bf16.msra.mxu0 %v2726_v26  ;;  %2419 = vmatpush3.bf16.msra.mxu1 %v2730_v1 }
 0x150   :  { %1480 = vmatprep.subr.bf16.mxu0 %v2733_v30  ;;  %2438 = vmatprep.subr.bf16.mxu1 %v2734_v5  ;;  %v3788_v41 = vpop.permute.xlu0 %1664 }
 0x152   :  { %1617 = vmatmul.mubr.bf16.vlgmr.msra.gmra.mrb[24].mxu1 %v3494_v21 }
 0x153   :  { %1481 = vmatpush1.bf16.msra.mxu0 %v2731_v49  ;;  %1624 = vmatprep.mubr.bf16.mxu1 %v3613_v48  ;;  %v3796_v49 = vld [vmem:[%s4094_s5] sm:$0x7] }
 0x154   :  { %2439 = vmatpush3.bf16.msra.mxu1 %v2735_v20  ;;  %1482 = vmatprep.subr.bf16.mxu0 %v2738_v50  ;;  %v3798_v50 = vpop.permute.xlu0 %1679 }
 0x155   :  { %2440 = vmatprep.subr.bf16.mxu1 %v2739_v3  ;;  %v885_v3 = vrot.slane %v3796_v49, %v132_v23 }
 0x157   :  { %1483 = vmatpush1.bf16.msra.mxu0 %v2736_v25 }
 0x158   :  { %2441 = vmatpush3.bf16.msra.mxu1 %v2740_v40  ;;  %1484 = vmatprep.subr.bf16.mxu0 %v2743_v8 }
 0x159   :  { %2442 = vmatprep.subr.bf16.mxu1 %v2744_v62 }
 0x15a   :  { %1625 = vmatmul.mubr.bf16.gmra.mrb[28].mxu1 %v3611_v54 }
 0x15b   :  { %1485 = vmatpush1.bf16.msra.mxu0 %v2741_v28  ;;  %1632 = vmatprep.mubr.bf16.mxu1 %v3653_v12 }
 0x15c   :  { %2443 = vmatpush3.bf16.msra.mxu1 %v2745_v56  ;;  %1486 = vmatprep.subr.bf16.mxu0 %v2748_v47 }
 0x15d   :  { %2444 = vmatprep.subr.bf16.mxu1 %v2749_v35  ;;  %v3813_v35 = vpop.permute.xlu0 %1727 }
 0x15f   :  { %1487 = vmatpush1.bf16.msra.mxu0 %v2746_v52 }
 0x160   :  { %2445 = vmatpush3.bf16.msra.mxu1 %v2750_v14  ;;  %1488 = vmatprep.subr.bf16.mxu0 %v2753_v33 }
 0x161   :  { %2446 = vmatprep.subr.bf16.mxu1 %v2754_v6 }
 0x162   :  { %1633 = vmatmul.mubr.bf16.gmra.mrb[32].mxu1 %v3651_v27 }
 0x163   :  { %1489 = vmatpush1.bf16.msra.mxu0 %v2751_v36  ;;  %1971 = vmatprep.mubr.bf16.mxu1 %v3034_v45  ;;  %v2761_v45 = vld [vmem:[%s4089_s4 + $0x2d0] ss:$12 sps:$4 sm:$0xff]  }
 0x164   :  { %2447 = vmatpush3.bf16.msra.mxu1 %v2755_v39  ;;  %1490 = vmatprep.subr.bf16.mxu0 %v2758_v42 }
 0x165   :  { %2448 = vmatprep.subr.bf16.mxu1 %v2759_v0 }
 0x167   :  { %1491 = vmatpush1.bf16.msra.mxu0 %v2756_v19 }
 0x168   :  { %2449 = vmatpush3.bf16.msra.mxu1 %v2760_v29  ;;  %1492 = vmatprep.subr.bf16.mxu0 %v2763_v43 }
 0x169   :  { %2450 = vmatprep.subr.bf16.mxu1 %v2764_v60 }
 0x16b   :  { %1493 = vmatpush1.bf16.msra.mxu0 %v2761_v45 }
 0x16c   :  { %2451 = vmatpush3.bf16.msra.mxu1 %v2765_v58  ;;  %1494 = vmatprep.subr.bf16.mxu0 %v2768_v17 }
 0x16d   :  { %2452 = vmatprep.subr.bf16.mxu1 %v2769_v37 }
 0x16f   :  { %1495 = vmatpush1.bf16.msra.mxu0 %v2766_v46 }
 0x170   :  { %2453 = vmatpush3.bf16.msra.mxu1 %v2770_v51 }
 0x172   :  { %1497 = vmatmul.mubr.bf16.vlgmr.msra.gmra.mrb[12].mxu0 %v3494_v21  ;;  %v2837_v21 = vmov 0.0  }
 0x173   :  { %1972 = vmatmul.mubr.bf16.vlgmr.msra.gmra.mrb[36].mxu1 %v3113_v7  ;;  %1506 = vmatprep.mubr.bf16.mxu0 %v3613_v48  ;;  %v2771_v7 = vld [vmem:[%s4093_s8] sm:$0xff]  }
 0x174   :  { %1979 = vmatprep.mubr.bf16.mxu1 %v3121_v10  ;;  %2479 = vmatprep.subr.bf16.mxu1 %v2837_v21  ;;  %v2772_v10 = vld [vmem:[%s4093_s8 + $0x8] sm:$0xff]  }
 0x175   :  { %2480 = vmatpush3.bf16.msra.mxu1 %v2771_v7 }
 0x176   :  { %2481 = vmatprep.subr.bf16.mxu1 %v2837_v21 }
 0x179   :  { %2482 = vmatpush3.bf16.msra.mxu1 %v2772_v10 }
 0x17a   :  { %1507 = vmatmul.mubr.bf16.gmra.mrb[16].mxu0 %v3611_v54  ;;  %2483 = vmatprep.subr.bf16.mxu1 %v2837_v21 }
 0x17b   :  { %1980 = vmatmul.mubr.bf16.gmra.mrb[40].mxu1 %v3158_v22  ;;  %1516 = vmatprep.mubr.bf16.mxu0 %v3653_v12  ;;  %v2773_v22 = vld [vmem:[%s4093_s8 + $0x10] sm:$0xff]   ;;  %v3791_v12 = vpop.permute.xlu1 %1674 }
 0x17c   :  { %1987 = vmatprep.mubr.bf16.mxu1 %v3164_v24  ;;  %v2774_v24 = vld [vmem:[%s4093_s8 + $0x18] sm:$0xff]  }
 0x17d   :  { %2484 = vmatpush3.bf16.msra.mxu1 %v2773_v22 }
 0x17e   :  { %2485 = vmatprep.subr.bf16.mxu1 %v2837_v21 }
 0x17f   :  { %v3803_v9 = vpop.permute.xlu1 %1684 }
 0x181   :  { %2486 = vmatpush3.bf16.msra.mxu1 %v2774_v24 }
 0x182   :  { %1517 = vmatmul.mubr.bf16.gmra.mrb[20].mxu0 %v3651_v27  ;;  %v1644_v27 = vadd.s32 256, %v3786_v11 }
 0x183   :  { %1988 = vmatmul.mubr.bf16.gmra.mrb[44].mxu1 %v3187_v31  ;;  %v3818_v36 = vpop.permute.xlu1 %1731 }
 0x184   :  { %2487 = vmatprep.mubr.msk.bf16.mxu1 %vm2838_vm8, %v2837_v21  ;;  %v1647_v20 = vand.u32 3, %v1644_v27 }
 0x186   :  { %vm3805_vm9 = vcmp.eq.s32.totalorder %v1647_v20, 0  ;;  %vm3809_vm10 = vcmp.eq.s32.totalorder %v1647_v20, 1 }
 0x187   :  { %v1689_v23 = vsel %vm3805_vm9, %v3779_v61, 0.0  ;;  %v1692_v39 = vsel %vm3805_vm9, %v3788_v41, 0.0  ;;  %v1752_v42 = vsel %vm3809_vm10, %v3813_v35, 0.0  ;;  %v1755_v29 = vsel %vm3809_vm10, %v3818_v36, 0.0  ;;  %v3832_v7 = vpop.permute.xlu1 %1735 }
 0x188   :  { %v1695_v10 = vsel %vm3805_vm9, %v3781_v2, 0.0  ;;  %v1701_v20 = vsel %vm3805_vm9, %v3798_v50, 0.0 }
 0x18b   :  { %v3854_v27 = vpop.permute.xlu1 %1743 }
 0x204   :  { %v2386_v31 = vpop.f32.mrb[12].mxu1 }
 0x205   :  { %v2387_v54 = vpop.f32.mrb[13].mxu1 }
 0x206   :  { %v2388_v48 = vadd.f32 %v2387_v54, %v2386_v31  ;;  %v2389_v53 = vpop.f32.mrb[14].mxu1 }
 0x207   :  { %v2390_v44 = vpop.f32.mrb[15].mxu1 }
 0x208   :  { %v2391_v55 = vadd.f32 %v2390_v44, %v2389_v53  ;;  %v1562_v62 = vadd.f32 %v2388_v48, %v885_v3  ;;  %v3840_v48 = vpop.permute.xlu0 %1739  ;;  %v1698_v53 = vsel %vm3805_vm9, %v3791_v12, 0.0  ;;  %v1758_v44 = vsel %vm3809_vm10, %v3832_v7, 0.0 }
 0x20a   :  { %v1565_v14 = vadd.f32 %v2391_v55, %v885_v3 }
 0x20c   :  { %v2392_v15 = vpop.f32.mrb[16].mxu1 }
 0x20d   :  { %v2393_v32 = vpop.f32.mrb[17].mxu1 }
 0x20e   :  { %v2394_v4 = vadd.f32 %v2393_v32, %v2392_v15  ;;  %v2395_v57 = vpop.f32.mrb[18].mxu1  ;;  %v1761_v32 = vsel %vm3809_vm10, %v3840_v48, 0.0 }
 0x20f   :  { %v2396_v59 = vpop.f32.mrb[19].mxu1 }
 0x210   :  { %v2397_v38 = vadd.f32 %v2396_v59, %v2395_v57  ;;  %v1570_v17 = vadd.f32 %v2394_v4, %v885_v3 }
 0x212   :  { %v1573_v24 = vadd.f32 %v2397_v38, %v885_v3 }
 0x215   :  { %v2398_v34 = vpop.f32.mrb[20].mxu1 }
 0x216   :  { %v2399_v63 = vpop.f32.mrb[21].mxu1 }
 0x217   :  { %v2400_v26 = vadd.f32 %v2399_v63, %v2398_v34  ;;  %v2401_v1 = vpop.f32.mrb[22].mxu1 }
 0x218   :  { %v2402_v30 = vpop.f32.mrb[23].mxu1 }
 0x219   :  { %v3783_v5 = vadd.f32 %v2402_v30, %v2401_v1  ;;  %v1578_v34 = vadd.f32 %v2400_v26, %v885_v3 }
 0x225   :  { %v2420_v40 = vpop.f32.mrb[24].mxu1 }
 0x226   :  { %v2421_v8 = vpop.f32.mrb[25].mxu1 }
 0x227   :  { %v2422_v28 = vadd.f32 %v2421_v8, %v2420_v40  ;;  %v2423_v56 = vpop.f32.mrb[26].mxu1  ;;  %v1581_v8 = vadd.f32 %v3783_v5, %v885_v3 }
 0x228   :  { %v2424_v52 = vpop.f32.mrb[27].mxu1 }
 0x229   :  { %v1619_v33 = vadd.f32 %v2422_v28, %v1562_v62  ;;  %v2425_v6 = vadd.f32 %v2424_v52, %v2423_v56  ;;  %v3863_v28 = vpop.permute.xlu0 %1747  ;;  %v1704_v56 = vsel %vm3805_vm9, %v3803_v9, 0.0  ;;  %v1643_v52 = vadd.s32 128, %v3786_v11 }
 0x22a   :  { %v1767_v3 = vsel %vm3809_vm10, %v3863_v28, 0.0 }
 0x22b   :  { %v1707_v0 = vadd.f32 %v1689_v23, %v1619_v33  ;;  %v1622_v19 = vadd.f32 %v2425_v6, %v1565_v14  ;;  %v1764_v23 = vsel %vm3809_vm10, %v3854_v27, 0.0 }
 0x22d   :  { %v1710_v43 = vadd.f32 %v1692_v39, %v1622_v19  ;;  %v1770_v60 = vadd.f32 %v1752_v42, %v1707_v0  ;;  %v2426_v45 = vpop.f32.mrb[28].mxu1  ;;  %v1645_v39 = vand.u32 3, %v3786_v11  ;;  %v1646_v42 = vand.u32 3, %v1643_v52 }
 0x22e   :  { %v2427_v58 = vpop.f32.mrb[29].mxu1  ;;  %v3885_v0 = vrot.slane %v3796_v49, %v124_v16  ;;  %v3898_v19 = vrot.slane %v3796_v49, %v128_v18 }
 0x22f   :  { %1788 = vst [vmem:[%s4095_s10 + $0x10] sm:$0xff] %v1770_v60  ;;  %v1773_v37 = vadd.f32 %v1755_v29, %v1710_v43  ;;  %v2428_v46 = vadd.f32 %v2427_v58, %v2426_v45  ;;  %v2429_v51 = vpop.f32.mrb[30].mxu1  ;;  %vm3887_vm11 = vcmp.eq.s32.totalorder %v1645_v39, 0  ;;  %vm3891_vm12 = vcmp.eq.s32.totalorder %v1645_v39, 1 }
 0x230   :  { %v2430_v22 = vpop.f32.mrb[31].mxu1  ;;  %vm3900_vm13 = vcmp.eq.s32.totalorder %v1646_v42, 0  ;;  %vm3904_vm14 = vcmp.eq.s32.totalorder %v1646_v42, 1  ;;  %v1687_v60 = vsel %vm3887_vm11, %v3779_v61, 0.0  ;;  %v1750_v13 = vsel %vm3891_vm12, %v3813_v35, 0.0 }
 0x231   :  { %1791 = vst [vmem:[%s4095_s10 + $0x28] sm:$0xff] %v1773_v37  ;;  %v1627_v31 = vadd.f32 %v2428_v46, %v1570_v17  ;;  %v2431_v54 = vadd.f32 %v2430_v22, %v2429_v51  ;;  %v1688_v58 = vsel %vm3900_vm13, %v3779_v61, 0.0  ;;  %v1751_v17 = vsel %vm3904_vm14, %v3813_v35, 0.0  ;;  %v3925_v46 = vld [vmem:[%s4096_s7] ss:$0 sm:$0xff] }
 0x232   :  { %v1690_v22 = vsel %vm3887_vm11, %v3788_v41, 0.0  ;;  %v1691_v35 = vsel %vm3900_vm13, %v3788_v41, 0.0  ;;  %v1696_v42 = vsel %vm3887_vm11, %v3791_v12, 0.0  ;;  %v1703_v11 = vsel %vm3900_vm13, %v3803_v9, 0.0 }
 0x233   :  { %v1713_v55 = vadd.f32 %v1695_v10, %v1627_v31  ;;  %v1630_v15 = vadd.f32 %v2431_v54, %v1573_v24 }
 0x235   :  { %v1716_v4 = vadd.f32 %v1698_v53, %v1630_v15  ;;  %v1776_v57 = vadd.f32 %v1758_v44, %v1713_v55  ;;  %v2432_v59 = vpop.f32.mrb[32].mxu1  ;;  %v1753_v44 = vsel %vm3891_vm12, %v3818_v36, 0.0  ;;  %v1754_v55 = vsel %vm3904_vm14, %v3818_v36, 0.0 }
 0x236   :  { %v2433_v38 = vpop.f32.mrb[33].mxu1 }
 0x237   :  { %1794 = vst [vmem:[%s4095_s10 + $0x40] sm:$0xff] %v1776_v57  ;;  %v1779_v63 = vadd.f32 %v1761_v32, %v1716_v4  ;;  %v2434_v1 = vadd.f32 %v2433_v38, %v2432_v59  ;;  %v2435_v30 = vpop.f32.mrb[34].mxu1 }
 0x238   :  { %v2436_v40 = vpop.f32.mrb[35].mxu1 }
 0x239   :  { %1797 = vst [vmem:[%s4095_s10 + $0x58] sm:$0xff] %v1779_v63  ;;  %v1635_v26 = vadd.f32 %v2434_v1, %v1578_v34  ;;  %v2437_v62 = vadd.f32 %v2436_v40, %v2435_v30  ;;  %v1757_v40 = vsel %vm3904_vm14, %v3832_v7, 0.0 }
 0x23b   :  { %v1719_v14 = vadd.f32 %v1701_v20, %v1635_v26  ;;  %v1638_v5 = vadd.f32 %v2437_v62, %v1581_v8  ;;  %v1756_v20 = vsel %vm3891_vm12, %v3832_v7, 0.0  ;;  %v1693_v62 = vsel %vm3887_vm11, %v3781_v2, 0.0 }
 0x23d   :  { %v1722_v33 = vadd.f32 %v1704_v56, %v1638_v5  ;;  %v1782_v6 = vadd.f32 %v1764_v23, %v1719_v14  ;;  %v1694_v5 = vsel %vm3900_vm13, %v3781_v2, 0.0  ;;  %v1697_v2 = vsel %vm3900_vm13, %v3791_v12, 0.0 }
 0x23f   :  { %1800 = vst [vmem:[%s4095_s10 + $0x70] sm:$0xff] %v1782_v6  ;;  %v1785_v25 = vadd.f32 %v1767_v3, %v1722_v33  ;;  %v1759_v3 = vsel %vm3891_vm12, %v3840_v48, 0.0 }
 0x241   :  { %1803 = vst [vmem:[%s4095_s10 + $0x88] sm:$0xff] %v1785_v25 }
 0x245   :  { %v1498_v43 = vpop.f32.mrb[12].mxu0 }
 0x246   :  { %v2499_v18 = vadd.f32 %v1498_v43, %v3885_v0  ;;  %v2454_v49 = vpop.f32.mrb[36].mxu1  ;;  %v1500_v45 = vpop.f32.mrb[13].mxu0 }
 0x247   :  { %v2500_v37 = vadd.f32 %v1500_v45, %v3898_v19  ;;  %v2455_v51 = vpop.f32.mrb[37].mxu1  ;;  %v1502_v10 = vpop.f32.mrb[14].mxu0 }
 0x248   :  { %v1705_v24 = vadd.f32 %v2499_v18, %v1687_v60  ;;  %v2456_v31 = vadd.f32 %v2455_v51, %v2454_v49  ;;  %v2501_v61 = vadd.f32 %v1502_v10, %v3885_v0  ;;  %v2457_v54 = vpop.f32.mrb[38].mxu1  ;;  %v1504_v53 = vpop.f32.mrb[15].mxu0  ;;  %v1760_v49 = vsel %vm3904_vm14, %v3840_v48, 0.0 }
 0x249   :  { %v1706_v15 = vadd.f32 %v2500_v37, %v1688_v58  ;;  %v2502_v32 = vadd.f32 %v1504_v53, %v3898_v19  ;;  %v2458_v4 = vpop.f32.mrb[39].mxu1  ;;  %v1763_v53 = vsel %vm3904_vm14, %v3854_v27, 0.0 }
 0x24a   :  { %v1768_v57 = vadd.f32 %v1750_v13, %v1705_v24  ;;  %v3942_v59 = vadd.f32 %v2456_v31, %v3925_v46  ;;  %v1708_v38 = vadd.f32 %v2501_v61, %v1690_v22  ;;  %v2459_v34 = vadd.f32 %v2458_v4, %v2457_v54 }
 0x24b   :  { %v1769_v63 = vadd.f32 %v1751_v17, %v1706_v15  ;;  %v1709_v41 = vadd.f32 %v2502_v32, %v1691_v35  ;;  %v1762_v61 = vsel %vm3891_vm12, %v3854_v27, 0.0  ;;  %v1699_v15 = vsel %vm3887_vm11, %v3798_v50, 0.0 }
 0x24c   :  { %1786 = vst [vmem:[%s4095_s10] sm:$0xff] %v1768_v57  ;;  %v2002_v1 = vmin.f32 %v3942_v59, 0.0  ;;  %v1771_v30 = vadd.f32 %v1753_v44, %v1708_v38  ;;  %v3949_v36 = vadd.f32 %v2459_v34, %v3925_v46  ;;  %v1700_v27 = vsel %vm3900_vm13, %v3798_v50, 0.0 }
 0x24d   :  { %1787 = vst [vmem:[%s4095_s10 + $0x8] sm:$0xff] %v1769_v63  ;;  %v1772_v8 = vadd.f32 %v1754_v55, %v1709_v41  ;;  %v1508_v26 = vpop.f32.mrb[16].mxu0  ;;  %v1765_v63 = vsel %vm3891_vm12, %v3863_v28, 0.0  ;;  %v1702_v50 = vsel %vm3887_vm11, %v3803_v9, 0.0  ;;  %vm1996_vm15 = vcmp.gt.f32.partialorder %v3942_v59, 0.0 }
 0x24e   :  { %v2008_v56 = vmul.f32 1.442695, %v2002_v1  ;;  %1789 = vst [vmem:[%s4095_s10 + $0x18] sm:$0xff] %v1771_v30  ;;  %v2003_v23 = vmin.f32 %v3949_v36, 0.0  ;;  %v2503_v52 = vadd.f32 %v1508_v26, %v3885_v0  ;;  %v2460_v7 = vpop.f32.mrb[40].mxu1  ;;  %v1510_v14 = vpop.f32.mrb[17].mxu0 }
 0x24f   :  { %1790 = vst [vmem:[%s4095_s10 + $0x20] sm:$0xff] %v1772_v8  ;;  %v2504_v33 = vadd.f32 %v1510_v14, %v3898_v19  ;;  %v2461_v6 = vpop.f32.mrb[41].mxu1  ;;  %v1512_v39 = vpop.f32.mrb[18].mxu0  ;;  %vm1997_vm0 = vcmp.gt.f32.partialorder %v3949_v36, 0.0 }
 0x250   :  { %2823 = vpow2.f32 %v2008_v56  ;;  %v2010_v25 = vmul.f32 1.442695, %v2003_v23  ;;  %v1711_v43 = vadd.f32 %v2503_v52, %v1693_v62  ;;  %v2462_v60 = vadd.f32 %v2461_v6, %v2460_v7  ;;  %v2463_v13 = vpop.f32.mrb[42].mxu1  ;;  %v1514_v18 = vpop.f32.mrb[19].mxu0 }
 0x251   :  { %v1712_v45 = vadd.f32 %v2504_v33, %v1694_v5  ;;  %v2505_v58 = vadd.f32 %v1512_v39, %v3885_v0  ;;  %v2506_v17 = vadd.f32 %v1514_v18, %v3898_v19  ;;  %v2464_v37 = vpop.f32.mrb[43].mxu1  ;;  %v1766_v56 = vsel %vm3904_vm14, %v3863_v28, 0.0 }
 0x252   :  { %2825 = vpow2.f32 %v2010_v25  ;;  %v1774_v51 = vadd.f32 %v1756_v20, %v1711_v43  ;;  %v3990_v12 = vadd.f32 %v2462_v60, %v3925_v46  ;;  %v2465_v10 = vadd.f32 %v2464_v37, %v2463_v13 }
 0x253   :  { %v1775_v22 = vadd.f32 %v1757_v40, %v1712_v45  ;;  %v1714_v24 = vadd.f32 %v2505_v58, %v1696_v42  ;;  %v1715_v31 = vadd.f32 %v2506_v17, %v1697_v2 }
 0x254   :  { %1792 = vst [vmem:[%s4095_s10 + $0x30] sm:$0xff] %v1774_v51  ;;  %v2004_v48 = vmin.f32 %v3990_v12, 0.0  ;;  %v4000_v54 = vadd.f32 %v2465_v10, %v3925_v46  ;;  %vm1998_vm2 = vcmp.gt.f32.partialorder %v3990_v12, 0.0 }
 0x255   :  { %1793 = vst [vmem:[%s4095_s10 + $0x38] sm:$0xff] %v1775_v22  ;;  %v1777_v35 = vadd.f32 %v1759_v3, %v1714_v24  ;;  %v1778_v44 = vadd.f32 %v1760_v49, %v1715_v31  ;;  %v1518_v55 = vpop.f32.mrb[20].mxu0 }
 0x256   :  { %v2012_v32 = vmul.f32 1.442695, %v2004_v48  ;;  %v2005_v4 = vmin.f32 %v4000_v54, 0.0  ;;  %v2507_v57 = vadd.f32 %v1518_v55, %v3885_v0  ;;  %v2466_v38 = vpop.f32.mrb[44].mxu1  ;;  %v1520_v34 = vpop.f32.mrb[21].mxu0  ;;  %vm1999_vm3 = vcmp.gt.f32.partialorder %v4000_v54, 0.0 }
 0x257   :  { %1795 = vst [vmem:[%s4095_s10 + $0x48] sm:$0xff] %v1777_v35  ;;  %1796 = vst [vmem:[%s4095_s10 + $0x50] sm:$0xff] %v1778_v44  ;;  %v2508_v41 = vadd.f32 %v1520_v34, %v3898_v19  ;;  %v2467_v1 = vpop.f32.mrb[45].mxu1  ;;  %v1522_v30 = vpop.f32.mrb[22].mxu0 }
 0x258   :  { %2827 = vpow2.f32 %v2012_v32  ;;  %v2014_v20 = vmul.f32 1.442695, %v2005_v4  ;;  %v1717_v40 = vadd.f32 %v2507_v57, %v1699_v15  ;;  %v2468_v8 = vadd.f32 %v2467_v1, %v2466_v38  ;;  %v2469_v26 = vpop.f32.mrb[46].mxu1  ;;  %v1524_v62 = vpop.f32.mrb[23].mxu0 }
 0x259   :  { %v1718_v23 = vadd.f32 %v2508_v41, %v1700_v27  ;;  %v2509_v52 = vadd.f32 %v1522_v30, %v3885_v0  ;;  %v2510_v47 = vadd.f32 %v1524_v62, %v3898_v19  ;;  %v2470_v7 = vpop.f32.mrb[47].mxu1 }
 0x25a   :  { %v2824_v14 = vpop.eup %2823  ;;  %2829 = vpow2.f32 %v2014_v20  ;;  %v1780_v29 = vadd.f32 %v1762_v61, %v1717_v40  ;;  %v1990_v9 = vadd.f32 %v2468_v8, %v3925_v46  ;;  %v2471_v5 = vadd.f32 %v2470_v7, %v2469_v26 }
 0x25b   :  { %v2356_v3 = vadd.f32 -1.0, %v2824_v14  ;;  %v1781_v33 = vadd.f32 %v1763_v53, %v1718_v23  ;;  %v1720_v6 = vadd.f32 %v2509_v52, %v1702_v50  ;;  %v1721_v39 = vadd.f32 %v2510_v47, %v1703_v11 }
 0x25c   :  { %v2826_v42 = vpop.eup %2825  ;;  %1798 = vst [vmem:[%s4095_s10 + $0x60] sm:$0xff] %v1780_v29  ;;  %v2006_v28 = vmin.f32 %v1990_v9, 0.0  ;;  %v1993_v0 = vadd.f32 %v2471_v5, %v3925_v46  ;;  %vm2000_vm4 = vcmp.gt.f32.partialorder %v1990_v9, 0.0 }
 0x25d   :  { %v2357_v19 = vadd.f32 -1.0, %v2826_v42  ;;  %1799 = vst [vmem:[%s4095_s10 + $0x68] sm:$0xff] %v1781_v33  ;;  %v1783_v16 = vadd.f32 %v1765_v63, %v1720_v6  ;;  %v1784_v2 = vadd.f32 %v1766_v56, %v1721_v39  ;;  %v2026_v60 = vsel %vm1996_vm15, %v3942_v59, %v2356_v3 }
 0x25e   :  { %v2016_v25 = vmul.f32 1.442695, %v2006_v28  ;;  %v2007_v43 = vmin.f32 %v1993_v0, 0.0  ;;  %vm2001_vm5 = vcmp.gt.f32.partialorder %v1993_v0, 0.0 }
 0x25f   :  { %v2027_v13 = vsel %vm1997_vm0, %v3949_v36, %v2357_v19  ;;  %1801 = vst [vmem:[%s4095_s10 + $0x78] sm:$0xff] %v1783_v16  ;;  %1802 = vst [vmem:[%s4095_s10 + $0x80] sm:$0xff] %v1784_v2 }
 0x260   :  { %v2032_v46 = vpack.c.bf16 %v2027_v13, %v2026_v60  ;;  %2831 = vpow2.f32 %v2016_v25  ;;  %v2018_v18 = vmul.f32 1.442695, %v2007_v43 }
 0x262   :  { %v2828_v49 = vpop.eup %2827  ;;  %2833 = vpow2.f32 %v2018_v18  ;;  %2488 = vmatmul.mubr.msk.bf16.vlgmr.msra.gmra.mrb[48].mxu1 %vm2074_vm1, %v2032_v46 }
 0x263   :  { %v2358_v45 = vadd.f32 -1.0, %v2828_v49  ;;  %2491 = vmatprep.mubr.msk.bf16.mxu1 %vm2838_vm8, %v2837_v21 }
 0x264   :  { %v2830_v59 = vpop.eup %2829 }
 0x265   :  { %v2359_v36 = vadd.f32 -1.0, %v2830_v59  ;;  %v2028_v58 = vsel %vm1998_vm2, %v3990_v12, %v2358_v45  ;;  %v2362_v12 = vld [vmem:[%s4097_s9] ss:$0 sm:$0xff] }
 0x267   :  { %v2029_v17 = vsel %vm1999_vm3, %v4000_v54, %v2359_v36 }
 0x268   :  { %v2033_v37 = vpack.c.bf16 %v2029_v17, %v2028_v58 }
 0x26a   :  { %v2832_v51 = vpop.eup %2831  ;;  %2492 = vmatmul.mubr.msk.bf16.gmra.mrb[52].mxu1 %vm2074_vm1, %v2033_v37 }
 0x26b   :  { %v2360_v10 = vadd.f32 -1.0, %v2832_v51  ;;  %2495 = vmatprep.mubr.msk.bf16.mxu1 %vm2838_vm8, %v2837_v21 }
 0x26c   :  { %v2834_v22 = vpop.eup %2833 }
 0x26d   :  { %v2361_v24 = vadd.f32 -1.0, %v2834_v22  ;;  %v2030_v31 = vsel %vm2000_vm4, %v1990_v9, %v2360_v10 }
 0x26f   :  { %v2031_v61 = vsel %vm2001_vm5, %v1993_v0, %v2361_v24 }
 0x270   :  { %v2034_v48 = vpack.c.bf16 %v2031_v61, %v2030_v31 }
 0x272   :  { %2496 = vmatmul.mubr.msk.bf16.gmra.mrb[56].mxu1 %vm2074_vm1, %v2034_v48 }
 0x335   :  { %v2118_v54 = vpop.f32.mrb[48].mxu1 }
 0x336   :  { %v2119_v53 = vadd.f32 %v2362_v12, %v2118_v54  ;;  %v2489_v35 = vpop.f32.mrb[49].mxu1 }
 0x337   :  { %v2121_v44 = vpop.f32.mrb[50].mxu1 }
 0x338   :  { %2141 = vst [vmem:[%s4098_s11] sm:$0xff] %v2119_v53  ;;  %v2122_v21 = vadd.f32 %v2362_v12, %v2121_v44  ;;  %v2490_v55 = vpop.f32.mrb[51].mxu1 }
 0x33a   :  { %2142 = vst [vmem:[%s4098_s11 + $0x8] sm:$0xff] %v2122_v21 }
 0x33d   :  { %v2126_v15 = vpop.f32.mrb[52].mxu1 }
 0x33e   :  { %v2127_v32 = vadd.f32 %v2362_v12, %v2126_v15  ;;  %v2493_v4 = vpop.f32.mrb[53].mxu1 }
 0x33f   :  { %v2129_v57 = vpop.f32.mrb[54].mxu1 }
 0x340   :  { %2143 = vst [vmem:[%s4098_s11 + $0x10] sm:$0xff] %v2127_v32  ;;  %v2130_v38 = vadd.f32 %v2362_v12, %v2129_v57  ;;  %v2494_v34 = vpop.f32.mrb[55].mxu1 }
 0x342   :  { %2144 = vst [vmem:[%s4098_s11 + $0x18] sm:$0xff] %v2130_v38 }
 0x345   :  { %v2134_v27 = vpop.f32.mrb[56].mxu1 }
 0x346   :  { %v2135_v63 = vadd.f32 %v2362_v12, %v2134_v27  ;;  %v2497_v41 = vpop.f32.mrb[57].mxu1 }
 0x347   :  { %v2137_v1 = vpop.f32.mrb[58].mxu1 }
 0x348   :  { %2145 = vst [vmem:[%s4098_s11 + $0x20] sm:$0xff] %v2135_v63  ;;  %v2138_v30 = vadd.f32 %v2362_v12, %v2137_v1  ;;  %v2498_v50 = vpop.f32.mrb[59].mxu1 }
 0x34a   :  { %2146 = vst [vmem:[%s4098_s11 + $0x28] sm:$0xff] %v2138_v30 }

// kernel: interaction_decoder_forward.5
= control target key start
LH: loop header
LB: loop body
LE: loop exit
PB: predicated region body
PF: predicated region fallthrough
CT: control target
= control target key end

     0   :  { %vm5424_vm0 = vmmov 0   ;;  %vm1057_vm1 = vcmask 261120   ;;  %s5425_s16 = smov 96   ;;  %vm1136_vm2 = vcmask 64512   ;;  %vm1394_vm3 = vcmask 523520   ;;  %s7001_s3 = inlined_call_operand.vmem [shape: bf16[256,512], index: 3, kind: input, shape index: {}]   ;;  %s7002_s2 = inlined_call_operand.vmem [shape: bf16[256,256], index: 2, kind: input, shape index: {}]   ;;  %s7003_s0 = inlined_call_operand.vmem [shape: f32[8,256], index: 0, kind: input, shape index: {}]   ;;  %s7004_s5 = inlined_call_operand.vmem [shape: f32[16,256], index: 5, kind: input, shape index: {}]   ;;  %s7005_s1 = inlined_call_operand.vmem [shape: f32[8,8], index: 1, kind: input, shape index: {}]   ;;  %s7006_s4 = inlined_call_operand.vmem [shape: bf16[256,256], index: 4, kind: input, shape index: {}]   ;;  %s7007_s6 = inlined_call_operand.vmem [shape: bf16[256,1024], index: 6, kind: input, shape index: {}]   ;;  %s7008_s8 = inlined_call_operand.vmem [shape: bf16[1024,256], index: 8, kind: input, shape index: {}]   ;;  %s7009_s7 = inlined_call_operand.vmem [shape: f32[1,1024], index: 7, kind: input, shape index: {}]   ;;  %s7010_s9 = inlined_call_operand.vmem [shape: f32[8,256], index: 9, kind: output, shape index: {}]  }
   0x1   :  { %v4982_v0 = vld [vmem:[%s7001_s3 + $0x4] ss:$16 sps:$4 sm:$0xff]   ;;  %v4984_v1 = vld [vmem:[%s7001_s3] ss:$16 sps:$4 sm:$0xff]   ;;  %v33_v47 = vld [vmem:[%s7003_s0 + $0x8] sm:$0xff]  ;;  %vm1567_vm4 = vcmask 785920  }
   0x2   :  { %955 = vmatprep.subr.bf16.mxu1 %v4982_v0  ;;  %v4985_v2 = vld [vmem:[%s7002_s2 + $0x4] ss:$8 sps:$4 sm:$0xff]   ;;  %v4987_v3 = vld [vmem:[%s7002_s2] ss:$8 sps:$4 sm:$0xff]   ;;  %v4991_v6 = vld [vmem:[%s7002_s2 + $0x14] ss:$8 sps:$4 sm:$0xff]   ;;  %v425_v50 = vpack.c.bf16 %v33_v47, %v33_v47 }
   0x3   :  { %956 = vmatpush1.bf16.msra.mxu1 %v4984_v1  ;;  %v4988_v4 = vld [vmem:[%s7001_s3 + $0x24] ss:$16 sps:$4 sm:$0xff]   ;;  %v4990_v5 = vld [vmem:[%s7001_s3 + $0x20] ss:$16 sps:$4 sm:$0xff]   ;;  %594 = vmatprep.subr.bf16.mxu0 %v4985_v2  ;;  %v5114_v47 = vld [vmem:[%s7001_s3 + $0x188] ss:$16 sps:$4 sm:$0xff]  }
   0x4   :  { %595 = vmatpush1.bf16.msra.mxu0 %v4987_v3  ;;  %957 = vmatprep.subr.bf16.mxu1 %v4988_v4  ;;  %v4993_v7 = vld [vmem:[%s7002_s2 + $0x10] ss:$8 sps:$4 sm:$0xff]   ;;  %v4994_v8 = vld [vmem:[%s7001_s3 + $0x44] ss:$16 sps:$4 sm:$0xff]   ;;  %v4999_v12 = vld [vmem:[%s7002_s2 + $0x20] ss:$8 sps:$4 sm:$0xff]  }
   0x5   :  { %596 = vmatprep.subr.bf16.mxu0 %v4991_v6  ;;  %v4996_v9 = vld [vmem:[%s7001_s3 + $0x40] ss:$16 sps:$4 sm:$0xff]   ;;  %v4997_v10 = vld [vmem:[%s7002_s2 + $0x24] ss:$8 sps:$4 sm:$0xff]   ;;  %v5003_v13 = vld [vmem:[%s7002_s2 + $0x34] ss:$8 sps:$4 sm:$0xff]   ;;  %987 = vmatprep.mubr.bf16.mxu1 %v425_v50 }
   0x6   :  { %v5000_v11 = vld [vmem:[%s7001_s3 + $0x64] ss:$16 sps:$4 sm:$0xff]   ;;  %v5002_v14 = vld [vmem:[%s7001_s3 + $0x60] ss:$16 sps:$4 sm:$0xff]   ;;  %626 = vmatprep.mubr.bf16.mxu0 %v425_v50  ;;  %v5423_v4 = vmov 0.0   ;;  %vm1740_vm5 = vcmask 1048320  }
   0x7   :  { %958 = vmatpush1.bf16.msra.mxu1 %v4990_v5  ;;  %v5006_v15 = vld [vmem:[%s7001_s3 + $0x84] ss:$16 sps:$4 sm:$0xff]   ;;  %v5005_v16 = vld [vmem:[%s7002_s2 + $0x30] ss:$8 sps:$4 sm:$0xff]   ;;  %v5011_v20 = vld [vmem:[%s7002_s2 + $0x40] ss:$8 sps:$4 sm:$0xff]   ;;  %v426_v5 = vlaneseq }
   0x8   :  { %959 = vmatprep.subr.bf16.mxu1 %v4994_v8  ;;  %597 = vmatpush1.bf16.msra.mxu0 %v4993_v7  ;;  %v5009_v17 = vld [vmem:[%s7002_s2 + $0x44] ss:$8 sps:$4 sm:$0xff]   ;;  %v5008_v18 = vld [vmem:[%s7001_s3 + $0x80] ss:$16 sps:$4 sm:$0xff]   ;;  %v5015_v21 = vld [vmem:[%s7002_s2 + $0x54] ss:$8 sps:$4 sm:$0xff]  }
   0x9   :  { %598 = vmatprep.subr.bf16.mxu0 %v4997_v10  ;;  %v5012_v19 = vld [vmem:[%s7001_s3 + $0xa4] ss:$16 sps:$4 sm:$0xff]   ;;  %v5014_v22 = vld [vmem:[%s7001_s3 + $0xa0] ss:$16 sps:$4 sm:$0xff]   ;;  %v5687_v6 = vshrl.u32 %v426_v5, 7 }
   0xa   :  { %v5018_v23 = vld [vmem:[%s7001_s3 + $0xc4] ss:$16 sps:$4 sm:$0xff]   ;;  %v5017_v24 = vld [vmem:[%s7002_s2 + $0x50] ss:$8 sps:$4 sm:$0xff]   ;;  %v5023_v28 = vld [vmem:[%s7002_s2 + $0x60] ss:$8 sps:$4 sm:$0xff]  }
   0xb   :  { %960 = vmatpush1.bf16.msra.mxu1 %v4996_v9  ;;  %v5021_v25 = vld [vmem:[%s7002_s2 + $0x64] ss:$8 sps:$4 sm:$0xff]   ;;  %v5020_v26 = vld [vmem:[%s7001_s3 + $0xc0] ss:$16 sps:$4 sm:$0xff]   ;;  %v5027_v29 = vld [vmem:[%s7002_s2 + $0x74] ss:$8 sps:$4 sm:$0xff]  }
   0xc   :  { %961 = vmatprep.subr.bf16.mxu1 %v5000_v11  ;;  %599 = vmatpush1.bf16.msra.mxu0 %v4999_v12  ;;  %v5024_v27 = vld [vmem:[%s7001_s3 + $0xe4] ss:$16 sps:$4 sm:$0xff]   ;;  %v5026_v30 = vld [vmem:[%s7001_s3 + $0xe0] ss:$16 sps:$4 sm:$0xff]   ;;  %v5690_v7 = vsub.s32 1, %v5687_v6  ;;  %v5698_v9 = vsub.s32 0, %v5687_v6 }
   0xd   :  { %600 = vmatprep.subr.bf16.mxu0 %v5003_v13  ;;  %v5030_v31 = vld [vmem:[%s7001_s3 + $0x104] ss:$16 sps:$4 sm:$0xff]   ;;  %v5029_v32 = vld [vmem:[%s7002_s2 + $0x70] ss:$8 sps:$4 sm:$0xff]   ;;  %v5035_v36 = vld [vmem:[%s7002_s2 + $0x80] ss:$8 sps:$4 sm:$0xff]  }
   0xe   :  { %v5033_v33 = vld [vmem:[%s7002_s2 + $0x84] ss:$8 sps:$4 sm:$0xff]   ;;  %v5032_v34 = vld [vmem:[%s7001_s3 + $0x100] ss:$16 sps:$4 sm:$0xff]   ;;  %v5039_v37 = vld [vmem:[%s7002_s2 + $0x94] ss:$8 sps:$4 sm:$0xff]  }
   0xf   :  { %962 = vmatpush1.bf16.msra.mxu1 %v5002_v14  ;;  %v5036_v35 = vld [vmem:[%s7001_s3 + $0x124] ss:$16 sps:$4 sm:$0xff]   ;;  %v5038_v38 = vld [vmem:[%s7001_s3 + $0x120] ss:$16 sps:$4 sm:$0xff]  }
  0x10   :  { %963 = vmatprep.subr.bf16.mxu1 %v5006_v15  ;;  %601 = vmatpush1.bf16.msra.mxu0 %v5005_v16  ;;  %v5042_v39 = vld [vmem:[%s7001_s3 + $0x144] ss:$16 sps:$4 sm:$0xff]   ;;  %v5041_v40 = vld [vmem:[%s7002_s2 + $0x90] ss:$8 sps:$4 sm:$0xff]   ;;  %v5047_v44 = vld [vmem:[%s7002_s2 + $0xa0] ss:$8 sps:$4 sm:$0xff]  }
  0x11   :  { %602 = vmatprep.subr.bf16.mxu0 %v5009_v17  ;;  %v5045_v41 = vld [vmem:[%s7002_s2 + $0xa4] ss:$8 sps:$4 sm:$0xff]   ;;  %v5044_v42 = vld [vmem:[%s7001_s3 + $0x140] ss:$16 sps:$4 sm:$0xff]   ;;  %v5051_v46 = vld [vmem:[%s7002_s2 + $0xb4] ss:$8 sps:$4 sm:$0xff]  }
  0x12   :  { %v5048_v43 = vld [vmem:[%s7001_s3 + $0x164] ss:$16 sps:$4 sm:$0xff]   ;;  %v5050_v45 = vld [vmem:[%s7001_s3 + $0x160] ss:$16 sps:$4 sm:$0xff]  }
  0x13   :  { %964 = vmatpush1.bf16.msra.mxu1 %v5008_v18  ;;  %v5053_v48 = vld [vmem:[%s7002_s2 + $0xb0] ss:$8 sps:$4 sm:$0xff]   ;;  %v5054_v49 = vld [vmem:[%s7001_s3 + $0x184] ss:$16 sps:$4 sm:$0xff]   ;;  %v5059_v54 = vld [vmem:[%s7002_s2 + $0xc0] ss:$8 sps:$4 sm:$0xff]  }
  0x14   :  { %965 = vmatprep.subr.bf16.mxu1 %v5012_v19  ;;  %603 = vmatpush1.bf16.msra.mxu0 %v5011_v20  ;;  %v5057_v51 = vld [vmem:[%s7002_s2 + $0xc4] ss:$8 sps:$4 sm:$0xff]   ;;  %v5056_v52 = vld [vmem:[%s7001_s3 + $0x180] ss:$16 sps:$4 sm:$0xff]   ;;  %v5063_v55 = vld [vmem:[%s7002_s2 + $0xd4] ss:$8 sps:$4 sm:$0xff]  }
  0x15   :  { %604 = vmatprep.subr.bf16.mxu0 %v5015_v21  ;;  %v5060_v53 = vld [vmem:[%s7001_s3 + $0x1a4] ss:$16 sps:$4 sm:$0xff]   ;;  %v5062_v56 = vld [vmem:[%s7001_s3 + $0x1a0] ss:$16 sps:$4 sm:$0xff]  }
  0x16   :  { %v5066_v57 = vld [vmem:[%s7001_s3 + $0x1c4] ss:$16 sps:$4 sm:$0xff]   ;;  %v5065_v58 = vld [vmem:[%s7002_s2 + $0xd0] ss:$8 sps:$4 sm:$0xff]   ;;  %v5071_v62 = vld [vmem:[%s7002_s2 + $0xe0] ss:$8 sps:$4 sm:$0xff]  }
  0x17   :  { %966 = vmatpush1.bf16.msra.mxu1 %v5014_v22  ;;  %v5069_v59 = vld [vmem:[%s7002_s2 + $0xe4] ss:$8 sps:$4 sm:$0xff]   ;;  %v5068_v60 = vld [vmem:[%s7001_s3 + $0x1c0] ss:$16 sps:$4 sm:$0xff]   ;;  %v5075_v63 = vld [vmem:[%s7002_s2 + $0xf4] ss:$8 sps:$4 sm:$0xff]  }
  0x18   :  { %967 = vmatprep.subr.bf16.mxu1 %v5018_v23  ;;  %605 = vmatpush1.bf16.msra.mxu0 %v5017_v24  ;;  %v5072_v61 = vld [vmem:[%s7001_s3 + $0x1e4] ss:$16 sps:$4 sm:$0xff]   ;;  %v5074_v0 = vld [vmem:[%s7001_s3 + $0x1e0] ss:$16 sps:$4 sm:$0xff]   ;;  %v5078_v22 = vld [vmem:[%s7001_s3 + $0x8] ss:$16 sps:$4 sm:$0xff]  }
  0x19   :  { %606 = vmatprep.subr.bf16.mxu0 %v5021_v25  ;;  %v5673_v1 = vld [vmem:[%s7003_s0] sm:$0xff]  ;;  %v5077_v2 = vld [vmem:[%s7002_s2 + $0xf0] ss:$8 sps:$4 sm:$0xff]   ;;  %v5080_v23 = vld [vmem:[%s7001_s3 + $0xc] ss:$16 sps:$4 sm:$0xff]  }
  0x1a   :  { %v5680_v3 = vpack.c.bf16 %v5673_v1, %v5673_v1  ;;  %v5695_v8 = vld [vmem:[%s7004_s5] sm:$0xff]  ;;  %v5083_v24 = vld [vmem:[%s7001_s3 + $0x2c] ss:$16 sps:$4 sm:$0xff]   ;;  %v5081_v25 = vld [vmem:[%s7001_s3 + $0x28] ss:$16 sps:$4 sm:$0xff]  }
  0x1b   :  { %968 = vmatpush1.bf16.msra.mxu1 %v5020_v26  ;;  %v1040_v10 = vrot.slane %v5695_v8, %v5690_v7  ;;  %v429_v11 = vrot.slane %v5695_v8, %v5698_v9  ;;  %v5086_v26 = vld [vmem:[%s7001_s3 + $0x4c] ss:$16 sps:$4 sm:$0xff]  }
  0x1c   :  { %969 = vmatprep.subr.bf16.mxu1 %v5024_v27  ;;  %607 = vmatpush1.bf16.msra.mxu0 %v5023_v28  ;;  %v5084_v27 = vld [vmem:[%s7001_s3 + $0x48] ss:$16 sps:$4 sm:$0xff]   ;;  %v5089_v28 = vld [vmem:[%s7001_s3 + $0x6c] ss:$16 sps:$4 sm:$0xff]  }
  0x1d   :  { %608 = vmatprep.subr.bf16.mxu0 %v5027_v29  ;;  %v5087_v29 = vld [vmem:[%s7001_s3 + $0x68] ss:$16 sps:$4 sm:$0xff]  }
  0x1f   :  { %970 = vmatpush1.bf16.msra.mxu1 %v5026_v30  ;;  %v5092_v30 = vld [vmem:[%s7001_s3 + $0x8c] ss:$16 sps:$4 sm:$0xff]  }
  0x20   :  { %971 = vmatprep.subr.bf16.mxu1 %v5030_v31  ;;  %609 = vmatpush1.bf16.msra.mxu0 %v5029_v32  ;;  %v5090_v31 = vld [vmem:[%s7001_s3 + $0x88] ss:$16 sps:$4 sm:$0xff]   ;;  %v5095_v32 = vld [vmem:[%s7001_s3 + $0xac] ss:$16 sps:$4 sm:$0xff]  }
  0x21   :  { %610 = vmatprep.subr.bf16.mxu0 %v5033_v33  ;;  %v5093_v33 = vld [vmem:[%s7001_s3 + $0xa8] ss:$16 sps:$4 sm:$0xff]  }
  0x23   :  { %972 = vmatpush1.bf16.msra.mxu1 %v5032_v34  ;;  %v5098_v34 = vld [vmem:[%s7001_s3 + $0xcc] ss:$16 sps:$4 sm:$0xff]  }
  0x24   :  { %973 = vmatprep.subr.bf16.mxu1 %v5036_v35  ;;  %611 = vmatpush1.bf16.msra.mxu0 %v5035_v36  ;;  %v5096_v35 = vld [vmem:[%s7001_s3 + $0xc8] ss:$16 sps:$4 sm:$0xff]   ;;  %v5101_v36 = vld [vmem:[%s7001_s3 + $0xec] ss:$16 sps:$4 sm:$0xff]  }
  0x25   :  { %612 = vmatprep.subr.bf16.mxu0 %v5039_v37  ;;  %v5099_v37 = vld [vmem:[%s7001_s3 + $0xe8] ss:$16 sps:$4 sm:$0xff]  }
  0x27   :  { %974 = vmatpush1.bf16.msra.mxu1 %v5038_v38  ;;  %v5104_v38 = vld [vmem:[%s7001_s3 + $0x10c] ss:$16 sps:$4 sm:$0xff]  }
  0x28   :  { %975 = vmatprep.subr.bf16.mxu1 %v5042_v39  ;;  %613 = vmatpush1.bf16.msra.mxu0 %v5041_v40  ;;  %v5102_v39 = vld [vmem:[%s7001_s3 + $0x108] ss:$16 sps:$4 sm:$0xff]   ;;  %v5107_v40 = vld [vmem:[%s7001_s3 + $0x12c] ss:$16 sps:$4 sm:$0xff]  }
  0x29   :  { %614 = vmatprep.subr.bf16.mxu0 %v5045_v41  ;;  %v5105_v41 = vld [vmem:[%s7001_s3 + $0x128] ss:$16 sps:$4 sm:$0xff]  }
  0x2b   :  { %976 = vmatpush1.bf16.msra.mxu1 %v5044_v42  ;;  %v5110_v42 = vld [vmem:[%s7001_s3 + $0x14c] ss:$16 sps:$4 sm:$0xff]  }
  0x2c   :  { %977 = vmatprep.subr.bf16.mxu1 %v5048_v43  ;;  %615 = vmatpush1.bf16.msra.mxu0 %v5047_v44  ;;  %v5108_v43 = vld [vmem:[%s7001_s3 + $0x148] ss:$16 sps:$4 sm:$0xff]   ;;  %v5113_v44 = vld [vmem:[%s7001_s3 + $0x16c] ss:$16 sps:$4 sm:$0xff]  }
  0x2d   :  { %616 = vmatprep.subr.bf16.mxu0 %v5051_v46  ;;  %v5116_v46 = vld [vmem:[%s7001_s3 + $0x18c] ss:$16 sps:$4 sm:$0xff]  }
  0x2f   :  { %978 = vmatpush1.bf16.msra.mxu1 %v5050_v45  ;;  %v5111_v45 = vld [vmem:[%s7001_s3 + $0x168] ss:$16 sps:$4 sm:$0xff]  }
  0x30   :  { %979 = vmatprep.subr.bf16.mxu1 %v5054_v49  ;;  %617 = vmatpush1.bf16.msra.mxu0 %v5053_v48  ;;  %v5119_v48 = vld [vmem:[%s7001_s3 + $0x1ac] ss:$16 sps:$4 sm:$0xff]   ;;  %v5117_v49 = vld [vmem:[%s7001_s3 + $0x1a8] ss:$16 sps:$4 sm:$0xff]  }
  0x31   :  { %618 = vmatprep.subr.bf16.mxu0 %v5057_v51  ;;  %v5120_v51 = vld [vmem:[%s7001_s3 + $0x1c8] ss:$16 sps:$4 sm:$0xff]  }
  0x33   :  { %980 = vmatpush1.bf16.msra.mxu1 %v5056_v52  ;;  %v5125_v52 = vld [vmem:[%s7001_s3 + $0x1ec] ss:$16 sps:$4 sm:$0xff]  }
  0x34   :  { %981 = vmatprep.subr.bf16.mxu1 %v5060_v53  ;;  %619 = vmatpush1.bf16.msra.mxu0 %v5059_v54  ;;  %v5123_v53 = vld [vmem:[%s7001_s3 + $0x1e8] ss:$16 sps:$4 sm:$0xff]  }
  0x35   :  { %620 = vmatprep.subr.bf16.mxu0 %v5063_v55  ;;  %v5823_v55 = vld [vmem:[%s7005_s1] sm:$0xff]  ;;  %s5426_s1 = smov 64  }
  0x37   :  { %982 = vmatpush1.bf16.msra.mxu1 %v5062_v56 }
  0x38   :  { %983 = vmatprep.subr.bf16.mxu1 %v5066_v57  ;;  %621 = vmatpush1.bf16.msra.mxu0 %v5065_v58 }
  0x39   :  { %622 = vmatprep.subr.bf16.mxu0 %v5069_v59 }
  0x3b   :  { %984 = vmatpush1.bf16.msra.mxu1 %v5068_v60 }
  0x3c   :  { %985 = vmatprep.subr.bf16.mxu1 %v5072_v61  ;;  %623 = vmatpush1.bf16.msra.mxu0 %v5071_v62 }
  0x3d   :  { %624 = vmatprep.subr.bf16.mxu0 %v5075_v63 }
  0x3f   :  { %986 = vmatpush1.bf16.msra.mxu1 %v5074_v0 }
  0x40   :  { %625 = vmatpush1.bf16.msra.mxu0 %v5077_v2  ;;  %4897 = vmatprep.subr.mxu1 %v5423_v4  ;;  %v5829_v2 = vsub.s32 2, %v5687_v6 }
  0x41   :  { %996 = vmatprep.subr.bf16.mxu0 %v5080_v23 }
  0x42   :  { %988 = vmatmul.mubr.bf16.vlgmr.msra.gmra.mrb[0].mxu1 %v5680_v3  ;;  %v1050_v5 = vrot.slane %v5695_v8, %v5829_v2 }
  0x43   :  { %627 = vmatmul.mubr.bf16.vlgmr.msra.gmra.mrb[0].mxu0 %v5680_v3  ;;  %4899 = vmatprep.mubr.msk.f32.mxu1 %vm5424_vm0, %v5423_v4 }
  0x44   :  { %1028 = vmatprep.mubr.bf16.mxu0 %v425_v50  ;;  %997 = vmatpush1.bf16.msra.mxu0 %v5078_v22  ;;  %v5122_v50 = vld [vmem:[%s7001_s3 + $0x1cc] ss:$16 sps:$4 sm:$0xff]   ;;  %s5427_s3 = smov 32  }
  0x45   :  { %998 = vmatprep.subr.bf16.mxu0 %v5083_v24 }
  0x48   :  { %999 = vmatpush1.bf16.msra.mxu0 %v5081_v25 }
  0x49   :  { %1000 = vmatprep.subr.bf16.mxu0 %v5086_v26 }
  0x4c   :  { %1001 = vmatpush1.bf16.msra.mxu0 %v5084_v27 }
  0x4d   :  { %1002 = vmatprep.subr.bf16.mxu0 %v5089_v28 }
  0x50   :  { %1003 = vmatpush1.bf16.msra.mxu0 %v5087_v29 }
  0x51   :  { %1004 = vmatprep.subr.bf16.mxu0 %v5092_v30 }
  0x54   :  { %1005 = vmatpush1.bf16.msra.mxu0 %v5090_v31 }
  0x55   :  { %1006 = vmatprep.subr.bf16.mxu0 %v5095_v32 }
  0x58   :  { %1007 = vmatpush1.bf16.msra.mxu0 %v5093_v33 }
  0x59   :  { %1008 = vmatprep.subr.bf16.mxu0 %v5098_v34 }
  0x5c   :  { %1009 = vmatpush1.bf16.msra.mxu0 %v5096_v35 }
  0x5d   :  { %1010 = vmatprep.subr.bf16.mxu0 %v5101_v36 }
  0x60   :  { %1011 = vmatpush1.bf16.msra.mxu0 %v5099_v37 }
  0x61   :  { %1012 = vmatprep.subr.bf16.mxu0 %v5104_v38 }
  0x64   :  { %1013 = vmatpush1.bf16.msra.mxu0 %v5102_v39 }
  0x65   :  { %1014 = vmatprep.subr.bf16.mxu0 %v5107_v40 }
  0x68   :  { %1015 = vmatpush1.bf16.msra.mxu0 %v5105_v41 }
  0x69   :  { %1016 = vmatprep.subr.bf16.mxu0 %v5110_v42 }
  0x6c   :  { %1017 = vmatpush1.bf16.msra.mxu0 %v5108_v43 }
  0x6d   :  { %1018 = vmatprep.subr.bf16.mxu0 %v5113_v44 }
  0x70   :  { %1019 = vmatpush1.bf16.msra.mxu0 %v5111_v45 }
  0x71   :  { %1020 = vmatprep.subr.bf16.mxu0 %v5116_v46 }
  0x74   :  { %1021 = vmatpush1.bf16.msra.mxu0 %v5114_v47 }
  0x75   :  { %1022 = vmatprep.subr.bf16.mxu0 %v5119_v48 }
  0x78   :  { %1023 = vmatpush1.bf16.msra.mxu0 %v5117_v49 }
  0x79   :  { %1024 = vmatprep.subr.bf16.mxu0 %v5122_v50 }
  0x7c   :  { %1025 = vmatpush1.bf16.msra.mxu0 %v5120_v51 }
  0x7d   :  { %1026 = vmatprep.subr.bf16.mxu0 %v5125_v52 }
  0x80   :  { %1027 = vmatpush1.bf16.msra.mxu0 %v5123_v53 }
  0x83   :  { %1029 = vmatmul.mubr.bf16.vlgmr.msra.gmra.mrb[4].mxu0 %v5680_v3 }
 0x115   :  { %v989_v12 = vpop.f32.mrb[0].mxu1 }
 0x116   :  { %v5704_v13 = vadd.f32 %v1040_v10, %v989_v12  ;;  %v5706_v14 = vpop.f32.mrb[1].mxu1  ;;  %v628_v16 = vpop.f32.mrb[0].mxu0 }
 0x117   :  { %v993_v15 = vpop.f32.mrb[2].mxu1  ;;  %v5710_v17 = vadd.f32 %v628_v16, %v429_v11  ;;  %v5714_v19 = vpop.f32.mrb[1].mxu0 }
 0x118   :  { %1224 = vrot.lane.b32.xlu1 %v5704_v13, %s5425_s16  ;;  %v994_v18 = vpop.f32.mrb[3].mxu1  ;;  %4898 = vmatpush3.xpose.msk.msra.mxu1 %vm1057_vm1, %v5704_v13  ;;  %v632_v20 = vpop.f32.mrb[2].mxu0 }
 0x119   :  { %4902 = vmatprep.subr.mxu1 %v5423_v4  ;;  %v633_v21 = vpop.f32.mrb[3].mxu0 }
 0x11b   :  { %4900 = vmatmul.mubr.msk.f32.vlgmr.msra.gmra.mrb[4].mxu1 %vm1057_vm1, %v5710_v17 }
 0x11c   :  { %1222 = vrot.lane.b32.xlu1 %v5710_v17, %s5425_s16  ;;  %4904 = vmatprep.mubr.msk.f32.mxu1 %vm5424_vm0, %v5423_v4 }
 0x156   :  { %v1030_v3 = vpop.f32.mrb[4].mxu0 }
 0x157   :  { %v5833_v10 = vpop.f32.mrb[5].mxu0  ;;  %v5835_v12 = vadd.f32 %v1050_v5, %v1030_v3 }
 0x158   :  { %v1034_v11 = vpop.f32.mrb[6].mxu0 }
 0x159   :  { %v1035_v15 = vpop.f32.mrb[7].mxu0  ;;  %4903 = vmatpush3.msra.mxu1 %v5835_v12 }
 0x15a   :  { %4907 = vmatprep.subr.mxu1 %v5423_v4 }
 0x18a   :  { %v1225_v20 = vpop.permute.xlu1 %1224 }
 0x18e   :  { %v1223_v22 = vpop.permute.xlu1 %1222 }
 0x1ee   :  { %v1130_v54 = vpop.f32.mrb[4].mxu1 }
 0x1ef   :  { %v1134_v56 = vmul.f32 0.17677669, %v1130_v54  ;;  %v4901_v57 = vpop.f32.mrb[5].mxu1 }
 0x1f1   :  { %v1135_v58 = vadd.f32 %v1134_v56, %v5823_v55 }
 0x1f3   :  { %v1137_v59 = vsel %vm1136_vm2, %v1135_v58, -inf }
 0x1f4   :  { %1138 = vmax.xlane.f32.xlu0 %v1137_v59 }
 0x281   :  { %v1139_v60 = vpop.xlane.xlu0 %1138 }
 0x282   :  { %v1140_v61 = vsub.f32 %v1135_v58, %v1139_v60 }
 0x284   :  { %v1141_v62 = vmul.f32 1.442695, %v1140_v61 }
 0x286   :  { %5366 = vpow2.f32 %v1141_v62 }
 0x290   :  { %v5367_v63 = vpop.eup %5366 }
 0x291   :  { %v1143_v0 = vsel %vm1136_vm2, %v5367_v63, 0.0 }
 0x292   :  { %1144 = vadd.xlane.f32.xlu0 %v1143_v0 }
 0x31f   :  { %v1145_v16 = vpop.xlane.xlu0 %1144 }
 0x320   :  { %5368 = vrcp.f32 %v1145_v16 }
 0x32a   :  { %v5369_v18 = vpop.eup %5368 }
 0x32b   :  { %v1147_v21 = vmul.f32 %v5369_v18, %v5367_v63 }
 0x32d   :  { %4905 = vmatmul.mubr.msk.f32.vlgmr.msra.gmra.mrb[6].mxu1 %vm1136_vm2, %v1147_v21  ;;  %v5897_v21 = vld [vmem:[%s7004_s5 + $0x8] sm:$0xff] }
 0x32e   :  { %4908 = vmatpush3.xpose.msk.msra.mxu1 %vm1057_vm1, %v1225_v20  ;;  %4909 = vmatprep.mubr.msk.f32.mxu1 %vm5424_vm0, %v5423_v4 }
 0x32f   :  { %4912 = vmatprep.subr.mxu1 %v5423_v4 }
 0x331   :  { %4910 = vmatmul.mubr.msk.f32.vlgmr.msra.gmra.mrb[8].mxu1 %vm1057_vm1, %v1223_v22 }
 0x332   :  { %4914 = vmatprep.mubr.msk.f32.mxu1 %vm5424_vm0, %v5423_v4 }
 0x400   :  { %v1217_v23 = vpop.f32.mrb[6].mxu1 }
 0x401   :  { %1221 = vst.msk [vmem:[#allocation2] sm:$0xff] %vm1057_vm1, %v1217_v23  ;;  %v4906_v24 = vpop.f32.mrb[7].mxu1  ;;  %v433_v23 = vrot.slane %v5897_v21, %v5698_v9 }
 0x404   :  { %v1296_v25 = vpop.f32.mrb[8].mxu1 }
 0x405   :  { %v1300_v26 = vmul.f32 0.17677669, %v1296_v25  ;;  %v4911_v27 = vpop.f32.mrb[9].mxu1 }
 0x406   :  { %v5914_v27 = vadd.f32 %v5714_v19, %v433_v23 }
 0x407   :  { %v1301_v28 = vadd.f32 %v1300_v26, %v5823_v55  ;;  %v1054_v26 = vrot.slane %v5897_v21, %v5829_v2 }
 0x409   :  { %v1302_v29 = vsel %vm1136_vm2, %v1301_v28, -inf }
 0x40a   :  { %1303 = vmax.xlane.f32.xlu0 %v1302_v29 }
 0x420   :  { %1314 = vrot.lane.b32.xlu0 %v5835_v12, %s5425_s16 }
 0x424   :  { %1398 = vrot.lane.b32.xlu0 %v5704_v13, %s5426_s1 }
 0x428   :  { %1396 = vrot.lane.b32.xlu0 %v5710_v17, %s5426_s1 }
 0x497   :  { %v1304_v30 = vpop.xlane.xlu0 %1303 }
 0x498   :  { %v1305_v31 = vsub.f32 %v1301_v28, %v1304_v30  ;;  %v5918_v28 = vadd.f32 %v1054_v26, %v5833_v10 }
 0x49a   :  { %v1306_v32 = vmul.f32 1.442695, %v1305_v31 }
 0x49b   :  { %v1315_v33 = vpop.permute.xlu0 %1314 }
 0x49c   :  { %5370 = vpow2.f32 %v1306_v32  ;;  %4913 = vmatpush3.msra.mxu1 %v1315_v33 }
 0x49d   :  { %4917 = vmatprep.subr.mxu1 %v5423_v4 }
 0x49f   :  { %v1399_v38 = vpop.permute.xlu0 %1398 }
 0x4a3   :  { %v1397_v40 = vpop.permute.xlu0 %1396 }
 0x4a6   :  { %v5371_v34 = vpop.eup %5370 }
 0x4a7   :  { %v1308_v35 = vsel %vm1136_vm2, %v5371_v34, 0.0 }
 0x4a8   :  { %1309 = vadd.xlane.f32.xlu1 %v1308_v35 }
 0x4b9   :  { %1487 = vrot.lane.b32.xlu1 %v5835_v12, %s5426_s1 }
 0x4bd   :  { %1571 = vrot.lane.b32.xlu1 %v5704_v13, %s5427_s3 }
 0x535   :  { %v1310_v36 = vpop.xlane.xlu1 %1309 }
 0x536   :  { %5372 = vrcp.f32 %v1310_v36 }
 0x539   :  { %v1488_v41 = vpop.permute.xlu1 %1487 }
 0x53d   :  { %v1572_v53 = vpop.permute.xlu1 %1571 }
 0x540   :  { %v5373_v37 = vpop.eup %5372 }
 0x541   :  { %v1312_v39 = vmul.f32 %v5373_v37, %v5371_v34 }
 0x543   :  { %4915 = vmatmul.mubr.msk.f32.vlgmr.msra.gmra.mrb[10].mxu1 %vm1136_vm2, %v1312_v39 }
 0x544   :  { %4918 = vmatpush3.xpose.msk.msra.mxu1 %vm1057_vm1, %v1399_v38  ;;  %4919 = vmatprep.mubr.msk.f32.mxu1 %vm5424_vm0, %v5423_v4 }
 0x545   :  { %4922 = vmatprep.subr.mxu1 %v5423_v4 }
 0x547   :  { %4920 = vmatmul.mubr.msk.f32.vlgmr.msra.gmra.mrb[12].mxu1 %vm1057_vm1, %v1397_v40 }
 0x548   :  { %4923 = vmatpush3.msra.mxu1 %v1488_v41  ;;  %4924 = vmatprep.mubr.msk.f32.mxu1 %vm5424_vm0, %v5423_v4 }
 0x549   :  { %4927 = vmatprep.subr.mxu1 %v5423_v4 }
 0x616   :  { %v5871_v13 = vpop.f32.mrb[10].mxu1 }
 0x617   :  { %v4916_v42 = vpop.f32.mrb[11].mxu1 }
 0x61a   :  { %v1470_v43 = vpop.f32.mrb[12].mxu1 }
 0x61b   :  { %v1474_v44 = vmul.f32 0.17677669, %v1470_v43  ;;  %v4921_v45 = vpop.f32.mrb[13].mxu1 }
 0x61d   :  { %v1475_v46 = vadd.f32 %v1474_v44, %v5823_v55 }
 0x61f   :  { %v1476_v47 = vsel %vm1136_vm2, %v1475_v46, -inf }
 0x620   :  { %1477 = vmax.xlane.f32.xlu0 %v1476_v47 }
 0x6ad   :  { %v1478_v48 = vpop.xlane.xlu0 %1477 }
 0x6ae   :  { %v1479_v49 = vsub.f32 %v1475_v46, %v1478_v48 }
 0x6b0   :  { %v1480_v50 = vmul.f32 1.442695, %v1479_v49 }
 0x6b2   :  { %5374 = vpow2.f32 %v1480_v50 }
 0x6bc   :  { %v5375_v51 = vpop.eup %5374 }
 0x6bd   :  { %v1482_v52 = vsel %vm1136_vm2, %v5375_v51, 0.0 }
 0x6be   :  { %1483 = vadd.xlane.f32.xlu1 %v1482_v52 }
 0x6cf   :  { %1569 = vrot.lane.b32.xlu1 %v5710_v17, %s5427_s3 }
 0x74b   :  { %v1484_v54 = vpop.xlane.xlu1 %1483 }
 0x74c   :  { %5376 = vrcp.f32 %v1484_v54 }
 0x74f   :  { %v1570_v58 = vpop.permute.xlu1 %1569 }
 0x756   :  { %v5377_v56 = vpop.eup %5376 }
 0x757   :  { %v1486_v57 = vmul.f32 %v5377_v56, %v5375_v51 }
 0x759   :  { %4925 = vmatmul.mubr.msk.f32.vlgmr.msra.gmra.mrb[14].mxu1 %vm1136_vm2, %v1486_v57 }
 0x75a   :  { %4928 = vmatpush3.xpose.msk.msra.mxu1 %vm1057_vm1, %v1572_v53  ;;  %4929 = vmatprep.mubr.msk.f32.mxu1 %vm5424_vm0, %v5423_v4 }
 0x75b   :  { %4932 = vmatprep.subr.mxu1 %v5423_v4 }
 0x75d   :  { %4930 = vmatmul.mubr.msk.f32.vlgmr.msra.gmra.mrb[16].mxu1 %vm1057_vm1, %v1570_v58 }
 0x75e   :  { %4934 = vmatprep.mubr.msk.f32.mxu1 %vm5424_vm0, %v5423_v4 }
 0x82c   :  { %v5886_v17 = vpop.f32.mrb[14].mxu1 }
 0x82d   :  { %v4926_v59 = vpop.f32.mrb[15].mxu1 }
 0x830   :  { %v1643_v60 = vpop.f32.mrb[16].mxu1 }
 0x831   :  { %v1647_v61 = vmul.f32 0.17677669, %v1643_v60  ;;  %v4931_v62 = vpop.f32.mrb[17].mxu1 }
 0x833   :  { %v1648_v63 = vadd.f32 %v1647_v61, %v5823_v55 }
 0x835   :  { %v1649_v0 = vsel %vm1136_vm2, %v1648_v63, -inf }
 0x836   :  { %1650 = vmax.xlane.f32.xlu0 %v1649_v0 }
 0x84c   :  { %1660 = vrot.lane.b32.xlu0 %v5835_v12, %s5427_s3  ;;  %v1044_v12 = vrot.slane %v5897_v21, %v5690_v7 }
 0x84e   :  { %v5904_v25 = vadd.f32 %v1044_v12, %v5706_v14 }
 0x8c3   :  { %v1651_v3 = vpop.xlane.xlu0 %1650 }
 0x8c4   :  { %v1652_v5 = vsub.f32 %v1648_v63, %v1651_v3 }
 0x8c6   :  { %v1653_v11 = vmul.f32 1.442695, %v1652_v5 }
 0x8c7   :  { %v1661_v15 = vpop.permute.xlu0 %1660 }
 0x8c8   :  { %5378 = vpow2.f32 %v1653_v11  ;;  %4933 = vmatpush3.msra.mxu1 %v1661_v15 }
 0x8c9   :  { %4937 = vmatprep.subr.mxu1 %v5423_v4 }
 0x8d2   :  { %v5379_v16 = vpop.eup %5378 }
 0x8d3   :  { %v1655_v18 = vsel %vm1136_vm2, %v5379_v16, 0.0 }
 0x8d4   :  { %1656 = vadd.xlane.f32.xlu1 %v1655_v18 }
 0x961   :  { %v1657_v20 = vpop.xlane.xlu1 %1656 }
 0x962   :  { %5380 = vrcp.f32 %v1657_v20 }
 0x96c   :  { %v5381_v22 = vpop.eup %5380 }
 0x96d   :  { %v1659_v24 = vmul.f32 %v5381_v22, %v5379_v16 }
 0x96f   :  { %4935 = vmatmul.mubr.msk.f32.vlgmr.msra.gmra.mrb[18].mxu1 %vm1136_vm2, %v1659_v24 }
 0x970   :  { %4938 = vmatpush3.xpose.msk.msra.mxu1 %vm1057_vm1, %v5904_v25  ;;  %4939 = vmatprep.mubr.msk.f32.mxu1 %vm5424_vm0, %v5423_v4 }
 0x971   :  { %4942 = vmatprep.subr.mxu1 %v5423_v4 }
 0x973   :  { %4940 = vmatmul.mubr.msk.f32.vlgmr.msra.gmra.mrb[20].mxu1 %vm1057_vm1, %v5914_v27 }
 0x974   :  { %4943 = vmatpush3.msra.mxu1 %v5918_v28  ;;  %4944 = vmatprep.mubr.msk.f32.mxu1 %vm5424_vm0, %v5423_v4 }
 0x975   :  { %4947 = vmatprep.subr.mxu1 %v5423_v4 }
 0xa42   :  { %v5926_v14 = vpop.f32.mrb[18].mxu1 }
 0xa43   :  { %v4936_v29 = vpop.f32.mrb[19].mxu1 }
 0xa46   :  { %v1814_v19 = vpop.f32.mrb[20].mxu1 }
 0xa47   :  { %v1818_v30 = vmul.f32 0.17677669, %v1814_v19  ;;  %v4941_v31 = vpop.f32.mrb[21].mxu1 }
 0xa49   :  { %v1819_v32 = vadd.f32 %v1818_v30, %v5823_v55 }
 0xa4b   :  { %v1820_v10 = vsel %vm1136_vm2, %v1819_v32, -inf }
 0xa4c   :  { %1821 = vmax.xlane.f32.xlu0 %v1820_v10 }
 0xa62   :  { %1905 = vrot.lane.b32.xlu0 %v5914_v27, %s5425_s16 }
 0xad9   :  { %v1822_v33 = vpop.xlane.xlu0 %1821 }
 0xada   :  { %v1823_v34 = vsub.f32 %v1819_v32, %v1822_v33 }
 0xadc   :  { %v1824_v35 = vmul.f32 1.442695, %v1823_v34 }
 0xadd   :  { %v1906_v42 = vpop.permute.xlu0 %1905 }
 0xade   :  { %5382 = vpow2.f32 %v1824_v35 }
 0xae8   :  { %v5383_v36 = vpop.eup %5382 }
 0xae9   :  { %v1826_v37 = vsel %vm1136_vm2, %v5383_v36, 0.0 }
 0xaea   :  { %1827 = vadd.xlane.f32.xlu1 %v1826_v37 }
 0xafb   :  { %1907 = vrot.lane.b32.xlu1 %v5904_v25, %s5425_s16 }
 0xb77   :  { %v1828_v38 = vpop.xlane.xlu1 %1827 }
 0xb78   :  { %5384 = vrcp.f32 %v1828_v38 }
 0xb7b   :  { %v1908_v41 = vpop.permute.xlu1 %1907 }
 0xb82   :  { %v5385_v39 = vpop.eup %5384 }
 0xb83   :  { %v1830_v40 = vmul.f32 %v5385_v39, %v5383_v36 }
 0xb85   :  { %4945 = vmatmul.mubr.msk.f32.vlgmr.msra.gmra.mrb[22].mxu1 %vm1136_vm2, %v1830_v40 }
 0xb86   :  { %4948 = vmatpush3.xpose.msk.msra.mxu1 %vm1057_vm1, %v1908_v41  ;;  %4949 = vmatprep.mubr.msk.f32.mxu1 %vm5424_vm0, %v5423_v4 }
 0xb87   :  { %4952 = vmatprep.subr.mxu1 %v5423_v4 }
 0xb89   :  { %4950 = vmatmul.mubr.msk.f32.vlgmr.msra.gmra.mrb[24].mxu1 %vm1057_vm1, %v1906_v42 }
 0xb8a   :  { %4954 = vmatprep.mubr.msk.f32.mxu1 %vm5424_vm0, %v5423_v4 }
 0xc58   :  { %v1900_v43 = vpop.f32.mrb[22].mxu1 }
 0xc59   :  { %1904 = vst.msk [vmem:[#allocation2 + $0x8] sm:$0xff] %vm1057_vm1, %v1900_v43  ;;  %v4946_v44 = vpop.f32.mrb[23].mxu1 }
 0xc5a   :  { %v5126_v44 = vld [vmem:[%s7006_s4] ss:$8 sps:$4 sm:$0xff]  }
 0xc5c   :  { %v1979_v45 = vpop.f32.mrb[24].mxu1 }
 0xc5d   :  { %v1983_v46 = vmul.f32 0.17677669, %v1979_v45  ;;  %v4951_v47 = vpop.f32.mrb[25].mxu1  ;;  %v5131_v45 = vld [vmem:[%s7006_s4 + $0x14] ss:$8 sps:$4 sm:$0xff]  }
 0xc5e   :  { %v5134_v47 = vld [vmem:[%s7006_s4 + $0x24] ss:$8 sps:$4 sm:$0xff]  }
 0xc5f   :  { %v1984_v48 = vadd.f32 %v1983_v46, %v5823_v55  ;;  %v5129_v46 = vld [vmem:[%s7006_s4 + $0x10] ss:$8 sps:$4 sm:$0xff]  }
 0xc61   :  { %v1985_v49 = vsel %vm1136_vm2, %v1984_v48, -inf }
 0xc62   :  { %1986 = vmax.xlane.f32.xlu1 %v1985_v49  ;;  %v5137_v49 = vld [vmem:[%s7006_s4 + $0x34] ss:$8 sps:$4 sm:$0xff]  }
 0xc73   :  { %1997 = vrot.lane.b32.xlu1 %v5918_v28, %s5425_s16 }
 0xc77   :  { %2078 = vrot.lane.b32.xlu1 %v5914_v27, %s5426_s1 }
 0xcef   :  { %v1987_v50 = vpop.xlane.xlu1 %1986 }
 0xcf0   :  { %v1988_v51 = vsub.f32 %v1984_v48, %v1987_v50  ;;  %v5132_v48 = vld [vmem:[%s7006_s4 + $0x20] ss:$8 sps:$4 sm:$0xff]   ;;  %v5135_v50 = vld [vmem:[%s7006_s4 + $0x30] ss:$8 sps:$4 sm:$0xff]  }
 0xcf2   :  { %v1989_v52 = vmul.f32 1.442695, %v1988_v51  ;;  %v5140_v51 = vld [vmem:[%s7006_s4 + $0x44] ss:$8 sps:$4 sm:$0xff]  }
 0xcf3   :  { %v1998_v53 = vpop.permute.xlu1 %1997 }
 0xcf4   :  { %5386 = vpow2.f32 %v1989_v52  ;;  %4953 = vmatpush3.msra.mxu1 %v1998_v53  ;;  %v5138_v52 = vld [vmem:[%s7006_s4 + $0x40] ss:$8 sps:$4 sm:$0xff]   ;;  %v5143_v53 = vld [vmem:[%s7006_s4 + $0x54] ss:$8 sps:$4 sm:$0xff]  }
 0xcf5   :  { %4957 = vmatprep.subr.mxu1 %v5423_v4 }
 0xcf7   :  { %v2079_v61 = vpop.permute.xlu1 %2078 }
 0xcfe   :  { %v5387_v54 = vpop.eup %5386 }
 0xcff   :  { %v1991_v56 = vsel %vm1136_vm2, %v5387_v54, 0.0 }
 0xd00   :  { %1992 = vadd.xlane.f32.xlu0 %v1991_v56  ;;  %v5146_v56 = vld [vmem:[%s7006_s4 + $0x64] ss:$8 sps:$4 sm:$0xff]  }
 0xd16   :  { %2080 = vrot.lane.b32.xlu0 %v5904_v25, %s5426_s1 }
 0xd8d   :  { %v1993_v57 = vpop.xlane.xlu0 %1992 }
 0xd8e   :  { %5388 = vrcp.f32 %v1993_v57  ;;  %v5144_v57 = vld [vmem:[%s7006_s4 + $0x60] ss:$8 sps:$4 sm:$0xff]  }
 0xd91   :  { %v2081_v60 = vpop.permute.xlu0 %2080 }
 0xd98   :  { %v5389_v58 = vpop.eup %5388 }
 0xd99   :  { %v1995_v59 = vmul.f32 %v5389_v58, %v5387_v54  ;;  %v5141_v54 = vld [vmem:[%s7006_s4 + $0x50] ss:$8 sps:$4 sm:$0xff]   ;;  %v5149_v58 = vld [vmem:[%s7006_s4 + $0x74] ss:$8 sps:$4 sm:$0xff]  }
 0xd9b   :  { %4955 = vmatmul.mubr.msk.f32.vlgmr.msra.gmra.mrb[26].mxu1 %vm1136_vm2, %v1995_v59  ;;  %v5147_v59 = vld [vmem:[%s7006_s4 + $0x70] ss:$8 sps:$4 sm:$0xff]  }
 0xd9c   :  { %4958 = vmatpush3.xpose.msk.msra.mxu1 %vm1057_vm1, %v2081_v60  ;;  %4959 = vmatprep.mubr.msk.f32.mxu1 %vm5424_vm0, %v5423_v4  ;;  %v5152_v60 = vld [vmem:[%s7006_s4 + $0x84] ss:$8 sps:$4 sm:$0xff]  }
 0xd9d   :  { %4962 = vmatprep.subr.mxu1 %v5423_v4 }
 0xd9f   :  { %4960 = vmatmul.mubr.msk.f32.vlgmr.msra.gmra.mrb[28].mxu1 %vm1057_vm1, %v2079_v61  ;;  %v5150_v61 = vld [vmem:[%s7006_s4 + $0x80] ss:$8 sps:$4 sm:$0xff]  }
 0xda0   :  { %4964 = vmatprep.mubr.msk.f32.mxu1 %vm5424_vm0, %v5423_v4 }
 0xe6e   :  { %v2069_v62 = vpop.f32.mrb[26].mxu1 }
 0xe6f   :  { %v4956_v63 = vpop.f32.mrb[27].mxu1 }
 0xe70   :  { %v5153_v63 = vld [vmem:[%s7006_s4 + $0x90] ss:$8 sps:$4 sm:$0xff]  }
 0xe72   :  { %v2152_v0 = vpop.f32.mrb[28].mxu1 }
 0xe73   :  { %v2156_v3 = vmul.f32 0.17677669, %v2152_v0  ;;  %v4961_v5 = vpop.f32.mrb[29].mxu1  ;;  %v5158_v0 = vld [vmem:[%s7006_s4 + $0xa4] ss:$8 sps:$4 sm:$0xff]  }
 0xe74   :  { %v5161_v5 = vld [vmem:[%s7006_s4 + $0xb4] ss:$8 sps:$4 sm:$0xff]  }
 0xe75   :  { %v2157_v11 = vadd.f32 %v2156_v3, %v5823_v55  ;;  %v5156_v3 = vld [vmem:[%s7006_s4 + $0xa0] ss:$8 sps:$4 sm:$0xff]  }
 0xe77   :  { %v2158_v15 = vsel %vm1136_vm2, %v2157_v11, -inf }
 0xe78   :  { %2159 = vmax.xlane.f32.xlu1 %v2158_v15  ;;  %v5164_v15 = vld [vmem:[%s7006_s4 + $0xc4] ss:$8 sps:$4 sm:$0xff]  }
 0xe89   :  { %2169 = vrot.lane.b32.xlu1 %v5918_v28, %s5426_s1 }
 0xe8d   :  { %2250 = vrot.lane.b32.xlu1 %v5914_v27, %s5427_s3 }
 0xf05   :  { %v2160_v16 = vpop.xlane.xlu1 %2159 }
 0xf06   :  { %v2161_v18 = vsub.f32 %v2157_v11, %v2160_v16  ;;  %v5159_v11 = vld [vmem:[%s7006_s4 + $0xb0] ss:$8 sps:$4 sm:$0xff]   ;;  %v5162_v16 = vld [vmem:[%s7006_s4 + $0xc0] ss:$8 sps:$4 sm:$0xff]  }
 0xf08   :  { %v2162_v20 = vmul.f32 1.442695, %v2161_v18  ;;  %v5167_v18 = vld [vmem:[%s7006_s4 + $0xd4] ss:$8 sps:$4 sm:$0xff]  }
 0xf09   :  { %v2170_v12 = vpop.permute.xlu1 %2169 }
 0xf0a   :  { %5390 = vpow2.f32 %v2162_v20  ;;  %4963 = vmatpush3.msra.mxu1 %v2170_v12  ;;  %v5165_v20 = vld [vmem:[%s7006_s4 + $0xd0] ss:$8 sps:$4 sm:$0xff]   ;;  %v5168_v12 = vld [vmem:[%s7006_s4 + $0xe0] ss:$8 sps:$4 sm:$0xff]  }
 0xf0b   :  { %4967 = vmatprep.subr.mxu1 %v5423_v4 }
 0xf0d   :  { %v2251_v19 = vpop.permute.xlu1 %2250 }
 0xf14   :  { %v5391_v22 = vpop.eup %5390 }
 0xf15   :  { %v2164_v23 = vsel %vm1136_vm2, %v5391_v22, 0.0 }
 0xf16   :  { %2165 = vadd.xlane.f32.xlu0 %v2164_v23  ;;  %v5173_v23 = vld [vmem:[%s7006_s4 + $0xf4] ss:$8 sps:$4 sm:$0xff]  }
 0xf2c   :  { %2252 = vrot.lane.b32.xlu0 %v5904_v25, %s5427_s3 }
 0xfa3   :  { %v2166_v24 = vpop.xlane.xlu0 %2165 }
 0xfa4   :  { %5392 = vrcp.f32 %v2166_v24  ;;  %v5171_v24 = vld [vmem:[%s7006_s4 + $0xf0] ss:$8 sps:$4 sm:$0xff]  }
 0xfa7   :  { %v2253_v27 = vpop.permute.xlu0 %2252 }
 0xfae   :  { %v5393_v26 = vpop.eup %5392 }
 0xfaf   :  { %v2168_v29 = vmul.f32 %v5393_v26, %v5391_v22  ;;  %v5170_v22 = vld [vmem:[%s7006_s4 + $0xe4] ss:$8 sps:$4 sm:$0xff]  }
 0xfb1   :  { %4965 = vmatmul.mubr.msk.f32.vlgmr.msra.gmra.mrb[30].mxu1 %vm1136_vm2, %v2168_v29 }
 0xfb2   :  { %4968 = vmatpush3.xpose.msk.msra.mxu1 %vm1057_vm1, %v2253_v27  ;;  %4969 = vmatprep.mubr.msk.f32.mxu1 %vm5424_vm0, %v5423_v4 }
 0xfb3   :  { %4972 = vmatprep.subr.mxu1 %v5423_v4 }
 0xfb5   :  { %4970 = vmatmul.mubr.msk.f32.vlgmr.msra.gmra.mrb[32].mxu1 %vm1057_vm1, %v2251_v19 }
 0xfb6   :  { %4974 = vmatprep.mubr.msk.f32.mxu1 %vm5424_vm0, %v5423_v4 }
0x1084   :  { %v2241_v25 = vpop.f32.mrb[30].mxu1 }
0x1085   :  { %v4966_v30 = vpop.f32.mrb[31].mxu1 }
0x1088   :  { %v2324_v31 = vpop.f32.mrb[32].mxu1 }
0x1089   :  { %v2328_v32 = vmul.f32 0.17677669, %v2324_v31  ;;  %v4971_v10 = vpop.f32.mrb[33].mxu1 }
0x108b   :  { %v2329_v33 = vadd.f32 %v2328_v32, %v5823_v55  ;;  %v6094_v32 = vsub.s32 3, %v5687_v6 }
0x108d   :  { %v2330_v34 = vsel %vm1136_vm2, %v2329_v33, -inf  ;;  %v2429_v10 = vrot.slane %v5695_v8, %v6094_v32 }
0x108e   :  { %2331 = vmax.xlane.f32.xlu1 %v2330_v34 }
0x109f   :  { %2341 = vrot.lane.b32.xlu1 %v5918_v28, %s5427_s3 }
0x10a3   :  { %1391 = vrot.lane.b32.xlu1 %v5871_v13, %s5427_s3 }
0x10a7   :  { %2246 = vrot.lane.b32.xlu1 %v2241_v25, %s5426_s1 }
0x10ab   :  { %1564 = vrot.lane.b32.xlu1 %v5886_v17, %s5426_s1 }
0x111b   :  { %v2332_v4 = vpop.xlane.xlu1 %2331 }
0x111c   :  { %v2333_v35 = vsub.f32 %v2329_v33, %v2332_v4  ;;  %v2433_v33 = vrot.slane %v5897_v21, %v6094_v32  ;;  %v167_v21 = vld [vmem:[%s7007_s6] sm:$0xff] }
0x111e   :  { %v2334_v36 = vmul.f32 1.442695, %v2333_v35 }
0x111f   :  { %v2342_v37 = vpop.permute.xlu1 %2341 }
0x1120   :  { %5394 = vpow2.f32 %v2334_v36  ;;  %4973 = vmatpush3.msra.mxu1 %v2342_v37 }
0x1123   :  { %v1392_v55 = vpop.permute.xlu1 %1391 }
0x1124   :  { %1395 = vst.msk [vmem:[#allocation2] sm:$0xff] %vm1394_vm3, %v1392_v55 }
0x1127   :  { %v2247_v38 = vpop.permute.xlu1 %2246 }
0x112a   :  { %v5395_v28 = vpop.eup %5394 }
0x112b   :  { %v1565_v39 = vpop.permute.xlu1 %1564  ;;  %v2336_v13 = vsel %vm1136_vm2, %v5395_v28, 0.0 }
0x112c   :  { %1568 = vst.msk [vmem:[#allocation2] sm:$0xff] %vm1567_vm4, %v1565_v39  ;;  %2337 = vadd.xlane.f32.xlu0 %v2336_v13  ;;  %v168_v13 = vld [vmem:[%s7007_s6 + $0x8] sm:$0xff] }
0x1142   :  { %2074 = vrot.lane.b32.xlu0 %v2069_v62, %s5427_s3  ;;  %v5155_v62 = vld [vmem:[%s7006_s4 + $0x94] ss:$8 sps:$4 sm:$0xff]  }
0x1146   :  { %1737 = vrot.lane.b32.xlu0 %v5926_v14, %s5425_s16  ;;  %v5128_v14 = vld [vmem:[%s7006_s4 + $0x4] ss:$8 sps:$4 sm:$0xff]  }
0x1147   :  { %2594 = vmatprep.subr.bf16.mxu0 %v5128_v14 }
0x1148   :  { %2595 = vmatpush1.bf16.msra.mxu0 %v5126_v44 }
0x1149   :  { %2596 = vmatprep.subr.bf16.mxu0 %v5131_v45 }
0x114c   :  { %2597 = vmatpush1.bf16.msra.mxu0 %v5129_v46  ;;  %v176_v46 = vld [vmem:[%s7007_s6 + $0x48] sm:$0xff] }
0x114d   :  { %2598 = vmatprep.subr.bf16.mxu0 %v5134_v47  ;;  %v180_v47 = vld [vmem:[%s7007_s6 + $0x68] sm:$0xff] }
0x1150   :  { %2599 = vmatpush1.bf16.msra.mxu0 %v5132_v48  ;;  %v183_v48 = vld [vmem:[%s7007_s6 + $0x80] sm:$0xff] }
0x1151   :  { %2600 = vmatprep.subr.bf16.mxu0 %v5137_v49  ;;  %v4620_v49 = vcombine.high %v176_v46, %v180_v47 }
0x1154   :  { %2601 = vmatpush1.bf16.msra.mxu0 %v5135_v50  ;;  %v187_v50 = vld [vmem:[%s7007_s6 + $0xa0] sm:$0xff] }
0x1155   :  { %2602 = vmatprep.subr.bf16.mxu0 %v5140_v51  ;;  %v184_v51 = vld [vmem:[%s7007_s6 + $0x88] sm:$0xff] }
0x1158   :  { %2603 = vmatpush1.bf16.msra.mxu0 %v5138_v52  ;;  %v188_v52 = vld [vmem:[%s7007_s6 + $0xa8] sm:$0xff] }
0x1159   :  { %2604 = vmatprep.subr.bf16.mxu0 %v5143_v53 }
0x115c   :  { %2605 = vmatpush1.bf16.msra.mxu0 %v5141_v54  ;;  %v4619_v54 = vcombine.low %v176_v46, %v180_v47 }
0x115d   :  { %2606 = vmatprep.subr.bf16.mxu0 %v5146_v56  ;;  %v4626_v56 = vcombine.high %v183_v48, %v187_v50 }
0x1160   :  { %2607 = vmatpush1.bf16.msra.mxu0 %v5144_v57  ;;  %v4628_v57 = vcombine.high %v184_v51, %v188_v52 }
0x1161   :  { %2608 = vmatprep.subr.bf16.mxu0 %v5149_v58  ;;  %v191_v58 = vld [vmem:[%s7007_s6 + $0xc0] sm:$0xff] }
0x1164   :  { %2609 = vmatpush1.bf16.msra.mxu0 %v5147_v59  ;;  %v195_v59 = vld [vmem:[%s7007_s6 + $0xe0] sm:$0xff] }
0x1165   :  { %2610 = vmatprep.subr.bf16.mxu0 %v5152_v60  ;;  %v192_v60 = vld [vmem:[%s7007_s6 + $0xc8] sm:$0xff] }
0x1168   :  { %2611 = vmatpush1.bf16.msra.mxu0 %v5150_v61  ;;  %v196_v61 = vld [vmem:[%s7007_s6 + $0xe8] sm:$0xff] }
0x1169   :  { %2612 = vmatprep.subr.bf16.mxu0 %v5155_v62  ;;  %v4625_v62 = vcombine.low %v183_v48, %v187_v50  ;;  %v239_v48 = vld [vmem:[%s7007_s6 + $0x240] sm:$0xff]  ;;  %v240_v50 = vld [vmem:[%s7007_s6 + $0x248] sm:$0xff] }
0x116c   :  { %2613 = vmatpush1.bf16.msra.mxu0 %v5153_v63  ;;  %v4627_v63 = vcombine.low %v184_v51, %v188_v52  ;;  %v244_v51 = vld [vmem:[%s7007_s6 + $0x268] sm:$0xff] }
0x116d   :  { %2614 = vmatprep.subr.bf16.mxu0 %v5158_v0  ;;  %v4634_v0 = vcombine.high %v191_v58, %v195_v59 }
0x1170   :  { %2615 = vmatpush1.bf16.msra.mxu0 %v5156_v3  ;;  %v4636_v3 = vcombine.high %v192_v60, %v196_v61 }
0x1171   :  { %2616 = vmatprep.subr.bf16.mxu0 %v5161_v5  ;;  %v199_v5 = vld [vmem:[%s7007_s6 + $0x100] sm:$0xff] }
0x1174   :  { %2617 = vmatpush1.bf16.msra.mxu0 %v5159_v11  ;;  %v203_v11 = vld [vmem:[%s7007_s6 + $0x120] sm:$0xff] }
0x1175   :  { %2618 = vmatprep.subr.bf16.mxu0 %v5164_v15  ;;  %v200_v15 = vld [vmem:[%s7007_s6 + $0x108] sm:$0xff] }
0x1178   :  { %2619 = vmatpush1.bf16.msra.mxu0 %v5162_v16  ;;  %v204_v16 = vld [vmem:[%s7007_s6 + $0x128] sm:$0xff] }
0x1179   :  { %2620 = vmatprep.subr.bf16.mxu0 %v5167_v18  ;;  %v4633_v18 = vcombine.low %v191_v58, %v195_v59  ;;  %v251_v58 = vld [vmem:[%s7007_s6 + $0x2a0] sm:$0xff]  ;;  %v248_v59 = vld [vmem:[%s7007_s6 + $0x288] sm:$0xff] }
0x117c   :  { %2621 = vmatpush1.bf16.msra.mxu0 %v5165_v20  ;;  %v4635_v20 = vcombine.low %v192_v60, %v196_v61  ;;  %v252_v60 = vld [vmem:[%s7007_s6 + $0x2a8] sm:$0xff] }
0x117d   :  { %2622 = vmatprep.subr.bf16.mxu0 %v5170_v22  ;;  %v4644_v22 = vcombine.high %v200_v15, %v204_v16 }
0x1180   :  { %2623 = vmatpush1.bf16.msra.mxu0 %v5168_v12  ;;  %v4642_v12 = vcombine.high %v199_v5, %v203_v11 }
0x1181   :  { %2624 = vmatprep.subr.bf16.mxu0 %v5173_v23  ;;  %v207_v23 = vld [vmem:[%s7007_s6 + $0x140] sm:$0xff] }
0x1184   :  { %2625 = vmatpush1.bf16.msra.mxu0 %v5171_v24  ;;  %v211_v24 = vld [vmem:[%s7007_s6 + $0x160] sm:$0xff] }
0x11b9   :  { %v2338_v17 = vpop.xlane.xlu0 %2337 }
0x11ba   :  { %5396 = vrcp.f32 %v2338_v17 }
0x11bd   :  { %v2075_v40 = vpop.permute.xlu0 %2074 }
0x11be   :  { %2077 = vst.msk [vmem:[#allocation2 + $0x8] sm:$0xff] %vm1394_vm3, %v2075_v40 }
0x11bf   :  { %2249 = vst.msk [vmem:[#allocation2 + $0x8] sm:$0xff] %vm1567_vm4, %v2247_v38 }
0x11c1   :  { %v1738_v41 = vpop.permute.xlu0 %1737 }
0x11c2   :  { %1741 = vst.msk [vmem:[#allocation2] sm:$0xff] %vm1740_vm5, %v1738_v41  ;;  %v172_v41 = vld [vmem:[%s7007_s6 + $0x28] sm:$0xff] }
0x11c3   :  { %v4611_v44 = vcombine.low %v168_v13, %v172_v41  ;;  %v4612_v14 = vcombine.high %v168_v13, %v172_v41  ;;  %v231_v41 = vld [vmem:[%s7007_s6 + $0x200] sm:$0xff] }
0x11c4   :  { %v5397_v42 = vpop.eup %5396 }
0x11c5   :  { %v2340_v43 = vmul.f32 %v5397_v42, %v5395_v28  ;;  %v5418_v28 = vld [vmem:[%s7003_s0 + $0x8] sm:$0xff]  ;;  %v175_v42 = vld [vmem:[%s7007_s6 + $0x40] sm:$0xff]  ;;  %3398 = vmatprep.subr.bf16.mxu0 %v4612_v14 }
0x11c7   :  { %4975 = vmatmul.mubr.msk.f32.vlgmr.msra.gmra.mrb[34].mxu1 %vm1136_vm2, %v2340_v43  ;;  %v179_v43 = vld [vmem:[%s7007_s6 + $0x60] sm:$0xff] }
0x11c8   :  { %v4618_v45 = vcombine.high %v175_v42, %v179_v43  ;;  %v4617_v53 = vcombine.low %v175_v42, %v179_v43  ;;  %v235_v42 = vld [vmem:[%s7007_s6 + $0x220] sm:$0xff]  ;;  %v232_v43 = vld [vmem:[%s7007_s6 + $0x208] sm:$0xff] }
0x11c9   :  { %v2422_v19 = vld [vmem:[#allocation2] sm:$0xff]  ;;  %v4674_v46 = vcombine.high %v231_v41, %v235_v42  ;;  %v4673_v52 = vcombine.low %v231_v41, %v235_v42  ;;  %v280_v41 = vld [vmem:[%s7007_s6 + $0x388] sm:$0xff] }
0x11ca   :  { %v2424_v31 = vpack.c.bf16 %v2422_v19, %v2422_v19  ;;  %v4643_v19 = vcombine.low %v200_v15, %v204_v16 }
0x129a   :  { %v2413_v26 = vpop.f32.mrb[34].mxu1 }
0x129b   :  { %2418 = vrot.lane.b32.xlu1 %v2413_v26, %s5425_s16  ;;  %v4976_v29 = vpop.f32.mrb[35].mxu1  ;;  %v208_v26 = vld [vmem:[%s7007_s6 + $0x148] sm:$0xff] }
0x129c   :  { %v212_v29 = vld [vmem:[%s7007_s6 + $0x168] sm:$0xff] }
0x130d   :  { %v2419_v27 = vpop.permute.xlu1 %2418 }
0x130e   :  { %2421 = vst.msk [vmem:[#allocation2 + $0x8] sm:$0xff] %vm1740_vm5, %v2419_v27  ;;  %v4641_v27 = vcombine.low %v199_v5, %v203_v11  ;;  %v4691_v5 = vcombine.low %v248_v59, %v252_v60 }
0x1315   :  { %v2423_v25 = vld [vmem:[#allocation2 + $0x8] sm:$0xff] }
0x1316   :  { %v2425_v30 = vpack.c.bf16 %v2423_v25, %v2423_v25  ;;  %v4650_v25 = vcombine.high %v207_v23, %v211_v24 }
0x1318   :  { %2626 = vmatprep.mubr.bf16.mxu0 %v2425_v30  ;;  %v4652_v30 = vcombine.high %v208_v26, %v212_v29 }
0x1319   :  { %2627 = vmatmul.mubr.bf16.vlgmr.msra.gmra.mrb[8].mxu0 %v2424_v31  ;;  %v215_v31 = vld [vmem:[%s7007_s6 + $0x180] sm:$0xff] }
0x131a   :  { %3399 = vmatpush1.bf16.msra.mxu0 %v4611_v44  ;;  %v236_v44 = vld [vmem:[%s7007_s6 + $0x228] sm:$0xff] }
0x131b   :  { %3400 = vmatprep.subr.bf16.mxu0 %v4620_v49  ;;  %v4676_v47 = vcombine.high %v232_v43, %v236_v44  ;;  %v243_v49 = vld [vmem:[%s7007_s6 + $0x260] sm:$0xff] }
0x131c   :  { %v4681_v61 = vcombine.low %v239_v48, %v243_v49 }
0x131e   :  { %3401 = vmatpush1.bf16.msra.mxu0 %v4619_v54  ;;  %v4682_v54 = vcombine.high %v239_v48, %v243_v49  ;;  %v288_v49 = vld [vmem:[%s7007_s6 + $0x3c8] sm:$0xff] }
0x131f   :  { %3402 = vmatprep.subr.bf16.mxu0 %v4628_v57  ;;  %v247_v57 = vld [vmem:[%s7007_s6 + $0x280] sm:$0xff] }
0x1322   :  { %3403 = vmatpush1.bf16.msra.mxu0 %v4627_v63  ;;  %v4690_v63 = vcombine.high %v247_v57, %v251_v58 }
0x1323   :  { %3404 = vmatprep.subr.bf16.mxu0 %v4636_v3  ;;  %v4689_v3 = vcombine.low %v247_v57, %v251_v58  ;;  %v170_v57 = vld [vmem:[%s7007_s6 + $0x18] sm:$0xff] }
0x1326   :  { %3405 = vmatpush1.bf16.msra.mxu0 %v4635_v20 }
0x1327   :  { %3406 = vmatprep.subr.bf16.mxu0 %v4644_v22 }
0x132a   :  { %3407 = vmatpush1.bf16.msra.mxu0 %v4643_v19 }
0x132b   :  { %3408 = vmatprep.subr.bf16.mxu0 %v4652_v30  ;;  %v267_v30 = vld [vmem:[%s7007_s6 + $0x320] sm:$0xff] }
0x13ec   :  { %v2628_v34 = vpop.f32.mrb[8].mxu0 }
0x13ed   :  { %v2629_v4 = vadd.f32 %v2628_v34, %v2429_v10  ;;  %v2630_v35 = vpop.f32.mrb[9].mxu0  ;;  %v219_v10 = vld [vmem:[%s7007_s6 + $0x1a0] sm:$0xff]  ;;  %v220_v34 = vld [vmem:[%s7007_s6 + $0x1a8] sm:$0xff] }
0x13ee   :  { %v2631_v36 = vadd.f32 %v2630_v35, %v2433_v33  ;;  %v2632_v37 = vpop.f32.mrb[10].mxu0  ;;  %v216_v33 = vld [vmem:[%s7007_s6 + $0x188] sm:$0xff]  ;;  %v4651_v35 = vcombine.low %v208_v26, %v212_v29 }
0x13ef   :  { %v6101_v55 = vadd.f32 %v2629_v4, %v5673_v1  ;;  %v2633_v38 = vpop.f32.mrb[11].mxu0  ;;  %v171_v1 = vld [vmem:[%s7007_s6 + $0x20] sm:$0xff]  ;;  %v4649_v4 = vcombine.low %v207_v23, %v211_v24  ;;  %v4660_v37 = vcombine.high %v216_v33, %v220_v34  ;;  %v4659_v13 = vcombine.low %v216_v33, %v220_v34  ;;  %v260_v26 = vld [vmem:[%s7007_s6 + $0x2e8] sm:$0xff] }
0x13f0   :  { %v6106_v39 = vadd.f32 %v5418_v28, %v2631_v36  ;;  %v4609_v17 = vcombine.low %v167_v21, %v171_v1  ;;  %v4610_v40 = vcombine.high %v167_v21, %v171_v1  ;;  %v4658_v36 = vcombine.high %v215_v31, %v219_v10  ;;  %v223_v38 = vld [vmem:[%s7007_s6 + $0x1c0] sm:$0xff]  ;;  %v228_v21 = vld [vmem:[%s7007_s6 + $0x1e8] sm:$0xff]  ;;  %3409 = vmatpush1.bf16.msra.mxu0 %v4651_v35 }
0x13f1   :  { %v227_v28 = vld [vmem:[%s7007_s6 + $0x1e0] sm:$0xff]  ;;  %v4657_v1 = vcombine.low %v215_v31, %v219_v10  ;;  %3410 = vmatprep.subr.bf16.mxu0 %v4660_v37  ;;  %v264_v31 = vld [vmem:[%s7007_s6 + $0x308] sm:$0xff] }
0x13f2   :  { %v2637_v8 = vadd.f32 %v6106_v39, %v6101_v55  ;;  %3357 = vmatprep.subr.bf16.mxu1 %v4610_v40  ;;  %v4665_v14 = vcombine.low %v223_v38, %v227_v28  ;;  %v255_v23 = vld [vmem:[%s7007_s6 + $0x2c0] sm:$0xff]  ;;  %v268_v33 = vld [vmem:[%s7007_s6 + $0x328] sm:$0xff] }
0x13f3   :  { %3358 = vmatpush1.bf16.msra.mxu1 %v4609_v17  ;;  %v4666_v17 = vcombine.high %v223_v38, %v227_v28  ;;  %v4708_v35 = vcombine.high %v264_v31, %v268_v33  ;;  %v275_v37 = vld [vmem:[%s7007_s6 + $0x360] sm:$0xff]  ;;  %v272_v38 = vld [vmem:[%s7007_s6 + $0x348] sm:$0xff] }
0x13f4   :  { %2638 = vadd.xlane.f32.xlu1 %v2637_v8  ;;  %3359 = vmatprep.subr.bf16.mxu1 %v4618_v45  ;;  %v224_v8 = vld [vmem:[%s7007_s6 + $0x1c8] sm:$0xff] }
0x13f5   :  { %v4668_v40 = vcombine.high %v224_v8, %v228_v21  ;;  %3411 = vmatpush1.bf16.msra.mxu0 %v4659_v13  ;;  %v4667_v45 = vcombine.low %v224_v8, %v228_v21  ;;  %v276_v8 = vld [vmem:[%s7007_s6 + $0x368] sm:$0xff] }
0x13f6   :  { %v4716_v13 = vcombine.high %v272_v38, %v276_v8 }
0x13f7   :  { %3360 = vmatpush1.bf16.msra.mxu1 %v4617_v53  ;;  %3412 = vmatprep.subr.bf16.mxu0 %v4668_v40  ;;  %v4675_v53 = vcombine.low %v232_v43, %v236_v44  ;;  %v283_v40 = vld [vmem:[%s7007_s6 + $0x3a0] sm:$0xff]  ;;  %v284_v44 = vld [vmem:[%s7007_s6 + $0x3a8] sm:$0xff] }
0x13f8   :  { %3361 = vmatprep.subr.bf16.mxu1 %v4626_v56  ;;  %v4684_v56 = vcombine.high %v240_v50, %v244_v51 }
0x13f9   :  { %3413 = vmatpush1.bf16.msra.mxu0 %v4667_v45  ;;  %v291_v45 = vld [vmem:[%s7007_s6 + $0x3e0] sm:$0xff] }
0x13fa   :  { %3414 = vmatprep.subr.bf16.mxu0 %v4676_v47  ;;  %v4724_v47 = vcombine.high %v280_v41, %v284_v44 }
0x13fb   :  { %3362 = vmatpush1.bf16.msra.mxu1 %v4625_v62  ;;  %v4683_v62 = vcombine.low %v240_v50, %v244_v51  ;;  %v292_v50 = vld [vmem:[%s7007_s6 + $0x3e8] sm:$0xff] }
0x13fc   :  { %3363 = vmatprep.subr.bf16.mxu1 %v4634_v0  ;;  %v4692_v0 = vcombine.high %v248_v59, %v252_v60  ;;  %v4732_v51 = vcombine.high %v288_v49, %v292_v50  ;;  %v174_v60 = vld [vmem:[%s7007_s6 + $0x38] sm:$0xff] }
0x13fd   :  { %3415 = vmatpush1.bf16.msra.mxu0 %v4675_v53  ;;  %v4731_v53 = vcombine.low %v288_v49, %v292_v50 }
0x13fe   :  { %3416 = vmatprep.subr.bf16.mxu0 %v4684_v56  ;;  %v173_v56 = vld [vmem:[%s7007_s6 + $0x30] sm:$0xff] }
0x13ff   :  { %3364 = vmatpush1.bf16.msra.mxu1 %v4633_v18 }
0x1400   :  { %3365 = vmatprep.subr.bf16.mxu1 %v4642_v12 }
0x1401   :  { %3417 = vmatpush1.bf16.msra.mxu0 %v4683_v62  ;;  %v4616_v62 = vcombine.high %v170_v57, %v174_v60 }
0x1402   :  { %3418 = vmatprep.subr.bf16.mxu0 %v4692_v0 }
0x1403   :  { %3366 = vmatpush1.bf16.msra.mxu1 %v4641_v27 }
0x1404   :  { %3367 = vmatprep.subr.bf16.mxu1 %v4650_v25  ;;  %v263_v25 = vld [vmem:[%s7007_s6 + $0x300] sm:$0xff] }
0x1405   :  { %3419 = vmatpush1.bf16.msra.mxu0 %v4691_v5  ;;  %v4706_v10 = vcombine.high %v263_v25, %v267_v30  ;;  %v4705_v34 = vcombine.low %v263_v25, %v267_v30  ;;  %v6325_v5 = vsub.s32 4, %v5687_v6  ;;  %v177_v30 = vld [vmem:[%s7007_s6 + $0x50] sm:$0xff] }
0x1407   :  { %3368 = vmatpush1.bf16.msra.mxu1 %v4649_v4  ;;  %v4707_v4 = vcombine.low %v264_v31, %v268_v33  ;;  %v182_v31 = vld [vmem:[%s7007_s6 + $0x78] sm:$0xff] }
0x1408   :  { %3369 = vmatprep.subr.bf16.mxu1 %v4658_v36  ;;  %v271_v36 = vld [vmem:[%s7007_s6 + $0x340] sm:$0xff] }
0x1409   :  { %v4714_v28 = vcombine.high %v271_v36, %v275_v37  ;;  %v4713_v21 = vcombine.low %v271_v36, %v275_v37  ;;  %v189_v36 = vld [vmem:[%s7007_s6 + $0xb0] sm:$0xff]  ;;  %v186_v37 = vld [vmem:[%s7007_s6 + $0x98] sm:$0xff] }
0x140b   :  { %3370 = vmatpush1.bf16.msra.mxu1 %v4657_v1  ;;  %v4715_v1 = vcombine.low %v272_v38, %v276_v8  ;;  %v190_v38 = vld [vmem:[%s7007_s6 + $0xb8] sm:$0xff] }
0x140c   :  { %3371 = vmatprep.subr.bf16.mxu1 %v4666_v17  ;;  %v279_v17 = vld [vmem:[%s7007_s6 + $0x380] sm:$0xff] }
0x140d   :  { %v4721_v42 = vcombine.low %v279_v17, %v283_v40  ;;  %v4722_v43 = vcombine.high %v279_v17, %v283_v40  ;;  %v197_v17 = vld [vmem:[%s7007_s6 + $0xf0] sm:$0xff]  ;;  %v194_v40 = vld [vmem:[%s7007_s6 + $0xd8] sm:$0xff] }
0x140f   :  { %3372 = vmatpush1.bf16.msra.mxu1 %v4665_v14  ;;  %v287_v14 = vld [vmem:[%s7007_s6 + $0x3c0] sm:$0xff] }
0x1410   :  { %3373 = vmatprep.subr.bf16.mxu1 %v4674_v46  ;;  %v4723_v46 = vcombine.low %v280_v41, %v284_v44  ;;  %v4730_v48 = vcombine.high %v287_v14, %v291_v45  ;;  %v198_v41 = vld [vmem:[%s7007_s6 + $0xf8] sm:$0xff] }
0x1411   :  { %v4639_v50 = vcombine.low %v194_v40, %v198_v41 }
0x1413   :  { %3374 = vmatpush1.bf16.msra.mxu1 %v4673_v52  ;;  %v4729_v52 = vcombine.low %v287_v14, %v291_v45  ;;  %v4640_v14 = vcombine.high %v194_v40, %v198_v41  ;;  %v201_v45 = vld [vmem:[%s7007_s6 + $0x110] sm:$0xff] }
0x1414   :  { %3375 = vmatprep.subr.bf16.mxu1 %v4682_v54  ;;  %v169_v54 = vld [vmem:[%s7007_s6 + $0x10] sm:$0xff] }
0x1415   :  { %v4613_v58 = vcombine.low %v169_v54, %v173_v56  ;;  %v4614_v59 = vcombine.high %v169_v54, %v173_v56  ;;  %v213_v54 = vld [vmem:[%s7007_s6 + $0x170] sm:$0xff]  ;;  %v210_v56 = vld [vmem:[%s7007_s6 + $0x158] sm:$0xff] }
0x1416   :  { %v249_v40 = vld [vmem:[%s7007_s6 + $0x290] sm:$0xff] }
0x1417   :  { %3376 = vmatpush1.bf16.msra.mxu1 %v4681_v61  ;;  %v4615_v61 = vcombine.low %v170_v57, %v174_v60  ;;  %v214_v57 = vld [vmem:[%s7007_s6 + $0x178] sm:$0xff]  ;;  %v253_v41 = vld [vmem:[%s7007_s6 + $0x2b0] sm:$0xff] }
0x1418   :  { %3377 = vmatprep.subr.bf16.mxu1 %v4690_v63 }
0x141b   :  { %3378 = vmatpush1.bf16.msra.mxu1 %v4689_v3 }
0x1481   :  { %v2639_v11 = vpop.xlane.xlu1 %2638 }
0x1482   :  { %v2641_v15 = vmul.f32 0.00390625, %v2639_v11  ;;  %v6328_v11 = vsub.s32 5, %v5687_v6 }
0x1484   :  { %v6243_v16 = vsub.f32 %v6101_v55, %v2641_v15  ;;  %v6246_v18 = vsub.f32 %v6106_v39, %v2641_v15  ;;  %v259_v55 = vld [vmem:[%s7007_s6 + $0x2e0] sm:$0xff]  ;;  %v256_v39 = vld [vmem:[%s7007_s6 + $0x2c8] sm:$0xff] }
0x1485   :  { %v4698_v24 = vcombine.high %v255_v23, %v259_v55  ;;  %v4697_v29 = vcombine.low %v255_v23, %v259_v55  ;;  %v4699_v27 = vcombine.low %v256_v39, %v260_v26  ;;  %v4700_v19 = vcombine.high %v256_v39, %v260_v26  ;;  %v5419_v15 = vld [vmem:[%s7004_s5 + $0x8] sm:$0xff] }
0x1486   :  { %v2644_v20 = vmul.f32 %v6243_v16, %v6243_v16  ;;  %v2645_v12 = vmul.f32 %v6246_v18, %v6246_v18 }
0x1487   :  { %3379 = vmatprep.subr.bf16.mxu1 %v4698_v24  ;;  %3420 = vmatprep.subr.bf16.mxu0 %v4700_v19  ;;  %v2671_v24 = vrot.slane %v5419_v15, %v6328_v11 }
0x1488   :  { %v2646_v22 = vadd.f32 %v2645_v12, %v2644_v20  ;;  %3380 = vmatpush1.bf16.msra.mxu1 %v4697_v29  ;;  %3421 = vmatpush1.bf16.msra.mxu0 %v4699_v27  ;;  %v2661_v20 = vrot.slane %v5419_v15, %v6325_v5  ;;  %v5420_v12 = vld [vmem:[%s7004_s5] sm:$0xff] }
0x1489   :  { %3381 = vmatprep.subr.bf16.mxu1 %v4706_v10  ;;  %3422 = vmatprep.subr.bf16.mxu0 %v4708_v35  ;;  %v2667_v26 = vrot.slane %v5420_v12, %v6328_v11 }
0x148a   :  { %2647 = vadd.xlane.f32.xlu0 %v2646_v22  ;;  %v2657_v22 = vrot.slane %v5420_v12, %v6325_v5 }
0x148c   :  { %3382 = vmatpush1.bf16.msra.mxu1 %v4705_v34  ;;  %3423 = vmatpush1.bf16.msra.mxu0 %v4707_v4  ;;  %v185_v34 = vld [vmem:[%s7007_s6 + $0x90] sm:$0xff] }
0x148d   :  { %3383 = vmatprep.subr.bf16.mxu1 %v4714_v28  ;;  %3424 = vmatprep.subr.bf16.mxu0 %v4716_v13  ;;  %v193_v13 = vld [vmem:[%s7007_s6 + $0xd0] sm:$0xff] }
0x148e   :  { %v4638_v44 = vcombine.high %v193_v13, %v197_v17  ;;  %v4637_v49 = vcombine.low %v193_v13, %v197_v17 }
0x1490   :  { %3384 = vmatpush1.bf16.msra.mxu1 %v4713_v21  ;;  %3425 = vmatpush1.bf16.msra.mxu0 %v4715_v1  ;;  %v4630_v21 = vcombine.high %v185_v34, %v189_v36  ;;  %v4632_v1 = vcombine.high %v186_v37, %v190_v38 }
0x1491   :  { %3385 = vmatprep.subr.bf16.mxu1 %v4722_v43  ;;  %3426 = vmatprep.subr.bf16.mxu0 %v4724_v47  ;;  %v4631_v43 = vcombine.low %v186_v37, %v190_v38  ;;  %v202_v47 = vld [vmem:[%s7007_s6 + $0x118] sm:$0xff]  ;;  %v241_v37 = vld [vmem:[%s7007_s6 + $0x250] sm:$0xff] }
0x1492   :  { %v245_v38 = vld [vmem:[%s7007_s6 + $0x270] sm:$0xff] }
0x1493   :  { %v4686_v13 = vcombine.high %v241_v37, %v245_v38 }
0x1494   :  { %3386 = vmatpush1.bf16.msra.mxu1 %v4721_v42  ;;  %3427 = vmatpush1.bf16.msra.mxu0 %v4723_v46  ;;  %v4629_v42 = vcombine.low %v185_v34, %v189_v36  ;;  %v205_v46 = vld [vmem:[%s7007_s6 + $0x130] sm:$0xff] }
0x1495   :  { %3387 = vmatprep.subr.bf16.mxu1 %v4730_v48  ;;  %3428 = vmatprep.subr.bf16.mxu0 %v4732_v51  ;;  %v206_v48 = vld [vmem:[%s7007_s6 + $0x138] sm:$0xff]  ;;  %v4646_v51 = vcombine.high %v201_v45, %v205_v46 }
0x1498   :  { %3388 = vmatpush1.bf16.msra.mxu1 %v4729_v52  ;;  %3429 = vmatpush1.bf16.msra.mxu0 %v4731_v53  ;;  %v4648_v52 = vcombine.high %v202_v47, %v206_v48  ;;  %v209_v53 = vld [vmem:[%s7007_s6 + $0x150] sm:$0xff] }
0x1499   :  { %3439 = vmatprep.subr.bf16.mxu1 %v4614_v59  ;;  %3480 = vmatprep.subr.bf16.mxu0 %v4616_v62  ;;  %v4647_v59 = vcombine.low %v202_v47, %v206_v48  ;;  %v4654_v60 = vcombine.high %v209_v53, %v213_v54  ;;  %v217_v62 = vld [vmem:[%s7007_s6 + $0x190] sm:$0xff]  ;;  %v4653_v15 = vcombine.low %v209_v53, %v213_v54 }
0x149a   :  { %v257_v47 = vld [vmem:[%s7007_s6 + $0x2d0] sm:$0xff] }
0x149b   :  { %v261_v48 = vld [vmem:[%s7007_s6 + $0x2f0] sm:$0xff] }
0x149c   :  { %v4702_v53 = vcombine.high %v257_v47, %v261_v48 }
0x1517   :  { %v2648_v63 = vpop.xlane.xlu0 %2647 }
0x1518   :  { %v2649_v0 = vmul.f32 0.00390625, %v2648_v63  ;;  %v221_v63 = vld [vmem:[%s7007_s6 + $0x1b0] sm:$0xff] }
0x1519   :  { %v4662_v12 = vcombine.high %v217_v62, %v221_v63 }
0x151a   :  { %v2650_v3 = vadd.f32 1e-05, %v2649_v0  ;;  %v218_v0 = vld [vmem:[%s7007_s6 + $0x198] sm:$0xff] }
0x151c   :  { %5398 = vrsqrt.f32 %v2650_v3  ;;  %v222_v3 = vld [vmem:[%s7007_s6 + $0x1b8] sm:$0xff] }
0x1526   :  { %v5399_v23 = vpop.eup %5398 }
0x1527   :  { %v2652_v55 = vmul.f32 %v5399_v23, %v6243_v16  ;;  %v2653_v39 = vmul.f32 %v5399_v23, %v6246_v18  ;;  %v181_v16 = vld [vmem:[%s7007_s6 + $0x70] sm:$0xff]  ;;  %v178_v18 = vld [vmem:[%s7007_s6 + $0x58] sm:$0xff] }
0x1528   :  { %v4622_v4 = vcombine.high %v177_v30, %v181_v16  ;;  %v4624_v35 = vcombine.high %v178_v18, %v182_v31  ;;  %v4621_v28 = vcombine.low %v177_v30, %v181_v16  ;;  %v4623_v8 = vcombine.low %v178_v18, %v182_v31  ;;  %v225_v23 = vld [vmem:[%s7007_s6 + $0x1d0] sm:$0xff]  ;;  %v234_v31 = vld [vmem:[%s7007_s6 + $0x218] sm:$0xff] }
0x1529   :  { %v2663_v29 = vmul.f32 %v2661_v20, %v2653_v39  ;;  %v2662_v27 = vmul.f32 %v2657_v22, %v2652_v55  ;;  %v4655_v20 = vcombine.low %v210_v56, %v214_v57  ;;  %v4664_v22 = vcombine.high %v218_v0, %v222_v3  ;;  %v229_v55 = vld [vmem:[%s7007_s6 + $0x1f0] sm:$0xff]  ;;  %v226_v39 = vld [vmem:[%s7007_s6 + $0x1d8] sm:$0xff] }
0x152a   :  { %v233_v16 = vld [vmem:[%s7007_s6 + $0x210] sm:$0xff]  ;;  %v4669_v34 = vcombine.low %v225_v23, %v229_v55 }
0x152b   :  { %v6342_v19 = vadd.f32 %v2671_v24, %v2663_v29  ;;  %v6344_v25 = vadd.f32 %v2667_v26, %v2662_v27  ;;  %v230_v24 = vld [vmem:[%s7007_s6 + $0x1f8] sm:$0xff]  ;;  %v4661_v26 = vcombine.low %v217_v62, %v221_v63  ;;  %v4663_v29 = vcombine.low %v218_v0, %v222_v3  ;;  %v237_v18 = vld [vmem:[%s7007_s6 + $0x230] sm:$0xff] }
0x152c   :  { %v4670_v27 = vcombine.high %v225_v23, %v229_v55  ;;  %v4672_v30 = vcombine.high %v226_v39, %v230_v24  ;;  %v273_v0 = vld [vmem:[%s7007_s6 + $0x350] sm:$0xff] }
0x152d   :  { %v2675_v10 = vpack.c.bf16 %v6342_v19, %v6342_v19  ;;  %v6362_v33 = vpack.c.bf16 %v6344_v25, %v6344_v25  ;;  %v277_v3 = vld [vmem:[%s7007_s6 + $0x370] sm:$0xff] }
0x152e   :  { %v4718_v23 = vcombine.high %v273_v0, %v277_v3 }
0x152f   :  { %3389 = vmatprep.mubr.bf16.mxu1 %v2675_v10  ;;  %3430 = vmatprep.mubr.bf16.mxu0 %v2675_v10 }
0x1530   :  { %3390 = vmatmul.mubr.bf16.vlgmr.msra.gmra.mrb[36].mxu1 %v6362_v33  ;;  %3431 = vmatmul.mubr.bf16.vlgmr.msra.gmra.mrb[12].mxu0 %v6362_v33 }
0x1531   :  { %3440 = vmatpush1.bf16.msra.mxu1 %v4613_v58  ;;  %3481 = vmatpush1.bf16.msra.mxu0 %v4615_v61  ;;  %v4645_v58 = vcombine.low %v201_v45, %v205_v46  ;;  %v4656_v61 = vcombine.high %v210_v56, %v214_v57  ;;  %v4694_v45 = vcombine.high %v249_v40, %v253_v41  ;;  %v265_v56 = vld [vmem:[%s7007_s6 + $0x310] sm:$0xff] }
0x1532   :  { %3471 = vmatprep.mubr.bf16.mxu1 %v2675_v10  ;;  %3512 = vmatprep.mubr.bf16.mxu0 %v2675_v10  ;;  %v238_v10 = vld [vmem:[%s7007_s6 + $0x238] sm:$0xff]  ;;  %v269_v57 = vld [vmem:[%s7007_s6 + $0x330] sm:$0xff] }
0x1533   :  { %3441 = vmatprep.subr.bf16.mxu1 %v4622_v4  ;;  %3482 = vmatprep.subr.bf16.mxu0 %v4624_v35  ;;  %v4671_v4 = vcombine.low %v226_v39, %v230_v24  ;;  %v4678_v35 = vcombine.high %v233_v16, %v237_v18  ;;  %v4680_v36 = vcombine.high %v234_v31, %v238_v10  ;;  %v281_v39 = vld [vmem:[%s7007_s6 + $0x390] sm:$0xff] }
0x1534   :  { %v4710_v62 = vcombine.high %v265_v56, %v269_v57  ;;  %v285_v24 = vld [vmem:[%s7007_s6 + $0x3b0] sm:$0xff] }
0x1535   :  { %3442 = vmatpush1.bf16.msra.mxu1 %v4621_v28  ;;  %3483 = vmatpush1.bf16.msra.mxu0 %v4623_v8  ;;  %v242_v28 = vld [vmem:[%s7007_s6 + $0x258] sm:$0xff] }
0x1536   :  { %3443 = vmatprep.subr.bf16.mxu1 %v4630_v21  ;;  %3484 = vmatprep.subr.bf16.mxu0 %v4632_v1  ;;  %v246_v8 = vld [vmem:[%s7007_s6 + $0x278] sm:$0xff]  ;;  %v4677_v21 = vcombine.low %v233_v16, %v237_v18  ;;  %v4679_v1 = vcombine.low %v234_v31, %v238_v10  ;;  %v4726_v16 = vcombine.high %v281_v39, %v285_v24  ;;  %v289_v31 = vld [vmem:[%s7007_s6 + $0x3d0] sm:$0xff] }
0x1537   :  { %v4688_v17 = vcombine.high %v242_v28, %v246_v8  ;;  %v293_v10 = vld [vmem:[%s7007_s6 + $0x3f0] sm:$0xff] }
0x1539   :  { %3444 = vmatpush1.bf16.msra.mxu1 %v4629_v42  ;;  %3485 = vmatpush1.bf16.msra.mxu0 %v4631_v43  ;;  %v250_v42 = vld [vmem:[%s7007_s6 + $0x298] sm:$0xff] }
0x153a   :  { %3445 = vmatprep.subr.bf16.mxu1 %v4638_v44  ;;  %3486 = vmatprep.subr.bf16.mxu0 %v4640_v14  ;;  %v254_v43 = vld [vmem:[%s7007_s6 + $0x2b8] sm:$0xff]  ;;  %v4685_v44 = vcombine.low %v241_v37, %v245_v38  ;;  %v4687_v14 = vcombine.low %v242_v28, %v246_v8  ;;  %v4734_v37 = vcombine.high %v289_v31, %v293_v10 }
0x153b   :  { %v4696_v46 = vcombine.high %v250_v42, %v254_v43  ;;  %v4733_v28 = vcombine.low %v289_v31, %v293_v10  ;;  %v5245_v31 = vld [vmem:[%s7008_s8 + $0x1b4] ss:$8 sps:$4 sm:$0xff]   ;;  %v5240_v10 = vld [vmem:[%s7008_s8 + $0xb0] ss:$8 sps:$4 sm:$0xff]  }
0x153d   :  { %3446 = vmatpush1.bf16.msra.mxu1 %v4637_v49  ;;  %3487 = vmatpush1.bf16.msra.mxu0 %v4639_v50  ;;  %v258_v49 = vld [vmem:[%s7007_s6 + $0x2d8] sm:$0xff] }
0x153e   :  { %3447 = vmatprep.subr.bf16.mxu1 %v4646_v51  ;;  %3488 = vmatprep.subr.bf16.mxu0 %v4648_v52  ;;  %v262_v50 = vld [vmem:[%s7007_s6 + $0x2f8] sm:$0xff]  ;;  %v4693_v51 = vcombine.low %v249_v40, %v253_v41  ;;  %v4695_v52 = vcombine.low %v250_v42, %v254_v43 }
0x153f   :  { %v4704_v54 = vcombine.high %v258_v49, %v262_v50  ;;  %v5182_v40 = vld [vmem:[%s7008_s8 + $0x14] ss:$8 sps:$4 sm:$0xff]   ;;  %v5180_v42 = vld [vmem:[%s7008_s8 + $0x10] ss:$8 sps:$4 sm:$0xff]  }
0x1540   :  { %v5185_v41 = vld [vmem:[%s7008_s8 + $0x114] ss:$8 sps:$4 sm:$0xff]   ;;  %v5183_v43 = vld [vmem:[%s7008_s8 + $0x110] ss:$8 sps:$4 sm:$0xff]  }
0x1541   :  { %3448 = vmatpush1.bf16.msra.mxu1 %v4645_v58  ;;  %3489 = vmatpush1.bf16.msra.mxu0 %v4647_v59  ;;  %v266_v58 = vld [vmem:[%s7007_s6 + $0x318] sm:$0xff] }
0x1542   :  { %3449 = vmatprep.subr.bf16.mxu1 %v4654_v60  ;;  %3490 = vmatprep.subr.bf16.mxu0 %v4656_v61  ;;  %v270_v59 = vld [vmem:[%s7007_s6 + $0x338] sm:$0xff]  ;;  %v4701_v60 = vcombine.low %v257_v47, %v261_v48  ;;  %v4703_v61 = vcombine.low %v258_v49, %v262_v50  ;;  %v5200_v50 = vld [vmem:[%s7008_s8 + $0x44] ss:$8 sps:$4 sm:$0xff]  }
0x1543   :  { %v4712_v63 = vcombine.high %v266_v58, %v270_v59  ;;  %v5197_v47 = vld [vmem:[%s7008_s8 + $0x134] ss:$8 sps:$4 sm:$0xff]   ;;  %v5192_v48 = vld [vmem:[%s7008_s8 + $0x30] ss:$8 sps:$4 sm:$0xff]  }
0x1544   :  { %v5195_v49 = vld [vmem:[%s7008_s8 + $0x130] ss:$8 sps:$4 sm:$0xff]  }
0x1545   :  { %3450 = vmatpush1.bf16.msra.mxu1 %v4653_v15  ;;  %3491 = vmatpush1.bf16.msra.mxu0 %v4655_v20  ;;  %v274_v15 = vld [vmem:[%s7007_s6 + $0x358] sm:$0xff] }
0x1546   :  { %3451 = vmatprep.subr.bf16.mxu1 %v4662_v12  ;;  %3492 = vmatprep.subr.bf16.mxu0 %v4664_v22  ;;  %v278_v20 = vld [vmem:[%s7007_s6 + $0x378] sm:$0xff]  ;;  %v4709_v12 = vcombine.low %v265_v56, %v269_v57  ;;  %v4711_v22 = vcombine.low %v266_v58, %v270_v59  ;;  %v5212_v59 = vld [vmem:[%s7008_s8 + $0x64] ss:$8 sps:$4 sm:$0xff]  }
0x1547   :  { %v4720_v55 = vcombine.high %v274_v15, %v278_v20  ;;  %v5209_v56 = vld [vmem:[%s7008_s8 + $0x154] ss:$8 sps:$4 sm:$0xff]   ;;  %v5204_v57 = vld [vmem:[%s7008_s8 + $0x50] ss:$8 sps:$4 sm:$0xff]  }
0x1548   :  { %v5207_v58 = vld [vmem:[%s7008_s8 + $0x150] ss:$8 sps:$4 sm:$0xff]  }
0x1549   :  { %3452 = vmatpush1.bf16.msra.mxu1 %v4661_v26  ;;  %3493 = vmatpush1.bf16.msra.mxu0 %v4663_v29  ;;  %v282_v26 = vld [vmem:[%s7007_s6 + $0x398] sm:$0xff] }
0x154a   :  { %3453 = vmatprep.subr.bf16.mxu1 %v4670_v27  ;;  %3494 = vmatprep.subr.bf16.mxu0 %v4672_v30  ;;  %v286_v29 = vld [vmem:[%s7007_s6 + $0x3b8] sm:$0xff]  ;;  %v4717_v27 = vcombine.low %v273_v0, %v277_v3  ;;  %v4719_v30 = vcombine.low %v274_v15, %v278_v20  ;;  %v5224_v20 = vld [vmem:[%s7008_s8 + $0x84] ss:$8 sps:$4 sm:$0xff]  }
0x154b   :  { %v4728_v18 = vcombine.high %v282_v26, %v286_v29  ;;  %v5221_v0 = vld [vmem:[%s7008_s8 + $0x174] ss:$8 sps:$4 sm:$0xff]   ;;  %v5216_v3 = vld [vmem:[%s7008_s8 + $0x70] ss:$8 sps:$4 sm:$0xff]  }
0x154c   :  { %v5219_v15 = vld [vmem:[%s7008_s8 + $0x170] ss:$8 sps:$4 sm:$0xff]  }
0x154d   :  { %3454 = vmatpush1.bf16.msra.mxu1 %v4669_v34  ;;  %3495 = vmatpush1.bf16.msra.mxu0 %v4671_v4  ;;  %v290_v34 = vld [vmem:[%s7007_s6 + $0x3d8] sm:$0xff] }
0x154e   :  { %3455 = vmatprep.subr.bf16.mxu1 %v4678_v35  ;;  %3496 = vmatprep.subr.bf16.mxu0 %v4680_v36  ;;  %v294_v4 = vld [vmem:[%s7007_s6 + $0x3f8] sm:$0xff]  ;;  %v4725_v35 = vcombine.low %v281_v39, %v285_v24  ;;  %v4727_v36 = vcombine.low %v282_v26, %v286_v29  ;;  %v5236_v29 = vld [vmem:[%s7008_s8 + $0xa4] ss:$8 sps:$4 sm:$0xff]  }
0x154f   :  { %v4736_v38 = vcombine.high %v290_v34, %v294_v4  ;;  %v4735_v8 = vcombine.low %v290_v34, %v294_v4  ;;  %v5233_v39 = vld [vmem:[%s7008_s8 + $0x194] ss:$8 sps:$4 sm:$0xff]   ;;  %v5228_v24 = vld [vmem:[%s7008_s8 + $0x90] ss:$8 sps:$4 sm:$0xff]   ;;  %v5248_v4 = vld [vmem:[%s7008_s8 + $0xc4] ss:$8 sps:$4 sm:$0xff]  }
0x1550   :  { %v5231_v26 = vld [vmem:[%s7008_s8 + $0x190] ss:$8 sps:$4 sm:$0xff]  }
0x1551   :  { %3456 = vmatpush1.bf16.msra.mxu1 %v4677_v21  ;;  %3497 = vmatpush1.bf16.msra.mxu0 %v4679_v1  ;;  %v5176_v21 = vld [vmem:[%s7008_s8 + $0x4] ss:$8 sps:$4 sm:$0xff]   ;;  %v5243_v34 = vld [vmem:[%s7008_s8 + $0x1b0] ss:$8 sps:$4 sm:$0xff]  }
0x1552   :  { %3457 = vmatprep.subr.bf16.mxu1 %v4686_v13  ;;  %3498 = vmatprep.subr.bf16.mxu0 %v4688_v17  ;;  %v5179_v1 = vld [vmem:[%s7008_s8 + $0x104] ss:$8 sps:$4 sm:$0xff]   ;;  %v5174_v13 = vld [vmem:[%s7008_s8] ss:$8 sps:$4 sm:$0xff]  }
0x1553   :  { %v5177_v17 = vld [vmem:[%s7008_s8 + $0x100] ss:$8 sps:$4 sm:$0xff]  }
0x1555   :  { %3458 = vmatpush1.bf16.msra.mxu1 %v4685_v44  ;;  %3499 = vmatpush1.bf16.msra.mxu0 %v4687_v14  ;;  %v5188_v44 = vld [vmem:[%s7008_s8 + $0x24] ss:$8 sps:$4 sm:$0xff]   ;;  %v5186_v14 = vld [vmem:[%s7008_s8 + $0x20] ss:$8 sps:$4 sm:$0xff]  }
0x1556   :  { %3459 = vmatprep.subr.bf16.mxu1 %v4694_v45  ;;  %3500 = vmatprep.subr.bf16.mxu0 %v4696_v46  ;;  %v5189_v45 = vld [vmem:[%s7008_s8 + $0x120] ss:$8 sps:$4 sm:$0xff]   ;;  %v5194_v46 = vld [vmem:[%s7008_s8 + $0x34] ss:$8 sps:$4 sm:$0xff]  }
0x1559   :  { %3460 = vmatpush1.bf16.msra.mxu1 %v4693_v51  ;;  %3501 = vmatpush1.bf16.msra.mxu0 %v4695_v52  ;;  %v5203_v51 = vld [vmem:[%s7008_s8 + $0x144] ss:$8 sps:$4 sm:$0xff]   ;;  %v5198_v52 = vld [vmem:[%s7008_s8 + $0x40] ss:$8 sps:$4 sm:$0xff]  }
0x155a   :  { %3461 = vmatprep.subr.bf16.mxu1 %v4702_v53  ;;  %3502 = vmatprep.subr.bf16.mxu0 %v4704_v54  ;;  %v5201_v53 = vld [vmem:[%s7008_s8 + $0x140] ss:$8 sps:$4 sm:$0xff]   ;;  %v5206_v54 = vld [vmem:[%s7008_s8 + $0x54] ss:$8 sps:$4 sm:$0xff]  }
0x155d   :  { %3462 = vmatpush1.bf16.msra.mxu1 %v4701_v60  ;;  %3503 = vmatpush1.bf16.msra.mxu0 %v4703_v61  ;;  %v5215_v60 = vld [vmem:[%s7008_s8 + $0x164] ss:$8 sps:$4 sm:$0xff]   ;;  %v5210_v61 = vld [vmem:[%s7008_s8 + $0x60] ss:$8 sps:$4 sm:$0xff]  }
0x155e   :  { %3463 = vmatprep.subr.bf16.mxu1 %v4710_v62  ;;  %3504 = vmatprep.subr.bf16.mxu0 %v4712_v63  ;;  %v5213_v62 = vld [vmem:[%s7008_s8 + $0x160] ss:$8 sps:$4 sm:$0xff]   ;;  %v5218_v63 = vld [vmem:[%s7008_s8 + $0x74] ss:$8 sps:$4 sm:$0xff]  }
0x1561   :  { %3464 = vmatpush1.bf16.msra.mxu1 %v4709_v12  ;;  %3505 = vmatpush1.bf16.msra.mxu0 %v4711_v22  ;;  %v5227_v12 = vld [vmem:[%s7008_s8 + $0x184] ss:$8 sps:$4 sm:$0xff]   ;;  %v5222_v22 = vld [vmem:[%s7008_s8 + $0x80] ss:$8 sps:$4 sm:$0xff]  }
0x1562   :  { %3465 = vmatprep.subr.bf16.mxu1 %v4718_v23  ;;  %3506 = vmatprep.subr.bf16.mxu0 %v4720_v55  ;;  %v5225_v23 = vld [vmem:[%s7008_s8 + $0x180] ss:$8 sps:$4 sm:$0xff]   ;;  %v5230_v55 = vld [vmem:[%s7008_s8 + $0x94] ss:$8 sps:$4 sm:$0xff]  }
0x1565   :  { %3466 = vmatpush1.bf16.msra.mxu1 %v4717_v27  ;;  %3507 = vmatpush1.bf16.msra.mxu0 %v4719_v30  ;;  %v5239_v27 = vld [vmem:[%s7008_s8 + $0x1a4] ss:$8 sps:$4 sm:$0xff]   ;;  %v5234_v30 = vld [vmem:[%s7008_s8 + $0xa0] ss:$8 sps:$4 sm:$0xff]  }
0x1566   :  { %3467 = vmatprep.subr.bf16.mxu1 %v4726_v16  ;;  %3508 = vmatprep.subr.bf16.mxu0 %v4728_v18  ;;  %v5237_v16 = vld [vmem:[%s7008_s8 + $0x1a0] ss:$8 sps:$4 sm:$0xff]   ;;  %v5242_v18 = vld [vmem:[%s7008_s8 + $0xb4] ss:$8 sps:$4 sm:$0xff]  }
0x1569   :  { %3468 = vmatpush1.bf16.msra.mxu1 %v4725_v35  ;;  %3509 = vmatpush1.bf16.msra.mxu0 %v4727_v36  ;;  %v5251_v35 = vld [vmem:[%s7008_s8 + $0x1c4] ss:$8 sps:$4 sm:$0xff]   ;;  %v5246_v36 = vld [vmem:[%s7008_s8 + $0xc0] ss:$8 sps:$4 sm:$0xff]  }
0x156a   :  { %3469 = vmatprep.subr.bf16.mxu1 %v4734_v37  ;;  %3510 = vmatprep.subr.bf16.mxu0 %v4736_v38  ;;  %v5249_v37 = vld [vmem:[%s7008_s8 + $0x1c0] ss:$8 sps:$4 sm:$0xff]   ;;  %v5254_v38 = vld [vmem:[%s7008_s8 + $0xd4] ss:$8 sps:$4 sm:$0xff]  }
0x156d   :  { %3470 = vmatpush1.bf16.msra.mxu1 %v4733_v28  ;;  %3511 = vmatpush1.bf16.msra.mxu0 %v4735_v8  ;;  %v5257_v28 = vld [vmem:[%s7008_s8 + $0x1d4] ss:$8 sps:$4 sm:$0xff]   ;;  %v5252_v8 = vld [vmem:[%s7008_s8 + $0xd0] ss:$8 sps:$4 sm:$0xff]  }
0x156e   :  { %4249 = vmatprep.subr.bf16.mxu1 %v5176_v21  ;;  %4290 = vmatprep.subr.bf16.mxu0 %v5179_v1  ;;  %v5255_v21 = vld [vmem:[%s7008_s8 + $0x1d0] ss:$8 sps:$4 sm:$0xff]   ;;  %v5260_v1 = vld [vmem:[%s7008_s8 + $0xe4] ss:$8 sps:$4 sm:$0xff]  }
0x1570   :  { %3472 = vmatmul.mubr.bf16.vlgmr.msra.gmra.mrb[40].mxu1 %v6362_v33  ;;  %3513 = vmatmul.mubr.bf16.vlgmr.msra.gmra.mrb[16].mxu0 %v6362_v33  ;;  %v5191_v33 = vld [vmem:[%s7008_s8 + $0x124] ss:$8 sps:$4 sm:$0xff]  }
0x1571   :  { %4250 = vmatpush1.bf16.msra.mxu1 %v5174_v13  ;;  %4291 = vmatpush1.bf16.msra.mxu0 %v5177_v17  ;;  %v5263_v13 = vld [vmem:[%s7008_s8 + $0x1e4] ss:$8 sps:$4 sm:$0xff]   ;;  %v5258_v17 = vld [vmem:[%s7008_s8 + $0xe0] ss:$8 sps:$4 sm:$0xff]  }
0x1572   :  { %4251 = vmatprep.subr.bf16.mxu1 %v5182_v40  ;;  %4292 = vmatprep.subr.bf16.mxu0 %v5185_v41  ;;  %v5261_v40 = vld [vmem:[%s7008_s8 + $0x1e0] ss:$8 sps:$4 sm:$0xff]   ;;  %v5266_v41 = vld [vmem:[%s7008_s8 + $0xf4] ss:$8 sps:$4 sm:$0xff]  }
0x1575   :  { %4252 = vmatpush1.bf16.msra.mxu1 %v5180_v42  ;;  %4293 = vmatpush1.bf16.msra.mxu0 %v5183_v43  ;;  %v5269_v42 = vld [vmem:[%s7008_s8 + $0x1f4] ss:$8 sps:$4 sm:$0xff]   ;;  %v5264_v43 = vld [vmem:[%s7008_s8 + $0xf0] ss:$8 sps:$4 sm:$0xff]  }
0x1576   :  { %4253 = vmatprep.subr.bf16.mxu1 %v5188_v44  ;;  %4294 = vmatprep.subr.bf16.mxu0 %v5191_v33  ;;  %v5267_v44 = vld [vmem:[%s7008_s8 + $0x1f0] ss:$8 sps:$4 sm:$0xff]   ;;  %v5272_v33 = vld [vmem:[%s7008_s8 + $0x204] ss:$8 sps:$4 sm:$0xff]  }
0x1579   :  { %4254 = vmatpush1.bf16.msra.mxu1 %v5186_v14  ;;  %4295 = vmatpush1.bf16.msra.mxu0 %v5189_v45  ;;  %v5275_v14 = vld [vmem:[%s7008_s8 + $0x304] ss:$8 sps:$4 sm:$0xff]  }
0x157a   :  { %4255 = vmatprep.subr.bf16.mxu1 %v5194_v46  ;;  %4296 = vmatprep.subr.bf16.mxu0 %v5197_v47  ;;  %v6737_v45 = vld [vmem:[%s7009_s7] sm:$0xff] }
0x157b   :  { %v2680_v46 = vrot.slane %v6737_v45, %v5698_v9  ;;  %v2688_v47 = vrot.slane %v6737_v45, %v5829_v2 }
0x157d   :  { %4256 = vmatpush1.bf16.msra.mxu1 %v5192_v48  ;;  %4297 = vmatpush1.bf16.msra.mxu0 %v5195_v49  ;;  %v2684_v48 = vrot.slane %v6737_v45, %v5690_v7  ;;  %v2692_v49 = vrot.slane %v6737_v45, %v6094_v32 }
0x157e   :  { %4257 = vmatprep.subr.bf16.mxu1 %v5200_v50  ;;  %4298 = vmatprep.subr.bf16.mxu0 %v5203_v51 }
0x1581   :  { %4258 = vmatpush1.bf16.msra.mxu1 %v5198_v52  ;;  %4299 = vmatpush1.bf16.msra.mxu0 %v5201_v53 }
0x1582   :  { %4259 = vmatprep.subr.bf16.mxu1 %v5206_v54  ;;  %4300 = vmatprep.subr.bf16.mxu0 %v5209_v56 }
0x1585   :  { %4260 = vmatpush1.bf16.msra.mxu1 %v5204_v57  ;;  %4301 = vmatpush1.bf16.msra.mxu0 %v5207_v58 }
0x1586   :  { %4261 = vmatprep.subr.bf16.mxu1 %v5212_v59  ;;  %4302 = vmatprep.subr.bf16.mxu0 %v5215_v60 }
0x1589   :  { %4262 = vmatpush1.bf16.msra.mxu1 %v5210_v61  ;;  %4303 = vmatpush1.bf16.msra.mxu0 %v5213_v62 }
0x158a   :  { %4263 = vmatprep.subr.bf16.mxu1 %v5218_v63  ;;  %4304 = vmatprep.subr.bf16.mxu0 %v5221_v0 }
0x158d   :  { %4264 = vmatpush1.bf16.msra.mxu1 %v5216_v3  ;;  %4305 = vmatpush1.bf16.msra.mxu0 %v5219_v15 }
0x158e   :  { %4265 = vmatprep.subr.bf16.mxu1 %v5224_v20  ;;  %4306 = vmatprep.subr.bf16.mxu0 %v5227_v12 }
0x1591   :  { %4266 = vmatpush1.bf16.msra.mxu1 %v5222_v22  ;;  %4307 = vmatpush1.bf16.msra.mxu0 %v5225_v23 }
0x1592   :  { %4267 = vmatprep.subr.bf16.mxu1 %v5230_v55  ;;  %4308 = vmatprep.subr.bf16.mxu0 %v5233_v39 }
0x1595   :  { %4268 = vmatpush1.bf16.msra.mxu1 %v5228_v24  ;;  %4309 = vmatpush1.bf16.msra.mxu0 %v5231_v26 }
0x1596   :  { %4269 = vmatprep.subr.bf16.mxu1 %v5236_v29  ;;  %4310 = vmatprep.subr.bf16.mxu0 %v5239_v27 }
0x1599   :  { %4270 = vmatpush1.bf16.msra.mxu1 %v5234_v30  ;;  %4311 = vmatpush1.bf16.msra.mxu0 %v5237_v16 }
0x159a   :  { %4271 = vmatprep.subr.bf16.mxu1 %v5242_v18  ;;  %4312 = vmatprep.subr.bf16.mxu0 %v5245_v31 }
0x159d   :  { %4272 = vmatpush1.bf16.msra.mxu1 %v5240_v10  ;;  %4313 = vmatpush1.bf16.msra.mxu0 %v5243_v34 }
0x159e   :  { %4273 = vmatprep.subr.bf16.mxu1 %v5248_v4  ;;  %4314 = vmatprep.subr.bf16.mxu0 %v5251_v35 }
0x15a1   :  { %4274 = vmatpush1.bf16.msra.mxu1 %v5246_v36  ;;  %4315 = vmatpush1.bf16.msra.mxu0 %v5249_v37 }
0x15a2   :  { %4275 = vmatprep.subr.bf16.mxu1 %v5254_v38  ;;  %4316 = vmatprep.subr.bf16.mxu0 %v5257_v28 }
0x15a5   :  { %4276 = vmatpush1.bf16.msra.mxu1 %v5252_v8  ;;  %4317 = vmatpush1.bf16.msra.mxu0 %v5255_v21 }
0x15a6   :  { %4277 = vmatprep.subr.bf16.mxu1 %v5260_v1  ;;  %4318 = vmatprep.subr.bf16.mxu0 %v5263_v13 }
0x15a9   :  { %4278 = vmatpush1.bf16.msra.mxu1 %v5258_v17  ;;  %4319 = vmatpush1.bf16.msra.mxu0 %v5261_v40 }
0x15aa   :  { %4279 = vmatprep.subr.bf16.mxu1 %v5266_v41  ;;  %4320 = vmatprep.subr.bf16.mxu0 %v5269_v42 }
0x15ad   :  { %4280 = vmatpush1.bf16.msra.mxu1 %v5264_v43  ;;  %4321 = vmatpush1.bf16.msra.mxu0 %v5267_v44  ;;  %v5270_v43 = vld [vmem:[%s7008_s8 + $0x200] ss:$8 sps:$4 sm:$0xff]  }
0x15ae   :  { %4331 = vmatprep.subr.bf16.mxu1 %v5272_v33  ;;  %4372 = vmatprep.subr.bf16.mxu0 %v5275_v14  ;;  %v5273_v33 = vld [vmem:[%s7008_s8 + $0x300] ss:$8 sps:$4 sm:$0xff]  }
0x1603   :  { %v3391_v50 = vpop.f32.mrb[36].mxu1  ;;  %v3432_v51 = vpop.f32.mrb[12].mxu0 }
0x1604   :  { %v3392_v52 = vadd.f32 %v3391_v50, %v2680_v46  ;;  %v3433_v53 = vadd.f32 %v3432_v51, %v2688_v47  ;;  %v3393_v54 = vpop.f32.mrb[37].mxu1  ;;  %v3434_v56 = vpop.f32.mrb[13].mxu0  ;;  %v5278_v46 = vld [vmem:[%s7008_s8 + $0x214] ss:$8 sps:$4 sm:$0xff]   ;;  %v5279_v50 = vld [vmem:[%s7008_s8 + $0x310] ss:$8 sps:$4 sm:$0xff]  }
0x1605   :  { %v3394_v57 = vadd.f32 %v3393_v54, %v2684_v48  ;;  %v3435_v58 = vadd.f32 %v3434_v56, %v2692_v49  ;;  %v3395_v59 = vpop.f32.mrb[38].mxu1  ;;  %v3436_v60 = vpop.f32.mrb[14].mxu0  ;;  %v5281_v48 = vld [vmem:[%s7008_s8 + $0x314] ss:$8 sps:$4 sm:$0xff]   ;;  %v5276_v49 = vld [vmem:[%s7008_s8 + $0x210] ss:$8 sps:$4 sm:$0xff]  }
0x1606   :  { %v3521_v61 = vmul.f32 %v3392_v52, %v3392_v52  ;;  %v3523_v62 = vmul.f32 %v3433_v53, %v3433_v53  ;;  %v3396_v63 = vpop.f32.mrb[39].mxu1  ;;  %v3437_v2 = vpop.f32.mrb[15].mxu0  ;;  %v5284_v51 = vld [vmem:[%s7008_s8 + $0x224] ss:$8 sps:$4 sm:$0xff]   ;;  %v5285_v54 = vld [vmem:[%s7008_s8 + $0x320] ss:$8 sps:$4 sm:$0xff]  }
0x1607   :  { %v3522_v0 = vmul.f32 %v3394_v57, %v3394_v57  ;;  %v3524_v3 = vmul.f32 %v3435_v58, %v3435_v58  ;;  %v5290_v56 = vld [vmem:[%s7008_s8 + $0x234] ss:$8 sps:$4 sm:$0xff]   ;;  %v5291_v59 = vld [vmem:[%s7008_s8 + $0x330] ss:$8 sps:$4 sm:$0xff]   ;;  %v5296_v60 = vld [vmem:[%s7008_s8 + $0x244] ss:$8 sps:$4 sm:$0xff]  }
0x1608   :  { %v3529_v7 = vmul.f32 %v3521_v61, %v3392_v52  ;;  %v3531_v15 = vmul.f32 %v3523_v62, %v3433_v53  ;;  %v5299_v61 = vld [vmem:[%s7008_s8 + $0x344] ss:$8 sps:$4 sm:$0xff]   ;;  %v5294_v62 = vld [vmem:[%s7008_s8 + $0x240] ss:$8 sps:$4 sm:$0xff]   ;;  %v5302_v2 = vld [vmem:[%s7008_s8 + $0x254] ss:$8 sps:$4 sm:$0xff]  }
0x1609   :  { %v3530_v20 = vmul.f32 %v3522_v0, %v3394_v57  ;;  %v3532_v32 = vmul.f32 %v3524_v3, %v3435_v58  ;;  %v5297_v63 = vld [vmem:[%s7008_s8 + $0x340] ss:$8 sps:$4 sm:$0xff]   ;;  %v5305_v0 = vld [vmem:[%s7008_s8 + $0x354] ss:$8 sps:$4 sm:$0xff]   ;;  %v5300_v3 = vld [vmem:[%s7008_s8 + $0x250] ss:$8 sps:$4 sm:$0xff]  }
0x160a   :  { %v3537_v12 = vmul.f32 0.044715, %v3529_v7  ;;  %v3539_v22 = vmul.f32 0.044715, %v3531_v15  ;;  %v5303_v7 = vld [vmem:[%s7008_s8 + $0x350] ss:$8 sps:$4 sm:$0xff]  }
0x160b   :  { %v3538_v23 = vmul.f32 0.044715, %v3530_v20  ;;  %v3540_v55 = vmul.f32 0.044715, %v3532_v32  ;;  %v5308_v15 = vld [vmem:[%s7008_s8 + $0x264] ss:$8 sps:$4 sm:$0xff]  }
0x160c   :  { %v3545_v39 = vadd.f32 %v3537_v12, %v3392_v52  ;;  %v3547_v24 = vadd.f32 %v3539_v22, %v3433_v53  ;;  %v5311_v20 = vld [vmem:[%s7008_s8 + $0x364] ss:$8 sps:$4 sm:$0xff]   ;;  %v5306_v32 = vld [vmem:[%s7008_s8 + $0x260] ss:$8 sps:$4 sm:$0xff]   ;;  %v5314_v22 = vld [vmem:[%s7008_s8 + $0x274] ss:$8 sps:$4 sm:$0xff]  }
0x160d   :  { %v3546_v26 = vadd.f32 %v3538_v23, %v3394_v57  ;;  %v3548_v29 = vadd.f32 %v3540_v55, %v3435_v58  ;;  %v5309_v12 = vld [vmem:[%s7008_s8 + $0x360] ss:$8 sps:$4 sm:$0xff]   ;;  %v6829_v23 = vsub.s32 6, %v5687_v6  ;;  %v5317_v55 = vld [vmem:[%s7008_s8 + $0x374] ss:$8 sps:$4 sm:$0xff]  }
0x160e   :  { %v3553_v27 = vmul.f32 0.7978846, %v3545_v39  ;;  %v3555_v30 = vmul.f32 0.7978846, %v3547_v24  ;;  %v6835_v39 = vsub.s32 7, %v5687_v6 }
0x160f   :  { %v3554_v16 = vmul.f32 0.7978846, %v3546_v26  ;;  %v3556_v18 = vmul.f32 0.7978846, %v3548_v29  ;;  %v5312_v24 = vld [vmem:[%s7008_s8 + $0x270] ss:$8 sps:$4 sm:$0xff]   ;;  %v2696_v29 = vrot.slane %v6737_v45, %v6325_v5 }
0x1610   :  { %5400 = vtanh.f32 %v3553_v27  ;;  %v5315_v26 = vld [vmem:[%s7008_s8 + $0x370] ss:$8 sps:$4 sm:$0xff]   ;;  %v2704_v27 = vrot.slane %v6737_v45, %v6829_v23  ;;  %v5320_v6 = vld [vmem:[%s7008_s8 + $0x284] ss:$8 sps:$4 sm:$0xff]  }
0x1611   :  { %5402 = vtanh.f32 %v3555_v30  ;;  %v2700_v30 = vrot.slane %v6737_v45, %v6328_v11 }
0x1612   :  { %5404 = vtanh.f32 %v3554_v16  ;;  %v2708_v16 = vrot.slane %v6737_v45, %v6835_v39  ;;  %v5321_v45 = vld [vmem:[%s7008_s8 + $0x380] ss:$8 sps:$4 sm:$0xff]  }
0x1613   :  { %5406 = vtanh.f32 %v3556_v18  ;;  %v5323_v18 = vld [vmem:[%s7008_s8 + $0x384] ss:$8 sps:$4 sm:$0xff]  }
0x161a   :  { %v5401_v31 = vpop.eup %5400 }
0x161b   :  { %v5403_v10 = vpop.eup %5402  ;;  %v3569_v34 = vadd.f32 1.0, %v5401_v31 }
0x161c   :  { %v5405_v4 = vpop.eup %5404  ;;  %v3571_v35 = vadd.f32 1.0, %v5403_v10  ;;  %v5318_v10 = vld [vmem:[%s7008_s8 + $0x280] ss:$8 sps:$4 sm:$0xff]  }
0x161d   :  { %v5407_v36 = vpop.eup %5406  ;;  %v3570_v37 = vadd.f32 1.0, %v5405_v4  ;;  %v3577_v38 = vmul.f32 0.5, %v3569_v34 }
0x161e   :  { %v3572_v28 = vadd.f32 1.0, %v5407_v36  ;;  %v3579_v8 = vmul.f32 0.5, %v3571_v35  ;;  %v5326_v36 = vld [vmem:[%s7008_s8 + $0x294] ss:$8 sps:$4 sm:$0xff]  }
0x161f   :  { %v3578_v21 = vmul.f32 0.5, %v3570_v37  ;;  %v3585_v13 = vmul.f32 %v3577_v38, %v3392_v52  ;;  %v5287_v52 = vld [vmem:[%s7008_s8 + $0x324] ss:$8 sps:$4 sm:$0xff]  }
0x1620   :  { %v3580_v1 = vmul.f32 0.5, %v3572_v28  ;;  %v3587_v40 = vmul.f32 %v3579_v8, %v3433_v53  ;;  %v5282_v53 = vld [vmem:[%s7008_s8 + $0x220] ss:$8 sps:$4 sm:$0xff]  }
0x1621   :  { %v3586_v17 = vmul.f32 %v3578_v21, %v3394_v57  ;;  %v3593_v14 = vpack.c.bf16 %v3585_v13, %v3585_v13  ;;  %v5293_v57 = vld [vmem:[%s7008_s8 + $0x334] ss:$8 sps:$4 sm:$0xff]  }
0x1622   :  { %v3588_v41 = vmul.f32 %v3580_v1, %v3435_v58  ;;  %v3595_v47 = vpack.c.bf16 %v3587_v40, %v3587_v40  ;;  %v5288_v58 = vld [vmem:[%s7008_s8 + $0x230] ss:$8 sps:$4 sm:$0xff]   ;;  %v5329_v21 = vld [vmem:[%s7008_s8 + $0x394] ss:$8 sps:$4 sm:$0xff]  }
0x1623   :  { %v3594_v42 = vpack.c.bf16 %v3586_v17, %v3586_v17 }
0x1624   :  { %v3596_v44 = vpack.c.bf16 %v3588_v41, %v3588_v41 }
0x1625   :  { %4281 = vmatprep.mubr.bf16.mxu1 %v3594_v42 }
0x1626   :  { %4322 = vmatprep.mubr.bf16.mxu0 %v3596_v44  ;;  %4282 = vmatmul.mubr.bf16.vlgmr.msra.gmra.mrb[44].mxu1 %v3593_v14  ;;  %v5327_v14 = vld [vmem:[%s7008_s8 + $0x390] ss:$8 sps:$4 sm:$0xff]  }
0x1627   :  { %4323 = vmatmul.mubr.bf16.vlgmr.msra.gmra.mrb[20].mxu0 %v3595_v47  ;;  %4332 = vmatpush1.bf16.msra.mxu1 %v5270_v43  ;;  %v5324_v43 = vld [vmem:[%s7008_s8 + $0x290] ss:$8 sps:$4 sm:$0xff]  }
0x1628   :  { %4373 = vmatpush1.bf16.msra.mxu0 %v5273_v33  ;;  %4333 = vmatprep.subr.bf16.mxu1 %v5278_v46  ;;  %v5332_v46 = vld [vmem:[%s7008_s8 + $0x2a4] ss:$8 sps:$4 sm:$0xff]  }
0x1629   :  { %4374 = vmatprep.subr.bf16.mxu0 %v5281_v48 }
0x162b   :  { %4334 = vmatpush1.bf16.msra.mxu1 %v5276_v49  ;;  %v5335_v49 = vld [vmem:[%s7008_s8 + $0x3a4] ss:$8 sps:$4 sm:$0xff]  }
0x162c   :  { %4375 = vmatpush1.bf16.msra.mxu0 %v5279_v50  ;;  %4335 = vmatprep.subr.bf16.mxu1 %v5284_v51 }
0x162d   :  { %4376 = vmatprep.subr.bf16.mxu0 %v5287_v52 }
0x162f   :  { %4336 = vmatpush1.bf16.msra.mxu1 %v5282_v53 }
0x1630   :  { %4377 = vmatpush1.bf16.msra.mxu0 %v5285_v54  ;;  %4337 = vmatprep.subr.bf16.mxu1 %v5290_v56  ;;  %v5330_v54 = vld [vmem:[%s7008_s8 + $0x2a0] ss:$8 sps:$4 sm:$0xff]  }
0x1631   :  { %4378 = vmatprep.subr.bf16.mxu0 %v5293_v57 }
0x1633   :  { %4338 = vmatpush1.bf16.msra.mxu1 %v5288_v58  ;;  %v5333_v58 = vld [vmem:[%s7008_s8 + $0x3a0] ss:$8 sps:$4 sm:$0xff]  }
0x1634   :  { %4379 = vmatpush1.bf16.msra.mxu0 %v5291_v59  ;;  %4339 = vmatprep.subr.bf16.mxu1 %v5296_v60  ;;  %v5338_v59 = vld [vmem:[%s7008_s8 + $0x2b4] ss:$8 sps:$4 sm:$0xff]  }
0x1635   :  { %4380 = vmatprep.subr.bf16.mxu0 %v5299_v61 }
0x1637   :  { %4340 = vmatpush1.bf16.msra.mxu1 %v5294_v62  ;;  %v5341_v62 = vld [vmem:[%s7008_s8 + $0x3b4] ss:$8 sps:$4 sm:$0xff]  }
0x1638   :  { %4381 = vmatpush1.bf16.msra.mxu0 %v5297_v63  ;;  %4341 = vmatprep.subr.bf16.mxu1 %v5302_v2 }
0x1639   :  { %4382 = vmatprep.subr.bf16.mxu0 %v5305_v0 }
0x163b   :  { %4342 = vmatpush1.bf16.msra.mxu1 %v5300_v3 }
0x163c   :  { %4383 = vmatpush1.bf16.msra.mxu0 %v5303_v7  ;;  %4343 = vmatprep.subr.bf16.mxu1 %v5308_v15  ;;  %v5336_v7 = vld [vmem:[%s7008_s8 + $0x2b0] ss:$8 sps:$4 sm:$0xff]  }
0x163d   :  { %4384 = vmatprep.subr.bf16.mxu0 %v5311_v20  ;;  %v5339_v15 = vld [vmem:[%s7008_s8 + $0x3b0] ss:$8 sps:$4 sm:$0xff]   ;;  %v5344_v20 = vld [vmem:[%s7008_s8 + $0x2c4] ss:$8 sps:$4 sm:$0xff]  }
0x163f   :  { %4344 = vmatpush1.bf16.msra.mxu1 %v5306_v32  ;;  %v5347_v32 = vld [vmem:[%s7008_s8 + $0x3c4] ss:$8 sps:$4 sm:$0xff]  }
0x1640   :  { %4385 = vmatpush1.bf16.msra.mxu0 %v5309_v12  ;;  %4345 = vmatprep.subr.bf16.mxu1 %v5314_v22  ;;  %v5342_v12 = vld [vmem:[%s7008_s8 + $0x2c0] ss:$8 sps:$4 sm:$0xff]  }
0x1641   :  { %4386 = vmatprep.subr.bf16.mxu0 %v5317_v55  ;;  %v5345_v22 = vld [vmem:[%s7008_s8 + $0x3c0] ss:$8 sps:$4 sm:$0xff]   ;;  %v5350_v55 = vld [vmem:[%s7008_s8 + $0x2d4] ss:$8 sps:$4 sm:$0xff]  }
0x1643   :  { %4346 = vmatpush1.bf16.msra.mxu1 %v5312_v24  ;;  %v3473_v5 = vpop.f32.mrb[40].mxu1  ;;  %v3514_v31 = vpop.f32.mrb[16].mxu0  ;;  %v5353_v24 = vld [vmem:[%s7008_s8 + $0x3d4] ss:$8 sps:$4 sm:$0xff]  }
0x1644   :  { %4387 = vmatpush1.bf16.msra.mxu0 %v5315_v26  ;;  %v6860_v34 = vadd.f32 %v3473_v5, %v2696_v29  ;;  %v6862_v4 = vadd.f32 %v3514_v31, %v2704_v27  ;;  %v3475_v11 = vpop.f32.mrb[41].mxu1  ;;  %v3516_v35 = vpop.f32.mrb[17].mxu0  ;;  %4347 = vmatprep.subr.bf16.mxu1 %v5320_v6  ;;  %v5348_v26 = vld [vmem:[%s7008_s8 + $0x2d0] ss:$8 sps:$4 sm:$0xff]   ;;  %v5356_v27 = vld [vmem:[%s7008_s8 + $0x2e4] ss:$8 sps:$4 sm:$0xff]  }
0x1645   :  { %v6870_v37 = vadd.f32 %v3475_v11, %v2700_v30  ;;  %v6872_v38 = vadd.f32 %v3516_v35, %v2708_v16  ;;  %v3477_v28 = vpop.f32.mrb[42].mxu1  ;;  %v3518_v8 = vpop.f32.mrb[18].mxu0  ;;  %4388 = vmatprep.subr.bf16.mxu0 %v5323_v18  ;;  %v5351_v29 = vld [vmem:[%s7008_s8 + $0x3d0] ss:$8 sps:$4 sm:$0xff]   ;;  %v5359_v6 = vld [vmem:[%s7008_s8 + $0x3e4] ss:$8 sps:$4 sm:$0xff]  }
0x1646   :  { %v3525_v1 = vmul.f32 %v6860_v34, %v6860_v34  ;;  %v3527_v13 = vmul.f32 %v6862_v4, %v6862_v4  ;;  %v3478_v17 = vpop.f32.mrb[43].mxu1  ;;  %v3519_v40 = vpop.f32.mrb[19].mxu0  ;;  %v5354_v18 = vld [vmem:[%s7008_s8 + $0x2e0] ss:$8 sps:$4 sm:$0xff]   ;;  %v5362_v11 = vld [vmem:[%s7008_s8 + $0x2f4] ss:$8 sps:$4 sm:$0xff]  }
0x1647   :  { %v3526_v41 = vmul.f32 %v6870_v37, %v6870_v37  ;;  %v3528_v42 = vmul.f32 %v6872_v38, %v6872_v38  ;;  %4348 = vmatpush1.bf16.msra.mxu1 %v5318_v10  ;;  %v5357_v10 = vld [vmem:[%s7008_s8 + $0x3e0] ss:$8 sps:$4 sm:$0xff]   ;;  %v5363_v40 = vld [vmem:[%s7008_s8 + $0x3f0] ss:$8 sps:$4 sm:$0xff]  }
0x1648   :  { %v3533_v44 = vmul.f32 %v3525_v1, %v6860_v34  ;;  %v3535_v33 = vmul.f32 %v3527_v13, %v6862_v4  ;;  %4389 = vmatpush1.bf16.msra.mxu0 %v5321_v45  ;;  %4349 = vmatprep.subr.bf16.mxu1 %v5326_v36  ;;  %v5365_v36 = vld [vmem:[%s7008_s8 + $0x3f4] ss:$8 sps:$4 sm:$0xff]   ;;  %v5360_v13 = vld [vmem:[%s7008_s8 + $0x2f0] ss:$8 sps:$4 sm:$0xff]  }
0x1649   :  { %v3534_v47 = vmul.f32 %v3526_v41, %v6870_v37  ;;  %v3536_v48 = vmul.f32 %v3528_v42, %v6872_v38  ;;  %4390 = vmatprep.subr.bf16.mxu0 %v5329_v21 }
0x164a   :  { %v3541_v50 = vmul.f32 0.044715, %v3533_v44  ;;  %v3543_v51 = vmul.f32 0.044715, %v3535_v33 }
0x164b   :  { %v3542_v52 = vmul.f32 0.044715, %v3534_v47  ;;  %v3544_v53 = vmul.f32 0.044715, %v3536_v48  ;;  %4350 = vmatpush1.bf16.msra.mxu1 %v5324_v43 }
0x164c   :  { %v3549_v56 = vadd.f32 %v3541_v50, %v6860_v34  ;;  %v3551_v57 = vadd.f32 %v3543_v51, %v6862_v4  ;;  %4391 = vmatpush1.bf16.msra.mxu0 %v5327_v14  ;;  %4351 = vmatprep.subr.bf16.mxu1 %v5332_v46 }
0x164d   :  { %v3550_v60 = vadd.f32 %v3542_v52, %v6870_v37  ;;  %v3552_v61 = vadd.f32 %v3544_v53, %v6872_v38  ;;  %4392 = vmatprep.subr.bf16.mxu0 %v5335_v49 }
0x164e   :  { %v3557_v63 = vmul.f32 0.7978846, %v3549_v56  ;;  %v3559_v2 = vmul.f32 0.7978846, %v3551_v57 }
0x164f   :  { %v3558_v0 = vmul.f32 0.7978846, %v3550_v60  ;;  %v3560_v3 = vmul.f32 0.7978846, %v3552_v61  ;;  %4352 = vmatpush1.bf16.msra.mxu1 %v5330_v54 }
0x1650   :  { %5408 = vtanh.f32 %v3557_v63  ;;  %4393 = vmatpush1.bf16.msra.mxu0 %v5333_v58  ;;  %4353 = vmatprep.subr.bf16.mxu1 %v5338_v59 }
0x1651   :  { %5410 = vtanh.f32 %v3559_v2  ;;  %4394 = vmatprep.subr.bf16.mxu0 %v5341_v62 }
0x1652   :  { %5412 = vtanh.f32 %v3558_v0 }
0x1653   :  { %5414 = vtanh.f32 %v3560_v3  ;;  %4354 = vmatpush1.bf16.msra.mxu1 %v5336_v7 }
0x1654   :  { %4395 = vmatpush1.bf16.msra.mxu0 %v5339_v15  ;;  %4355 = vmatprep.subr.bf16.mxu1 %v5344_v20 }
0x1655   :  { %4396 = vmatprep.subr.bf16.mxu0 %v5347_v32 }
0x1657   :  { %4356 = vmatpush1.bf16.msra.mxu1 %v5342_v12 }
0x1658   :  { %4397 = vmatpush1.bf16.msra.mxu0 %v5345_v22  ;;  %4357 = vmatprep.subr.bf16.mxu1 %v5350_v55 }
0x1659   :  { %4398 = vmatprep.subr.bf16.mxu0 %v5353_v24 }
0x165a   :  { %v5409_v30 = vpop.eup %5408 }
0x165b   :  { %v5411_v16 = vpop.eup %5410  ;;  %4358 = vmatpush1.bf16.msra.mxu1 %v5348_v26  ;;  %v3573_v5 = vadd.f32 1.0, %v5409_v30 }
0x165c   :  { %v5413_v31 = vpop.eup %5412  ;;  %4399 = vmatpush1.bf16.msra.mxu0 %v5351_v29  ;;  %4359 = vmatprep.subr.bf16.mxu1 %v5356_v27  ;;  %v3575_v35 = vadd.f32 1.0, %v5411_v16 }
0x165d   :  { %v5415_v45 = vpop.eup %5414  ;;  %4400 = vmatprep.subr.bf16.mxu0 %v5359_v6  ;;  %v3574_v28 = vadd.f32 1.0, %v5413_v31  ;;  %v3581_v8 = vmul.f32 0.5, %v3573_v5 }
0x165e   :  { %v3576_v21 = vadd.f32 1.0, %v5415_v45  ;;  %v3583_v1 = vmul.f32 0.5, %v3575_v35  ;;  %v5422_v35 = vld [vmem:[%s7004_s5 + $0x8] sm:$0xff] }
0x165f   :  { %4360 = vmatpush1.bf16.msra.mxu1 %v5354_v18  ;;  %v3582_v17 = vmul.f32 0.5, %v3574_v28  ;;  %v3589_v42 = vmul.f32 %v3581_v8, %v6860_v34  ;;  %v165_v34 = vld [vmem:[%s7004_s5 + $0x10] sm:$0xff]  ;;  %v4438_v45 = vrot.slane %v5422_v35, %v6829_v23  ;;  %v4448_v8 = vrot.slane %v5422_v35, %v6835_v39 }
0x1660   :  { %4401 = vmatpush1.bf16.msra.mxu0 %v5357_v10  ;;  %4361 = vmatprep.subr.bf16.mxu1 %v5362_v11  ;;  %v3584_v41 = vmul.f32 0.5, %v3576_v21  ;;  %v3591_v44 = vmul.f32 %v3583_v1, %v6862_v4  ;;  %v166_v4 = vld [vmem:[%s7004_s5 + $0x18] sm:$0xff] }
0x1661   :  { %4402 = vmatprep.subr.bf16.mxu0 %v5365_v36  ;;  %v3590_v43 = vmul.f32 %v3582_v17, %v6870_v37  ;;  %v3597_v47 = vpack.c.bf16 %v3589_v42, %v3589_v42  ;;  %v3604_v37 = vrot.slane %v165_v34, %v5698_v9 }
0x1662   :  { %v3592_v33 = vmul.f32 %v3584_v41, %v6872_v38  ;;  %v3599_v48 = vpack.c.bf16 %v3591_v44, %v3591_v44  ;;  %v3608_v38 = vrot.slane %v166_v4, %v5698_v9 }
0x1663   :  { %4362 = vmatpush1.bf16.msra.mxu1 %v5360_v13  ;;  %v3598_v14 = vpack.c.bf16 %v3590_v43, %v3590_v43 }
0x1664   :  { %4403 = vmatpush1.bf16.msra.mxu0 %v5363_v40  ;;  %v3600_v46 = vpack.c.bf16 %v3592_v33, %v3592_v33 }
0x1665   :  { %4363 = vmatprep.mubr.bf16.mxu1 %v3598_v14 }
0x1666   :  { %4404 = vmatprep.mubr.bf16.mxu0 %v3600_v46  ;;  %4364 = vmatmul.mubr.bf16.vlgmr.msra.gmra.mrb[48].mxu1 %v3597_v47 }
0x1667   :  { %4405 = vmatmul.mubr.bf16.vlgmr.msra.gmra.mrb[24].mxu0 %v3599_v48 }
0x16f9   :  { %v4283_v49 = vpop.f32.mrb[44].mxu1 }
0x16fa   :  { %v4284_v50 = vadd.f32 %v4283_v49, %v3604_v37  ;;  %v4324_v51 = vpop.f32.mrb[20].mxu0  ;;  %v4285_v52 = vpop.f32.mrb[45].mxu1 }
0x16fb   :  { %v4286_v53 = vadd.f32 %v4285_v52, %v3608_v38  ;;  %v4326_v54 = vpop.f32.mrb[21].mxu0  ;;  %v4287_v56 = vpop.f32.mrb[46].mxu1 }
0x16fc   :  { %v4325_v57 = vadd.f32 %v4324_v51, %v4284_v50  ;;  %v4328_v58 = vpop.f32.mrb[22].mxu0  ;;  %v4288_v59 = vpop.f32.mrb[47].mxu1 }
0x16fd   :  { %v4327_v60 = vadd.f32 %v4326_v54, %v4286_v53  ;;  %v4329_v61 = vpop.f32.mrb[23].mxu0 }
0x1739   :  { %v4365_v62 = vpop.f32.mrb[48].mxu1 }
0x173a   :  { %v4366_v63 = vadd.f32 %v4365_v62, %v4325_v57  ;;  %v4406_v2 = vpop.f32.mrb[24].mxu0  ;;  %v4367_v0 = vpop.f32.mrb[49].mxu1 }
0x173b   :  { %v4368_v3 = vadd.f32 %v4367_v0, %v4327_v60  ;;  %v4408_v7 = vpop.f32.mrb[25].mxu0  ;;  %v4369_v15 = vpop.f32.mrb[50].mxu1 }
0x173c   :  { %v4407_v9 = vadd.f32 %v4406_v2, %v4366_v63  ;;  %v4410_v20 = vpop.f32.mrb[26].mxu0  ;;  %v4370_v32 = vpop.f32.mrb[51].mxu1 }
0x173d   :  { %v4409_v12 = vadd.f32 %v4408_v7, %v4368_v3  ;;  %v4411_v22 = vpop.f32.mrb[27].mxu0 }
0x173e   :  { %v4413_v55 = vadd.f32 %v4407_v9, %v6344_v25  ;;  %v5421_v25 = vld [vmem:[%s7004_s5] sm:$0xff] }
0x173f   :  { %v4414_v24 = vadd.f32 %v4409_v12, %v6342_v19  ;;  %v4434_v19 = vrot.slane %v5421_v25, %v6829_v23  ;;  %v4444_v28 = vrot.slane %v5421_v25, %v6835_v39 }
0x1741   :  { %v4415_v26 = vadd.f32 %v4414_v24, %v4413_v55 }
0x1743   :  { %4416 = vadd.xlane.f32.xlu0 %v4415_v26 }
0x17d0   :  { %v4417_v29 = vpop.xlane.xlu0 %4416 }
0x17d1   :  { %v4418_v27 = vmul.f32 0.00390625, %v4417_v29 }
0x17d3   :  { %v4419_v6 = vsub.f32 %v4413_v55, %v4418_v27  ;;  %v4420_v30 = vsub.f32 %v4414_v24, %v4418_v27 }
0x17d5   :  { %v4421_v16 = vmul.f32 %v4419_v6, %v4419_v6  ;;  %v4422_v18 = vmul.f32 %v4420_v30, %v4420_v30 }
0x17d7   :  { %v4423_v5 = vadd.f32 %v4422_v18, %v4421_v16 }
0x17d9   :  { %4424 = vadd.xlane.f32.xlu1 %v4423_v5 }
0x1866   :  { %v4425_v31 = vpop.xlane.xlu1 %4424 }
0x1867   :  { %v4426_v10 = vmul.f32 0.00390625, %v4425_v31 }
0x1869   :  { %v4427_v11 = vadd.f32 1e-05, %v4426_v10 }
0x186b   :  { %5416 = vrsqrt.f32 %v4427_v11 }
0x1875   :  { %v5417_v36 = vpop.eup %5416 }
0x1876   :  { %v4429_v21 = vmul.f32 %v5417_v36, %v4419_v6  ;;  %v4430_v1 = vmul.f32 %v5417_v36, %v4420_v30 }
0x1878   :  { %v4439_v13 = vmul.f32 %v4434_v19, %v4429_v21  ;;  %v4440_v17 = vmul.f32 %v4438_v45, %v4430_v1 }
0x187a   :  { %v4449_v40 = vadd.f32 %v4444_v28, %v4439_v13  ;;  %v4450_v41 = vadd.f32 %v4448_v8, %v4440_v17 }
0x187c   :  { %4451 = vst [vmem:[%s7010_s9] sm:$0xff] %v4449_v40  ;;  %4452 = vst [vmem:[%s7010_s9 + $0x8] sm:$0xff] %v4450_v41 }

// kernel: interaction_decoder_forward.6
= control target key start
LH: loop header
LB: loop body
LE: loop exit
PB: predicated region body
PF: predicated region fallthrough
CT: control target
= control target key end

     0   :  { %s7475_s17 = smov 0   ;;  %s9772_s0 = inlined_call_operand.vmem [shape: f32[2,24,256], index: 0, kind: input, shape index: {}]   ;;  %s9773_s1 = inlined_call_operand.vmem [shape: f32[2,4,256], index: 1, kind: input, shape index: {}]   ;;  %s9774_s2 = inlined_call_operand.vmem [shape: f32[2,8,256], index: 2, kind: input, shape index: {}]   ;;  %s9775_s3 = inlined_call_operand.vmem [shape: f32[2,24,12], index: 3, kind: input, shape index: {}]   ;;  %s9776_s4 = inlined_call_operand.vmem [shape: bf16[256,256], index: 4, kind: input, shape index: {}]   ;;  %s9777_s5 = inlined_call_operand.vmem [shape: bf16[256,512], index: 5, kind: input, shape index: {}]   ;;  %s9778_s6 = inlined_call_operand.vmem [shape: bf16[256,256], index: 6, kind: input, shape index: {}]   ;;  %s9779_s7 = inlined_call_operand.vmem [shape: f32[16,256], index: 7, kind: input, shape index: {}]   ;;  %s9780_s8 = inlined_call_operand.vmem [shape: bf16[256,1024], index: 8, kind: input, shape index: {}]   ;;  %s9781_s9 = inlined_call_operand.vmem [shape: f32[1,1024], index: 9, kind: input, shape index: {}]   ;;  %s9782_s10 = inlined_call_operand.vmem [shape: bf16[1024,256], index: 10, kind: input, shape index: {}]   ;;  %s9783_s11 = inlined_call_operand.vmem [shape: f32[2,24,256], index: 11, kind: output, shape index: {}]  }
   0x1 LB: > { %s5938_s18 = sadd.s32 4294967295, %s7406_s17   ;;  %p5942_p0 = scmp.ge.s32.totalorder %s7406_s17, 1  ;;  %s7406_s17 = sphi %s7475_s17, %s21_s17  }
   0x2   : > { %p367_p1 = scmp.lt.s32.totalorder %s7406_s17, 3 }
   0x4   : > { %p368_p2 = pnand %p5942_p0, %p367_p1 }
   0x5   : > { %v6855_v0 = vld [vmem:[%s9776_s4 + $0x4] ss:$8 sps:$4 sm:$0xff] (!%p368_p2)   ;;  %v6857_v1 = vld [vmem:[%s9776_s4] ss:$8 sps:$4 sm:$0xff] (!%p368_p2)   ;;  %v6858_v2 = vld [vmem:[%s9776_s4 + $0x14] ss:$8 sps:$4 sm:$0xff] (!%p368_p2)  }
   0x6   : > { %371 = sbr.rel (%p368_p2) target bundleno = 4058 (0xfda), region = 64  ;;  %1034 = vmatprep.subr.bf16.mxu0 (!%p368_p2), %v6855_v0  ;;  %v6860_v3 = vld [vmem:[%s9776_s4 + $0x10] ss:$8 sps:$4 sm:$0xff] (!%p368_p2)   ;;  %v6861_v4 = vld [vmem:[%s9776_s4 + $0x24] ss:$8 sps:$4 sm:$0xff] (!%p368_p2)   ;;  %p422_p3 = scmp.lt.s32.totalorder (!%p368_p2), %s5938_s18, 1 }
   0x7   : > { %1035 = vmatpush1.bf16.msra.mxu0 (!%p368_p2), %v6857_v1  ;;  %v6863_v5 = vld [vmem:[%s9776_s4 + $0x20] ss:$8 sps:$4 sm:$0xff] (!%p368_p2)   ;;  %v6864_v6 = vld [vmem:[%s9776_s4 + $0x34] ss:$8 sps:$4 sm:$0xff] (!%p368_p2)   ;;  %v6866_v7 = vld [vmem:[%s9776_s4 + $0x30] ss:$8 sps:$4 sm:$0xff] (!%p368_p2)  }
   0x8   : > { %1036 = vmatprep.subr.bf16.mxu0 (!%p368_p2), %v6858_v2  ;;  %v6867_v8 = vld [vmem:[%s9776_s4 + $0x44] ss:$8 sps:$4 sm:$0xff] (!%p368_p2)   ;;  %v6869_v9 = vld [vmem:[%s9776_s4 + $0x40] ss:$8 sps:$4 sm:$0xff] (!%p368_p2)   ;;  %v6870_v10 = vld [vmem:[%s9776_s4 + $0x54] ss:$8 sps:$4 sm:$0xff] (!%p368_p2)  }
   0x9   : > { %v6872_v11 = vld [vmem:[%s9776_s4 + $0x50] ss:$8 sps:$4 sm:$0xff] (!%p368_p2)   ;;  %v6873_v12 = vld [vmem:[%s9776_s4 + $0x64] ss:$8 sps:$4 sm:$0xff] (!%p368_p2)   ;;  %v6875_v16 = vld [vmem:[%s9776_s4 + $0x60] ss:$8 sps:$4 sm:$0xff] (!%p368_p2)  }
   0xa   : > { %v6876_v17 = vld [vmem:[%s9776_s4 + $0x74] ss:$8 sps:$4 sm:$0xff] (!%p368_p2)   ;;  %v6878_v18 = vld [vmem:[%s9776_s4 + $0x70] ss:$8 sps:$4 sm:$0xff] (!%p368_p2)   ;;  %v6879_v19 = vld [vmem:[%s9776_s4 + $0x84] ss:$8 sps:$4 sm:$0xff] (!%p368_p2)  }
   0xb   : > { %1037 = vmatpush1.bf16.msra.mxu0 (!%p368_p2), %v6860_v3  ;;  %v6881_v20 = vld [vmem:[%s9776_s4 + $0x80] ss:$8 sps:$4 sm:$0xff] (!%p368_p2)   ;;  %v6882_v21 = vld [vmem:[%s9776_s4 + $0x94] ss:$8 sps:$4 sm:$0xff] (!%p368_p2)   ;;  %v6884_v22 = vld [vmem:[%s9776_s4 + $0x90] ss:$8 sps:$4 sm:$0xff] (!%p368_p2)  }
   0xc   : > { %1038 = vmatprep.subr.bf16.mxu0 (!%p368_p2), %v6861_v4  ;;  %v6885_v23 = vld [vmem:[%s9776_s4 + $0xa4] ss:$8 sps:$4 sm:$0xff] (!%p368_p2)   ;;  %v6887_v24 = vld [vmem:[%s9776_s4 + $0xa0] ss:$8 sps:$4 sm:$0xff] (!%p368_p2)   ;;  %v6888_v25 = vld [vmem:[%s9776_s4 + $0xb4] ss:$8 sps:$4 sm:$0xff] (!%p368_p2)  }
   0xd   : > { %s9789_s18 = smov (!%p422_p3, %s5938_s18), 1  ;;  %v6890_v26 = vld [vmem:[%s9776_s4 + $0xb0] ss:$8 sps:$4 sm:$0xff]   ;;  %v6891_v27 = vld [vmem:[%s9776_s4 + $0xc4] ss:$8 sps:$4 sm:$0xff]   ;;  %vm459_vm0 = vcmask 1043456  }
   0xe   : > { %s6778_s20 = smul.u32 48, %s9789_s18  ;;  %v6893_v28 = vld [vmem:[%s9776_s4 + $0xc0] ss:$8 sps:$4 sm:$0xff]   ;;  %v6894_v29 = vld [vmem:[%s9776_s4 + $0xd4] ss:$8 sps:$4 sm:$0xff]   ;;  %s6408_s19 = sshll.u32 %s9789_s18, 3 }
   0xf   : > { %1039 = vmatpush1.bf16.msra.mxu0 %v6863_v5  ;;  %v6896_v30 = vld [vmem:[%s9776_s4 + $0xd0] ss:$8 sps:$4 sm:$0xff]   ;;  %v6897_v31 = vld [vmem:[%s9776_s4 + $0xe4] ss:$8 sps:$4 sm:$0xff]   ;;  %v6899_v32 = vld [vmem:[%s9776_s4 + $0xe0] ss:$8 sps:$4 sm:$0xff]   ;;  %s431_s26 = scalar_lea.vmem %s9773_s1, %s6408_s19 }
  0x10   : > { %1040 = vmatprep.subr.bf16.mxu0 %v6864_v6  ;;  %s7524_s27 = scalar_lea.vmem %s9772_s0, %s6778_s20  ;;  %s6409_s21 = sshll.u32 %s9789_s18, 4  ;;  %v6900_v33 = vld [vmem:[%s9776_s4 + $0xf4] ss:$8 sps:$4 sm:$0xff]   ;;  %v6902_v34 = vld [vmem:[%s9776_s4 + $0xf0] ss:$8 sps:$4 sm:$0xff]   ;;  %v7607_v39 = vld [vmem:[%s431_s26] sm:$0xff] }
  0x11   : > { %v463_v13 = vld [vmem:[%s7524_s27 + $0x8] sm:$0xff]  ;;  %v465_v14 = vld [vmem:[%s7524_s27 + $0x18] sm:$0xff]  ;;  %s7596_s30 = scalar_lea.vmem %s9774_s2, %s6409_s21  ;;  %v462_v35 = vld [vmem:[%s7524_s27] sm:$0xff]  ;;  %v451_v45 = vcombine.high %v7607_v39, %v7607_v39  ;;  %vm7409_vm1 = vmmov 0   ;;  %vm1515_vm2 = vcmask 261120   ;;  %vm7411_vm4 = vmmov 1  }
  0x12   : > { %v861_v15 = vpack.c.bf16 %v465_v14, %v463_v13  ;;  %v464_v36 = vld [vmem:[%s7524_s27 + $0x10] sm:$0xff]  ;;  %v467_v38 = vld [vmem:[%s7524_s27 + $0x28] sm:$0xff]  ;;  %v466_v48 = vld [vmem:[%s7524_s27 + $0x20] sm:$0xff]  ;;  %s6779_s24 = smul.u32 24, %s9789_s18  ;;  %vm1617_vm6 = vcmask 97280   ;;  %s7412_s29 = smov 96  }
  0x13   : > { %1041 = vmatpush1.bf16.msra.mxu0 %v6866_v7  ;;  %v6905_v37 = vld [vmem:[%s9777_s5 + $0x4] ss:$16 sps:$4 sm:$0xff]   ;;  %v449_v40 = vld [vmem:[%s7596_s30 + $0x8] sm:$0xff]  ;;  %v6903_v41 = vld [vmem:[%s9777_s5] ss:$16 sps:$4 sm:$0xff]   ;;  %v860_v42 = vpack.c.bf16 %v464_v36, %v462_v35  ;;  %v863_v44 = vpack.c.bf16 %v467_v38, %v467_v38  ;;  %v862_v53 = vpack.c.bf16 %v466_v48, %v466_v48  ;;  %s7413_s12 = smov 64  }
  0x14   : > { %1042 = vmatprep.subr.bf16.mxu0 %v6867_v8  ;;  %1066 = vmatprep.mubr.bf16.mxu0 %v861_v15  ;;  %v6908_v43 = vld [vmem:[%s9777_s5 + $0x24] ss:$16 sps:$4 sm:$0xff]   ;;  %v456_v46 = vrot.slane %v449_v40, 4  ;;  %v6906_v47 = vld [vmem:[%s9777_s5 + $0x20] ss:$16 sps:$4 sm:$0xff]   ;;  %vm7847_vm3 = vmpackc.low %vm1515_vm2, %vm1515_vm2  ;;  %s441_s28 = scalar_lea.vmem %s9775_s3, %s6779_s24  ;;  %s7414_s13 = smov 32  }
  0x15   : > { %v6911_v49 = vld [vmem:[%s9777_s5 + $0x44] ss:$16 sps:$4 sm:$0xff]   ;;  %v6909_v51 = vld [vmem:[%s9777_s5 + $0x40] ss:$16 sps:$4 sm:$0xff]   ;;  %v6973_v35 = vld [vmem:[%s9777_s5 + $0xe8] ss:$16 sps:$4 sm:$0xff]  }
  0x16   : > { %v461_v50 = vsel %vm459_vm0, %v451_v45, %v456_v46  ;;  %v6914_v52 = vld [vmem:[%s9777_s5 + $0x64] ss:$16 sps:$4 sm:$0xff]   ;;  %v6912_v55 = vld [vmem:[%s9777_s5 + $0x60] ss:$16 sps:$4 sm:$0xff]   ;;  %v6978_v36 = vld [vmem:[%s9777_s5 + $0x10c] ss:$16 sps:$4 sm:$0xff]  }
  0x17   : > { %1043 = vmatpush1.bf16.msra.mxu0 %v6869_v9  ;;  %v865_v54 = vpack.c.bf16 %v456_v46, %v461_v50  ;;  %v6917_v56 = vld [vmem:[%s9777_s5 + $0x84] ss:$16 sps:$4 sm:$0xff]   ;;  %v6915_v57 = vld [vmem:[%s9777_s5 + $0x80] ss:$16 sps:$4 sm:$0xff]   ;;  %v6981_v38 = vld [vmem:[%s9777_s5 + $0x12c] ss:$16 sps:$4 sm:$0xff]  }
  0x18   : > { %1044 = vmatprep.subr.bf16.mxu0 %v6870_v10  ;;  %v6920_v58 = vld [vmem:[%s9777_s5 + $0xa4] ss:$16 sps:$4 sm:$0xff]   ;;  %v6918_v59 = vld [vmem:[%s9777_s5 + $0xa0] ss:$16 sps:$4 sm:$0xff]   ;;  %v6984_v40 = vld [vmem:[%s9777_s5 + $0x14c] ss:$16 sps:$4 sm:$0xff]  }
  0x19   : > { %v6923_v60 = vld [vmem:[%s9777_s5 + $0xc4] ss:$16 sps:$4 sm:$0xff]   ;;  %v6921_v61 = vld [vmem:[%s9777_s5 + $0xc0] ss:$16 sps:$4 sm:$0xff]   ;;  %v6988_v45 = vld [vmem:[%s9777_s5 + $0x188] ss:$16 sps:$4 sm:$0xff]  }
  0x1a   : > { %v6926_v62 = vld [vmem:[%s9777_s5 + $0xe4] ss:$16 sps:$4 sm:$0xff]   ;;  %v6924_v63 = vld [vmem:[%s9777_s5 + $0xe0] ss:$16 sps:$4 sm:$0xff]   ;;  %v6993_v46 = vld [vmem:[%s9777_s5 + $0x1ac] ss:$16 sps:$4 sm:$0xff]  }
  0x1b   : > { %1045 = vmatpush1.bf16.msra.mxu0 %v6872_v11  ;;  %v6929_v0 = vld [vmem:[%s9777_s5 + $0x104] ss:$16 sps:$4 sm:$0xff]   ;;  %v6927_v1 = vld [vmem:[%s9777_s5 + $0x100] ss:$16 sps:$4 sm:$0xff]   ;;  %v6996_v48 = vld [vmem:[%s9777_s5 + $0x1cc] ss:$16 sps:$4 sm:$0xff]  }
  0x1c   : > { %1046 = vmatprep.subr.bf16.mxu0 %v6873_v12  ;;  %v6932_v2 = vld [vmem:[%s9777_s5 + $0x124] ss:$16 sps:$4 sm:$0xff]   ;;  %v6930_v3 = vld [vmem:[%s9777_s5 + $0x120] ss:$16 sps:$4 sm:$0xff]   ;;  %v6999_v50 = vld [vmem:[%s9777_s5 + $0x1ec] ss:$16 sps:$4 sm:$0xff]  }
  0x1d   : > { %v6935_v4 = vld [vmem:[%s9777_s5 + $0x144] ss:$16 sps:$4 sm:$0xff]   ;;  %v6933_v5 = vld [vmem:[%s9777_s5 + $0x140] ss:$16 sps:$4 sm:$0xff]   ;;  %vm7890_vm5 = vmpackc.low %vm459_vm0, %vm7411_vm4  ;;  %vm1994_vm7 = vcmask 523520   ;;  %vm2245_vm8 = vcmask 785920  }
  0x1e   : > { %v6938_v6 = vld [vmem:[%s9777_s5 + $0x164] ss:$16 sps:$4 sm:$0xff]   ;;  %v6936_v7 = vld [vmem:[%s9777_s5 + $0x160] ss:$16 sps:$4 sm:$0xff]   ;;  %vm2496_vm9 = vcmask 1048320  }
  0x1f   : > { %1047 = vmatpush1.bf16.msra.mxu0 %v6875_v16  ;;  %v6941_v8 = vld [vmem:[%s9777_s5 + $0x184] ss:$16 sps:$4 sm:$0xff]   ;;  %v6939_v9 = vld [vmem:[%s9777_s5 + $0x180] ss:$16 sps:$4 sm:$0xff]  }
  0x20   : > { %1048 = vmatprep.subr.bf16.mxu0 %v6876_v17  ;;  %v6944_v10 = vld [vmem:[%s9777_s5 + $0x1a4] ss:$16 sps:$4 sm:$0xff]   ;;  %v6942_v11 = vld [vmem:[%s9777_s5 + $0x1a0] ss:$16 sps:$4 sm:$0xff]  }
  0x21   : > { %v6947_v12 = vld [vmem:[%s9777_s5 + $0x1c4] ss:$16 sps:$4 sm:$0xff]   ;;  %v6945_v14 = vld [vmem:[%s9777_s5 + $0x1c0] ss:$16 sps:$4 sm:$0xff]  }
  0x22   : > { %v448_v13 = vld [vmem:[%s7596_s30] sm:$0xff] }
  0x23   : > { %1049 = vmatpush1.bf16.msra.mxu0 %v6878_v18  ;;  %v455_v15 = vrot.slane %v448_v13, 4  ;;  %v6950_v16 = vld [vmem:[%s9777_s5 + $0x1e4] ss:$16 sps:$4 sm:$0xff]   ;;  %v6948_v17 = vld [vmem:[%s9777_s5 + $0x1e0] ss:$16 sps:$4 sm:$0xff]  }
  0x24   : > { %1050 = vmatprep.subr.bf16.mxu0 %v6879_v19 }
  0x25   : > { %v460_v18 = vsel %vm459_vm0, %v7607_v39, %v455_v15  ;;  %v6979_v39 = vld [vmem:[%s9777_s5 + $0x128] ss:$16 sps:$4 sm:$0xff]  }
  0x26   : > { %v7710_v19 = vpack.c.bf16 %v455_v15, %v460_v18 }
  0x27   : > { %1051 = vmatpush1.bf16.msra.mxu0 %v6881_v20  ;;  %v6954_v20 = vld [vmem:[%s9777_s5 + $0xc] ss:$16 sps:$4 sm:$0xff]  }
  0x28   : > { %1052 = vmatprep.subr.bf16.mxu0 %v6882_v21  ;;  %v6952_v21 = vld [vmem:[%s9777_s5 + $0x8] ss:$16 sps:$4 sm:$0xff]  }
  0x2b   : > { %1053 = vmatpush1.bf16.msra.mxu0 %v6884_v22  ;;  %v6957_v22 = vld [vmem:[%s9777_s5 + $0x2c] ss:$16 sps:$4 sm:$0xff]  }
  0x2c   : > { %1054 = vmatprep.subr.bf16.mxu0 %v6885_v23  ;;  %v6955_v23 = vld [vmem:[%s9777_s5 + $0x28] ss:$16 sps:$4 sm:$0xff]  }
  0x2f   : > { %1055 = vmatpush1.bf16.msra.mxu0 %v6887_v24  ;;  %v6960_v24 = vld [vmem:[%s9777_s5 + $0x4c] ss:$16 sps:$4 sm:$0xff]  }
  0x30   : > { %1056 = vmatprep.subr.bf16.mxu0 %v6888_v25  ;;  %v6958_v25 = vld [vmem:[%s9777_s5 + $0x48] ss:$16 sps:$4 sm:$0xff]  }
  0x33   : > { %1057 = vmatpush1.bf16.msra.mxu0 %v6890_v26  ;;  %v6963_v26 = vld [vmem:[%s9777_s5 + $0x6c] ss:$16 sps:$4 sm:$0xff]  }
  0x34   : > { %1058 = vmatprep.subr.bf16.mxu0 %v6891_v27  ;;  %v6961_v27 = vld [vmem:[%s9777_s5 + $0x68] ss:$16 sps:$4 sm:$0xff]  }
  0x37   : > { %1059 = vmatpush1.bf16.msra.mxu0 %v6893_v28  ;;  %v6966_v28 = vld [vmem:[%s9777_s5 + $0x8c] ss:$16 sps:$4 sm:$0xff]  }
  0x38   : > { %1060 = vmatprep.subr.bf16.mxu0 %v6894_v29  ;;  %v6964_v29 = vld [vmem:[%s9777_s5 + $0x88] ss:$16 sps:$4 sm:$0xff]  }
  0x3b   : > { %1061 = vmatpush1.bf16.msra.mxu0 %v6896_v30  ;;  %v6969_v30 = vld [vmem:[%s9777_s5 + $0xac] ss:$16 sps:$4 sm:$0xff]  }
  0x3c   : > { %1062 = vmatprep.subr.bf16.mxu0 %v6897_v31  ;;  %v6967_v31 = vld [vmem:[%s9777_s5 + $0xa8] ss:$16 sps:$4 sm:$0xff]  }
  0x3f   : > { %1063 = vmatpush1.bf16.msra.mxu0 %v6899_v32  ;;  %v6972_v32 = vld [vmem:[%s9777_s5 + $0xcc] ss:$16 sps:$4 sm:$0xff]  }
  0x40   : > { %1064 = vmatprep.subr.bf16.mxu0 %v6900_v33  ;;  %v6970_v33 = vld [vmem:[%s9777_s5 + $0xc8] ss:$16 sps:$4 sm:$0xff]  }
  0x43   : > { %1065 = vmatpush1.bf16.msra.mxu0 %v6902_v34  ;;  %v6975_v34 = vld [vmem:[%s9777_s5 + $0xec] ss:$16 sps:$4 sm:$0xff]  }
  0x44   : > { %1405 = vmatprep.subr.bf16.mxu0 %v6905_v37  ;;  %v6976_v37 = vld [vmem:[%s9777_s5 + $0x108] ss:$16 sps:$4 sm:$0xff]  }
  0x46   : > { %1067 = vmatmul.mubr.bf16.vlgmr.msra.gmra.mrb[0].mxu0 %v860_v42  ;;  %v6987_v42 = vld [vmem:[%s9777_s5 + $0x16c] ss:$16 sps:$4 sm:$0xff]  }
  0x47   : > { %1406 = vmatpush1.bf16.msra.mxu0 %v6903_v41  ;;  %1076 = vmatprep.mubr.bf16.mxu0 %v863_v44  ;;  %v6982_v41 = vld [vmem:[%s9777_s5 + $0x148] ss:$16 sps:$4 sm:$0xff]   ;;  %v6990_v44 = vld [vmem:[%s9777_s5 + $0x18c] ss:$16 sps:$4 sm:$0xff]  }
  0x48   : > { %1407 = vmatprep.subr.bf16.mxu0 %v6908_v43  ;;  %v6985_v43 = vld [vmem:[%s9777_s5 + $0x168] ss:$16 sps:$4 sm:$0xff]  }
  0x4b   : > { %1408 = vmatpush1.bf16.msra.mxu0 %v6906_v47  ;;  %v6991_v47 = vld [vmem:[%s9777_s5 + $0x1a8] ss:$16 sps:$4 sm:$0xff]  }
  0x4c   : > { %1409 = vmatprep.subr.bf16.mxu0 %v6911_v49  ;;  %v6994_v49 = vld [vmem:[%s9777_s5 + $0x1c8] ss:$16 sps:$4 sm:$0xff]  }
  0x4e   : > { %1077 = vmatmul.mubr.bf16.gmra.mrb[4].mxu0 %v862_v53  ;;  %v7410_v53 = vmov 0.0  }
  0x4f   : > { %1410 = vmatpush1.bf16.msra.mxu0 %v6909_v51  ;;  %1437 = vmatprep.mubr.bf16.mxu0 %v865_v54  ;;  %v6997_v51 = vld [vmem:[%s9777_s5 + $0x1e8] ss:$16 sps:$4 sm:$0xff]  }
  0x50   : > { %1411 = vmatprep.subr.bf16.mxu0 %v6914_v52  ;;  %v7408_v52 = vmov 0.0|0.0   ;;  %6533 = vmatprep.mubr.msk.f32.mxu1 %vm7409_vm1, %v7410_v53 }
  0x51   : > { %6710 = vmatprep.subr.bf16.mxu1 %v7408_v52 }
  0x53   : > { %1412 = vmatpush1.bf16.msra.mxu0 %v6912_v55 }
  0x54   : > { %1413 = vmatprep.subr.bf16.mxu0 %v6917_v56 }
  0x57   : > { %1414 = vmatpush1.bf16.msra.mxu0 %v6915_v57 }
  0x58   : > { %1415 = vmatprep.subr.bf16.mxu0 %v6920_v58 }
  0x5b   : > { %1416 = vmatpush1.bf16.msra.mxu0 %v6918_v59 }
  0x5c   : > { %1417 = vmatprep.subr.bf16.mxu0 %v6923_v60 }
  0x5f   : > { %1418 = vmatpush1.bf16.msra.mxu0 %v6921_v61 }
  0x60   : > { %1419 = vmatprep.subr.bf16.mxu0 %v6926_v62  ;;  %v866_v62 = vlaneseq }
  0x63   : > { %1420 = vmatpush1.bf16.msra.mxu0 %v6924_v63  ;;  %v7822_v63 = vshrl.u32 %v866_v62, 7 }
  0x64   : > { %1421 = vmatprep.subr.bf16.mxu0 %v6929_v0 }
  0x65   : > { %v7825_v0 = vsub.s32 1, %v7822_v63 }
  0x67   : > { %1422 = vmatpush1.bf16.msra.mxu0 %v6927_v1  ;;  %v599_v1 = vld [vmem:[%s9779_s7] sm:$0xff] }
  0x68   : > { %1423 = vmatprep.subr.bf16.mxu0 %v6932_v2  ;;  %v7833_v2 = vld [vmem:[%s9779_s7 + $0x8] sm:$0xff] }
  0x6b   : > { %1424 = vmatpush1.bf16.msra.mxu0 %v6930_v3  ;;  %v1494_v3 = vrot.slane %v599_v1, %v7825_v0 }
  0x6c   : > { %1425 = vmatprep.subr.bf16.mxu0 %v6935_v4 }
  0x6f   : > { %1426 = vmatpush1.bf16.msra.mxu0 %v6933_v5  ;;  %v1498_v5 = vrot.slane %v7833_v2, %v7825_v0 }
  0x70   : > { %1427 = vmatprep.subr.bf16.mxu0 %v6938_v6 }
  0x73   : > { %1428 = vmatpush1.bf16.msra.mxu0 %v6936_v7 }
  0x74   : > { %1429 = vmatprep.subr.bf16.mxu0 %v6941_v8 }
  0x77   : > { %1430 = vmatpush1.bf16.msra.mxu0 %v6939_v9 }
  0x78   : > { %1431 = vmatprep.subr.bf16.mxu0 %v6944_v10 }
  0x7b   : > { %1432 = vmatpush1.bf16.msra.mxu0 %v6942_v11  ;;  %v7839_v11 = vsub.s32 0, %v7822_v63 }
  0x7c   : > { %1433 = vmatprep.subr.bf16.mxu0 %v6947_v12 }
  0x7f   : > { %1434 = vmatpush1.bf16.msra.mxu0 %v6945_v14 }
  0x80   : > { %1435 = vmatprep.subr.bf16.mxu0 %v6950_v16 }
  0x83   : > { %1436 = vmatpush1.bf16.msra.mxu0 %v6948_v17 }
  0x84   : > { %1448 = vmatprep.subr.bf16.mxu0 %v6954_v20 }
  0x86   : > { %1438 = vmatmul.mubr.bf16.vlgmr.msra.gmra.mrb[8].mxu0 %v7710_v19 }
  0x87   : > { %1480 = vmatprep.mubr.bf16.mxu0 %v865_v54  ;;  %1449 = vmatpush1.bf16.msra.mxu0 %v6952_v21 }
  0x88   : > { %1450 = vmatprep.subr.bf16.mxu0 %v6957_v22 }
  0x8b   : > { %1451 = vmatpush1.bf16.msra.mxu0 %v6955_v23  ;;  %v7882_v23 = vsub.s32 2, %v7822_v63 }
  0x8c   : > { %1452 = vmatprep.subr.bf16.mxu0 %v6960_v24 }
  0x8d   : > { %v1506_v24 = vrot.slane %v599_v1, %v7882_v23 }
  0x8f   : > { %1453 = vmatpush1.bf16.msra.mxu0 %v6958_v25  ;;  %v1510_v25 = vrot.slane %v7833_v2, %v7882_v23 }
  0x90   : > { %1454 = vmatprep.subr.bf16.mxu0 %v6963_v26 }
  0x93   : > { %1455 = vmatpush1.bf16.msra.mxu0 %v6961_v27 }
  0x94   : > { %1456 = vmatprep.subr.bf16.mxu0 %v6966_v28 }
  0x97   : > { %1457 = vmatpush1.bf16.msra.mxu0 %v6964_v29 }
  0x98   : > { %1458 = vmatprep.subr.bf16.mxu0 %v6969_v30 }
  0x9b   : > { %1459 = vmatpush1.bf16.msra.mxu0 %v6967_v31 }
  0x9c   : > { %1460 = vmatprep.subr.bf16.mxu0 %v6972_v32 }
  0x9f   : > { %1461 = vmatpush1.bf16.msra.mxu0 %v6970_v33 }
  0xa0   : > { %1462 = vmatprep.subr.bf16.mxu0 %v6975_v34 }
  0xa3   : > { %1463 = vmatpush1.bf16.msra.mxu0 %v6973_v35 }
  0xa4   : > { %1464 = vmatprep.subr.bf16.mxu0 %v6978_v36 }
  0xa7   : > { %1465 = vmatpush1.bf16.msra.mxu0 %v6976_v37 }
  0xa8   : > { %1466 = vmatprep.subr.bf16.mxu0 %v6981_v38 }
  0xab   : > { %1467 = vmatpush1.bf16.msra.mxu0 %v6979_v39 }
  0xac   : > { %1468 = vmatprep.subr.bf16.mxu0 %v6984_v40  ;;  %v7911_v40 = vld [vmem:[%s441_s28] sm:$0xff] }
  0xaf   : > { %1469 = vmatpush1.bf16.msra.mxu0 %v6982_v41 }
  0xb0   : > { %1470 = vmatprep.subr.bf16.mxu0 %v6987_v42 }
  0xb3   : > { %1471 = vmatpush1.bf16.msra.mxu0 %v6985_v43 }
  0xb4   : > { %1472 = vmatprep.subr.bf16.mxu0 %v6990_v44 }
  0xb7   : > { %1473 = vmatpush1.bf16.msra.mxu0 %v6988_v45  ;;  %v7914_v45 = vld [vmem:[%s441_s28 + $0x8] sm:$0xff] }
  0xb8   : > { %1474 = vmatprep.subr.bf16.mxu0 %v6993_v46 }
  0xbb   : > { %1475 = vmatpush1.bf16.msra.mxu0 %v6991_v47 }
  0xbc   : > { %1476 = vmatprep.subr.bf16.mxu0 %v6996_v48 }
  0xbf   : > { %1477 = vmatpush1.bf16.msra.mxu0 %v6994_v49 }
  0xc0   : > { %1478 = vmatprep.subr.bf16.mxu0 %v6999_v50 }
  0xc3   : > { %1479 = vmatpush1.bf16.msra.mxu0 %v6997_v51  ;;  %v7918_v51 = vld [vmem:[%s441_s28 + $0x10] sm:$0xff] }
  0xc4   : > { %6698 = vmatprep.subr.bf16.mxu0 %v7408_v52 }
  0xc6   : > { %1481 = vmatmul.mubr.bf16.vlgmr.msra.gmra.mrb[12].mxu0 %v7710_v19  ;;  %v869_v19 = vrot.slane %v599_v1, %v7839_v11 }
  0xc7   : > { %6494 = vmatprep.mubr.msk.f32.mxu0 %vm7409_vm1, %v7410_v53 }
 0x119   : > { %v1068_v54 = vpop.f32.mrb[0].mxu0 }
 0x11a   : > { %v7816_v55 = vpop.f32.mrb[1].mxu0  ;;  %v7863_v20 = vadd.f32 %v1068_v54, %v869_v19 }
 0x11b   : > { %v1072_v56 = vpop.f32.mrb[2].mxu0 }
 0x11c   : > { %v7818_v57 = vpop.f32.mrb[3].mxu0  ;;  %v7869_v21 = vadd.f32 %v1072_v56, %v869_v19 }
 0x121   : > { %v1078_v58 = vpop.f32.mrb[4].mxu0 }
 0x122   : > { %v7820_v59 = vpop.f32.mrb[5].mxu0  ;;  %v7875_v22 = vadd.f32 %v1078_v58, %v869_v19 }
 0x123   : > { %v1082_v60 = vpop.f32.mrb[6].mxu0 }
 0x124   : > { %v1083_v61 = vpop.f32.mrb[7].mxu0 }
 0x159   : > { %v1439_v4 = vpop.f32.mrb[8].mxu0 }
 0x15a   : > { %v1441_v6 = vpop.f32.mrb[9].mxu0  ;;  %v1499_v8 = vadd.f32 %v1494_v3, %v1439_v4 }
 0x15b   : > { %v1443_v7 = vpop.f32.mrb[10].mxu0  ;;  %v7841_v12 = vadd.f32 %v1498_v5, %v1441_v6 }
 0x15c   : > { %v1501_v9 = vadd.f32 %v1494_v3, %v1443_v7  ;;  %v1445_v10 = vpop.f32.mrb[11].mxu0 }
 0x15d   : > { %v7843_v13 = vadd.f32 %v1498_v5, %v1445_v10 }
 0x15e   : > { %v6699_v15 = vpack.c.bf16 %v1501_v9, %v1499_v8  ;;  %v7851_v16 = vpack.i.bf16 %v1501_v9, %v1499_v8 }
 0x15f   : > { %v6731_v17 = vpack.c.bf16 %v7843_v13, %v7841_v12  ;;  %v7857_v18 = vpack.i.bf16 %v7843_v13, %v7841_v12 }
 0x160   : > { %6701 = vmatpush3.bf16.xpose.msk.msra.mxu0 %vm7847_vm3, %v6699_v15 }
 0x161   : > { %6702 = vmatprep.subr.bf16.mxu0 %v7408_v52 }
 0x167   : > { %6495 = vmatmul.mubr.msk.f32.vlgmr.msra.gmra.mrb[16].mxu0 %vm1515_vm2, %v7863_v20 }
 0x168   : > { %6497 = vmatprep.mubr.msk.f32.mxu0 %vm7409_vm1, %v7410_v53 }
 0x16b   : > { %6498 = vmatmul.mubr.msk.f32.gmra.mrb[18].mxu0 %vm1515_vm2, %v7869_v21 }
 0x16c   : > { %6500 = vmatprep.mubr.msk.f32.mxu0 %vm7409_vm1, %v7410_v53 }
 0x16f   : > { %6501 = vmatmul.mubr.msk.f32.gmra.mrb[20].mxu0 %vm1515_vm2, %v7875_v22 }
 0x170   : > { %6507 = vmatprep.mubr.msk.f32.mxu0 %vm7409_vm1, %v7410_v53 }
 0x199   : > { %v1482_v26 = vpop.f32.mrb[12].mxu0 }
 0x19a   : > { %v1511_v27 = vadd.f32 %v1506_v24, %v1482_v26  ;;  %v1484_v28 = vpop.f32.mrb[13].mxu0 }
 0x19b   : > { %v7887_v29 = vadd.f32 %v1510_v25, %v1484_v28  ;;  %v1486_v30 = vpop.f32.mrb[14].mxu0 }
 0x19c   : > { %v1513_v31 = vadd.f32 %v1506_v24, %v1486_v30  ;;  %v1488_v32 = vpop.f32.mrb[15].mxu0 }
 0x19d   : > { %v7894_v34 = vadd.f32 %v1510_v25, %v1488_v32 }
 0x19e   : > { %v6703_v35 = vpack.c.bf16 %v1513_v31, %v1511_v27  ;;  %v7901_v37 = vpack.i.bf16 %v1513_v31, %v1511_v27 }
 0x19f   : > { %v6735_v36 = vpack.c.bf16 %v7894_v34, %v7887_v29  ;;  %v7905_v38 = vpack.i.bf16 %v7894_v34, %v7887_v29 }
 0x1a0   : > { %6705 = vmatpush3.bf16.msk.msra.mxu0 %vm7890_vm5, %v6703_v35 }
 0x1a1   : > { %6706 = vmatprep.subr.bf16.mxu0 %v7408_v52 }
 0x23a   : > { %v1597_v39 = vpop.f32.mrb[16].mxu0 }
 0x23b   : > { %v1611_v41 = vmul.f32 0.17677669, %v1597_v39  ;;  %v6496_v42 = vpop.f32.mrb[17].mxu0 }
 0x23d   : > { %v1614_v43 = vadd.f32 %v1611_v41, %v7911_v40 }
 0x23e   : > { %v1602_v44 = vpop.f32.mrb[18].mxu0 }
 0x23f   : > { %v1612_v46 = vmul.f32 0.17677669, %v1602_v44  ;;  %v6499_v47 = vpop.f32.mrb[19].mxu0  ;;  %v1618_v48 = vsel %vm1617_vm6, %v1614_v43, -inf }
 0x240   : > { %1619 = vmax.xlane.f32.xlu0 %v1618_v48 }
 0x241   : > { %v1615_v49 = vadd.f32 %v1612_v46, %v7914_v45 }
 0x242   : > { %v1607_v50 = vpop.f32.mrb[20].mxu0 }
 0x243   : > { %v1613_v54 = vmul.f32 0.17677669, %v1607_v50  ;;  %v6502_v56 = vpop.f32.mrb[21].mxu0  ;;  %v1621_v58 = vsel %vm1617_vm6, %v1615_v49, -inf }
 0x244   : > { %1622 = vmax.xlane.f32.xlu0 %v1621_v58 }
 0x245   : > { %v1616_v60 = vadd.f32 %v1613_v54, %v7918_v51 }
 0x247   : > { %v1624_v61 = vsel %vm1617_vm6, %v1616_v60, -inf }
 0x248   : > { %1625 = vmax.xlane.f32.xlu1 %v1624_v61 }
 0x2cd   : > { %v1620_v62 = vpop.xlane.xlu0 %1619 }
 0x2ce   : > { %v1627_v1 = vsub.f32 %v1614_v43, %v1620_v62 }
 0x2d0   : > { %v1630_v3 = vmul.f32 1.442695, %v1627_v1 }
 0x2d1   : > { %v1623_v4 = vpop.xlane.xlu0 %1622 }
 0x2d2   : > { %7240 = vpow2.f32 %v1630_v3  ;;  %v1628_v5 = vsub.f32 %v1615_v49, %v1623_v4 }
 0x2d4   : > { %v1632_v6 = vmul.f32 1.442695, %v1628_v5 }
 0x2d5   : > { %v1626_v15 = vpop.xlane.xlu1 %1625 }
 0x2d6   : > { %7242 = vpow2.f32 %v1632_v6  ;;  %v1629_v19 = vsub.f32 %v1616_v60, %v1626_v15 }
 0x2d8   : > { %v1634_v24 = vmul.f32 1.442695, %v1629_v19 }
 0x2da   : > { %7244 = vpow2.f32 %v1634_v24 }
 0x2dc   : > { %v7241_v7 = vpop.eup %7240 }
 0x2dd   : > { %v1636_v8 = vsel %vm1617_vm6, %v7241_v7, 0.0 }
 0x2de   : > { %1637 = vadd.xlane.f32.xlu1 %v1636_v8 }
 0x2e0   : > { %v7243_v9 = vpop.eup %7242 }
 0x2e1   : > { %v1639_v10 = vsel %vm1617_vm6, %v7243_v9, 0.0 }
 0x2e2   : > { %1640 = vadd.xlane.f32.xlu0 %v1639_v10 }
 0x2e4   : > { %v7245_v25 = vpop.eup %7244 }
 0x2e5   : > { %v1642_v26 = vsel %vm1617_vm6, %v7245_v25, 0.0 }
 0x2ef   : > { %1746 = vrot.lane.b32.xlu1 %v7863_v20, %s7412_s29 }
 0x2f8   : > { %6796 = vrot.lane.b32.xlu0 %v7851_v16, %s7412_s29 }
 0x313   : > { %1643 = vadd.xlane.f32.xlu1 %v1642_v26 }
 0x324   : > { %1748 = vrot.lane.b32.xlu1 %v7869_v21, %s7412_s29 }
 0x328   : > { %1750 = vrot.lane.b32.xlu1 %v7875_v22, %s7412_s29 }
 0x36b   : > { %v1638_v27 = vpop.xlane.xlu1 %1637 }
 0x36c   : > { %7246 = vrcp.f32 %v1638_v27 }
 0x36f   : > { %v1641_v28 = vpop.xlane.xlu0 %1640  ;;  %v1747_v44 = vpop.permute.xlu1 %1746 }
 0x370   : > { %7248 = vrcp.f32 %v1641_v28 }
 0x373   : > { %v6797_v30 = vpop.permute.xlu0 %6796 }
 0x374   : > { %v6799_v31 = vunpack.i.h.bf16 %v6797_v30  ;;  %v6798_v32 = vunpack.i.l.bf16 %v6797_v30 }
 0x376   : > { %v7247_v35 = vpop.eup %7246  ;;  %v6707_v39 = vpack.c.bf16 %v6799_v31, %v6798_v32 }
 0x377   : > { %v1646_v41 = vmul.f32 %v7247_v35, %v7241_v7 }
 0x379   : > { %6508 = vmatmul.mubr.msk.f32.vlgmr.msra.gmra.mrb[22].mxu0 %vm1617_vm6, %v1646_v41 }
 0x37a   : > { %v7249_v42 = vpop.eup %7248  ;;  %6709 = vmatpush3.bf16.xpose.msk.msra.mxu0 %vm7847_vm3, %v6707_v39  ;;  %6510 = vmatprep.mubr.msk.f32.mxu0 %vm7409_vm1, %v7410_v53 }
 0x37b   : > { %v1648_v43 = vmul.f32 %v7249_v42, %v7243_v9  ;;  %6722 = vmatprep.subr.bf16.mxu0 %v7408_v52 }
 0x37d   : > { %6511 = vmatmul.mubr.msk.f32.gmra.mrb[24].mxu0 %vm1617_vm6, %v1648_v43 }
 0x37e   : > { %6513 = vmatprep.mubr.msk.f32.mxu0 %vm7409_vm1, %v7410_v53 }
 0x3a0   : > { %v1644_v46 = vpop.xlane.xlu1 %1643 }
 0x3a1   : > { %7250 = vrcp.f32 %v1644_v46 }
 0x3a4   : > { %v1749_v49 = vpop.permute.xlu1 %1748 }
 0x3a8   : > { %v1751_v50 = vpop.permute.xlu1 %1750 }
 0x3ab   : > { %v7251_v47 = vpop.eup %7250 }
 0x3ac   : > { %v1650_v48 = vmul.f32 %v7251_v47, %v7245_v25 }
 0x3ae   : > { %6514 = vmatmul.mubr.msk.f32.gmra.mrb[26].mxu0 %vm1617_vm6, %v1650_v48 }
 0x3af   : > { %6520 = vmatprep.mubr.msk.f32.mxu0 %vm7409_vm1, %v7410_v53 }
 0x3b2   : > { %6521 = vmatmul.mubr.msk.f32.vlgmr.msra.gmra.mrb[28].mxu0 %vm1515_vm2, %v1747_v44 }
 0x3b3   : > { %6523 = vmatprep.mubr.msk.f32.mxu0 %vm7409_vm1, %v7410_v53 }
 0x3b6   : > { %6524 = vmatmul.mubr.msk.f32.gmra.mrb[30].mxu0 %vm1515_vm2, %v1749_v49 }
 0x3b7   : > { %6526 = vmatprep.mubr.msk.f32.mxu0 %vm7409_vm1, %v7410_v53 }
 0x3ba   : > { %6527 = vmatmul.mubr.msk.f32.gmra.mrb[32].mxu0 %vm1515_vm2, %v1751_v50 }
 0x3bb   : > { %6572 = vmatprep.mubr.msk.f32.mxu0 %vm7409_vm1, %v7410_v53 }
 0x44c   : > { %v1729_v54 = vpop.f32.mrb[22].mxu0 }
 0x44d   : > { %1743 = vst.msk [vmem:[#allocation2] sm:$0xff] %vm1515_vm2, %v1729_v54  ;;  %v6509_v56 = vpop.f32.mrb[23].mxu0  ;;  %v873_v54 = vrot.slane %v7833_v2, %v7839_v11 }
 0x44f   : > { %v8003_v2 = vadd.f32 %v7818_v57, %v873_v54 }
 0x450   : > { %v1734_v58 = vpop.f32.mrb[24].mxu0 }
 0x451   : > { %1744 = vst.msk [vmem:[#allocation2 + $0x10] sm:$0xff] %vm1515_vm2, %v1734_v58  ;;  %v6512_v60 = vpop.f32.mrb[25].mxu0 }
 0x481   : > { %v1739_v61 = vpop.f32.mrb[26].mxu0 }
 0x482   : > { %1745 = vst.msk [vmem:[#allocation2 + $0x20] sm:$0xff] %vm1515_vm2, %v1739_v61  ;;  %v6515_v62 = vpop.f32.mrb[27].mxu0 }
 0x485   : > { %v1832_v1 = vpop.f32.mrb[28].mxu0 }
 0x486   : > { %v1846_v3 = vmul.f32 0.17677669, %v1832_v1  ;;  %v6522_v4 = vpop.f32.mrb[29].mxu0 }
 0x488   : > { %v1849_v5 = vadd.f32 %v1846_v3, %v7911_v40 }
 0x489   : > { %v1837_v6 = vpop.f32.mrb[30].mxu0 }
 0x48a   : > { %v1847_v7 = vmul.f32 0.17677669, %v1837_v6  ;;  %v6525_v8 = vpop.f32.mrb[31].mxu0  ;;  %v1852_v9 = vsel %vm1617_vm6, %v1849_v5, -inf }
 0x48b   : > { %1853 = vmax.xlane.f32.xlu0 %v1852_v9 }
 0x48c   : > { %v1850_v10 = vadd.f32 %v1847_v7, %v7914_v45 }
 0x48d   : > { %v1842_v15 = vpop.f32.mrb[32].mxu0 }
 0x48e   : > { %v1848_v19 = vmul.f32 0.17677669, %v1842_v15  ;;  %v6528_v24 = vpop.f32.mrb[33].mxu0  ;;  %v1855_v25 = vsel %vm1617_vm6, %v1850_v10, -inf }
 0x48f   : > { %1856 = vmax.xlane.f32.xlu1 %v1855_v25 }
 0x490   : > { %v1851_v26 = vadd.f32 %v1848_v19, %v7918_v51 }
 0x492   : > { %v1858_v27 = vsel %vm1617_vm6, %v1851_v26, -inf }
 0x493   : > { %1859 = vmax.xlane.f32.xlu0 %v1858_v27 }
 0x4a0   : > { %6806 = vrot.lane.b32.xlu1 %v7851_v16, %s7413_s12 }
 0x4a4   : > { %1998 = vrot.lane.b32.xlu1 %v7863_v20, %s7413_s12 }
 0x518   : > { %v1854_v28 = vpop.xlane.xlu0 %1853 }
 0x519   : > { %v1861_v30 = vsub.f32 %v1849_v5, %v1854_v28 }
 0x51b   : > { %v1864_v31 = vmul.f32 1.442695, %v1861_v30 }
 0x51c   : > { %v1857_v32 = vpop.xlane.xlu1 %1856 }
 0x51d   : > { %7252 = vpow2.f32 %v1864_v31  ;;  %v1862_v35 = vsub.f32 %v1850_v10, %v1857_v32 }
 0x51f   : > { %v1866_v39 = vmul.f32 1.442695, %v1862_v35 }
 0x520   : > { %v1860_v41 = vpop.xlane.xlu0 %1859 }
 0x521   : > { %7254 = vpow2.f32 %v1866_v39  ;;  %v1863_v42 = vsub.f32 %v1851_v26, %v1860_v41 }
 0x523   : > { %v1868_v43 = vmul.f32 1.442695, %v1863_v42 }
 0x525   : > { %7256 = vpow2.f32 %v1868_v43 }
 0x527   : > { %v7253_v44 = vpop.eup %7252 }
 0x528   : > { %v1870_v46 = vsel %vm1617_vm6, %v7253_v44, 0.0 }
 0x529   : > { %1871 = vadd.xlane.f32.xlu0 %v1870_v46 }
 0x52b   : > { %v7255_v47 = vpop.eup %7254 }
 0x52c   : > { %v1873_v48 = vsel %vm1617_vm6, %v7255_v47, 0.0 }
 0x52d   : > { %1874 = vadd.xlane.f32.xlu0 %v1873_v48 }
 0x52f   : > { %v7970_v49 = vpop.eup %7256 }
 0x530   : > { %v1876_v50 = vsel %vm1617_vm6, %v7970_v49, 0.0 }
 0x531   : > { %1877 = vadd.xlane.f32.xlu1 %v1876_v50 }
 0x542   : > { %6811 = vrot.lane.b32.xlu1 %v7851_v16, %s7414_s13  ;;  %v7993_v16 = vadd.f32 %v7816_v55, %v873_v54  ;;  %v6807_v55 = vpop.permute.xlu1 %6806 }
 0x543   : > { %6801 = vrot.lane.b32.xlu0 %v7901_v37, %s7412_s29  ;;  %v6809_v7 = vunpack.i.h.bf16 %v6807_v55  ;;  %v6808_v8 = vunpack.i.l.bf16 %v6807_v55 }
 0x545   : > { %v6715_v24 = vpack.c.bf16 %v6809_v7, %v6808_v8 }
 0x546   : > { %2002 = vrot.lane.b32.xlu1 %v7875_v22, %s7413_s12 }
 0x547   : > { %2000 = vrot.lane.b32.xlu0 %v7869_v21, %s7413_s12 }
 0x54a   : > { %2251 = vrot.lane.b32.xlu1 %v7869_v21, %s7414_s13 }
 0x54b   : > { %2249 = vrot.lane.b32.xlu0 %v7863_v20, %s7414_s13  ;;  %v8000_v20 = vadd.f32 %v7820_v59, %v873_v54  ;;  %v1999_v59 = vpop.permute.xlu1 %1998 }
 0x54e   : > { %6816 = vrot.lane.b32.xlu1 %v7857_v18, %s7412_s29 }
 0x54f   : > { %2253 = vrot.lane.b32.xlu0 %v7875_v22, %s7414_s13 }
 0x552   : > { %6821 = vrot.lane.b32.xlu1 %v7857_v18, %s7413_s12 }
 0x553   : > { %2729 = vrot.lane.b32.xlu0 %v7993_v16, %s7412_s29 }
 0x556   : > { %2733 = vrot.lane.b32.xlu1 %v8000_v20, %s7412_s29 }
 0x557   : > { %2731 = vrot.lane.b32.xlu0 %v8003_v2, %s7412_s29 }
 0x55a   : > { %6826 = vrot.lane.b32.xlu1 %v7857_v18, %s7414_s13 }
 0x55b   : > { %2980 = vrot.lane.b32.xlu0 %v7993_v16, %s7413_s12 }
 0x55e   : > { %2984 = vrot.lane.b32.xlu1 %v8000_v20, %s7413_s12 }
 0x55f   : > { %2982 = vrot.lane.b32.xlu0 %v8003_v2, %s7413_s12 }
 0x562   : > { %3232 = vrot.lane.b32.xlu1 %v8003_v2, %s7414_s13 }
 0x563   : > { %3230 = vrot.lane.b32.xlu0 %v7993_v16, %s7414_s13 }
 0x567   : > { %3234 = vrot.lane.b32.xlu0 %v8000_v20, %s7414_s13 }
 0x5b6   : > { %v1872_v57 = vpop.xlane.xlu0 %1871 }
 0x5b7   : > { %7258 = vrcp.f32 %v1872_v57 }
 0x5ba   : > { %v1875_v18 = vpop.xlane.xlu0 %1874 }
 0x5bb   : > { %7260 = vrcp.f32 %v1875_v18 }
 0x5be   : > { %v1878_v21 = vpop.xlane.xlu1 %1877  ;;  %v6802_v22 = vpop.permute.xlu0 %6801 }
 0x5bf   : > { %7262 = vrcp.f32 %v1878_v21  ;;  %v6804_v56 = vunpack.i.h.bf16 %v6802_v22  ;;  %v6803_v58 = vunpack.i.l.bf16 %v6802_v22 }
 0x5c1   : > { %v7259_v60 = vpop.eup %7258  ;;  %v6711_v61 = vpack.c.bf16 %v6804_v56, %v6803_v58 }
 0x5c2   : > { %v6812_v62 = vpop.permute.xlu1 %6811  ;;  %v1880_v4 = vmul.f32 %v7259_v60, %v7253_v44  ;;  %v2001_v10 = vpop.permute.xlu0 %2000 }
 0x5c3   : > { %v6814_v1 = vunpack.i.h.bf16 %v6812_v62  ;;  %v6813_v3 = vunpack.i.l.bf16 %v6812_v62  ;;  %6713 = vmatpush3.bf16.msk.msra.mxu1 %vm7890_vm5, %v6711_v61 }
 0x5c4   : > { %6714 = vmatprep.subr.bf16.mxu1 %v7408_v52 }
 0x5c5   : > { %v7261_v5 = vpop.eup %7260  ;;  %v6723_v6 = vpack.c.bf16 %v6814_v1, %v6813_v3 }
 0x5c6   : > { %v2003_v9 = vpop.permute.xlu1 %2002  ;;  %6534 = vmatmul.mubr.msk.f32.vlgmr.msra.gmra.mrb[0].mxu1 %vm1617_vm6, %v1880_v4  ;;  %v1882_v15 = vmul.f32 %v7261_v5, %v7255_v47  ;;  %v2250_v27 = vpop.permute.xlu0 %2249 }
 0x5c7   : > { %6725 = vmatpush3.bf16.xpose.msk.msra.mxu0 %vm7847_vm3, %v6723_v6  ;;  %6536 = vmatprep.mubr.msk.f32.mxu1 %vm7409_vm1, %v7410_v53 }
 0x5c8   : > { %6730 = vmatprep.subr.bf16.mxu0 %v7408_v52 }
 0x5c9   : > { %v7263_v19 = vpop.eup %7262 }
 0x5ca   : > { %6537 = vmatmul.mubr.msk.f32.gmra.mrb[2].mxu1 %vm1617_vm6, %v1882_v15  ;;  %v2252_v25 = vpop.permute.xlu1 %2251  ;;  %v1884_v26 = vmul.f32 %v7263_v19, %v7970_v49  ;;  %v2254_v12 = vpop.permute.xlu0 %2253 }
 0x5cb   : > { %6539 = vmatprep.mubr.msk.f32.mxu1 %vm7409_vm1, %v7410_v53 }
 0x5cc   : > { %6717 = vmatpush3.bf16.xpose.msk.msra.mxu1 %vm7847_vm3, %v6715_v24 }
 0x5cd   : > { %6718 = vmatprep.subr.bf16.mxu1 %v7408_v52 }
 0x5ce   : > { %6573 = vmatmul.mubr.msk.f32.vlgmr.msra.gmra.mrb[34].mxu0 %vm1515_vm2, %v2250_v27  ;;  %6540 = vmatmul.mubr.msk.f32.gmra.mrb[4].mxu1 %vm1617_vm6, %v1884_v26  ;;  %v6817_v28 = vpop.permute.xlu1 %6816  ;;  %v2730_v39 = vpop.permute.xlu0 %2729 }
 0x5cf   : > { %6733 = vmatpush3.bf16.xpose.msk.msra.mxu0 %vm7847_vm3, %v6731_v17  ;;  %6575 = vmatprep.mubr.msk.f32.mxu0 %vm7409_vm1, %v7410_v53  ;;  %v6819_v13 = vunpack.i.h.bf16 %v6817_v28  ;;  %v6818_v17 = vunpack.i.l.bf16 %v6817_v28 }
 0x5d0   : > { %6546 = vmatprep.mubr.msk.f32.mxu1 %vm7409_vm1, %v7410_v53  ;;  %6738 = vmatprep.subr.bf16.mxu0 %v7408_v52 }
 0x5d1   : > { %v6739_v30 = vpack.c.bf16 %v6819_v13, %v6818_v17 }
 0x5d2   : > { %6576 = vmatmul.mubr.msk.f32.gmra.mrb[36].mxu0 %vm1515_vm2, %v2252_v25  ;;  %v6822_v31 = vpop.permute.xlu1 %6821  ;;  %v2732_v43 = vpop.permute.xlu0 %2731 }
 0x5d3   : > { %6547 = vmatmul.mubr.msk.f32.vlgmr.msra.gmra.mrb[6].mxu1 %vm1515_vm2, %v1999_v59  ;;  %6578 = vmatprep.mubr.msk.f32.mxu0 %vm7409_vm1, %v7410_v53  ;;  %v6824_v32 = vunpack.i.h.bf16 %v6822_v31  ;;  %v6823_v35 = vunpack.i.l.bf16 %v6822_v31 }
 0x5d4   : > { %6549 = vmatprep.mubr.msk.f32.mxu1 %vm7409_vm1, %v7410_v53 }
 0x5d5   : > { %v6747_v42 = vpack.c.bf16 %v6824_v32, %v6823_v35 }
 0x5d6   : > { %6579 = vmatmul.mubr.msk.f32.gmra.mrb[38].mxu0 %vm1515_vm2, %v2254_v12  ;;  %v2734_v41 = vpop.permute.xlu1 %2733  ;;  %v2981_v48 = vpop.permute.xlu0 %2980 }
 0x5d7   : > { %6550 = vmatmul.mubr.msk.f32.gmra.mrb[8].mxu1 %vm1515_vm2, %v2001_v10  ;;  %6598 = vmatprep.mubr.msk.f32.mxu0 %vm7409_vm1, %v7410_v53 }
 0x5d8   : > { %6552 = vmatprep.mubr.msk.f32.mxu1 %vm7409_vm1, %v7410_v53 }
 0x5da   : > { %6599 = vmatmul.mubr.msk.f32.vlgmr.msra.gmra.mrb[40].mxu0 %vm1515_vm2, %v7993_v16  ;;  %v6827_v44 = vpop.permute.xlu1 %6826  ;;  %v2983_v50 = vpop.permute.xlu0 %2982 }
 0x5db   : > { %6741 = vmatpush3.bf16.xpose.msk.msra.mxu0 %vm7847_vm3, %v6739_v30  ;;  %6553 = vmatmul.mubr.msk.f32.gmra.mrb[10].mxu1 %vm1515_vm2, %v2003_v9  ;;  %v6829_v46 = vunpack.i.h.bf16 %v6827_v44  ;;  %v6828_v47 = vunpack.i.l.bf16 %v6827_v44 }
 0x5dc   : > { %6601 = vmatprep.mubr.msk.f32.mxu0 %vm7409_vm1, %v7410_v53  ;;  %6746 = vmatprep.subr.bf16.mxu0 %v7408_v52 }
 0x5dd   : > { %6559 = vmatprep.mubr.msk.f32.mxu1 %vm7409_vm1, %v7410_v53  ;;  %v6755_v49 = vpack.c.bf16 %v6829_v46, %v6828_v47 }
 0x5de   : > { %6602 = vmatmul.mubr.msk.f32.gmra.mrb[42].mxu0 %vm1515_vm2, %v8003_v2  ;;  %v2985_v54 = vpop.permute.xlu1 %2984  ;;  %v3231_v16 = vpop.permute.xlu0 %3230 }
 0x5df   : > { %6604 = vmatprep.mubr.msk.f32.mxu0 %vm7409_vm1, %v7410_v53 }
 0x5e2   : > { %6605 = vmatmul.mubr.msk.f32.gmra.mrb[44].mxu0 %vm1515_vm2, %v8000_v20  ;;  %v3233_v14 = vpop.permute.xlu1 %3232  ;;  %v3235_v20 = vpop.permute.xlu0 %3234 }
 0x5e3   : > { %6624 = vmatprep.mubr.msk.f32.mxu0 %vm7409_vm1, %v7410_v53 }
 0x5e6   : > { %6625 = vmatmul.mubr.msk.f32.vlgmr.msra.gmra.mrb[46].mxu0 %vm1515_vm2, %v2730_v39 }
 0x5e7   : > { %6749 = vmatpush3.bf16.xpose.msk.msra.mxu0 %vm7847_vm3, %v6747_v42  ;;  %6627 = vmatprep.mubr.msk.f32.mxu0 %vm7409_vm1, %v7410_v53 }
 0x5e8   : > { %6754 = vmatprep.subr.bf16.mxu0 %v7408_v52 }
 0x5ea   : > { %6628 = vmatmul.mubr.msk.f32.gmra.mrb[48].mxu0 %vm1515_vm2, %v2732_v43 }
 0x5eb   : > { %6630 = vmatprep.mubr.msk.f32.mxu0 %vm7409_vm1, %v7410_v53 }
 0x5ee   : > { %6631 = vmatmul.mubr.msk.f32.gmra.mrb[50].mxu0 %vm1515_vm2, %v2734_v41 }
 0x5ef   : > { %6650 = vmatprep.mubr.msk.f32.mxu0 %vm7409_vm1, %v7410_v53 }
 0x5f2   : > { %6651 = vmatmul.mubr.msk.f32.vlgmr.msra.gmra.mrb[52].mxu0 %vm1515_vm2, %v2981_v48 }
 0x5f3   : > { %6757 = vmatpush3.bf16.xpose.msk.msra.mxu0 %vm7847_vm3, %v6755_v49  ;;  %6653 = vmatprep.mubr.msk.f32.mxu0 %vm7409_vm1, %v7410_v53 }
 0x5f6   : > { %6654 = vmatmul.mubr.msk.f32.gmra.mrb[54].mxu0 %vm1515_vm2, %v2983_v50 }
 0x5f7   : > { %6656 = vmatprep.mubr.msk.f32.mxu0 %vm7409_vm1, %v7410_v53 }
 0x5fa   : > { %6657 = vmatmul.mubr.msk.f32.gmra.mrb[56].mxu0 %vm1515_vm2, %v2985_v54 }
 0x5fb   : > { %6676 = vmatprep.mubr.msk.f32.mxu0 %vm7409_vm1, %v7410_v53 }
 0x5fe   : > { %6677 = vmatmul.mubr.msk.f32.vlgmr.msra.gmra.mrb[58].mxu0 %vm1515_vm2, %v3231_v16 }
 0x5ff   : > { %6679 = vmatprep.mubr.msk.f32.mxu0 %vm7409_vm1, %v7410_v53 }
 0x602   : > { %6680 = vmatmul.mubr.msk.f32.gmra.mrb[60].mxu0 %vm1515_vm2, %v3233_v14 }
 0x603   : > { %6682 = vmatprep.mubr.msk.f32.mxu0 %vm7409_vm1, %v7410_v53 }
 0x606   : > { %6683 = vmatmul.mubr.msk.f32.gmra.mrb[62].mxu0 %vm1515_vm2, %v3235_v20 }
 0x699   : > { %v8111_v2 = vpop.f32.mrb[0].mxu1 }
 0x69a   : > { %v6535_v55 = vpop.f32.mrb[1].mxu1 }
 0x69d   : > { %v8113_v57 = vpop.f32.mrb[2].mxu1 }
 0x69e   : > { %v6538_v59 = vpop.f32.mrb[3].mxu1 }
 0x6a1   : > { %v8115_v18 = vpop.f32.mrb[4].mxu1  ;;  %v2335_v21 = vpop.f32.mrb[34].mxu0 }
 0x6a2   : > { %v6541_v22 = vpop.f32.mrb[5].mxu1  ;;  %v6574_v56 = vpop.f32.mrb[35].mxu0  ;;  %v2349_v25 = vmul.f32 0.17677669, %v2335_v21 }
 0x6a4   : > { %v8143_v44 = vadd.f32 %v2349_v25, %v7911_v40 }
 0x6a5   : > { %v2340_v58 = vpop.f32.mrb[36].mxu0 }
 0x6a6   : > { %v2084_v60 = vpop.f32.mrb[6].mxu1  ;;  %v6577_v61 = vpop.f32.mrb[37].mxu0  ;;  %v2350_v62 = vmul.f32 0.17677669, %v2340_v58  ;;  %v2355_v50 = vsel %vm1617_vm6, %v8143_v44, -inf }
 0x6a7   : > { %v2098_v1 = vmul.f32 0.17677669, %v2084_v60  ;;  %v6548_v3 = vpop.f32.mrb[7].mxu1 }
 0x6a8   : > { %v8123_v15 = vadd.f32 %v2350_v62, %v7914_v45 }
 0x6a9   : > { %v2345_v4 = vpop.f32.mrb[38].mxu0  ;;  %v8118_v5 = vadd.f32 %v2098_v1, %v7911_v40 }
 0x6aa   : > { %v2089_v6 = vpop.f32.mrb[8].mxu1  ;;  %v6580_v7 = vpop.f32.mrb[39].mxu0  ;;  %v2358_v30 = vsel %vm1617_vm6, %v8123_v15, -inf  ;;  %v2351_v42 = vmul.f32 0.17677669, %v2345_v4 }
 0x6ab   : > { %v2099_v8 = vmul.f32 0.17677669, %v2089_v6  ;;  %v6551_v9 = vpop.f32.mrb[9].mxu1  ;;  %v2104_v10 = vsel %vm1617_vm6, %v8118_v5, -inf }
 0x6ac   : > { %2105 = vmax.xlane.f32.xlu1 %v2104_v10  ;;  %v8148_v54 = vadd.f32 %v2351_v42, %v7918_v51 }
 0x6ad   : > { %v2581_v19 = vpop.f32.mrb[40].mxu0  ;;  %v8126_v24 = vadd.f32 %v2099_v8, %v7914_v45 }
 0x6ae   : > { %v2595_v26 = vmul.f32 0.17677669, %v2581_v19  ;;  %v2094_v27 = vpop.f32.mrb[10].mxu1  ;;  %v6600_v28 = vpop.f32.mrb[41].mxu0  ;;  %v2361_v21 = vsel %vm1617_vm6, %v8148_v54, -inf }
 0x6af   : > { %v2100_v12 = vmul.f32 0.17677669, %v2094_v27  ;;  %v6554_v13 = vpop.f32.mrb[11].mxu1  ;;  %v2107_v17 = vsel %vm1617_vm6, %v8126_v24, -inf }
 0x6b0   : > { %2108 = vmax.xlane.f32.xlu0 %v2107_v17  ;;  %2359 = vmax.xlane.f32.xlu1 %v2358_v30  ;;  %v8133_v31 = vadd.f32 %v2595_v26, %v7911_v40 }
 0x6b1   : > { %v2586_v32 = vpop.f32.mrb[42].mxu0  ;;  %v8136_v35 = vadd.f32 %v2100_v12, %v7918_v51 }
 0x6b2   : > { %v6603_v39 = vpop.f32.mrb[43].mxu0  ;;  %v2601_v41 = vsel %vm1617_vm6, %v8133_v31, -inf  ;;  %v2596_v49 = vmul.f32 0.17677669, %v2586_v32 }
 0x6b3   : > { %v2110_v43 = vsel %vm1617_vm6, %v8136_v35, -inf }
 0x6b4   : > { %2111 = vmax.xlane.f32.xlu0 %v2110_v43  ;;  %2602 = vmax.xlane.f32.xlu1 %v2601_v41  ;;  %v8158_v22 = vadd.f32 %v2596_v49, %v7914_v45 }
 0x6b5   : > { %v2591_v46 = vpop.f32.mrb[44].mxu0 }
 0x6b6   : > { %v2597_v47 = vmul.f32 0.17677669, %v2591_v46  ;;  %v6606_v48 = vpop.f32.mrb[45].mxu0  ;;  %v2604_v61 = vsel %vm1617_vm6, %v8158_v22, -inf }
 0x6b8   : > { %2356 = vmax.xlane.f32.xlu0 %v2355_v50  ;;  %v8151_v16 = vadd.f32 %v2597_v47, %v7918_v51 }
 0x6b9   : > { %v2815_v14 = vpop.f32.mrb[46].mxu0 }
 0x6ba   : > { %v6626_v20 = vpop.f32.mrb[47].mxu0  ;;  %v2607_v55 = vsel %vm1617_vm6, %v8151_v16, -inf  ;;  %v2829_v59 = vmul.f32 0.17677669, %v2815_v14 }
 0x6bb   : > { %2608 = vmax.xlane.f32.xlu1 %v2607_v55 }
 0x6bc   : > { %2362 = vmax.xlane.f32.xlu0 %v2361_v21  ;;  %v8163_v62 = vadd.f32 %v2829_v59, %v7911_v40 }
 0x6bd   : > { %v2820_v56 = vpop.f32.mrb[48].mxu0 }
 0x6be   : > { %v2830_v58 = vmul.f32 0.17677669, %v2820_v56  ;;  %v6629_v60 = vpop.f32.mrb[49].mxu0  ;;  %v2835_v8 = vsel %vm1617_vm6, %v8163_v62, -inf }
 0x6c0   : > { %2605 = vmax.xlane.f32.xlu0 %v2604_v61  ;;  %v8166_v1 = vadd.f32 %v2830_v58, %v7914_v45 }
 0x6c1   : > { %v2825_v3 = vpop.f32.mrb[50].mxu0 }
 0x6c2   : > { %v2831_v4 = vmul.f32 0.17677669, %v2825_v3  ;;  %v6632_v6 = vpop.f32.mrb[51].mxu0  ;;  %v2838_v7 = vsel %vm1617_vm6, %v8166_v1, -inf }
 0x6c3   : > { %2839 = vmax.xlane.f32.xlu1 %v2838_v7 }
 0x6c4   : > { %2836 = vmax.xlane.f32.xlu0 %v2835_v8  ;;  %v8173_v9 = vadd.f32 %v2831_v4, %v7918_v51 }
 0x6c5   : > { %v3066_v10 = vpop.f32.mrb[52].mxu0 }
 0x6c6   : > { %v3080_v19 = vmul.f32 0.17677669, %v3066_v10  ;;  %v6652_v25 = vpop.f32.mrb[53].mxu0  ;;  %v2841_v26 = vsel %vm1617_vm6, %v8173_v9, -inf }
 0x6c8   : > { %2842 = vmax.xlane.f32.xlu0 %v2841_v26  ;;  %v8178_v27 = vadd.f32 %v3080_v19, %v7911_v40 }
 0x6c9   : > { %v3071_v28 = vpop.f32.mrb[54].mxu0 }
 0x6ca   : > { %v3081_v12 = vmul.f32 0.17677669, %v3071_v28  ;;  %v6655_v13 = vpop.f32.mrb[55].mxu0  ;;  %v3086_v17 = vsel %vm1617_vm6, %v8178_v27, -inf }
 0x6cb   : > { %3087 = vmax.xlane.f32.xlu1 %v3086_v17 }
 0x6cc   : > { %v8183_v30 = vadd.f32 %v3081_v12, %v7914_v45 }
 0x6cd   : > { %v3076_v32 = vpop.f32.mrb[56].mxu0 }
 0x6ce   : > { %v3082_v39 = vmul.f32 0.17677669, %v3076_v32  ;;  %v6658_v41 = vpop.f32.mrb[57].mxu0  ;;  %v3089_v42 = vsel %vm1617_vm6, %v8183_v30, -inf }
 0x6cf   : > { %3090 = vmax.xlane.f32.xlu0 %v3089_v42 }
 0x6d0   : > { %v8188_v43 = vadd.f32 %v3082_v39, %v7918_v51 }
 0x6d1   : > { %v3316_v46 = vpop.f32.mrb[58].mxu0 }
 0x6d2   : > { %v3330_v47 = vmul.f32 0.17677669, %v3316_v46  ;;  %v6678_v48 = vpop.f32.mrb[59].mxu0  ;;  %v3092_v49 = vsel %vm1617_vm6, %v8188_v43, -inf }
 0x6d3   : > { %3093 = vmax.xlane.f32.xlu1 %v3092_v49 }
 0x6d4   : > { %v8193_v50 = vadd.f32 %v3330_v47, %v7911_v40 }
 0x6d5   : > { %v3321_v14 = vpop.f32.mrb[60].mxu0 }
 0x6d6   : > { %v3331_v20 = vmul.f32 0.17677669, %v3321_v14  ;;  %v6681_v55 = vpop.f32.mrb[61].mxu0  ;;  %v3336_v59 = vsel %vm1617_vm6, %v8193_v50, -inf }
 0x6d7   : > { %3337 = vmax.xlane.f32.xlu0 %v3336_v59 }
 0x6d8   : > { %v8198_v21 = vadd.f32 %v3331_v20, %v7914_v45 }
 0x6d9   : > { %v8200_v56 = vpop.f32.mrb[62].mxu0 }
 0x6da   : > { %v6684_v58 = vpop.f32.mrb[63].mxu0  ;;  %v3339_v60 = vsel %vm1617_vm6, %v8198_v21, -inf }
 0x6db   : > { %3340 = vmax.xlane.f32.xlu1 %v3339_v60 }
 0x739   : > { %v2106_v61 = vpop.xlane.xlu1 %2105 }
 0x73a   : > { %v2113_v40 = vsub.f32 %v8118_v5, %v2106_v61 }
 0x73c   : > { %v2116_v8 = vmul.f32 1.442695, %v2113_v40 }
 0x73d   : > { %v2109_v3 = vpop.xlane.xlu0 %2108  ;;  %v2360_v4 = vpop.xlane.xlu1 %2359 }
 0x73e   : > { %v2365_v6 = vsub.f32 %v8123_v15, %v2360_v4  ;;  %v2114_v48 = vsub.f32 %v8126_v24, %v2109_v3 }
 0x740   : > { %v2369_v7 = vmul.f32 1.442695, %v2365_v6  ;;  %v2118_v20 = vmul.f32 1.442695, %v2114_v48 }
 0x741   : > { %v2112_v10 = vpop.xlane.xlu0 %2111  ;;  %v2603_v45 = vpop.xlane.xlu1 %2602 }
 0x742   : > { %7264 = vpow2.f32 %v2369_v7  ;;  %v2610_v26 = vsub.f32 %v8133_v31, %v2603_v45  ;;  %v2115_v4 = vsub.f32 %v8136_v35, %v2112_v10 }
 0x743   : > { %7266 = vpow2.f32 %v2116_v8 }
 0x744   : > { %v2613_v13 = vmul.f32 1.442695, %v2610_v26  ;;  %v2120_v7 = vmul.f32 1.442695, %v2115_v4 }
 0x745   : > { %v2357_v19 = vpop.xlane.xlu0 %2356 }
 0x746   : > { %v2364_v25 = vsub.f32 %v8143_v44, %v2357_v19 }
 0x748   : > { %v2367_v28 = vmul.f32 1.442695, %v2364_v25  ;;  %v2609_v15 = vpop.xlane.xlu1 %2608 }
 0x749   : > { %v2363_v12 = vpop.xlane.xlu0 %2362  ;;  %v2612_v31 = vsub.f32 %v8151_v16, %v2609_v15 }
 0x74a   : > { %7268 = vpow2.f32 %v2367_v28  ;;  %v2366_v5 = vsub.f32 %v8148_v54, %v2363_v12 }
 0x74b   : > { %v2617_v49 = vmul.f32 1.442695, %v2612_v31 }
 0x74c   : > { %v2371_v17 = vmul.f32 1.442695, %v2366_v5  ;;  %v8209_v32 = vpop.eup %7264 }
 0x74d   : > { %v2606_v39 = vpop.xlane.xlu0 %2605  ;;  %v2376_v42 = vsel %vm1617_vm6, %v8209_v32, 0.0  ;;  %v8214_v44 = vpop.eup %7266 }
 0x74e   : > { %7270 = vpow2.f32 %v2371_v17  ;;  %v2611_v41 = vsub.f32 %v8158_v22, %v2606_v39  ;;  %2377 = vadd.xlane.f32.xlu0 %v2376_v42  ;;  %v2122_v54 = vsel %vm1617_vm6, %v8214_v44, 0.0 }
 0x74f   : > { %7272 = vpow2.f32 %v2613_v13 }
 0x750   : > { %v2615_v46 = vmul.f32 1.442695, %v2611_v41  ;;  %v2840_v45 = vpop.xlane.xlu1 %2839 }
 0x751   : > { %v2837_v6 = vpop.xlane.xlu0 %2836  ;;  %v2845_v19 = vsub.f32 %v8166_v1, %v2840_v45 }
 0x752   : > { %2123 = vadd.xlane.f32.xlu0 %v2122_v54  ;;  %7274 = vpow2.f32 %v2615_v46  ;;  %v2844_v8 = vsub.f32 %v8163_v62, %v2837_v6 }
 0x753   : > { %7276 = vpow2.f32 %v2617_v49  ;;  %v2849_v28 = vmul.f32 1.442695, %v2845_v19 }
 0x754   : > { %v8219_v47 = vpop.eup %7268  ;;  %7278 = vpow2.f32 %v2118_v20  ;;  %v2847_v25 = vmul.f32 1.442695, %v2844_v8 }
 0x755   : > { %v2373_v22 = vsel %vm1617_vm6, %v8219_v47, 0.0  ;;  %7280 = vpow2.f32 %v2120_v7  ;;  %v2843_v26 = vpop.xlane.xlu0 %2842 }
 0x756   : > { %2374 = vadd.xlane.f32.xlu1 %v2373_v22  ;;  %7282 = vpow2.f32 %v2847_v25  ;;  %v2846_v12 = vsub.f32 %v8173_v9, %v2843_v26 }
 0x757   : > { %7284 = vpow2.f32 %v2849_v28 }
 0x758   : > { %v8224_v14 = vpop.eup %7270  ;;  %v3088_v5 = vpop.xlane.xlu1 %3087  ;;  %v2851_v35 = vmul.f32 1.442695, %v2846_v12 }
 0x759   : > { %v2379_v16 = vsel %vm1617_vm6, %v8224_v14, 0.0  ;;  %v8228_v55 = vpop.eup %7272  ;;  %v3095_v10 = vsub.f32 %v8178_v27, %v3088_v5 }
 0x75a   : > { %2380 = vadd.xlane.f32.xlu1 %v2379_v16  ;;  %v2619_v24 = vsel %vm1617_vm6, %v8228_v55, 0.0  ;;  %7286 = vpow2.f32 %v2851_v35 }
 0x75b   : > { %v3098_v17 = vmul.f32 1.442695, %v3095_v10 }
 0x75c   : > { %v8232_v59 = vpop.eup %7274  ;;  %v3091_v13 = vpop.xlane.xlu0 %3090 }
 0x75d   : > { %v2622_v58 = vsel %vm1617_vm6, %v8232_v59, 0.0  ;;  %v8236_v60 = vpop.eup %7276  ;;  %v3096_v1 = vsub.f32 %v8183_v30, %v3091_v13  ;;  %7288 = vpow2.f32 %v3098_v17 }
 0x75e   : > { %2620 = vadd.xlane.f32.xlu1 %v2619_v24  ;;  %v2625_v61 = vsel %vm1617_vm6, %v8236_v60, 0.0  ;;  %v8240_v40 = vpop.eup %7278  ;;  %v3332_v24 = vmul.f32 0.17677669, %v8200_v56 }
 0x75f   : > { %v2125_v3 = vsel %vm1617_vm6, %v8240_v40, 0.0  ;;  %v8253_v62 = vpop.eup %7280  ;;  %v3100_v9 = vmul.f32 1.442695, %v3096_v1 }
 0x760   : > { %v2128_v15 = vsel %vm1617_vm6, %v8253_v62, 0.0  ;;  %v3094_v39 = vpop.xlane.xlu1 %3093 }
 0x761   : > { %v3097_v42 = vsub.f32 %v8188_v43, %v3094_v39  ;;  %7290 = vpow2.f32 %v3100_v9 }
 0x762   : > { %2623 = vadd.xlane.f32.xlu1 %v2622_v58 }
 0x763   : > { %v3102_v54 = vmul.f32 1.442695, %v3097_v42 }
 0x764   : > { %v3338_v31 = vpop.xlane.xlu0 %3337 }
 0x765   : > { %v3345_v48 = vsub.f32 %v8193_v50, %v3338_v31  ;;  %7292 = vpow2.f32 %v3102_v54 }
 0x766   : > { %2626 = vadd.xlane.f32.xlu1 %v2625_v61 }
 0x767   : > { %v3348_v43 = vmul.f32 1.442695, %v3345_v48 }
 0x768   : > { %6831 = vrot.lane.b32.xlu0 %v7901_v37, %s7413_s12  ;;  %v3341_v49 = vpop.xlane.xlu1 %3340 }
 0x769   : > { %v3346_v16 = vsub.f32 %v8198_v21, %v3341_v49  ;;  %7294 = vpow2.f32 %v3348_v43 }
 0x76a   : > { %2126 = vadd.xlane.f32.xlu1 %v2125_v3  ;;  %v8281_v3 = vadd.f32 %v3332_v24, %v7918_v51 }
 0x76b   : > { %v3350_v50 = vmul.f32 1.442695, %v3346_v16 }
 0x76c   : > { %v3342_v21 = vsel %vm1617_vm6, %v8281_v3, -inf }
 0x76d   : > { %7296 = vpow2.f32 %v3350_v50 }
 0x77b   : > { %6836 = vrot.lane.b32.xlu1 %v7901_v37, %s7414_s13  ;;  %v8258_v37 = vpop.eup %7282 }
 0x77c   : > { %v2853_v41 = vsel %vm1617_vm6, %v8258_v37, 0.0  ;;  %v8262_v27 = vpop.eup %7284 }
 0x77d   : > { %v2856_v30 = vsel %vm1617_vm6, %v8262_v27, 0.0  ;;  %v8267_v46 = vpop.eup %7286 }
 0x77e   : > { %v2859_v22 = vsel %vm1617_vm6, %v8267_v46, 0.0  ;;  %v8272_v20 = vpop.eup %7288 }
 0x77f   : > { %v3104_v58 = vsel %vm1617_vm6, %v8272_v20, 0.0  ;;  %v8278_v61 = vpop.eup %7290 }
 0x780   : > { %v3107_v4 = vsel %vm1617_vm6, %v8278_v61, 0.0  ;;  %v8287_v56 = vpop.eup %7292 }
 0x781   : > { %v3110_v6 = vsel %vm1617_vm6, %v8287_v56, 0.0  ;;  %v8291_v7 = vpop.eup %7294 }
 0x782   : > { %v3354_v51 = vsel %vm1617_vm6, %v8291_v7, 0.0  ;;  %v8295_v8 = vpop.eup %7296 }
 0x783   : > { %v3357_v45 = vsel %vm1617_vm6, %v8295_v8, 0.0 }
 0x787   : > { %2129 = vadd.xlane.f32.xlu0 %v2128_v15 }
 0x78b   : > { %2854 = vadd.xlane.f32.xlu0 %v2853_v41 }
 0x78f   : > { %2857 = vadd.xlane.f32.xlu0 %v2856_v30 }
 0x793   : > { %2860 = vadd.xlane.f32.xlu0 %v2859_v22 }
 0x797   : > { %3105 = vadd.xlane.f32.xlu0 %v3104_v58 }
 0x79b   : > { %3108 = vadd.xlane.f32.xlu0 %v3107_v4 }
 0x79f   : > { %3343 = vmax.xlane.f32.xlu1 %v3342_v21 }
 0x7a3   : > { %3111 = vadd.xlane.f32.xlu1 %v3110_v6 }
 0x7a7   : > { %3355 = vadd.xlane.f32.xlu1 %v3354_v51 }
 0x7ab   : > { %3358 = vadd.xlane.f32.xlu1 %v3357_v45 }
 0x7b1   : > { %6841 = vrot.lane.b32.xlu0 %v7905_v38, %s7412_s29 }
 0x7b5   : > { %6851 = vrot.lane.b32.xlu0 %v7905_v38, %s7414_s13 }
 0x7b9   : > { %1985 = vrot.lane.b32.xlu0 %v8111_v2, %s7414_s13 }
 0x7bc   : > { %6846 = vrot.lane.b32.xlu1 %v7905_v38, %s7413_s12 }
 0x7bd   : > { %1987 = vrot.lane.b32.xlu0 %v8113_v57, %s7414_s13 }
 0x7db   : > { %v2378_v19 = vpop.xlane.xlu0 %2377 }
 0x7df   : > { %v2124_v25 = vpop.xlane.xlu0 %2123 }
 0x7e0   : > { %7298 = vrcp.f32 %v2124_v25 }
 0x7e3   : > { %v2375_v26 = vpop.xlane.xlu1 %2374  ;;  %v6832_v28 = vpop.permute.xlu0 %6831 }
 0x7e4   : > { %v6834_v12 = vunpack.i.h.bf16 %v6832_v28  ;;  %v6833_v5 = vunpack.i.l.bf16 %v6832_v28 }
 0x7e6   : > { %v6719_v35 = vpack.c.bf16 %v6834_v12, %v6833_v5 }
 0x7e7   : > { %v2381_v10 = vpop.xlane.xlu1 %2380 }
 0x7e8   : > { %6721 = vmatpush3.bf16.msk.msra.mxu1 %vm7890_vm5, %v6719_v35 }
 0x7e9   : > { %6726 = vmatprep.subr.bf16.mxu1 %v7408_v52 }
 0x7ea   : > { %v7299_v2 = vpop.eup %7298 }
 0x7eb   : > { %v2621_v13 = vpop.xlane.xlu1 %2620  ;;  %v2132_v38 = vmul.f32 %v7299_v2, %v8214_v44 }
 0x7ed   : > { %6560 = vmatmul.mubr.msk.f32.vlgmr.msra.gmra.mrb[12].mxu1 %vm1617_vm6, %v2132_v38 }
 0x7ee   : > { %6562 = vmatprep.mubr.msk.f32.mxu1 %vm7409_vm1, %v7410_v53 }
 0x7ef   : > { %v2624_v57 = vpop.xlane.xlu1 %2623 }
 0x7f3   : > { %v2627_v17 = vpop.xlane.xlu1 %2626 }
 0x7f7   : > { %v2127_v1 = vpop.xlane.xlu1 %2126 }
 0x7f8   : > { %7300 = vrcp.f32 %v2127_v1 }
 0x7fb   : > { %v6837_v15 = vpop.permute.xlu1 %6836 }
 0x7fc   : > { %v6839_v9 = vunpack.i.h.bf16 %v6837_v15  ;;  %v6838_v39 = vunpack.i.l.bf16 %v6837_v15 }
 0x7fe   : > { %v6727_v41 = vpack.c.bf16 %v6839_v9, %v6838_v39 }
 0x800   : > { %6729 = vmatpush3.bf16.msk.msra.mxu1 %vm7890_vm5, %v6727_v41 }
 0x801   : > { %6734 = vmatprep.subr.bf16.mxu1 %v7408_v52 }
 0x802   : > { %v7301_v42 = vpop.eup %7300 }
 0x803   : > { %v2134_v44 = vmul.f32 %v7301_v42, %v8240_v40 }
 0x805   : > { %6563 = vmatmul.mubr.msk.f32.gmra.mrb[14].mxu1 %vm1617_vm6, %v2134_v44 }
 0x806   : > { %6565 = vmatprep.mubr.msk.f32.mxu1 %vm7409_vm1, %v7410_v53 }
 0x814   : > { %v2130_v31 = vpop.xlane.xlu0 %2129 }
 0x815   : > { %7302 = vrcp.f32 %v2130_v31 }
 0x816   : > { %7304 = vrcp.f32 %v2375_v26 }
 0x817   : > { %7306 = vrcp.f32 %v2378_v19 }
 0x818   : > { %v2855_v30 = vpop.xlane.xlu0 %2854  ;;  %7308 = vrcp.f32 %v2381_v10 }
 0x819   : > { %7310 = vrcp.f32 %v2621_v13 }
 0x81a   : > { %7312 = vrcp.f32 %v2624_v57 }
 0x81b   : > { %7314 = vrcp.f32 %v2627_v17 }
 0x81c   : > { %v2858_v54 = vpop.xlane.xlu0 %2857  ;;  %7316 = vrcp.f32 %v2855_v30 }
 0x81f   : > { %v7303_v48 = vpop.eup %7302 }
 0x820   : > { %v2861_v49 = vpop.xlane.xlu0 %2860  ;;  %v2136_v22 = vmul.f32 %v7303_v48, %v8253_v62  ;;  %v7305_v43 = vpop.eup %7304 }
 0x821   : > { %v2383_v40 = vmul.f32 %v7305_v43, %v8219_v47  ;;  %v7307_v24 = vpop.eup %7306  ;;  %v7008_v43 = vld [vmem:[%s9778_s6 + $0x24] ss:$8 sps:$4 sm:$0xff]  }
 0x822   : > { %6566 = vmatmul.mubr.msk.f32.gmra.mrb[16].mxu1 %vm1617_vm6, %v2136_v22  ;;  %v2385_v58 = vmul.f32 %v7307_v24, %v8209_v32  ;;  %v7309_v47 = vpop.eup %7308  ;;  %v7002_v22 = vld [vmem:[%s9778_s6 + $0x4] ss:$8 sps:$4 sm:$0xff]  }
 0x823   : > { %6585 = vmatprep.mubr.msk.f32.mxu1 %vm7409_vm1, %v7410_v53  ;;  %v7311_v4 = vpop.eup %7310  ;;  %3658 = vmatprep.subr.bf16.mxu0 %v7002_v22 }
 0x824   : > { %v3106_v16 = vpop.xlane.xlu0 %3105  ;;  %v2629_v19 = vmul.f32 %v7311_v4, %v8228_v55  ;;  %v7313_v26 = vpop.eup %7312  ;;  %v7015_v4 = vld [vmem:[%s9778_s6 + $0x50] ss:$8 sps:$4 sm:$0xff]  }
 0x825   : > { %v2631_v28 = vmul.f32 %v7313_v26, %v8232_v59  ;;  %v7315_v55 = vpop.eup %7314 }
 0x826   : > { %6586 = vmatmul.mubr.msk.f32.vlgmr.msra.gmra.mrb[18].mxu1 %vm1617_vm6, %v2383_v40  ;;  %v2633_v35 = vmul.f32 %v7315_v55, %v8236_v60  ;;  %v7317_v10 = vpop.eup %7316  ;;  %v7006_v40 = vld [vmem:[%s9778_s6 + $0x20] ss:$8 sps:$4 sm:$0xff]  }
 0x827   : > { %6737 = vmatpush3.bf16.msk.msra.mxu1 %vm7890_vm5, %v6735_v36  ;;  %6588 = vmatprep.mubr.msk.f32.mxu1 %vm7409_vm1, %v7410_v53  ;;  %v2387_v36 = vmul.f32 %v7309_v47, %v8224_v14  ;;  %v2863_v38 = vmul.f32 %v7317_v10, %v8258_v37 }
 0x828   : > { %v3109_v62 = vpop.xlane.xlu0 %3108  ;;  %6742 = vmatprep.subr.bf16.mxu1 %v7408_v52 }
 0x82a   : > { %6589 = vmatmul.mubr.msk.f32.gmra.mrb[20].mxu1 %vm1617_vm6, %v2385_v58  ;;  %v7009_v58 = vld [vmem:[%s9778_s6 + $0x30] ss:$8 sps:$4 sm:$0xff]  }
 0x82b   : > { %6591 = vmatprep.mubr.msk.f32.mxu1 %vm7409_vm1, %v7410_v53 }
 0x82c   : > { %v3344_v50 = vpop.xlane.xlu1 %3343  ;;  %v6842_v29 = vpop.permute.xlu0 %6841 }
 0x82d   : > { %v3347_v34 = vsub.f32 %v8281_v3, %v3344_v50  ;;  %v6844_v21 = vunpack.i.h.bf16 %v6842_v29  ;;  %v6843_v6 = vunpack.i.l.bf16 %v6842_v29  ;;  %v7014_v50 = vld [vmem:[%s9778_s6 + $0x44] ss:$8 sps:$4 sm:$0xff]  }
 0x82e   : > { %6592 = vmatmul.mubr.msk.f32.gmra.mrb[22].mxu1 %vm1617_vm6, %v2387_v36  ;;  %v7017_v36 = vld [vmem:[%s9778_s6 + $0x54] ss:$8 sps:$4 sm:$0xff]  }
 0x82f   : > { %v3352_v51 = vmul.f32 1.442695, %v3347_v34  ;;  %v6743_v32 = vpack.c.bf16 %v6844_v21, %v6843_v6  ;;  %6611 = vmatprep.mubr.msk.f32.mxu1 %vm7409_vm1, %v7410_v53  ;;  %v7012_v34 = vld [vmem:[%s9778_s6 + $0x40] ss:$8 sps:$4 sm:$0xff]  }
 0x830   : > { %v3112_v45 = vpop.xlane.xlu1 %3111  ;;  %v6852_v25 = vpop.permute.xlu0 %6851 }
 0x831   : > { %7318 = vpow2.f32 %v3352_v51  ;;  %v6854_v41 = vunpack.i.h.bf16 %v6852_v25  ;;  %v6853_v42 = vunpack.i.l.bf16 %v6852_v25 }
 0x832   : > { %6612 = vmatmul.mubr.msk.f32.vlgmr.msra.gmra.mrb[24].mxu1 %vm1617_vm6, %v2629_v19  ;;  %7320 = vrcp.f32 %v2858_v54 }
 0x833   : > { %6745 = vmatpush3.bf16.msk.msra.mxu1 %vm7890_vm5, %v6743_v32  ;;  %6614 = vmatprep.mubr.msk.f32.mxu1 %vm7409_vm1, %v7410_v53  ;;  %7322 = vrcp.f32 %v2861_v49  ;;  %v6759_v44 = vpack.c.bf16 %v6854_v41, %v6853_v42  ;;  %v7035_v41 = vld [vmem:[%s9778_s6 + $0xb4] ss:$8 sps:$4 sm:$0xff]   ;;  %v7033_v42 = vld [vmem:[%s9778_s6 + $0xb0] ss:$8 sps:$4 sm:$0xff]  }
 0x834   : > { %v3356_v14 = vpop.xlane.xlu1 %3355  ;;  %v1986_v3 = vpop.permute.xlu0 %1985  ;;  %6750 = vmatprep.subr.bf16.mxu1 %v7408_v52  ;;  %7324 = vrcp.f32 %v3106_v16  ;;  %v7011_v16 = vld [vmem:[%s9778_s6 + $0x34] ss:$8 sps:$4 sm:$0xff]  }
 0x835   : > { %1995 = vst.msk [vmem:[#allocation2] sm:$0xff] %vm1994_vm7, %v1986_v3  ;;  %7326 = vrcp.f32 %v3109_v62  ;;  %v7018_v3 = vld [vmem:[%s9778_s6 + $0x60] ss:$8 sps:$4 sm:$0xff]  }
 0x836   : > { %6615 = vmatmul.mubr.msk.f32.gmra.mrb[26].mxu1 %vm1617_vm6, %v2631_v28  ;;  %7328 = vrcp.f32 %v3112_v45  ;;  %v7020_v28 = vld [vmem:[%s9778_s6 + $0x64] ss:$8 sps:$4 sm:$0xff]  }
 0x837   : > { %6617 = vmatprep.mubr.msk.f32.mxu1 %vm7409_vm1, %v7410_v53  ;;  %7330 = vrcp.f32 %v3356_v14 }
 0x838   : > { %v3359_v12 = vpop.xlane.xlu1 %3358  ;;  %v1988_v5 = vpop.permute.xlu0 %1987 }
 0x839   : > { %1996 = vst.msk [vmem:[#allocation2 + $0x10] sm:$0xff] %vm1994_vm7, %v1988_v5  ;;  %7332 = vrcp.f32 %v3359_v12  ;;  %v7021_v5 = vld [vmem:[%s9778_s6 + $0x70] ss:$8 sps:$4 sm:$0xff]  }
 0x83a   : > { %6618 = vmatmul.mubr.msk.f32.gmra.mrb[28].mxu1 %vm1617_vm6, %v2633_v35  ;;  %v7023_v35 = vld [vmem:[%s9778_s6 + $0x74] ss:$8 sps:$4 sm:$0xff]  }
 0x83b   : > { %v8360_v2 = vpop.eup %7318  ;;  %6637 = vmatprep.mubr.msk.f32.mxu1 %vm7409_vm1, %v7410_v53 }
 0x83c   : > { %v6847_v59 = vpop.permute.xlu1 %6846  ;;  %v3360_v13 = vsel %vm1617_vm6, %v8360_v2, 0.0  ;;  %v7321_v60 = vpop.eup %7320 }
 0x83d   : > { %v6849_v57 = vunpack.i.h.bf16 %v6847_v59  ;;  %v6848_v17 = vunpack.i.l.bf16 %v6847_v59  ;;  %3361 = vadd.xlane.f32.xlu1 %v3360_v13  ;;  %v2865_v15 = vmul.f32 %v7321_v60, %v8262_v27  ;;  %v7323_v9 = vpop.eup %7322  ;;  %v7024_v59 = vld [vmem:[%s9778_s6 + $0x80] ss:$8 sps:$4 sm:$0xff]   ;;  %v7029_v60 = vld [vmem:[%s9778_s6 + $0x94] ss:$8 sps:$4 sm:$0xff]  }
 0x83e   : > { %6638 = vmatmul.mubr.msk.f32.vlgmr.msra.gmra.mrb[30].mxu1 %vm1617_vm6, %v2863_v38  ;;  %v2867_v37 = vmul.f32 %v7323_v9, %v8267_v46  ;;  %v7325_v39 = vpop.eup %7324  ;;  %v7030_v9 = vld [vmem:[%s9778_s6 + $0xa0] ss:$8 sps:$4 sm:$0xff]  }
 0x83f   : > { %v6751_v1 = vpack.c.bf16 %v6849_v57, %v6848_v17  ;;  %6640 = vmatprep.mubr.msk.f32.mxu1 %vm7409_vm1, %v7410_v53  ;;  %v3114_v27 = vmul.f32 %v7325_v39, %v8272_v20  ;;  %v7027_v17 = vld [vmem:[%s9778_s6 + $0x90] ss:$8 sps:$4 sm:$0xff]  }
 0x841   : > { %6753 = vmatpush3.bf16.msk.msra.mxu1 %vm7890_vm5, %v6751_v1 }
 0x842   : > { %6758 = vmatprep.subr.bf16.mxu1 %v7408_v52  ;;  %6641 = vmatmul.mubr.msk.f32.gmra.mrb[32].mxu1 %vm1617_vm6, %v2865_v15  ;;  %v7327_v52 = vpop.eup %7326 }
 0x843   : > { %6643 = vmatprep.mubr.msk.f32.mxu1 %vm7409_vm1, %v7410_v53  ;;  %v3116_v46 = vmul.f32 %v7327_v52, %v8278_v61  ;;  %v7329_v31 = vpop.eup %7328 }
 0x844   : > { %v3118_v20 = vmul.f32 %v7329_v31, %v8287_v56  ;;  %v7331_v30 = vpop.eup %7330  ;;  %v7038_v31 = vld [vmem:[%s9778_s6 + $0xc4] ss:$8 sps:$4 sm:$0xff]  }
 0x845   : > { %v3364_v33 = vmul.f32 %v7331_v30, %v8291_v7  ;;  %v7333_v54 = vpop.eup %7332  ;;  %v7000_v7 = vld [vmem:[%s9778_s6] ss:$8 sps:$4 sm:$0xff]  }
 0x846   : > { %6644 = vmatmul.mubr.msk.f32.gmra.mrb[34].mxu1 %vm1617_vm6, %v2867_v37  ;;  %v3366_v61 = vmul.f32 %v7333_v54, %v8295_v8  ;;  %v7005_v8 = vld [vmem:[%s9778_s6 + $0x14] ss:$8 sps:$4 sm:$0xff]   ;;  %3659 = vmatpush1.bf16.msra.mxu0 %v7000_v7  ;;  %v7032_v37 = vld [vmem:[%s9778_s6 + $0xa4] ss:$8 sps:$4 sm:$0xff]  }
 0x847   : > { %6663 = vmatprep.mubr.msk.f32.mxu1 %vm7409_vm1, %v7410_v53  ;;  %3660 = vmatprep.subr.bf16.mxu0 %v7005_v8  ;;  %v7041_v54 = vld [vmem:[%s9778_s6 + $0xd4] ss:$8 sps:$4 sm:$0xff]  }
 0x84a   : > { %6664 = vmatmul.mubr.msk.f32.vlgmr.msra.gmra.mrb[36].mxu1 %vm1617_vm6, %v3114_v27 }
 0x84b   : > { %6761 = vmatpush3.bf16.msk.msra.mxu1 %vm7890_vm5, %v6759_v44  ;;  %6666 = vmatprep.mubr.msk.f32.mxu1 %vm7409_vm1, %v7410_v53 }
 0x84e   : > { %6667 = vmatmul.mubr.msk.f32.gmra.mrb[38].mxu1 %vm1617_vm6, %v3116_v46  ;;  %v7036_v46 = vld [vmem:[%s9778_s6 + $0xc0] ss:$8 sps:$4 sm:$0xff]  }
 0x84f   : > { %6669 = vmatprep.mubr.msk.f32.mxu1 %vm7409_vm1, %v7410_v53 }
 0x852   : > { %6670 = vmatmul.mubr.msk.f32.gmra.mrb[40].mxu1 %vm1617_vm6, %v3118_v20 }
 0x853   : > { %6689 = vmatprep.mubr.msk.f32.mxu1 %vm7409_vm1, %v7410_v53 }
 0x856   : > { %6690 = vmatmul.mubr.msk.f32.vlgmr.msra.gmra.mrb[42].mxu1 %vm1617_vm6, %v3364_v33  ;;  %v7039_v33 = vld [vmem:[%s9778_s6 + $0xd0] ss:$8 sps:$4 sm:$0xff]  }
 0x857   : > { %6692 = vmatprep.mubr.msk.f32.mxu1 %vm7409_vm1, %v7410_v53 }
 0x85a   : > { %6693 = vmatmul.mubr.msk.f32.gmra.mrb[44].mxu1 %vm1617_vm6, %v3366_v61 }
 0x85b   : > { %6695 = vmatprep.mubr.msk.f32.mxu1 %vm7409_vm1, %v7410_v53  ;;  %v7003_v53 = vld [vmem:[%s9778_s6 + $0x10] ss:$8 sps:$4 sm:$0xff]  }
 0x85c   : > { %3661 = vmatpush1.bf16.msra.mxu0 %v7003_v53  ;;  %v7045_v53 = vld [vmem:[%s9778_s6 + $0xf0] ss:$8 sps:$4 sm:$0xff]  }
 0x85d   : > { %3662 = vmatprep.subr.bf16.mxu0 %v7008_v43  ;;  %v7047_v43 = vld [vmem:[%s9778_s6 + $0xf4] ss:$8 sps:$4 sm:$0xff]  }
 0x860   : > { %3663 = vmatpush1.bf16.msra.mxu0 %v7006_v40 }
 0x861   : > { %3664 = vmatprep.subr.bf16.mxu0 %v7011_v16 }
 0x864   : > { %3665 = vmatpush1.bf16.msra.mxu0 %v7009_v58 }
 0x865   : > { %3666 = vmatprep.subr.bf16.mxu0 %v7014_v50 }
 0x868   : > { %3667 = vmatpush1.bf16.msra.mxu0 %v7012_v34 }
 0x869   : > { %3668 = vmatprep.subr.bf16.mxu0 %v7017_v36 }
 0x86c   : > { %3669 = vmatpush1.bf16.msra.mxu0 %v7015_v4 }
 0x86d   : > { %3670 = vmatprep.subr.bf16.mxu0 %v7020_v28 }
 0x870   : > { %3671 = vmatpush1.bf16.msra.mxu0 %v7018_v3 }
 0x871   : > { %3672 = vmatprep.subr.bf16.mxu0 %v7023_v35 }
 0x874   : > { %3673 = vmatpush1.bf16.msra.mxu0 %v7021_v5 }
 0x8c0   : > { %v2219_v56 = vpop.f32.mrb[12].mxu1 }
 0x8c1   : > { %2236 = vrot.lane.b32.xlu0 %v2219_v56, %s7413_s12  ;;  %v6561_v48 = vpop.f32.mrb[13].mxu1 }
 0x8c2   : > { %v7042_v48 = vld [vmem:[%s9778_s6 + $0xe0] ss:$8 sps:$4 sm:$0xff]  }
 0x8ca   : > { %v3362_v49 = vpop.xlane.xlu1 %3361 }
 0x8cb   : > { %7334 = vrcp.f32 %v3362_v49  ;;  %v7044_v49 = vld [vmem:[%s9778_s6 + $0xe4] ss:$8 sps:$4 sm:$0xff]  }
 0x8d5   : > { %v7335_v24 = vpop.eup %7334 }
 0x8d6   : > { %v3368_v62 = vmul.f32 %v7335_v24, %v8360_v2  ;;  %v7026_v2 = vld [vmem:[%s9778_s6 + $0x84] ss:$8 sps:$4 sm:$0xff]  }
 0x8d7   : > { %3674 = vmatprep.subr.bf16.mxu0 %v7026_v2 }
 0x8d8   : > { %v2224_v47 = vpop.f32.mrb[14].mxu1  ;;  %6696 = vmatmul.mubr.msk.f32.gmra.mrb[46].mxu1 %vm1617_vm6, %v3368_v62  ;;  %3675 = vmatpush1.bf16.msra.mxu0 %v7024_v59 }
 0x8d9   : > { %2238 = vrot.lane.b32.xlu0 %v2224_v47, %s7413_s12  ;;  %v6564_v29 = vpop.f32.mrb[15].mxu1  ;;  %3676 = vmatprep.subr.bf16.mxu0 %v7029_v60 }
 0x8dc   : > { %3677 = vmatpush1.bf16.msra.mxu0 %v7027_v17  ;;  %v8563_v17 = vld [vmem:[%s9779_s7 + $0x8] sm:$0xff] }
 0x8dd   : > { %3678 = vmatprep.subr.bf16.mxu0 %v7032_v37 }
 0x8e0   : > { %3679 = vmatpush1.bf16.msra.mxu0 %v7030_v9 }
 0x8e1   : > { %3680 = vmatprep.subr.bf16.mxu0 %v7035_v41 }
 0x8e4   : > { %3681 = vmatpush1.bf16.msra.mxu0 %v7033_v42 }
 0x8e5   : > { %3682 = vmatprep.subr.bf16.mxu0 %v7038_v31  ;;  %v607_v31 = vld [vmem:[%s9780_s8 + $0x20] sm:$0xff] }
 0x8e8   : > { %3683 = vmatpush1.bf16.msra.mxu0 %v7036_v46  ;;  %v603_v46 = vld [vmem:[%s9780_s8] sm:$0xff] }
 0x8e9   : > { %3684 = vmatprep.subr.bf16.mxu0 %v7041_v54  ;;  %v608_v54 = vld [vmem:[%s9780_s8 + $0x28] sm:$0xff] }
 0x8ec   : > { %3685 = vmatpush1.bf16.msra.mxu0 %v7039_v33  ;;  %v6151_v33 = vcombine.high %v603_v46, %v607_v31 }
 0x8ed   : > { %3686 = vmatprep.subr.bf16.mxu0 %v7044_v49 }
 0x8ee   : > { %4471 = vmatprep.subr.bf16.mxu1 %v6151_v33  ;;  %v651_v33 = vld [vmem:[%s9780_s8 + $0x180] sm:$0xff] }
 0x8f0   : > { %3687 = vmatpush1.bf16.msra.mxu0 %v7042_v48 }
 0x8f1   : > { %3688 = vmatprep.subr.bf16.mxu0 %v7047_v43 }
 0x8f4   : > { %3689 = vmatpush1.bf16.msra.mxu0 %v7045_v53  ;;  %v619_v53 = vld [vmem:[%s9780_s8 + $0x80] sm:$0xff] }
 0x8f5   : > { %v8444_v21 = vpop.f32.mrb[16].mxu1 }
 0x8f6   : > { %v6567_v6 = vpop.f32.mrb[17].mxu1 }
 0x8f9   : > { %v8446_v51 = vpop.f32.mrb[18].mxu1 }
 0x8fa   : > { %v6587_v32 = vpop.f32.mrb[19].mxu1 }
 0x8fd   : > { %v8448_v45 = vpop.f32.mrb[20].mxu1 }
 0x8fe   : > { %v6590_v19 = vpop.f32.mrb[21].mxu1 }
 0x901   : > { %v8450_v25 = vpop.f32.mrb[22].mxu1 }
 0x902   : > { %v6593_v26 = vpop.f32.mrb[23].mxu1 }
 0x905   : > { %v2712_v14 = vpop.f32.mrb[24].mxu1 }
 0x906   : > { %2726 = vst.msk [vmem:[#allocation2 + $0x8] sm:$0xff] %vm1515_vm2, %v2712_v14  ;;  %v6613_v55 = vpop.f32.mrb[25].mxu1 }
 0x909   : > { %v2717_v12 = vpop.f32.mrb[26].mxu1 }
 0x90a   : > { %2727 = vst.msk [vmem:[#allocation2 + $0x18] sm:$0xff] %vm1515_vm2, %v2717_v12  ;;  %v6616_v10 = vpop.f32.mrb[27].mxu1 }
 0x90d   : > { %v2722_v13 = vpop.f32.mrb[28].mxu1 }
 0x90e   : > { %2728 = vst.msk [vmem:[#allocation2 + $0x28] sm:$0xff] %vm1515_vm2, %v2722_v13  ;;  %v6619_v38 = vpop.f32.mrb[29].mxu1  ;;  %v8551_v13 = vsub.s32 3, %v7822_v63 }
 0x90f   : > { %v8556_v38 = vld [vmem:[%s9779_s7] sm:$0xff] }
 0x910   : > { %v3497_v60 = vrot.slane %v8563_v17, %v8551_v13 }
 0x911   : > { %v2951_v57 = vpop.f32.mrb[30].mxu1 }
 0x912   : > { %2968 = vrot.lane.b32.xlu0 %v2951_v57, %s7414_s13  ;;  %v6639_v1 = vpop.f32.mrb[31].mxu1  ;;  %v3493_v57 = vrot.slane %v8556_v38, %v8551_v13 }
 0x915   : > { %v2956_v15 = vpop.f32.mrb[32].mxu1 }
 0x916   : > { %2970 = vrot.lane.b32.xlu0 %v2956_v15, %s7414_s13  ;;  %v6642_v39 = vpop.f32.mrb[33].mxu1 }
 0x919   : > { %v2961_v27 = vpop.f32.mrb[34].mxu1 }
 0x91a   : > { %v6645_v52 = vpop.f32.mrb[35].mxu1 }
 0x91d   : > { %v3201_v44 = vpop.f32.mrb[36].mxu1 }
 0x91e   : > { %3218 = vrot.lane.b32.xlu0 %v3201_v44, %s7413_s12  ;;  %v6665_v20 = vpop.f32.mrb[37].mxu1 }
 0x91f   : > { %v604_v20 = vld [vmem:[%s9780_s8 + $0x8] sm:$0xff] }
 0x920   : > { %v6152_v48 = vcombine.low %v604_v20, %v608_v54  ;;  %v6153_v49 = vcombine.high %v604_v20, %v608_v54  ;;  %v644_v20 = vld [vmem:[%s9780_s8 + $0x148] sm:$0xff]  ;;  %v655_v54 = vld [vmem:[%s9780_s8 + $0x1a0] sm:$0xff] }
 0x921   : > { %v3206_v30 = vpop.f32.mrb[38].mxu1 }
 0x922   : > { %3220 = vrot.lane.b32.xlu0 %v3206_v30, %s7413_s12  ;;  %v6668_v61 = vpop.f32.mrb[39].mxu1  ;;  %v6150_v30 = vcombine.low %v603_v46, %v607_v31  ;;  %4522 = vmatprep.subr.bf16.mxu0 %v6153_v49  ;;  %v643_v46 = vld [vmem:[%s9780_s8 + $0x140] sm:$0xff] }
 0x923   : > { %v611_v61 = vld [vmem:[%s9780_s8 + $0x40] sm:$0xff] }
 0x924   : > { %4472 = vmatpush1.bf16.msra.mxu1 %v6150_v30  ;;  %v647_v31 = vld [vmem:[%s9780_s8 + $0x160] sm:$0xff] }
 0x925   : > { %v3211_v56 = vpop.f32.mrb[40].mxu1  ;;  %v6191_v30 = vcombine.high %v643_v46, %v647_v31 }
 0x926   : > { %v6671_v7 = vpop.f32.mrb[41].mxu1 }
 0x929   : > { %v3451_v22 = vpop.f32.mrb[42].mxu1 }
 0x92a   : > { %3468 = vrot.lane.b32.xlu0 %v3451_v22, %s7412_s29  ;;  %v6691_v8 = vpop.f32.mrb[43].mxu1  ;;  %v612_v22 = vld [vmem:[%s9780_s8 + $0x48] sm:$0xff] }
 0x92b   : > { %v616_v8 = vld [vmem:[%s9780_s8 + $0x68] sm:$0xff] }
 0x92c   : > { %v6161_v43 = vcombine.high %v612_v22, %v616_v8 }
 0x92d   : > { %v3456_v40 = vpop.f32.mrb[44].mxu1 }
 0x92e   : > { %2487 = vrot.lane.b32.xlu0 %v8446_v51, %s7412_s29  ;;  %3470 = vrot.lane.b32.xlu1 %v3456_v40, %s7412_s29  ;;  %v6694_v16 = vpop.f32.mrb[45].mxu1  ;;  %v623_v40 = vld [vmem:[%s9780_s8 + $0xa0] sm:$0xff] }
 0x92f   : > { %v620_v16 = vld [vmem:[%s9780_s8 + $0x88] sm:$0xff] }
 0x932   : > { %2489 = vrot.lane.b32.xlu0 %v8448_v45, %s7412_s29  ;;  %2240 = vrot.lane.b32.xlu1 %v8444_v21, %s7413_s12 }
 0x933   : > { %v2237_v24 = vpop.permute.xlu0 %2236 }
 0x934   : > { %2246 = vst.msk [vmem:[#allocation2] sm:$0xff] %vm2245_vm8, %v2237_v24  ;;  %v624_v24 = vld [vmem:[%s9780_s8 + $0xa8] sm:$0xff] }
 0x936   : > { %2972 = vrot.lane.b32.xlu0 %v2961_v27, %s7414_s13  ;;  %2491 = vrot.lane.b32.xlu1 %v8450_v25, %s7412_s29 }
 0x93a   : > { %1989 = vrot.lane.b32.xlu0 %v8115_v18, %s7414_s13 }
 0x93e   : > { %3222 = vrot.lane.b32.xlu0 %v3211_v56, %s7413_s12  ;;  %v615_v56 = vld [vmem:[%s9780_s8 + $0x60] sm:$0xff] }
 0x93f   : > { %v6159_v7 = vcombine.high %v611_v61, %v615_v56 }
 0x941   : > { %4473 = vmatprep.subr.bf16.mxu1 %v6159_v7  ;;  %v652_v7 = vld [vmem:[%s9780_s8 + $0x188] sm:$0xff] }
 0x94b   : > { %v2239_v62 = vpop.permute.xlu0 %2238 }
 0x94c   : > { %2247 = vst.msk [vmem:[#allocation2 + $0x10] sm:$0xff] %vm2245_vm8, %v2239_v62  ;;  %v6158_v62 = vcombine.low %v611_v61, %v615_v56 }
 0x94e   : > { %4474 = vmatpush1.bf16.msra.mxu1 %v6158_v62  ;;  %v6198_v62 = vcombine.low %v651_v33, %v655_v54 }
 0x984   : > { %v2969_v58 = vpop.permute.xlu0 %2968 }
 0x985   : > { %2977 = vst.msk [vmem:[#allocation2 + $0x8] sm:$0xff] %vm1994_vm7, %v2969_v58  ;;  %v6160_v58 = vcombine.low %v612_v22, %v616_v8  ;;  %v656_v22 = vld [vmem:[%s9780_s8 + $0x1a8] sm:$0xff]  ;;  %v659_v8 = vld [vmem:[%s9780_s8 + $0x1c0] sm:$0xff] }
 0x988   : > { %v2971_v47 = vpop.permute.xlu0 %2970 }
 0x989   : > { %2978 = vst.msk [vmem:[#allocation2 + $0x18] sm:$0xff] %vm1994_vm7, %v2971_v47  ;;  %v6167_v47 = vcombine.high %v619_v53, %v623_v40 }
 0x98b   : > { %4475 = vmatprep.subr.bf16.mxu1 %v6167_v47  ;;  %v664_v47 = vld [vmem:[%s9780_s8 + $0x1e8] sm:$0xff] }
 0x990   : > { %v3219_v50 = vpop.permute.xlu0 %3218 }
 0x991   : > { %3227 = vst.msk [vmem:[#allocation2 + $0x8] sm:$0xff] %vm2245_vm8, %v3219_v50  ;;  %v6169_v50 = vcombine.high %v620_v16, %v624_v24 }
 0x994   : > { %v3221_v29 = vpop.permute.xlu0 %3220 }
 0x995   : > { %3228 = vst.msk [vmem:[#allocation2 + $0x18] sm:$0xff] %vm2245_vm8, %v3221_v29  ;;  %v6166_v29 = vcombine.low %v619_v53, %v623_v40 }
 0x997   : > { %4476 = vmatpush1.bf16.msra.mxu1 %v6166_v29 }
 0x99c   : > { %v3469_v34 = vpop.permute.xlu0 %3468 }
 0x99d   : > { %3477 = vst.msk [vmem:[#allocation2 + $0x8] sm:$0xff] %vm2496_vm9, %v3469_v34  ;;  %v6168_v34 = vcombine.low %v620_v16, %v624_v24 }
 0x9a0   : > { %v2488_v18 = vpop.permute.xlu0 %2487  ;;  %v3471_v36 = vpop.permute.xlu1 %3470 }
 0x9a1   : > { %2497 = vst.msk [vmem:[#allocation2] sm:$0xff] %vm2496_vm9, %v2488_v18  ;;  %3478 = vst.msk [vmem:[#allocation2 + $0x18] sm:$0xff] %vm2496_vm9, %v3471_v36 }
 0x9a4   : > { %v2490_v4 = vpop.permute.xlu0 %2489  ;;  %v2241_v21 = vpop.permute.xlu1 %2240  ;;  %v3481_v51 = vld [vmem:[#allocation2 + $0x8] sm:$0xff] }
 0x9a5   : > { %2498 = vst.msk [vmem:[#allocation2 + $0x10] sm:$0xff] %vm2496_vm9, %v2490_v4 }
 0x9a8   : > { %v2973_v6 = vpop.permute.xlu0 %2972  ;;  %v3483_v32 = vld [vmem:[#allocation2 + $0x18] sm:$0xff]  ;;  %v3480_v14 = vld [vmem:[#allocation2] sm:$0xff]  ;;  %v2492_v55 = vpop.permute.xlu1 %2491 }
 0x9a9   : > { %2979 = vst.msk [vmem:[#allocation2 + $0x28] sm:$0xff] %vm1994_vm7, %v2973_v6  ;;  %v3487_v45 = vpack.c.bf16 %v3483_v32, %v3481_v51 }
 0x9ab   : > { %v3461_v19 = vpop.f32.mrb[46].mxu1  ;;  %3690 = vmatprep.mubr.bf16.mxu0 %v3487_v45  ;;  %v627_v45 = vld [vmem:[%s9780_s8 + $0xc0] sm:$0xff] }
 0x9ac   : > { %3472 = vrot.lane.b32.xlu0 %v3461_v19, %s7412_s29  ;;  %v6697_v25 = vpop.f32.mrb[47].mxu1  ;;  %v1990_v26 = vpop.permute.xlu0 %1989  ;;  %v3482_v3 = vld [vmem:[#allocation2 + $0x10] sm:$0xff]  ;;  %v631_v19 = vld [vmem:[%s9780_s8 + $0xe0] sm:$0xff]  ;;  %s446_s29 = scalar_lea.vmem %s9783_s11, %s6778_s20 }
 0x9ad   : > { %1997 = vst.msk [vmem:[#allocation2 + $0x20] sm:$0xff] %vm1994_vm7, %v1990_v26  ;;  %v3486_v28 = vpack.c.bf16 %v3482_v3, %v3480_v14  ;;  %v628_v25 = vld [vmem:[%s9780_s8 + $0xc8] sm:$0xff]  ;;  %v6175_v26 = vcombine.high %v627_v45, %v631_v19  ;;  %v6174_v3 = vcombine.low %v627_v45, %v631_v19 }
 0x9ae   : > { %2248 = vst.msk [vmem:[#allocation2 + $0x20] sm:$0xff] %vm2245_vm8, %v2241_v21  ;;  %v632_v14 = vld [vmem:[%s9780_s8 + $0xe8] sm:$0xff] }
 0x9af   : > { %2499 = vst.msk [vmem:[#allocation2 + $0x20] sm:$0xff] %vm2496_vm9, %v2492_v55  ;;  %3691 = vmatmul.mubr.bf16.vlgmr.msra.gmra.mrb[64].mxu0 %v3486_v28  ;;  %v6176_v28 = vcombine.low %v628_v25, %v632_v14  ;;  %v6177_v55 = vcombine.high %v628_v25, %v632_v14  ;;  %4477 = vmatprep.subr.bf16.mxu1 %v6175_v26  ;;  %v668_v45 = vld [vmem:[%s9780_s8 + $0x208] sm:$0xff]  ;;  %v675_v14 = vld [vmem:[%s9780_s8 + $0x240] sm:$0xff] }
 0x9b0   : > { %v3223_v12 = vpop.permute.xlu0 %3222  ;;  %4523 = vmatpush1.bf16.msra.mxu0 %v6152_v48  ;;  %4478 = vmatpush1.bf16.msra.mxu1 %v6174_v3  ;;  %v672_v19 = vld [vmem:[%s9780_s8 + $0x228] sm:$0xff]  ;;  %v679_v3 = vld [vmem:[%s9780_s8 + $0x260] sm:$0xff] }
 0x9b1   : > { %3229 = vst.msk [vmem:[#allocation2 + $0x28] sm:$0xff] %vm2245_vm8, %v3223_v12  ;;  %4524 = vmatprep.subr.bf16.mxu0 %v6161_v43  ;;  %v635_v12 = vld [vmem:[%s9780_s8 + $0x100] sm:$0xff] }
 0x9b4   : > { %4525 = vmatpush1.bf16.msra.mxu0 %v6160_v58  ;;  %v660_v58 = vld [vmem:[%s9780_s8 + $0x1c8] sm:$0xff] }
 0x9b5   : > { %4526 = vmatprep.subr.bf16.mxu0 %v6169_v50  ;;  %v6201_v50 = vcombine.high %v652_v7, %v656_v22  ;;  %v6208_v26 = vcombine.low %v660_v58, %v664_v47 }
 0x9b6   : > { %v3484_v35 = vld [vmem:[#allocation2 + $0x20] sm:$0xff] }
 0x9b7   : > { %v3488_v59 = vpack.c.bf16 %v3484_v35, %v3484_v35  ;;  %v636_v35 = vld [vmem:[%s9780_s8 + $0x108] sm:$0xff] }
 0x9b8   : > { %4527 = vmatpush1.bf16.msra.mxu0 %v6168_v34 }
 0x9b9   : > { %4528 = vmatprep.subr.bf16.mxu0 %v6177_v55 }
 0x9bc   : > { %4529 = vmatpush1.bf16.msra.mxu0 %v6176_v28  ;;  %v6217_v28 = vcombine.high %v668_v45, %v672_v19 }
 0xa1e   : > { %v3473_v5 = vpop.permute.xlu0 %3472 }
 0xa1f   : > { %3479 = vst.msk [vmem:[#allocation2 + $0x28] sm:$0xff] %vm2496_vm9, %v3473_v5  ;;  %v639_v5 = vld [vmem:[%s9780_s8 + $0x120] sm:$0xff] }
 0xa26   : > { %v3485_v10 = vld [vmem:[#allocation2 + $0x28] sm:$0xff] }
 0xa27   : > { %v3489_v2 = vpack.c.bf16 %v3485_v10, %v3485_v10 }
 0xa29   : > { %3700 = vmatprep.mubr.bf16.mxu0 %v3489_v2  ;;  %v6182_v2 = vcombine.low %v635_v12, %v639_v5 }
 0xa2a   : > { %3701 = vmatmul.mubr.bf16.gmra.mrb[68].mxu0 %v3488_v59  ;;  %v6183_v59 = vcombine.high %v635_v12, %v639_v5  ;;  %v676_v12 = vld [vmem:[%s9780_s8 + $0x248] sm:$0xff] }
 0xa2b   : > { %v680_v5 = vld [vmem:[%s9780_s8 + $0x268] sm:$0xff] }
 0xa2c   : > { %4479 = vmatprep.subr.bf16.mxu1 %v6183_v59  ;;  %v6222_v59 = vcombine.low %v675_v14, %v679_v3 }
 0xa2d   : > { %4480 = vmatpush1.bf16.msra.mxu1 %v6182_v2  ;;  %v6225_v2 = vcombine.high %v676_v12, %v680_v5 }
 0xa2e   : > { %4481 = vmatprep.subr.bf16.mxu1 %v6191_v30  ;;  %v695_v30 = vld [vmem:[%s9780_s8 + $0x2e0] sm:$0xff] }
 0xa82   : > { %v3692_v1 = vpop.f32.mrb[64].mxu0 }
 0xa83   : > { %v8567_v15 = vadd.f32 %v3692_v1, %v3493_v57  ;;  %v3694_v9 = vpop.f32.mrb[65].mxu0 }
 0xa84   : > { %v8569_v37 = vadd.f32 %v3694_v9, %v3497_v60  ;;  %v3696_v39 = vpop.f32.mrb[66].mxu0 }
 0xa85   : > { %v8571_v41 = vadd.f32 %v3696_v39, %v3493_v57  ;;  %v3698_v42 = vpop.f32.mrb[67].mxu0 }
 0xa86   : > { %v3709_v27 = vadd.f32 %v8569_v37, %v8567_v15  ;;  %v8575_v52 = vadd.f32 %v3698_v42, %v3497_v60 }
 0xa88   : > { %3710 = vadd.xlane.f32.xlu0 %v3709_v27  ;;  %v3712_v44 = vadd.f32 %v8575_v52, %v8571_v41 }
 0xa8a   : > { %3713 = vadd.xlane.f32.xlu1 %v3712_v44 }
 0xafd   : > { %v3702_v18 = vpop.f32.mrb[68].mxu0 }
 0xafe   : > { %v8615_v36 = vadd.f32 %v3702_v18, %v3493_v57  ;;  %v3704_v4 = vpop.f32.mrb[69].mxu0  ;;  %v640_v57 = vld [vmem:[%s9780_s8 + $0x128] sm:$0xff]  ;;  %v6200_v18 = vcombine.low %v652_v7, %v656_v22  ;;  %v699_v22 = vld [vmem:[%s9780_s8 + $0x300] sm:$0xff] }
 0xaff   : > { %v8617_v21 = vadd.f32 %v3704_v4, %v3497_v60  ;;  %v3706_v6 = vpop.f32.mrb[70].mxu0  ;;  %v6184_v1 = vcombine.low %v636_v35, %v640_v57  ;;  %v6185_v9 = vcombine.high %v636_v35, %v640_v57  ;;  %v667_v4 = vld [vmem:[%s9780_s8 + $0x200] sm:$0xff]  ;;  %v6223_v35 = vcombine.high %v675_v14, %v679_v3 }
 0xb00   : > { %v3707_v51 = vpop.f32.mrb[71].mxu0  ;;  %v671_v6 = vld [vmem:[%s9780_s8 + $0x220] sm:$0xff]  ;;  %v6224_v57 = vcombine.low %v676_v12, %v680_v5  ;;  %v728_v5 = vld [vmem:[%s9780_s8 + $0x3e8] sm:$0xff] }
 0xb01   : > { %v3715_v32 = vadd.f32 %v8617_v21, %v8615_v36  ;;  %4530 = vmatprep.subr.bf16.mxu0 %v6185_v9  ;;  %v6209_v51 = vcombine.high %v660_v58, %v664_v47  ;;  %v6215_v25 = vcombine.high %v667_v4, %v671_v6  ;;  %v6214_v55 = vcombine.low %v667_v4, %v671_v6  ;;  %v684_v9 = vld [vmem:[%s9780_s8 + $0x288] sm:$0xff]  ;;  %v715_v4 = vld [vmem:[%s9780_s8 + $0x380] sm:$0xff] }
 0xb02   : > { %4531 = vmatpush1.bf16.msra.mxu0 %v6184_v1  ;;  %v687_v1 = vld [vmem:[%s9780_s8 + $0x2a0] sm:$0xff]  ;;  %v708_v58 = vld [vmem:[%s9780_s8 + $0x348] sm:$0xff] }
 0xb03   : > { %3716 = vadd.xlane.f32.xlu0 %v3715_v32  ;;  %v719_v6 = vld [vmem:[%s9780_s8 + $0x3a0] sm:$0xff] }
 0xb04   : > { %v723_v14 = vld [vmem:[%s9780_s8 + $0x3c0] sm:$0xff] }
 0xb05   : > { %v727_v3 = vld [vmem:[%s9780_s8 + $0x3e0] sm:$0xff] }
 0xb06   : > { %v6271_v12 = vcombine.high %v723_v14, %v727_v3 }
 0xb15   : > { %v3711_v10 = vpop.xlane.xlu0 %3710 }
 0xb16   : > { %v3719_v60 = vmul.f32 0.00390625, %v3711_v10  ;;  %v6216_v10 = vcombine.low %v668_v45, %v672_v19  ;;  %v720_v45 = vld [vmem:[%s9780_s8 + $0x3a8] sm:$0xff]  ;;  %v6262_v19 = vcombine.low %v715_v4, %v719_v6 }
 0xb17   : > { %v3714_v39 = vpop.xlane.xlu1 %3713 }
 0xb18   : > { %v8646_v42 = vsub.f32 %v8567_v15, %v3719_v60  ;;  %v8649_v27 = vsub.f32 %v8569_v37, %v3719_v60  ;;  %v3720_v44 = vmul.f32 0.00390625, %v3714_v39  ;;  %v6190_v15 = vcombine.low %v643_v46, %v647_v31  ;;  %v648_v37 = vld [vmem:[%s9780_s8 + $0x168] sm:$0xff]  ;;  %v683_v60 = vld [vmem:[%s9780_s8 + $0x280] sm:$0xff] }
 0xb19   : > { %v6192_v53 = vcombine.low %v644_v20, %v648_v37  ;;  %v6193_v43 = vcombine.high %v644_v20, %v648_v37  ;;  %v6231_v39 = vcombine.high %v683_v60, %v687_v1  ;;  %v6230_v46 = vcombine.low %v683_v60, %v687_v1  ;;  %v692_v37 = vld [vmem:[%s9780_s8 + $0x2c8] sm:$0xff] }
 0xb1a   : > { %v3728_v61 = vmul.f32 %v8646_v42, %v8646_v42  ;;  %v3729_v56 = vmul.f32 %v8649_v27, %v8649_v27  ;;  %v8674_v48 = vsub.f32 %v8571_v41, %v3720_v44  ;;  %v8677_v49 = vsub.f32 %v8575_v52, %v3720_v44  ;;  %v663_v52 = vld [vmem:[%s9780_s8 + $0x1e0] sm:$0xff]  ;;  %4482 = vmatpush1.bf16.msra.mxu1 %v6190_v15  ;;  %v688_v44 = vld [vmem:[%s9780_s8 + $0x2a8] sm:$0xff] }
 0xb1b   : > { %v6199_v41 = vcombine.high %v651_v33, %v655_v54  ;;  %4532 = vmatprep.subr.bf16.mxu0 %v6193_v43  ;;  %v6207_v29 = vcombine.high %v659_v8, %v663_v52  ;;  %v6206_v32 = vcombine.low %v659_v8, %v663_v52  ;;  %v6232_v31 = vcombine.low %v684_v9, %v688_v44  ;;  %v691_v15 = vld [vmem:[%s9780_s8 + $0x2c0] sm:$0xff]  ;;  %v696_v54 = vld [vmem:[%s9780_s8 + $0x2e8] sm:$0xff] }
 0xb1c   : > { %v3734_v40 = vadd.f32 %v3729_v56, %v3728_v61  ;;  %v3730_v16 = vmul.f32 %v8674_v48, %v8674_v48  ;;  %v3731_v24 = vmul.f32 %v8677_v49, %v8677_v49  ;;  %4533 = vmatpush1.bf16.msra.mxu0 %v6192_v53  ;;  %v6233_v20 = vcombine.high %v684_v9, %v688_v44  ;;  %v703_v8 = vld [vmem:[%s9780_s8 + $0x320] sm:$0xff]  ;;  %v700_v53 = vld [vmem:[%s9780_s8 + $0x308] sm:$0xff]  ;;  %v610_v9 = vld [vmem:[%s9780_s8 + $0x38] sm:$0xff] }
 0xb1d   : > { %4483 = vmatprep.subr.bf16.mxu1 %v6199_v41  ;;  %4534 = vmatprep.subr.bf16.mxu0 %v6201_v50  ;;  %v6239_v33 = vcombine.high %v691_v15, %v695_v30  ;;  %v6238_v61 = vcombine.low %v691_v15, %v695_v30  ;;  %v6240_v56 = vcombine.low %v692_v37, %v696_v54  ;;  %v704_v41 = vld [vmem:[%s9780_s8 + $0x328] sm:$0xff] }
 0xb1e   : > { %3735 = vadd.xlane.f32.xlu0 %v3734_v40  ;;  %v3737_v34 = vadd.f32 %v3731_v24, %v3730_v16  ;;  %4484 = vmatpush1.bf16.msra.mxu1 %v6198_v62  ;;  %v6241_v7 = vcombine.high %v692_v37, %v696_v54  ;;  %v6247_v43 = vcombine.high %v699_v22, %v703_v8  ;;  %v707_v24 = vld [vmem:[%s9780_s8 + $0x340] sm:$0xff]  ;;  %v712_v50 = vld [vmem:[%s9780_s8 + $0x368] sm:$0xff] }
 0xb1f   : > { %4485 = vmatprep.subr.bf16.mxu1 %v6207_v29  ;;  %v6246_v52 = vcombine.low %v699_v22, %v703_v8  ;;  %v6248_v40 = vcombine.low %v700_v53, %v704_v41  ;;  %v6249_v16 = vcombine.high %v700_v53, %v704_v41  ;;  %v711_v62 = vld [vmem:[%s9780_s8 + $0x360] sm:$0xff] }
 0xb20   : > { %3738 = vadd.xlane.f32.xlu1 %v3737_v34  ;;  %4535 = vmatpush1.bf16.msra.mxu0 %v6200_v18  ;;  %v6255_v47 = vcombine.high %v707_v24, %v711_v62  ;;  %v6254_v29 = vcombine.low %v707_v24, %v711_v62  ;;  %v6256_v34 = vcombine.low %v708_v58, %v712_v50 }
 0xb21   : > { %4536 = vmatprep.subr.bf16.mxu0 %v6209_v51  ;;  %v6257_v18 = vcombine.high %v708_v58, %v712_v50  ;;  %v716_v51 = vld [vmem:[%s9780_s8 + $0x388] sm:$0xff] }
 0xb22   : > { %4486 = vmatpush1.bf16.msra.mxu1 %v6206_v32  ;;  %v6263_v32 = vcombine.high %v715_v4, %v719_v6  ;;  %v614_v4 = vld [vmem:[%s9780_s8 + $0x58] sm:$0xff] }
 0xb23   : > { %4487 = vmatprep.subr.bf16.mxu1 %v6215_v25  ;;  %v6264_v25 = vcombine.low %v716_v51, %v720_v45  ;;  %v618_v6 = vld [vmem:[%s9780_s8 + $0x78] sm:$0xff] }
 0xb24   : > { %4537 = vmatpush1.bf16.msra.mxu0 %v6208_v26  ;;  %v6265_v26 = vcombine.high %v716_v51, %v720_v45 }
 0xb25   : > { %4538 = vmatprep.subr.bf16.mxu0 %v6217_v28  ;;  %v724_v28 = vld [vmem:[%s9780_s8 + $0x3c8] sm:$0xff] }
 0xb26   : > { %4488 = vmatpush1.bf16.msra.mxu1 %v6214_v55  ;;  %v6270_v55 = vcombine.low %v723_v14, %v727_v3  ;;  %v622_v14 = vld [vmem:[%s9780_s8 + $0x98] sm:$0xff] }
 0xb27   : > { %4489 = vmatprep.subr.bf16.mxu1 %v6223_v35  ;;  %v6273_v35 = vcombine.high %v724_v28, %v728_v5  ;;  %v626_v3 = vld [vmem:[%s9780_s8 + $0xb8] sm:$0xff] }
 0xb28   : > { %4539 = vmatpush1.bf16.msra.mxu0 %v6216_v10  ;;  %v6272_v10 = vcombine.low %v724_v28, %v728_v5  ;;  %v6173_v5 = vcombine.high %v622_v14, %v626_v3 }
 0xb29   : > { %4540 = vmatprep.subr.bf16.mxu0 %v6225_v2  ;;  %v605_v2 = vld [vmem:[%s9780_s8 + $0x10] sm:$0xff] }
 0xb2a   : > { %4490 = vmatpush1.bf16.msra.mxu1 %v6222_v59  ;;  %v609_v59 = vld [vmem:[%s9780_s8 + $0x30] sm:$0xff] }
 0xb2b   : > { %4491 = vmatprep.subr.bf16.mxu1 %v6231_v39  ;;  %v6154_v60 = vcombine.low %v605_v2, %v609_v59  ;;  %v6155_v1 = vcombine.high %v605_v2, %v609_v59  ;;  %v630_v2 = vld [vmem:[%s9780_s8 + $0xd8] sm:$0xff] }
 0xb2c   : > { %4541 = vmatpush1.bf16.msra.mxu0 %v6224_v57  ;;  %v606_v57 = vld [vmem:[%s9780_s8 + $0x18] sm:$0xff] }
 0xb2d   : > { %4542 = vmatprep.subr.bf16.mxu0 %v6233_v20  ;;  %v6156_v39 = vcombine.low %v606_v57, %v610_v9  ;;  %v6157_v44 = vcombine.high %v606_v57, %v610_v9  ;;  %v634_v59 = vld [vmem:[%s9780_s8 + $0xf8] sm:$0xff] }
 0xb2e   : > { %4492 = vmatpush1.bf16.msra.mxu1 %v6230_v46  ;;  %v6181_v9 = vcombine.high %v630_v2, %v634_v59 }
 0xb2f   : > { %4493 = vmatprep.subr.bf16.mxu1 %v6239_v33 }
 0xb30   : > { %4543 = vmatpush1.bf16.msra.mxu0 %v6232_v31 }
 0xb31   : > { %4544 = vmatprep.subr.bf16.mxu0 %v6241_v7 }
 0xb32   : > { %4494 = vmatpush1.bf16.msra.mxu1 %v6238_v61 }
 0xb33   : > { %4495 = vmatprep.subr.bf16.mxu1 %v6247_v43 }
 0xb34   : > { %4545 = vmatpush1.bf16.msra.mxu0 %v6240_v56 }
 0xb35   : > { %4546 = vmatprep.subr.bf16.mxu0 %v6249_v16 }
 0xb36   : > { %4496 = vmatpush1.bf16.msra.mxu1 %v6246_v52 }
 0xb37   : > { %4497 = vmatprep.subr.bf16.mxu1 %v6255_v47 }
 0xb38   : > { %4547 = vmatpush1.bf16.msra.mxu0 %v6248_v40 }
 0xb39   : > { %4548 = vmatprep.subr.bf16.mxu0 %v6257_v18  ;;  %v617_v18 = vld [vmem:[%s9780_s8 + $0x70] sm:$0xff] }
 0xb3a   : > { %4498 = vmatpush1.bf16.msra.mxu1 %v6254_v29 }
 0xb3b   : > { %4499 = vmatprep.subr.bf16.mxu1 %v6263_v32 }
 0xb3c   : > { %4549 = vmatpush1.bf16.msra.mxu0 %v6256_v34 }
 0xb3d   : > { %4550 = vmatprep.subr.bf16.mxu0 %v6265_v26  ;;  %v625_v26 = vld [vmem:[%s9780_s8 + $0xb0] sm:$0xff] }
 0xb3e   : > { %4500 = vmatpush1.bf16.msra.mxu1 %v6262_v19  ;;  %v6165_v19 = vcombine.high %v614_v4, %v618_v6 }
 0xb3f   : > { %4501 = vmatprep.subr.bf16.mxu1 %v6271_v12 }
 0xb40   : > { %4551 = vmatpush1.bf16.msra.mxu0 %v6264_v25  ;;  %v621_v25 = vld [vmem:[%s9780_s8 + $0x90] sm:$0xff] }
 0xb41   : > { %4552 = vmatprep.subr.bf16.mxu0 %v6273_v35  ;;  %v6171_v12 = vcombine.high %v621_v25, %v625_v26  ;;  %v629_v35 = vld [vmem:[%s9780_s8 + $0xd0] sm:$0xff]  ;;  %v6170_v57 = vcombine.low %v621_v25, %v625_v26 }
 0xb42   : > { %4502 = vmatpush1.bf16.msra.mxu1 %v6270_v55  ;;  %v6164_v55 = vcombine.low %v614_v4, %v618_v6  ;;  %v665_v4 = vld [vmem:[%s9780_s8 + $0x1f0] sm:$0xff]  ;;  %v662_v6 = vld [vmem:[%s9780_s8 + $0x1d8] sm:$0xff] }
 0xb43   : > { %4573 = vmatprep.subr.bf16.mxu1 %v6155_v1 }
 0xb44   : > { %4553 = vmatpush1.bf16.msra.mxu0 %v6272_v10  ;;  %v633_v10 = vld [vmem:[%s9780_s8 + $0xf0] sm:$0xff] }
 0xb45   : > { %4624 = vmatprep.subr.bf16.mxu0 %v6157_v44  ;;  %v6179_v1 = vcombine.high %v629_v35, %v633_v10  ;;  %v641_v44 = vld [vmem:[%s9780_s8 + $0x130] sm:$0xff] }
 0xb90   : > { %v3717_v46 = vpop.xlane.xlu0 %3716 }
 0xb91   : > { %v3721_v31 = vmul.f32 0.00390625, %v3717_v46  ;;  %v638_v46 = vld [vmem:[%s9780_s8 + $0x118] sm:$0xff] }
 0xb93   : > { %v8810_v20 = vsub.f32 %v8615_v36, %v3721_v31  ;;  %v8813_v15 = vsub.f32 %v8617_v21, %v3721_v31  ;;  %v8820_v36 = vsub.s32 4, %v7822_v63  ;;  %v8823_v21 = vsub.s32 5, %v7822_v63  ;;  %v642_v31 = vld [vmem:[%s9780_s8 + $0x138] sm:$0xff] }
 0xb95   : > { %v3732_v30 = vmul.f32 %v8810_v20, %v8810_v20  ;;  %v3733_v37 = vmul.f32 %v8813_v15, %v8813_v15  ;;  %v8827_v53 = vrot.slane %v8556_v38, %v8820_v36  ;;  %v8831_v43 = vrot.slane %v8563_v17, %v8820_v36 }
 0xb96   : > { %v8837_v24 = vrot.slane %v8563_v17, %v8823_v21  ;;  %v8841_v62 = vrot.slane %v8556_v38, %v8823_v21  ;;  %v613_v17 = vld [vmem:[%s9780_s8 + $0x50] sm:$0xff] }
 0xb97   : > { %v3740_v33 = vadd.f32 %v3733_v37, %v3732_v30  ;;  %v6163_v45 = vcombine.high %v613_v17, %v617_v18  ;;  %v6162_v28 = vcombine.low %v613_v17, %v617_v18  ;;  %v6178_v30 = vcombine.low %v629_v35, %v633_v10  ;;  %v661_v18 = vld [vmem:[%s9780_s8 + $0x1d0] sm:$0xff] }
 0xb98   : > { %v6180_v37 = vcombine.low %v630_v2, %v634_v59  ;;  %v6211_v26 = vcombine.high %v661_v18, %v665_v4  ;;  %v677_v59 = vld [vmem:[%s9780_s8 + $0x250] sm:$0xff] }
 0xb99   : > { %3741 = vadd.xlane.f32.xlu0 %v3740_v33 }
 0xbab   : > { %v3736_v54 = vpop.xlane.xlu0 %3735 }
 0xbac   : > { %v3743_v61 = vmul.f32 0.00390625, %v3736_v54  ;;  %v6189_v54 = vcombine.high %v638_v46, %v642_v31 }
 0xbad   : > { %v3739_v56 = vpop.xlane.xlu1 %3738 }
 0xbae   : > { %v3746_v7 = vadd.f32 1e-05, %v3743_v61  ;;  %v3744_v22 = vmul.f32 0.00390625, %v3739_v56  ;;  %v645_v61 = vld [vmem:[%s9780_s8 + $0x150] sm:$0xff] }
 0xbaf   : > { %v649_v56 = vld [vmem:[%s9780_s8 + $0x170] sm:$0xff] }
 0xbb0   : > { %7336 = vrsqrt.f32 %v3746_v7  ;;  %v3747_v8 = vadd.f32 1e-05, %v3744_v22  ;;  %v646_v7 = vld [vmem:[%s9780_s8 + $0x158] sm:$0xff] }
 0xbb1   : > { %v650_v22 = vld [vmem:[%s9780_s8 + $0x178] sm:$0xff] }
 0xbb2   : > { %7338 = vrsqrt.f32 %v3747_v8 }
 0xbba   : > { %v7337_v41 = vpop.eup %7336 }
 0xbbb   : > { %v3752_v52 = vmul.f32 %v7337_v41, %v8646_v42  ;;  %v3753_v40 = vmul.f32 %v7337_v41, %v8649_v27  ;;  %v6188_v41 = vcombine.low %v638_v46, %v642_v31  ;;  %v685_v31 = vld [vmem:[%s9780_s8 + $0x290] sm:$0xff] }
 0xbbc   : > { %v7339_v16 = vpop.eup %7338 }
 0xbbd   : > { %v3766_v58 = vmul.f32 %v8827_v53, %v3752_v52  ;;  %v3754_v47 = vmul.f32 %v7339_v16, %v8674_v48  ;;  %v3755_v50 = vmul.f32 %v7339_v16, %v8677_v49  ;;  %v3767_v29 = vmul.f32 %v8831_v43, %v3753_v40  ;;  %v653_v16 = vld [vmem:[%s9780_s8 + $0x190] sm:$0xff] }
 0xbbe   : > { %v6195_v52 = vcombine.high %v645_v61, %v649_v56  ;;  %v6197_v40 = vcombine.high %v646_v7, %v650_v22 }
 0xbbf   : > { %v3768_v42 = vmul.f32 %v8827_v53, %v3754_v47  ;;  %v3769_v27 = vmul.f32 %v8831_v43, %v3755_v50  ;;  %v8853_v34 = vadd.f32 %v8837_v24, %v3767_v29  ;;  %v8859_v48 = vadd.f32 %v8841_v62, %v3766_v58  ;;  %v657_v58 = vld [vmem:[%s9780_s8 + $0x1b0] sm:$0xff]  ;;  %v654_v47 = vld [vmem:[%s9780_s8 + $0x198] sm:$0xff] }
 0xbc0   : > { %v658_v50 = vld [vmem:[%s9780_s8 + $0x1b8] sm:$0xff]  ;;  %v6194_v29 = vcombine.low %v645_v61, %v649_v56 }
 0xbc1   : > { %v8856_v38 = vadd.f32 %v8837_v24, %v3769_v27  ;;  %v8862_v49 = vadd.f32 %v8841_v62, %v3768_v42  ;;  %v6196_v42 = vcombine.low %v646_v7, %v650_v22  ;;  %v6203_v27 = vcombine.high %v653_v16, %v657_v58  ;;  %v693_v22 = vld [vmem:[%s9780_s8 + $0x2d0] sm:$0xff] }
 0xbc2   : > { %v6205_v17 = vcombine.high %v654_v47, %v658_v50  ;;  %v6204_v25 = vcombine.low %v654_v47, %v658_v50  ;;  %v701_v50 = vld [vmem:[%s9780_s8 + $0x310] sm:$0xff] }
 0xbc3   : > { %v8875_v51 = vpack.c.bf16 %v8856_v38, %v8853_v34  ;;  %v8879_v32 = vpack.c.bf16 %v8862_v49, %v8859_v48 }
 0xbc5   : > { %4503 = vmatprep.mubr.bf16.mxu1 %v8875_v51  ;;  %4554 = vmatprep.mubr.bf16.mxu0 %v8875_v51 }
 0xbc6   : > { %4504 = vmatmul.mubr.bf16.vlgmr.msra.gmra.mrb[48].mxu1 %v8879_v32  ;;  %4555 = vmatmul.mubr.bf16.vlgmr.msra.gmra.mrb[72].mxu0 %v8879_v32 }
 0xbc7   : > { %4574 = vmatpush1.bf16.msra.mxu1 %v6154_v60  ;;  %4625 = vmatpush1.bf16.msra.mxu0 %v6156_v39  ;;  %v6172_v60 = vcombine.low %v622_v14, %v626_v3  ;;  %v637_v39 = vld [vmem:[%s9780_s8 + $0x110] sm:$0xff] }
 0xbc8   : > { %4575 = vmatprep.subr.bf16.mxu1 %v6163_v45  ;;  %4626 = vmatprep.subr.bf16.mxu0 %v6165_v19  ;;  %v6187_v33 = vcombine.high %v637_v39, %v641_v44  ;;  %v6186_v8 = vcombine.low %v637_v39, %v641_v44  ;;  %v666_v45 = vld [vmem:[%s9780_s8 + $0x1f8] sm:$0xff]  ;;  %v6202_v19 = vcombine.low %v653_v16, %v657_v58  ;;  %v669_v3 = vld [vmem:[%s9780_s8 + $0x210] sm:$0xff] }
 0xbc9   : > { %v6213_v14 = vcombine.high %v662_v6, %v666_v45  ;;  %v6212_v35 = vcombine.low %v662_v6, %v666_v45  ;;  %v709_v45 = vld [vmem:[%s9780_s8 + $0x350] sm:$0xff] }
 0xbcb   : > { %4576 = vmatpush1.bf16.msra.mxu1 %v6162_v28  ;;  %4627 = vmatpush1.bf16.msra.mxu0 %v6164_v55  ;;  %v673_v28 = vld [vmem:[%s9780_s8 + $0x230] sm:$0xff]  ;;  %v670_v55 = vld [vmem:[%s9780_s8 + $0x218] sm:$0xff] }
 0xbcc   : > { %4577 = vmatprep.subr.bf16.mxu1 %v6171_v12  ;;  %4628 = vmatprep.subr.bf16.mxu0 %v6173_v5  ;;  %v674_v12 = vld [vmem:[%s9780_s8 + $0x238] sm:$0xff]  ;;  %v6210_v5 = vcombine.low %v661_v18, %v665_v4  ;;  %v6219_v10 = vcombine.high %v669_v3, %v673_v28 }
 0xbcd   : > { %v6221_v2 = vcombine.high %v670_v55, %v674_v12  ;;  %v6220_v39 = vcombine.low %v670_v55, %v674_v12  ;;  %v717_v12 = vld [vmem:[%s9780_s8 + $0x390] sm:$0xff] }
 0xbcf   : > { %4578 = vmatpush1.bf16.msra.mxu1 %v6170_v57  ;;  %4629 = vmatpush1.bf16.msra.mxu0 %v6172_v60  ;;  %v681_v57 = vld [vmem:[%s9780_s8 + $0x270] sm:$0xff]  ;;  %v678_v60 = vld [vmem:[%s9780_s8 + $0x258] sm:$0xff] }
 0xbd0   : > { %4579 = vmatprep.subr.bf16.mxu1 %v6179_v1  ;;  %4630 = vmatprep.subr.bf16.mxu0 %v6181_v9  ;;  %v682_v1 = vld [vmem:[%s9780_s8 + $0x278] sm:$0xff]  ;;  %v6218_v9 = vcombine.low %v669_v3, %v673_v28  ;;  %v6227_v44 = vcombine.high %v677_v59, %v681_v57 }
 0xbd1   : > { %v6229_v46 = vcombine.high %v678_v60, %v682_v1  ;;  %v6228_v61 = vcombine.low %v678_v60, %v682_v1  ;;  %v725_v1 = vld [vmem:[%s9780_s8 + $0x3d0] sm:$0xff] }
 0xbd3   : > { %4580 = vmatpush1.bf16.msra.mxu1 %v6178_v30  ;;  %4631 = vmatpush1.bf16.msra.mxu0 %v6180_v37  ;;  %v689_v30 = vld [vmem:[%s9780_s8 + $0x2b0] sm:$0xff]  ;;  %v686_v37 = vld [vmem:[%s9780_s8 + $0x298] sm:$0xff] }
 0xbd4   : > { %4581 = vmatprep.subr.bf16.mxu1 %v6187_v33  ;;  %4632 = vmatprep.subr.bf16.mxu0 %v6189_v54  ;;  %v690_v33 = vld [vmem:[%s9780_s8 + $0x2b8] sm:$0xff]  ;;  %v6226_v54 = vcombine.low %v677_v59, %v681_v57  ;;  %v6235_v56 = vcombine.high %v685_v31, %v689_v30 }
 0xbd5   : > { %v6237_v7 = vcombine.high %v686_v37, %v690_v33  ;;  %v6236_v16 = vcombine.low %v686_v37, %v690_v33 }
 0xbd7   : > { %4582 = vmatpush1.bf16.msra.mxu1 %v6186_v8  ;;  %4633 = vmatpush1.bf16.msra.mxu0 %v6188_v41  ;;  %v697_v8 = vld [vmem:[%s9780_s8 + $0x2f0] sm:$0xff]  ;;  %v694_v41 = vld [vmem:[%s9780_s8 + $0x2d8] sm:$0xff] }
 0xbd8   : > { %4583 = vmatprep.subr.bf16.mxu1 %v6195_v52  ;;  %4634 = vmatprep.subr.bf16.mxu0 %v6197_v40  ;;  %v698_v52 = vld [vmem:[%s9780_s8 + $0x2f8] sm:$0xff]  ;;  %v6234_v40 = vcombine.low %v685_v31, %v689_v30  ;;  %v6243_v58 = vcombine.high %v693_v22, %v697_v8 }
 0xbd9   : > { %v6245_v47 = vcombine.high %v694_v41, %v698_v52  ;;  %v6244_v18 = vcombine.low %v694_v41, %v698_v52 }
 0xbdb   : > { %4584 = vmatpush1.bf16.msra.mxu1 %v6194_v29  ;;  %4635 = vmatpush1.bf16.msra.mxu0 %v6196_v42  ;;  %v705_v29 = vld [vmem:[%s9780_s8 + $0x330] sm:$0xff]  ;;  %v702_v42 = vld [vmem:[%s9780_s8 + $0x318] sm:$0xff] }
 0xbdc   : > { %4585 = vmatprep.subr.bf16.mxu1 %v6203_v27  ;;  %4636 = vmatprep.subr.bf16.mxu0 %v6205_v17  ;;  %v706_v27 = vld [vmem:[%s9780_s8 + $0x338] sm:$0xff]  ;;  %v6242_v17 = vcombine.low %v693_v22, %v697_v8  ;;  %v6251_v4 = vcombine.high %v701_v50, %v705_v29 }
 0xbdd   : > { %v6253_v6 = vcombine.high %v702_v42, %v706_v27  ;;  %v6252_v3 = vcombine.low %v702_v42, %v706_v27  ;;  %v7060_v42 = vld [vmem:[%s9782_s10 + $0x40] ss:$8 sps:$4 sm:$0xff]   ;;  %v7065_v27 = vld [vmem:[%s9782_s10 + $0x54] ss:$8 sps:$4 sm:$0xff]  }
 0xbdf   : > { %4586 = vmatpush1.bf16.msra.mxu1 %v6202_v19  ;;  %4637 = vmatpush1.bf16.msra.mxu0 %v6204_v25  ;;  %v713_v19 = vld [vmem:[%s9780_s8 + $0x370] sm:$0xff]  ;;  %v710_v25 = vld [vmem:[%s9780_s8 + $0x358] sm:$0xff] }
 0xbe0   : > { %4587 = vmatprep.subr.bf16.mxu1 %v6211_v26  ;;  %4638 = vmatprep.subr.bf16.mxu0 %v6213_v14  ;;  %v714_v26 = vld [vmem:[%s9780_s8 + $0x378] sm:$0xff]  ;;  %v6250_v14 = vcombine.low %v701_v50, %v705_v29  ;;  %v6259_v28 = vcombine.high %v709_v45, %v713_v19 }
 0xbe1   : > { %v6261_v55 = vcombine.high %v710_v25, %v714_v26  ;;  %v6260_v59 = vcombine.low %v710_v25, %v714_v26  ;;  %v7072_v25 = vld [vmem:[%s9782_s10 + $0x80] ss:$8 sps:$4 sm:$0xff]   ;;  %v7077_v26 = vld [vmem:[%s9782_s10 + $0x94] ss:$8 sps:$4 sm:$0xff]  }
 0xbe3   : > { %4588 = vmatpush1.bf16.msra.mxu1 %v6210_v5  ;;  %4639 = vmatpush1.bf16.msra.mxu0 %v6212_v35  ;;  %v721_v5 = vld [vmem:[%s9780_s8 + $0x3b0] sm:$0xff]  ;;  %v718_v35 = vld [vmem:[%s9780_s8 + $0x398] sm:$0xff] }
 0xbe4   : > { %4589 = vmatprep.subr.bf16.mxu1 %v6219_v10  ;;  %4640 = vmatprep.subr.bf16.mxu0 %v6221_v2  ;;  %v722_v10 = vld [vmem:[%s9780_s8 + $0x3b8] sm:$0xff]  ;;  %v6258_v2 = vcombine.low %v709_v45, %v713_v19  ;;  %v6267_v57 = vcombine.high %v717_v12, %v721_v5  ;;  %v7074_v19 = vld [vmem:[%s9782_s10 + $0x84] ss:$8 sps:$4 sm:$0xff]  }
 0xbe5   : > { %v6269_v60 = vcombine.high %v718_v35, %v722_v10  ;;  %v6268_v31 = vcombine.low %v718_v35, %v722_v10  ;;  %v7069_v45 = vld [vmem:[%s9782_s10 + $0x70] ss:$8 sps:$4 sm:$0xff]   ;;  %v7084_v35 = vld [vmem:[%s9782_s10 + $0xc0] ss:$8 sps:$4 sm:$0xff]   ;;  %v7089_v10 = vld [vmem:[%s9782_s10 + $0xd4] ss:$8 sps:$4 sm:$0xff]  }
 0xbe7   : > { %4590 = vmatpush1.bf16.msra.mxu1 %v6218_v9  ;;  %4641 = vmatpush1.bf16.msra.mxu0 %v6220_v39  ;;  %v729_v9 = vld [vmem:[%s9780_s8 + $0x3f0] sm:$0xff]  ;;  %v726_v39 = vld [vmem:[%s9780_s8 + $0x3d8] sm:$0xff] }
 0xbe8   : > { %4591 = vmatprep.subr.bf16.mxu1 %v6227_v44  ;;  %4642 = vmatprep.subr.bf16.mxu0 %v6229_v46  ;;  %v730_v44 = vld [vmem:[%s9780_s8 + $0x3f8] sm:$0xff]  ;;  %v6266_v46 = vcombine.low %v717_v12, %v721_v5  ;;  %v6275_v30 = vcombine.high %v725_v1, %v729_v9  ;;  %v6274_v33 = vcombine.low %v725_v1, %v729_v9  ;;  %v7086_v5 = vld [vmem:[%s9782_s10 + $0xc4] ss:$8 sps:$4 sm:$0xff]  }
 0xbe9   : > { %v6277_v37 = vcombine.high %v726_v39, %v730_v44  ;;  %v7081_v12 = vld [vmem:[%s9782_s10 + $0xb0] ss:$8 sps:$4 sm:$0xff]   ;;  %v7098_v9 = vld [vmem:[%s9782_s10 + $0x104] ss:$8 sps:$4 sm:$0xff]  }
 0xbea   : > { %v7093_v1 = vld [vmem:[%s9782_s10 + $0xf0] ss:$8 sps:$4 sm:$0xff]  }
 0xbeb   : > { %4592 = vmatpush1.bf16.msra.mxu1 %v6226_v54  ;;  %4643 = vmatpush1.bf16.msra.mxu0 %v6228_v61  ;;  %v6276_v54 = vcombine.low %v726_v39, %v730_v44  ;;  %v7050_v61 = vld [vmem:[%s9782_s10 + $0x4] ss:$8 sps:$4 sm:$0xff]  }
 0xbec   : > { %4593 = vmatprep.subr.bf16.mxu1 %v6235_v56  ;;  %4644 = vmatprep.subr.bf16.mxu0 %v6237_v7  ;;  %v9173_v39 = vld [vmem:[%s9781_s9] sm:$0xff] }
 0xbed   : > { %v9177_v44 = vrot.slane %v9173_v39, %v7839_v11 }
 0xbef   : > { %4594 = vmatpush1.bf16.msra.mxu1 %v6234_v40  ;;  %4645 = vmatpush1.bf16.msra.mxu0 %v6236_v16 }
 0xbf0   : > { %4595 = vmatprep.subr.bf16.mxu1 %v6243_v58  ;;  %4646 = vmatprep.subr.bf16.mxu0 %v6245_v47 }
 0xbf3   : > { %4596 = vmatpush1.bf16.msra.mxu1 %v6242_v17  ;;  %4647 = vmatpush1.bf16.msra.mxu0 %v6244_v18  ;;  %v7063_v17 = vld [vmem:[%s9782_s10 + $0x50] ss:$8 sps:$4 sm:$0xff]   ;;  %v7068_v18 = vld [vmem:[%s9782_s10 + $0x64] ss:$8 sps:$4 sm:$0xff]  }
 0xbf4   : > { %4597 = vmatprep.subr.bf16.mxu1 %v6251_v4  ;;  %4648 = vmatprep.subr.bf16.mxu0 %v6253_v6  ;;  %v7066_v4 = vld [vmem:[%s9782_s10 + $0x60] ss:$8 sps:$4 sm:$0xff]   ;;  %v7071_v6 = vld [vmem:[%s9782_s10 + $0x74] ss:$8 sps:$4 sm:$0xff]  }
 0xbf7   : > { %4598 = vmatpush1.bf16.msra.mxu1 %v6250_v14  ;;  %4649 = vmatpush1.bf16.msra.mxu0 %v6252_v3  ;;  %v7075_v14 = vld [vmem:[%s9782_s10 + $0x90] ss:$8 sps:$4 sm:$0xff]   ;;  %v7080_v3 = vld [vmem:[%s9782_s10 + $0xa4] ss:$8 sps:$4 sm:$0xff]  }
 0xbf8   : > { %4599 = vmatprep.subr.bf16.mxu1 %v6259_v28  ;;  %4650 = vmatprep.subr.bf16.mxu0 %v6261_v55  ;;  %v7078_v28 = vld [vmem:[%s9782_s10 + $0xa0] ss:$8 sps:$4 sm:$0xff]   ;;  %v7083_v55 = vld [vmem:[%s9782_s10 + $0xb4] ss:$8 sps:$4 sm:$0xff]  }
 0xbfb   : > { %4600 = vmatpush1.bf16.msra.mxu1 %v6258_v2  ;;  %4651 = vmatpush1.bf16.msra.mxu0 %v6260_v59  ;;  %v7087_v2 = vld [vmem:[%s9782_s10 + $0xd0] ss:$8 sps:$4 sm:$0xff]   ;;  %v7092_v59 = vld [vmem:[%s9782_s10 + $0xe4] ss:$8 sps:$4 sm:$0xff]  }
 0xbfc   : > { %4601 = vmatprep.subr.bf16.mxu1 %v6267_v57  ;;  %4652 = vmatprep.subr.bf16.mxu0 %v6269_v60  ;;  %v7090_v57 = vld [vmem:[%s9782_s10 + $0xe0] ss:$8 sps:$4 sm:$0xff]   ;;  %v7095_v60 = vld [vmem:[%s9782_s10 + $0xf4] ss:$8 sps:$4 sm:$0xff]  }
 0xbff   : > { %4602 = vmatpush1.bf16.msra.mxu1 %v6266_v46  ;;  %4653 = vmatpush1.bf16.msra.mxu0 %v6268_v31  ;;  %v9181_v46 = vrot.slane %v9173_v39, %v7882_v23  ;;  %v9185_v31 = vrot.slane %v9173_v39, %v7825_v0 }
 0xc00   : > { %4603 = vmatprep.subr.bf16.mxu1 %v6275_v30  ;;  %4654 = vmatprep.subr.bf16.mxu0 %v6277_v37  ;;  %v9189_v30 = vrot.slane %v9173_v39, %v8551_v13 }
 0xc03   : > { %4604 = vmatpush1.bf16.msra.mxu1 %v6274_v33  ;;  %4655 = vmatpush1.bf16.msra.mxu0 %v6276_v54 }
 0xc04   : > { %5555 = vmatprep.subr.bf16.mxu1 %v7050_v61 }
 0xc26   : > { %v3742_v56 = vpop.xlane.xlu0 %3741 }
 0xc27   : > { %v3745_v7 = vmul.f32 0.00390625, %v3742_v56 }
 0xc29   : > { %v3748_v22 = vadd.f32 1e-05, %v3745_v7 }
 0xc2b   : > { %7340 = vrsqrt.f32 %v3748_v22 }
 0xc35   : > { %v7341_v8 = vpop.eup %7340 }
 0xc36   : > { %v3756_v41 = vmul.f32 %v7341_v8, %v8810_v20  ;;  %v3757_v52 = vmul.f32 %v7341_v8, %v8813_v15  ;;  %v7048_v20 = vld [vmem:[%s9782_s10] ss:$8 sps:$4 sm:$0xff]   ;;  %v7053_v15 = vld [vmem:[%s9782_s10 + $0x14] ss:$8 sps:$4 sm:$0xff]  }
 0xc38   : > { %v3771_v40 = vmul.f32 %v8831_v43, %v3757_v52  ;;  %v3770_v16 = vmul.f32 %v8827_v53, %v3756_v41  ;;  %v7051_v53 = vld [vmem:[%s9782_s10 + $0x10] ss:$8 sps:$4 sm:$0xff]   ;;  %v7056_v43 = vld [vmem:[%s9782_s10 + $0x24] ss:$8 sps:$4 sm:$0xff]  }
 0xc3a   : > { %v9061_v58 = vadd.f32 %v8837_v24, %v3771_v40  ;;  %v9064_v47 = vadd.f32 %v8841_v62, %v3770_v16  ;;  %v7054_v24 = vld [vmem:[%s9782_s10 + $0x20] ss:$8 sps:$4 sm:$0xff]   ;;  %v7059_v62 = vld [vmem:[%s9782_s10 + $0x34] ss:$8 sps:$4 sm:$0xff]  }
 0xc3c   : > { %v3789_v50 = vpack.c.bf16 %v9061_v58, %v9061_v58  ;;  %v3788_v29 = vpack.c.bf16 %v9064_v47, %v9064_v47 }
 0xc3e   : > { %4513 = vmatprep.mubr.bf16.mxu1 %v3789_v50  ;;  %4564 = vmatprep.mubr.bf16.mxu0 %v3789_v50 }
 0xc3f   : > { %4514 = vmatmul.mubr.bf16.gmra.mrb[52].mxu1 %v3788_v29  ;;  %4565 = vmatmul.mubr.bf16.gmra.mrb[76].mxu0 %v3788_v29 }
 0xc40   : > { %4605 = vmatprep.mubr.bf16.mxu1 %v8875_v51  ;;  %4656 = vmatprep.mubr.bf16.mxu0 %v8875_v51  ;;  %v7057_v51 = vld [vmem:[%s9782_s10 + $0x30] ss:$8 sps:$4 sm:$0xff]  }
 0xc47   : > { %4606 = vmatmul.mubr.bf16.vlgmr.msra.gmra.mrb[56].mxu1 %v8879_v32  ;;  %4657 = vmatmul.mubr.bf16.vlgmr.msra.gmra.mrb[80].mxu0 %v8879_v32  ;;  %v7062_v32 = vld [vmem:[%s9782_s10 + $0x44] ss:$8 sps:$4 sm:$0xff]  }
 0xc48   : > { %4615 = vmatprep.mubr.bf16.mxu1 %v3789_v50  ;;  %4666 = vmatprep.mubr.bf16.mxu0 %v3789_v50 }
 0xc49   : > { %5556 = vmatpush1.bf16.msra.mxu1 %v7048_v20 }
 0xc4a   : > { %5557 = vmatprep.subr.bf16.mxu1 %v7053_v15 }
 0xc4d   : > { %5558 = vmatpush1.bf16.msra.mxu1 %v7051_v53 }
 0xc4e   : > { %5559 = vmatprep.subr.bf16.mxu1 %v7056_v43 }
 0xc4f   : > { %4616 = vmatmul.mubr.bf16.gmra.mrb[60].mxu1 %v3788_v29  ;;  %4667 = vmatmul.mubr.bf16.gmra.mrb[84].mxu0 %v3788_v29 }
 0xc51   : > { %5560 = vmatpush1.bf16.msra.mxu1 %v7054_v24 }
 0xc52   : > { %5561 = vmatprep.subr.bf16.mxu1 %v7059_v62 }
 0xc55   : > { %5562 = vmatpush1.bf16.msra.mxu1 %v7057_v51 }
 0xc56   : > { %5563 = vmatprep.subr.bf16.mxu1 %v7062_v32 }
 0xc59   : > { %5564 = vmatpush1.bf16.msra.mxu1 %v7060_v42 }
 0xc5a   : > { %5565 = vmatprep.subr.bf16.mxu1 %v7065_v27 }
 0xc5d   : > { %5566 = vmatpush1.bf16.msra.mxu1 %v7063_v17 }
 0xc5e   : > { %5567 = vmatprep.subr.bf16.mxu1 %v7068_v18 }
 0xc61   : > { %5568 = vmatpush1.bf16.msra.mxu1 %v7066_v4 }
 0xc62   : > { %5569 = vmatprep.subr.bf16.mxu1 %v7071_v6 }
 0xc65   : > { %5570 = vmatpush1.bf16.msra.mxu1 %v7069_v45 }
 0xc66   : > { %5571 = vmatprep.subr.bf16.mxu1 %v7074_v19 }
 0xc69   : > { %5572 = vmatpush1.bf16.msra.mxu1 %v7072_v25 }
 0xc6a   : > { %5573 = vmatprep.subr.bf16.mxu1 %v7077_v26 }
 0xc6d   : > { %5574 = vmatpush1.bf16.msra.mxu1 %v7075_v14 }
 0xc6e   : > { %5575 = vmatprep.subr.bf16.mxu1 %v7080_v3 }
 0xc71   : > { %5576 = vmatpush1.bf16.msra.mxu1 %v7078_v28 }
 0xc72   : > { %5577 = vmatprep.subr.bf16.mxu1 %v7083_v55 }
 0xc75   : > { %5578 = vmatpush1.bf16.msra.mxu1 %v7081_v12 }
 0xc76   : > { %5579 = vmatprep.subr.bf16.mxu1 %v7086_v5 }
 0xc79   : > { %5580 = vmatpush1.bf16.msra.mxu1 %v7084_v35 }
 0xc7a   : > { %5581 = vmatprep.subr.bf16.mxu1 %v7089_v10 }
 0xc7d   : > { %5582 = vmatpush1.bf16.msra.mxu1 %v7087_v2 }
 0xc7e   : > { %5583 = vmatprep.subr.bf16.mxu1 %v7092_v59 }
 0xc81   : > { %5584 = vmatpush1.bf16.msra.mxu1 %v7090_v57 }
 0xc82   : > { %5585 = vmatprep.subr.bf16.mxu1 %v7095_v60 }
 0xc85   : > { %5586 = vmatpush1.bf16.msra.mxu1 %v7093_v1 }
 0xc86   : > { %5606 = vmatprep.subr.bf16.mxu1 %v7098_v9 }
 0xc99   : > { %v4505_v37 = vpop.f32.mrb[48].mxu1  ;;  %v4556_v33 = vpop.f32.mrb[72].mxu0 }
 0xc9a   : > { %v9192_v54 = vadd.f32 %v4505_v37, %v9177_v44  ;;  %v9195_v61 = vadd.f32 %v4556_v33, %v9181_v46  ;;  %v4507_v56 = vpop.f32.mrb[49].mxu1  ;;  %v4558_v7 = vpop.f32.mrb[73].mxu0 }
 0xc9b   : > { %v9198_v23 = vadd.f32 %v4507_v56, %v9185_v31  ;;  %v9201_v0 = vadd.f32 %v4558_v7, %v9189_v30  ;;  %v4509_v22 = vpop.f32.mrb[50].mxu1  ;;  %v4560_v8 = vpop.f32.mrb[74].mxu0 }
 0xc9c   : > { %v4675_v13 = vmul.f32 %v9192_v54, %v9192_v54  ;;  %v4677_v41 = vmul.f32 %v9195_v61, %v9195_v61  ;;  %v9208_v52 = vadd.f32 %v4509_v22, %v9177_v44  ;;  %v9211_v40 = vadd.f32 %v4560_v8, %v9181_v46  ;;  %v4511_v16 = vpop.f32.mrb[51].mxu1  ;;  %v4562_v50 = vpop.f32.mrb[75].mxu0 }
 0xc9d   : > { %v4676_v29 = vmul.f32 %v9198_v23, %v9198_v23  ;;  %v4678_v20 = vmul.f32 %v9201_v0, %v9201_v0  ;;  %v9218_v15 = vadd.f32 %v4511_v16, %v9185_v31  ;;  %v9221_v53 = vadd.f32 %v4562_v50, %v9189_v30 }
 0xc9e   : > { %v4699_v43 = vmul.f32 %v4675_v13, %v9192_v54  ;;  %v4701_v24 = vmul.f32 %v4677_v41, %v9195_v61  ;;  %v4683_v62 = vmul.f32 %v9208_v52, %v9208_v52  ;;  %v4685_v51 = vmul.f32 %v9211_v40, %v9211_v40 }
 0xc9f   : > { %v4700_v32 = vmul.f32 %v4676_v29, %v9198_v23  ;;  %v4702_v42 = vmul.f32 %v4678_v20, %v9201_v0  ;;  %v4684_v27 = vmul.f32 %v9218_v15, %v9218_v15  ;;  %v4686_v17 = vmul.f32 %v9221_v53, %v9221_v53 }
 0xca0   : > { %v4723_v18 = vmul.f32 0.044715, %v4699_v43  ;;  %v4725_v4 = vmul.f32 0.044715, %v4701_v24  ;;  %v4707_v6 = vmul.f32 %v4683_v62, %v9208_v52  ;;  %v4709_v45 = vmul.f32 %v4685_v51, %v9211_v40 }
 0xca1   : > { %v4724_v19 = vmul.f32 0.044715, %v4700_v32  ;;  %v4726_v25 = vmul.f32 0.044715, %v4702_v42  ;;  %v4708_v26 = vmul.f32 %v4684_v27, %v9218_v15  ;;  %v4710_v14 = vmul.f32 %v4686_v17, %v9221_v53 }
 0xca2   : > { %v4747_v3 = vadd.f32 %v4723_v18, %v9192_v54  ;;  %v4749_v28 = vadd.f32 %v4725_v4, %v9195_v61  ;;  %v4731_v55 = vmul.f32 0.044715, %v4707_v6  ;;  %v4733_v12 = vmul.f32 0.044715, %v4709_v45 }
 0xca3   : > { %v4748_v5 = vadd.f32 %v4724_v19, %v9198_v23  ;;  %v4750_v35 = vadd.f32 %v4726_v25, %v9201_v0  ;;  %v4732_v10 = vmul.f32 0.044715, %v4708_v26  ;;  %v4734_v2 = vmul.f32 0.044715, %v4710_v14 }
 0xca4   : > { %v4771_v59 = vmul.f32 0.7978846, %v4747_v3  ;;  %v4773_v57 = vmul.f32 0.7978846, %v4749_v28  ;;  %v4755_v60 = vadd.f32 %v4731_v55, %v9208_v52  ;;  %v4757_v1 = vadd.f32 %v4733_v12, %v9211_v40 }
 0xca5   : > { %v4772_v9 = vmul.f32 0.7978846, %v4748_v5  ;;  %v4774_v37 = vmul.f32 0.7978846, %v4750_v35  ;;  %v4756_v33 = vadd.f32 %v4732_v10, %v9218_v15  ;;  %v4758_v56 = vadd.f32 %v4734_v2, %v9221_v53 }
 0xca6   : > { %7342 = vtanh.f32 %v4771_v59  ;;  %v4779_v7 = vmul.f32 0.7978846, %v4755_v60  ;;  %v4781_v22 = vmul.f32 0.7978846, %v4757_v1  ;;  %v7102_v1 = vld [vmem:[%s9782_s10 + $0x120] ss:$8 sps:$4 sm:$0xff]  }
 0xca7   : > { %7344 = vtanh.f32 %v4773_v57  ;;  %v4780_v8 = vmul.f32 0.7978846, %v4756_v33  ;;  %v4782_v13 = vmul.f32 0.7978846, %v4758_v56  ;;  %v7110_v33 = vld [vmem:[%s9782_s10 + $0x144] ss:$8 sps:$4 sm:$0xff]  }
 0xca8   : > { %7346 = vtanh.f32 %v4772_v9  ;;  %v7107_v9 = vld [vmem:[%s9782_s10 + $0x134] ss:$8 sps:$4 sm:$0xff]   ;;  %v7108_v56 = vld [vmem:[%s9782_s10 + $0x140] ss:$8 sps:$4 sm:$0xff]  }
 0xca9   : > { %7348 = vtanh.f32 %v4774_v37  ;;  %v7105_v37 = vld [vmem:[%s9782_s10 + $0x130] ss:$8 sps:$4 sm:$0xff]  }
 0xcaa   : > { %7350 = vtanh.f32 %v4779_v7  ;;  %v7113_v7 = vld [vmem:[%s9782_s10 + $0x154] ss:$8 sps:$4 sm:$0xff]  }
 0xcab   : > { %7352 = vtanh.f32 %v4781_v22  ;;  %v7111_v22 = vld [vmem:[%s9782_s10 + $0x150] ss:$8 sps:$4 sm:$0xff]  }
 0xcac   : > { %7354 = vtanh.f32 %v4780_v8  ;;  %v7116_v8 = vld [vmem:[%s9782_s10 + $0x164] ss:$8 sps:$4 sm:$0xff]  }
 0xcad   : > { %7356 = vtanh.f32 %v4782_v13  ;;  %v7114_v13 = vld [vmem:[%s9782_s10 + $0x160] ss:$8 sps:$4 sm:$0xff]  }
 0xcb0   : > { %v7343_v41 = vpop.eup %7342 }
 0xcb1   : > { %v7345_v16 = vpop.eup %7344  ;;  %v4819_v50 = vadd.f32 1.0, %v7343_v41  ;;  %v7119_v41 = vld [vmem:[%s9782_s10 + $0x174] ss:$8 sps:$4 sm:$0xff]  }
 0xcb2   : > { %v7347_v29 = vpop.eup %7346  ;;  %v4821_v20 = vadd.f32 1.0, %v7345_v16  ;;  %v7117_v16 = vld [vmem:[%s9782_s10 + $0x170] ss:$8 sps:$4 sm:$0xff]  }
 0xcb3   : > { %v7349_v43 = vpop.eup %7348  ;;  %v4820_v24 = vadd.f32 1.0, %v7347_v29  ;;  %v4843_v42 = vmul.f32 0.5, %v4819_v50  ;;  %v7122_v50 = vld [vmem:[%s9782_s10 + $0x184] ss:$8 sps:$4 sm:$0xff]   ;;  %v7120_v29 = vld [vmem:[%s9782_s10 + $0x180] ss:$8 sps:$4 sm:$0xff]  }
 0xcb4   : > { %v7351_v62 = vpop.eup %7350  ;;  %v4822_v51 = vadd.f32 1.0, %v7349_v43  ;;  %v4845_v18 = vmul.f32 0.5, %v4821_v20  ;;  %v7125_v20 = vld [vmem:[%s9782_s10 + $0x194] ss:$8 sps:$4 sm:$0xff]   ;;  %v7123_v43 = vld [vmem:[%s9782_s10 + $0x190] ss:$8 sps:$4 sm:$0xff]  }
 0xcb5   : > { %v7353_v32 = vpop.eup %7352  ;;  %v4827_v27 = vadd.f32 1.0, %v7351_v62  ;;  %v4844_v25 = vmul.f32 0.5, %v4820_v24  ;;  %v4867_v28 = vmul.f32 %v4843_v42, %v9192_v54  ;;  %v7128_v24 = vld [vmem:[%s9782_s10 + $0x1a4] ss:$8 sps:$4 sm:$0xff]   ;;  %v7126_v62 = vld [vmem:[%s9782_s10 + $0x1a0] ss:$8 sps:$4 sm:$0xff]  }
 0xcb6   : > { %v7355_v17 = vpop.eup %7354  ;;  %v4829_v4 = vadd.f32 1.0, %v7353_v32  ;;  %v4846_v3 = vmul.f32 0.5, %v4822_v51  ;;  %v9250_v5 = vmul.f32 %v4845_v18, %v9195_v61  ;;  %v7131_v51 = vld [vmem:[%s9782_s10 + $0x1b4] ss:$8 sps:$4 sm:$0xff]   ;;  %v7129_v32 = vld [vmem:[%s9782_s10 + $0x1b0] ss:$8 sps:$4 sm:$0xff]  }
 0xcb7   : > { %v7357_v6 = vpop.eup %7356  ;;  %v4851_v45 = vmul.f32 0.5, %v4827_v27  ;;  %v4828_v19 = vadd.f32 1.0, %v7355_v17  ;;  %v4868_v59 = vmul.f32 %v4844_v25, %v9198_v23  ;;  %v7101_v23 = vld [vmem:[%s9782_s10 + $0x114] ss:$8 sps:$4 sm:$0xff]   ;;  %v7134_v42 = vld [vmem:[%s9782_s10 + $0x1c4] ss:$8 sps:$4 sm:$0xff]  }
 0xcb8   : > { %v4853_v26 = vmul.f32 0.5, %v4829_v4  ;;  %v4830_v14 = vadd.f32 1.0, %v7357_v6  ;;  %v9260_v54 = vmul.f32 %v4846_v3, %v9201_v0  ;;  %v7099_v0 = vld [vmem:[%s9782_s10 + $0x110] ss:$8 sps:$4 sm:$0xff]   ;;  %v7132_v27 = vld [vmem:[%s9782_s10 + $0x1c0] ss:$8 sps:$4 sm:$0xff]  }
 0xcb9   : > { %v4875_v55 = vmul.f32 %v4851_v45, %v9208_v52  ;;  %v4852_v12 = vmul.f32 0.5, %v4828_v19  ;;  %v7137_v17 = vld [vmem:[%s9782_s10 + $0x1d4] ss:$8 sps:$4 sm:$0xff]   ;;  %v7135_v18 = vld [vmem:[%s9782_s10 + $0x1d0] ss:$8 sps:$4 sm:$0xff]  }
 0xcba   : > { %v9253_v35 = vmul.f32 %v4853_v26, %v9211_v40  ;;  %v4854_v10 = vmul.f32 0.5, %v4830_v14  ;;  %v7096_v40 = vld [vmem:[%s9782_s10 + $0x100] ss:$8 sps:$4 sm:$0xff]   ;;  %v7140_v4 = vld [vmem:[%s9782_s10 + $0x1e4] ss:$8 sps:$4 sm:$0xff]  }
 0xcbb   : > { %v4891_v2 = vpack.c.bf16 %v4875_v55, %v4867_v28  ;;  %v4876_v57 = vmul.f32 %v4852_v12, %v9218_v15  ;;  %v7138_v6 = vld [vmem:[%s9782_s10 + $0x1e0] ss:$8 sps:$4 sm:$0xff]   ;;  %v7143_v45 = vld [vmem:[%s9782_s10 + $0x1f4] ss:$8 sps:$4 sm:$0xff]   ;;  %v7141_v19 = vld [vmem:[%s9782_s10 + $0x1f0] ss:$8 sps:$4 sm:$0xff]  }
 0xcbc   : > { %v4893_v60 = vpack.c.bf16 %v9253_v35, %v9250_v5  ;;  %v9263_v52 = vmul.f32 %v4854_v10, %v9221_v53  ;;  %v7104_v53 = vld [vmem:[%s9782_s10 + $0x124] ss:$8 sps:$4 sm:$0xff]   ;;  %v9370_v10 = vsub.s32 6, %v7822_v63 }
 0xcbd   : > { %v4892_v61 = vpack.c.bf16 %v4876_v57, %v4868_v59  ;;  %v7146_v25 = vld [vmem:[%s9782_s10 + $0x204] ss:$8 sps:$4 sm:$0xff]  }
 0xcbe   : > { %v4894_v15 = vpack.c.bf16 %v9263_v52, %v9260_v54  ;;  %v7144_v52 = vld [vmem:[%s9782_s10 + $0x200] ss:$8 sps:$4 sm:$0xff]   ;;  %v7152_v5 = vld [vmem:[%s9782_s10 + $0x224] ss:$8 sps:$4 sm:$0xff]  }
 0xcbf   : > { %5587 = vmatprep.mubr.bf16.mxu1 %v4892_v61 }
 0xcc0   : > { %5588 = vmatmul.mubr.bf16.vlgmr.msra.gmra.mrb[64].mxu1 %v4891_v2 }
 0xcc1   : > { %5607 = vmatpush1.bf16.msra.mxu1 %v7096_v40  ;;  %v9379_v40 = vsub.s32 7, %v7822_v63  ;;  %v9393_v63 = vrot.slane %v9173_v39, %v8820_v36 }
 0xcc2   : > { %5608 = vmatprep.subr.bf16.mxu1 %v7101_v23 }
 0xcc5   : > { %5609 = vmatpush1.bf16.msra.mxu1 %v7099_v0 }
 0xcc6   : > { %5610 = vmatprep.subr.bf16.mxu1 %v7104_v53 }
 0xcc9   : > { %5611 = vmatpush1.bf16.msra.mxu1 %v7102_v1 }
 0xcca   : > { %5612 = vmatprep.subr.bf16.mxu1 %v7107_v9  ;;  %v9397_v9 = vrot.slane %v9173_v39, %v9370_v10 }
 0xccd   : > { %5613 = vmatpush1.bf16.msra.mxu1 %v7105_v37 }
 0xcce   : > { %5614 = vmatprep.subr.bf16.mxu1 %v7110_v33 }
 0xcd1   : > { %5615 = vmatpush1.bf16.msra.mxu1 %v7108_v56  ;;  %v9403_v56 = vrot.slane %v9173_v39, %v8823_v21 }
 0xcd2   : > { %5616 = vmatprep.subr.bf16.mxu1 %v7113_v7  ;;  %v9407_v7 = vrot.slane %v9173_v39, %v9379_v40 }
 0xcd5   : > { %5617 = vmatpush1.bf16.msra.mxu1 %v7111_v22 }
 0xcd6   : > { %5618 = vmatprep.subr.bf16.mxu1 %v7116_v8 }
 0xcd9   : > { %5619 = vmatpush1.bf16.msra.mxu1 %v7114_v13 }
 0xcda   : > { %5620 = vmatprep.subr.bf16.mxu1 %v7119_v41 }
 0xcdd   : > { %5621 = vmatpush1.bf16.msra.mxu1 %v7117_v16 }
 0xcde   : > { %5622 = vmatprep.subr.bf16.mxu1 %v7122_v50 }
 0xce1   : > { %5623 = vmatpush1.bf16.msra.mxu1 %v7120_v29 }
 0xce2   : > { %5624 = vmatprep.subr.bf16.mxu1 %v7125_v20 }
 0xce5   : > { %5625 = vmatpush1.bf16.msra.mxu1 %v7123_v43 }
 0xce6   : > { %5626 = vmatprep.subr.bf16.mxu1 %v7128_v24 }
 0xce9   : > { %5627 = vmatpush1.bf16.msra.mxu1 %v7126_v62 }
 0xcea   : > { %5628 = vmatprep.subr.bf16.mxu1 %v7131_v51 }
 0xced   : > { %5629 = vmatpush1.bf16.msra.mxu1 %v7129_v32 }
 0xcee   : > { %5630 = vmatprep.subr.bf16.mxu1 %v7134_v42 }
 0xcf1   : > { %5631 = vmatpush1.bf16.msra.mxu1 %v7132_v27 }
 0xcf2   : > { %5632 = vmatprep.subr.bf16.mxu1 %v7137_v17 }
 0xcf5   : > { %5633 = vmatpush1.bf16.msra.mxu1 %v7135_v18 }
 0xcf6   : > { %5634 = vmatprep.subr.bf16.mxu1 %v7140_v4 }
 0xcf9   : > { %5635 = vmatpush1.bf16.msra.mxu1 %v7138_v6 }
 0xcfa   : > { %5636 = vmatprep.subr.bf16.mxu1 %v7143_v45 }
 0xcfd   : > { %5637 = vmatpush1.bf16.msra.mxu1 %v7141_v19 }
 0xcfe   : > { %5657 = vmatprep.subr.bf16.mxu1 %v7146_v25 }
 0xd12   : > { %v4515_v26 = vpop.f32.mrb[52].mxu1  ;;  %v4566_v14 = vpop.f32.mrb[76].mxu0 }
 0xd13   : > { %v9364_v3 = vadd.f32 %v4515_v26, %v9177_v44  ;;  %v9367_v28 = vadd.f32 %v4566_v14, %v9181_v46  ;;  %v4517_v55 = vpop.f32.mrb[53].mxu1  ;;  %v4568_v12 = vpop.f32.mrb[77].mxu0 }
 0xd14   : > { %v9373_v2 = vadd.f32 %v4517_v55, %v9185_v31  ;;  %v9376_v59 = vadd.f32 %v4568_v12, %v9189_v30  ;;  %v4519_v57 = vpop.f32.mrb[54].mxu1  ;;  %v4570_v61 = vpop.f32.mrb[78].mxu0 }
 0xd15   : > { %v4691_v44 = vmul.f32 %v9364_v3, %v9364_v3  ;;  %v4693_v46 = vmul.f32 %v9367_v28, %v9367_v28  ;;  %v4520_v23 = vpop.f32.mrb[55].mxu1  ;;  %v4571_v0 = vpop.f32.mrb[79].mxu0 }
 0xd16   : > { %v4692_v31 = vmul.f32 %v9373_v2, %v9373_v2  ;;  %v4694_v30 = vmul.f32 %v9376_v59, %v9376_v59 }
 0xd17   : > { %v4715_v53 = vmul.f32 %v4691_v44, %v9364_v3  ;;  %v4717_v1 = vmul.f32 %v4693_v46, %v9367_v28 }
 0xd18   : > { %v4716_v37 = vmul.f32 %v4692_v31, %v9373_v2  ;;  %v4718_v33 = vmul.f32 %v4694_v30, %v9376_v59 }
 0xd19   : > { %v4739_v22 = vmul.f32 0.044715, %v4715_v53  ;;  %v4741_v8 = vmul.f32 0.044715, %v4717_v1 }
 0xd1a   : > { %v4740_v36 = vmul.f32 0.044715, %v4716_v37  ;;  %v4742_v13 = vmul.f32 0.044715, %v4718_v33  ;;  %v4607_v41 = vpop.f32.mrb[56].mxu1  ;;  %v4658_v16 = vpop.f32.mrb[80].mxu0 }
 0xd1b   : > { %v4763_v50 = vadd.f32 %v4739_v22, %v9364_v3  ;;  %v4765_v29 = vadd.f32 %v4741_v8, %v9367_v28  ;;  %v9412_v20 = vadd.f32 %v4607_v41, %v9393_v63  ;;  %v9415_v21 = vadd.f32 %v4658_v16, %v9397_v9  ;;  %v4609_v43 = vpop.f32.mrb[57].mxu1  ;;  %v4660_v24 = vpop.f32.mrb[81].mxu0 }
 0xd1c   : > { %v4764_v39 = vadd.f32 %v4740_v36, %v9373_v2  ;;  %v4766_v62 = vadd.f32 %v4742_v13, %v9376_v59  ;;  %v9420_v51 = vadd.f32 %v4609_v43, %v9403_v56  ;;  %v9423_v32 = vadd.f32 %v4660_v24, %v9407_v7  ;;  %v4611_v42 = vpop.f32.mrb[58].mxu1  ;;  %v4662_v27 = vpop.f32.mrb[82].mxu0 }
 0xd1d   : > { %v4787_v17 = vmul.f32 0.7978846, %v4763_v50  ;;  %v4789_v18 = vmul.f32 0.7978846, %v4765_v29  ;;  %v4679_v4 = vmul.f32 %v9412_v20, %v9412_v20  ;;  %v4681_v6 = vmul.f32 %v9415_v21, %v9415_v21  ;;  %v4613_v45 = vpop.f32.mrb[59].mxu1  ;;  %v4664_v19 = vpop.f32.mrb[83].mxu0 }
 0xd1e   : > { %v4788_v25 = vmul.f32 0.7978846, %v4764_v39  ;;  %v4790_v26 = vmul.f32 0.7978846, %v4766_v62  ;;  %v4680_v14 = vmul.f32 %v9420_v51, %v9420_v51  ;;  %v4682_v55 = vmul.f32 %v9423_v32, %v9423_v32 }
 0xd1f   : > { %7358 = vtanh.f32 %v4787_v17  ;;  %v4703_v12 = vmul.f32 %v4679_v4, %v9412_v20  ;;  %v4705_v57 = vmul.f32 %v4681_v6, %v9415_v21  ;;  %v9436_v61 = vadd.f32 %v4611_v42, %v9393_v63 }
 0xd20   : > { %7360 = vtanh.f32 %v4789_v18  ;;  %v4704_v44 = vmul.f32 %v4680_v14, %v9420_v51  ;;  %v4706_v46 = vmul.f32 %v4682_v55, %v9423_v32  ;;  %v9441_v23 = vadd.f32 %v4662_v27, %v9397_v9 }
 0xd21   : > { %7362 = vtanh.f32 %v4788_v25  ;;  %v4727_v0 = vmul.f32 0.044715, %v4703_v12  ;;  %v4729_v31 = vmul.f32 0.044715, %v4705_v57  ;;  %v4687_v30 = vmul.f32 %v9436_v61, %v9436_v61 }
 0xd22   : > { %7364 = vtanh.f32 %v4790_v26  ;;  %v4728_v53 = vmul.f32 0.044715, %v4704_v44  ;;  %v4730_v1 = vmul.f32 0.044715, %v4706_v46  ;;  %v4689_v37 = vmul.f32 %v9441_v23, %v9441_v23  ;;  %v9447_v33 = vpop.f32.mrb[60].mxu1  ;;  %v9449_v22 = vpop.f32.mrb[84].mxu0 }
 0xd23   : > { %v4751_v8 = vadd.f32 %v4727_v0, %v9412_v20  ;;  %v4753_v36 = vadd.f32 %v4729_v31, %v9415_v21  ;;  %v4711_v13 = vmul.f32 %v4687_v30, %v9436_v61  ;;  %v9455_v41 = vadd.f32 %v4613_v45, %v9403_v56  ;;  %v9457_v16 = vpop.f32.mrb[61].mxu1  ;;  %v9459_v50 = vpop.f32.mrb[85].mxu0 }
 0xd24   : > { %v4752_v29 = vadd.f32 %v4728_v53, %v9420_v51  ;;  %v4754_v43 = vadd.f32 %v4730_v1, %v9423_v32  ;;  %v4713_v24 = vmul.f32 %v4689_v37, %v9441_v23  ;;  %v9465_v39 = vadd.f32 %v4664_v19, %v9407_v7  ;;  %v4621_v62 = vpop.f32.mrb[62].mxu1  ;;  %v4672_v42 = vpop.f32.mrb[86].mxu0 }
 0xd25   : > { %v4775_v27 = vmul.f32 0.7978846, %v4751_v8  ;;  %v4777_v17 = vmul.f32 0.7978846, %v4753_v36  ;;  %v4735_v18 = vmul.f32 0.044715, %v4711_v13  ;;  %v4688_v4 = vmul.f32 %v9455_v41, %v9455_v41 }
 0xd26   : > { %v4776_v6 = vmul.f32 0.7978846, %v4752_v29  ;;  %v4778_v45 = vmul.f32 0.7978846, %v4754_v43  ;;  %v4737_v25 = vmul.f32 0.044715, %v4713_v24  ;;  %v4690_v26 = vmul.f32 %v9465_v39, %v9465_v39 }
 0xd27   : > { %7366 = vtanh.f32 %v4775_v27  ;;  %v4759_v14 = vadd.f32 %v4735_v18, %v9436_v61  ;;  %v4712_v19 = vmul.f32 %v4688_v4, %v9455_v41  ;;  %v4622_v55 = vpop.f32.mrb[63].mxu1  ;;  %v4673_v12 = vpop.f32.mrb[87].mxu0 }
 0xd28   : > { %7368 = vtanh.f32 %v4777_v17  ;;  %v4761_v57 = vadd.f32 %v4737_v25, %v9441_v23  ;;  %v4714_v44 = vmul.f32 %v4690_v26, %v9465_v39 }
 0xd29   : > { %v7359_v46 = vpop.eup %7358  ;;  %7370 = vtanh.f32 %v4776_v6  ;;  %v4783_v0 = vmul.f32 0.7978846, %v4759_v14  ;;  %v4736_v31 = vmul.f32 0.044715, %v4712_v19 }
 0xd2a   : > { %v7361_v30 = vpop.eup %7360  ;;  %7372 = vtanh.f32 %v4778_v45  ;;  %v4785_v53 = vmul.f32 0.7978846, %v4761_v57  ;;  %v4738_v1 = vmul.f32 0.044715, %v4714_v44  ;;  %v4835_v62 = vadd.f32 1.0, %v7359_v46 }
 0xd2b   : > { %v7363_v37 = vpop.eup %7362  ;;  %7374 = vtanh.f32 %v4783_v0  ;;  %v4760_v8 = vadd.f32 %v4736_v31, %v9455_v41 }
 0xd2c   : > { %v7365_v36 = vpop.eup %7364  ;;  %7376 = vtanh.f32 %v4785_v53  ;;  %v4762_v13 = vadd.f32 %v4738_v1, %v9465_v39  ;;  %v4836_v43 = vadd.f32 1.0, %v7363_v37  ;;  %v4859_v27 = vmul.f32 0.5, %v4835_v62 }
 0xd2d   : > { %v4784_v29 = vmul.f32 0.7978846, %v4760_v8  ;;  %v4838_v4 = vadd.f32 1.0, %v7365_v36  ;;  %v4837_v37 = vadd.f32 1.0, %v7361_v30 }
 0xd2e   : > { %v4786_v24 = vmul.f32 0.7978846, %v4762_v13  ;;  %v4860_v42 = vmul.f32 0.5, %v4836_v43  ;;  %v4883_v25 = vmul.f32 %v4859_v27, %v9364_v3 }
 0xd2f   : > { %7378 = vtanh.f32 %v4784_v29  ;;  %v4862_v44 = vmul.f32 0.5, %v4838_v4  ;;  %v4861_v30 = vmul.f32 0.5, %v4837_v37  ;;  %v7168_v37 = vld [vmem:[%s9782_s10 + $0x280] ss:$8 sps:$4 sm:$0xff]  }
 0xd30   : > { %7380 = vtanh.f32 %v4786_v24  ;;  %v4884_v18 = vmul.f32 %v4860_v42, %v9373_v2  ;;  %v4899_v12 = vpack.c.bf16 %v4883_v25, %v4883_v25  ;;  %v7147_v25 = vld [vmem:[%s9782_s10 + $0x210] ss:$8 sps:$4 sm:$0xff]  }
 0xd31   : > { %v7367_v17 = vpop.eup %7366  ;;  %v4886_v13 = vmul.f32 %v4862_v44, %v9376_v59  ;;  %v4885_v35 = vmul.f32 %v4861_v30, %v9367_v28  ;;  %v7153_v28 = vld [vmem:[%s9782_s10 + $0x230] ss:$8 sps:$4 sm:$0xff]   ;;  %v7182_v30 = vld [vmem:[%s9782_s10 + $0x2c4] ss:$8 sps:$4 sm:$0xff]  }
 0xd32   : > { %v7369_v6 = vpop.eup %7368  ;;  %v4823_v45 = vadd.f32 1.0, %v7367_v17  ;;  %v4900_v19 = vpack.c.bf16 %v4884_v18, %v4884_v18  ;;  %v7159_v44 = vld [vmem:[%s9782_s10 + $0x250] ss:$8 sps:$4 sm:$0xff]  }
 0xd33   : > { %v7371_v26 = vpop.eup %7370  ;;  %v4825_v14 = vadd.f32 1.0, %v7369_v6 }
 0xd34   : > { %v7373_v55 = vpop.eup %7372  ;;  %5597 = vmatprep.mubr.bf16.mxu1 %v4900_v19  ;;  %v4847_v0 = vmul.f32 0.5, %v4823_v45  ;;  %v4824_v53 = vadd.f32 1.0, %v7371_v26  ;;  %v7158_v19 = vld [vmem:[%s9782_s10 + $0x244] ss:$8 sps:$4 sm:$0xff]  }
 0xd35   : > { %v7375_v57 = vpop.eup %7374  ;;  %5598 = vmatmul.mubr.bf16.gmra.mrb[68].mxu1 %v4899_v12  ;;  %v4849_v1 = vmul.f32 0.5, %v4825_v14  ;;  %v4826_v29 = vadd.f32 1.0, %v7373_v55  ;;  %v7156_v55 = vld [vmem:[%s9782_s10 + $0x240] ss:$8 sps:$4 sm:$0xff]   ;;  %v9542_v12 = vadd.f32 %v9457_v16, %v9403_v56  ;;  %v9557_v56 = vadd.f32 %v9447_v33, %v9393_v63  ;;  %v7165_v63 = vld [vmem:[%s9782_s10 + $0x270] ss:$8 sps:$4 sm:$0xff]  }
 0xd36   : > { %v7377_v46 = vpop.eup %7376  ;;  %v4831_v31 = vadd.f32 1.0, %v7375_v57  ;;  %5638 = vmatprep.mubr.bf16.mxu1 %v4894_v15  ;;  %v9484_v24 = vmul.f32 %v4847_v0, %v9412_v20  ;;  %v4848_v27 = vmul.f32 0.5, %v4824_v53  ;;  %v7161_v57 = vld [vmem:[%s9782_s10 + $0x254] ss:$8 sps:$4 sm:$0xff]   ;;  %v7164_v0 = vld [vmem:[%s9782_s10 + $0x264] ss:$8 sps:$4 sm:$0xff]  }
 0xd37   : > { %v4833_v2 = vadd.f32 1.0, %v7377_v46  ;;  %v9490_v17 = vmul.f32 %v4849_v1, %v9415_v21  ;;  %v4850_v59 = vmul.f32 0.5, %v4826_v29  ;;  %v4696_v46 = vmul.f32 %v9542_v12, %v9542_v12  ;;  %v7162_v16 = vld [vmem:[%s9782_s10 + $0x260] ss:$8 sps:$4 sm:$0xff]   ;;  %v7167_v53 = vld [vmem:[%s9782_s10 + $0x274] ss:$8 sps:$4 sm:$0xff]  }
 0xd38   : > { %v4855_v3 = vmul.f32 0.5, %v4831_v31  ;;  %v4872_v6 = vmul.f32 %v4848_v27, %v9420_v51  ;;  %v4695_v1 = vmul.f32 %v9557_v56, %v9557_v56  ;;  %v7171_v29 = vld [vmem:[%s9782_s10 + $0x290] ss:$8 sps:$4 sm:$0xff]  }
 0xd39   : > { %v7379_v8 = vpop.eup %7378  ;;  %v4857_v36 = vmul.f32 0.5, %v4833_v2  ;;  %v9514_v26 = vmul.f32 %v4850_v59, %v9423_v32  ;;  %v7150_v32 = vld [vmem:[%s9782_s10 + $0x220] ss:$8 sps:$4 sm:$0xff]   ;;  %v4720_v31 = vmul.f32 %v4696_v46, %v9542_v12  ;;  %v7170_v2 = vld [vmem:[%s9782_s10 + $0x284] ss:$8 sps:$4 sm:$0xff]  }
 0xd3a   : > { %v7381_v43 = vpop.eup %7380  ;;  %v9487_v62 = vmul.f32 %v4855_v3, %v9436_v61  ;;  %v4832_v42 = vadd.f32 1.0, %v7379_v8  ;;  %v7149_v61 = vld [vmem:[%s9782_s10 + $0x214] ss:$8 sps:$4 sm:$0xff]   ;;  %v4719_v3 = vmul.f32 %v4695_v1, %v9557_v56  ;;  %v9662_v1 = vadd.f32 %v9459_v50, %v9407_v7  ;;  %v7210_v50 = vld [vmem:[%s9782_s10 + $0x360] ss:$8 sps:$4 sm:$0xff]  }
 0xd3b   : > { %v9493_v54 = vmul.f32 %v4857_v36, %v9441_v23  ;;  %v4834_v15 = vadd.f32 1.0, %v7381_v43  ;;  %v4902_v23 = vpack.c.bf16 %v4886_v13, %v4886_v13  ;;  %v4744_v33 = vmul.f32 0.044715, %v4720_v31  ;;  %v7173_v36 = vld [vmem:[%s9782_s10 + $0x294] ss:$8 sps:$4 sm:$0xff]  }
 0xd3c   : > { %v4895_v20 = vpack.c.bf16 %v9487_v62, %v9484_v24  ;;  %v4856_v18 = vmul.f32 0.5, %v4832_v42  ;;  %v4743_v13 = vmul.f32 0.044715, %v4719_v3  ;;  %v7176_v42 = vld [vmem:[%s9782_s10 + $0x2a4] ss:$8 sps:$4 sm:$0xff]   ;;  %v4669_v7 = vadd.f32 %v9449_v22, %v9397_v9 }
 0xd3d   : > { %v4897_v21 = vpack.c.bf16 %v9493_v54, %v9490_v17  ;;  %v4858_v4 = vmul.f32 0.5, %v4834_v15  ;;  %5639 = vmatmul.mubr.bf16.vlgmr.msra.gmra.mrb[64].mxu1 %v4893_v60  ;;  %v4768_v8 = vadd.f32 %v4744_v33, %v9542_v12  ;;  %v7179_v15 = vld [vmem:[%s9782_s10 + $0x2b4] ss:$8 sps:$4 sm:$0xff]   ;;  %v7198_v31 = vld [vmem:[%s9782_s10 + $0x320] ss:$8 sps:$4 sm:$0xff]  }
 0xd3e   : > { %v4880_v45 = vmul.f32 %v4856_v18, %v9455_v41  ;;  %5658 = vmatpush1.bf16.msra.mxu1 %v7144_v52  ;;  %5648 = vmatprep.mubr.bf16.mxu1 %v4902_v23  ;;  %v4901_v41 = vpack.c.bf16 %v4885_v35, %v4885_v35  ;;  %v4767_v27 = vadd.f32 %v4743_v13, %v9557_v56  ;;  %v7174_v52 = vld [vmem:[%s9782_s10 + $0x2a0] ss:$8 sps:$4 sm:$0xff]   ;;  %v7185_v23 = vld [vmem:[%s9782_s10 + $0x2d4] ss:$8 sps:$4 sm:$0xff]   ;;  %v7218_v9 = vld [vmem:[%s9782_s10 + $0x384] ss:$8 sps:$4 sm:$0xff]  }
 0xd3f   : > { %v9517_v14 = vmul.f32 %v4858_v4, %v9465_v39  ;;  %5659 = vmatprep.subr.bf16.mxu1 %v7149_v61  ;;  %v7155_v39 = vld [vmem:[%s9782_s10 + $0x234] ss:$8 sps:$4 sm:$0xff]   ;;  %v4792_v43 = vmul.f32 0.7978846, %v4768_v8  ;;  %v7177_v61 = vld [vmem:[%s9782_s10 + $0x2b0] ss:$8 sps:$4 sm:$0xff]   ;;  %v4697_v3 = vmul.f32 %v4669_v7, %v4669_v7 }
 0xd40   : > { %v4896_v60 = vpack.c.bf16 %v4880_v45, %v4872_v6  ;;  %v4791_v59 = vmul.f32 0.7978846, %v4767_v27  ;;  %v7180_v18 = vld [vmem:[%s9782_s10 + $0x2c0] ss:$8 sps:$4 sm:$0xff]   ;;  %v7183_v6 = vld [vmem:[%s9782_s10 + $0x2d0] ss:$8 sps:$4 sm:$0xff]  }
 0xd41   : > { %v4898_v51 = vpack.c.bf16 %v9517_v14, %v9514_v26  ;;  %7382 = vtanh.f32 %v4792_v43  ;;  %v7188_v45 = vld [vmem:[%s9782_s10 + $0x2e4] ss:$8 sps:$4 sm:$0xff]   ;;  %v7191_v35 = vld [vmem:[%s9782_s10 + $0x2f4] ss:$8 sps:$4 sm:$0xff]   ;;  %v7207_v14 = vld [vmem:[%s9782_s10 + $0x350] ss:$8 sps:$4 sm:$0xff]   ;;  %v4721_v22 = vmul.f32 %v4697_v3, %v4669_v7 }
 0xd42   : > { %5660 = vmatpush1.bf16.msra.mxu1 %v7147_v25  ;;  %7384 = vtanh.f32 %v4791_v59  ;;  %v7203_v62 = vld [vmem:[%s9782_s10 + $0x334] ss:$8 sps:$4 sm:$0xff]   ;;  %v7222_v59 = vld [vmem:[%s9782_s10 + $0x3a0] ss:$8 sps:$4 sm:$0xff]  }
 0xd43   : > { %5661 = vmatprep.subr.bf16.mxu1 %v7152_v5  ;;  %v7186_v5 = vld [vmem:[%s9782_s10 + $0x2e0] ss:$8 sps:$4 sm:$0xff]   ;;  %v7209_v26 = vld [vmem:[%s9782_s10 + $0x354] ss:$8 sps:$4 sm:$0xff]   ;;  %v4745_v43 = vmul.f32 0.044715, %v4721_v22 }
 0xd45   : > { %5649 = vmatmul.mubr.bf16.gmra.mrb[72].mxu1 %v4901_v41  ;;  %v7189_v41 = vld [vmem:[%s9782_s10 + $0x2f0] ss:$8 sps:$4 sm:$0xff]  }
 0xd46   : > { %5662 = vmatpush1.bf16.msra.mxu1 %v7150_v32  ;;  %5689 = vmatprep.mubr.bf16.mxu1 %v4896_v60 }
 0xd47   : > { %5663 = vmatprep.subr.bf16.mxu1 %v7155_v39  ;;  %v7194_v39 = vld [vmem:[%s9782_s10 + $0x304] ss:$8 sps:$4 sm:$0xff]  }
 0xd4a   : > { %5664 = vmatpush1.bf16.msra.mxu1 %v7153_v28 }
 0xd4b   : > { %5665 = vmatprep.subr.bf16.mxu1 %v7158_v19  ;;  %v7383_v4 = vpop.eup %7382 }
 0xd4c   : > { %v4840_v25 = vadd.f32 1.0, %v7383_v4  ;;  %v7385_v60 = vpop.eup %7384  ;;  %v7228_v4 = vld [vmem:[%s9782_s10 + $0x3c0] ss:$8 sps:$4 sm:$0xff]  }
 0xd4d   : > { %v4839_v28 = vadd.f32 1.0, %v7385_v60  ;;  %v7234_v60 = vld [vmem:[%s9782_s10 + $0x3e0] ss:$8 sps:$4 sm:$0xff]  }
 0xd4e   : > { %5666 = vmatpush1.bf16.msra.mxu1 %v7156_v55  ;;  %v4864_v32 = vmul.f32 0.5, %v4840_v25  ;;  %v7192_v55 = vld [vmem:[%s9782_s10 + $0x300] ss:$8 sps:$4 sm:$0xff]   ;;  %v7231_v25 = vld [vmem:[%s9782_s10 + $0x3d0] ss:$8 sps:$4 sm:$0xff]  }
 0xd4f   : > { %5667 = vmatprep.subr.bf16.mxu1 %v7161_v57  ;;  %v7197_v57 = vld [vmem:[%s9782_s10 + $0x314] ss:$8 sps:$4 sm:$0xff]  }
 0xd50   : > { %v4888_v19 = vmul.f32 %v4864_v32, %v9542_v12  ;;  %v7195_v12 = vld [vmem:[%s9782_s10 + $0x310] ss:$8 sps:$4 sm:$0xff]   ;;  %v7239_v32 = vld [vmem:[%s9782_s10 + $0x3f4] ss:$8 sps:$4 sm:$0xff]  }
 0xd52   : > { %5668 = vmatpush1.bf16.msra.mxu1 %v7159_v44  ;;  %v4863_v44 = vmul.f32 0.5, %v4839_v28  ;;  %v4904_v46 = vpack.c.bf16 %v4888_v19, %v4888_v19  ;;  %v7237_v28 = vld [vmem:[%s9782_s10 + $0x3f0] ss:$8 sps:$4 sm:$0xff]  }
 0xd53   : > { %5669 = vmatprep.subr.bf16.mxu1 %v7164_v0 }
 0xd54   : > { %v4887_v0 = vmul.f32 %v4863_v44, %v9557_v56  ;;  %v7206_v56 = vld [vmem:[%s9782_s10 + $0x344] ss:$8 sps:$4 sm:$0xff]  }
 0xd56   : > { %5670 = vmatpush1.bf16.msra.mxu1 %v7162_v16  ;;  %v7200_v16 = vld [vmem:[%s9782_s10 + $0x324] ss:$8 sps:$4 sm:$0xff]   ;;  %v4903_v24 = vpack.c.bf16 %v4887_v0, %v4887_v0 }
 0xd57   : > { %5671 = vmatprep.subr.bf16.mxu1 %v7167_v53  ;;  %v7204_v53 = vld [vmem:[%s9782_s10 + $0x340] ss:$8 sps:$4 sm:$0xff]  }
 0xd5a   : > { %5672 = vmatpush1.bf16.msra.mxu1 %v7165_v63  ;;  %v7212_v63 = vld [vmem:[%s9782_s10 + $0x364] ss:$8 sps:$4 sm:$0xff]  }
 0xd5b   : > { %5673 = vmatprep.subr.bf16.mxu1 %v7170_v2  ;;  %v7215_v2 = vld [vmem:[%s9782_s10 + $0x374] ss:$8 sps:$4 sm:$0xff]  }
 0xd5e   : > { %5674 = vmatpush1.bf16.msra.mxu1 %v7168_v37  ;;  %v7213_v37 = vld [vmem:[%s9782_s10 + $0x370] ss:$8 sps:$4 sm:$0xff]  }
 0xd5f   : > { %5675 = vmatprep.subr.bf16.mxu1 %v7173_v36  ;;  %v7216_v36 = vld [vmem:[%s9782_s10 + $0x380] ss:$8 sps:$4 sm:$0xff]  }
 0xd62   : > { %5676 = vmatpush1.bf16.msra.mxu1 %v7171_v29  ;;  %v7221_v29 = vld [vmem:[%s9782_s10 + $0x394] ss:$8 sps:$4 sm:$0xff]  }
 0xd63   : > { %5677 = vmatprep.subr.bf16.mxu1 %v7176_v42  ;;  %v7219_v42 = vld [vmem:[%s9782_s10 + $0x390] ss:$8 sps:$4 sm:$0xff]  }
 0xd66   : > { %5678 = vmatpush1.bf16.msra.mxu1 %v7174_v52  ;;  %v7224_v52 = vld [vmem:[%s9782_s10 + $0x3a4] ss:$8 sps:$4 sm:$0xff]  }
 0xd67   : > { %5679 = vmatprep.subr.bf16.mxu1 %v7179_v15  ;;  %v4769_v15 = vadd.f32 %v4745_v43, %v4669_v7 }
 0xd6a   : > { %5680 = vmatpush1.bf16.msra.mxu1 %v7177_v61  ;;  %v7227_v61 = vld [vmem:[%s9782_s10 + $0x3b4] ss:$8 sps:$4 sm:$0xff]  }
 0xd6b   : > { %5681 = vmatprep.subr.bf16.mxu1 %v7182_v30  ;;  %v4793_v30 = vmul.f32 0.7978846, %v4769_v15 }
 0xd6e   : > { %5682 = vmatpush1.bf16.msra.mxu1 %v7180_v18  ;;  %v7225_v18 = vld [vmem:[%s9782_s10 + $0x3b0] ss:$8 sps:$4 sm:$0xff]  }
 0xd6f   : > { %5683 = vmatprep.subr.bf16.mxu1 %v7185_v23  ;;  %v7230_v23 = vld [vmem:[%s9782_s10 + $0x3c4] ss:$8 sps:$4 sm:$0xff]  }
 0xd72   : > { %5684 = vmatpush1.bf16.msra.mxu1 %v7183_v6  ;;  %v7233_v6 = vld [vmem:[%s9782_s10 + $0x3d4] ss:$8 sps:$4 sm:$0xff]  }
 0xd73   : > { %5685 = vmatprep.subr.bf16.mxu1 %v7188_v45 }
 0xd76   : > { %5686 = vmatpush1.bf16.msra.mxu1 %v7186_v5  ;;  %v7236_v5 = vld [vmem:[%s9782_s10 + $0x3e4] ss:$8 sps:$4 sm:$0xff]  }
 0xd77   : > { %5687 = vmatprep.subr.bf16.mxu1 %v7191_v35 }
 0xd7a   : > { %5688 = vmatpush1.bf16.msra.mxu1 %v7189_v41 }
 0xd7b   : > { %5708 = vmatprep.subr.bf16.mxu1 %v7194_v39 }
 0xd7d   : > { %5690 = vmatmul.mubr.bf16.vlgmr.msra.gmra.mrb[64].mxu1 %v4895_v20  ;;  %v7201_v20 = vld [vmem:[%s9782_s10 + $0x330] ss:$8 sps:$4 sm:$0xff]  }
 0xd7e   : > { %5699 = vmatprep.mubr.bf16.mxu1 %v4904_v46  ;;  %5709 = vmatpush1.bf16.msra.mxu1 %v7192_v55 }
 0xd7f   : > { %5710 = vmatprep.subr.bf16.mxu1 %v7197_v57 }
 0xd82   : > { %5711 = vmatpush1.bf16.msra.mxu1 %v7195_v12 }
 0xd83   : > { %5712 = vmatprep.subr.bf16.mxu1 %v7200_v16 }
 0xd85   : > { %5700 = vmatmul.mubr.bf16.gmra.mrb[76].mxu1 %v4903_v24 }
 0xd86   : > { %5713 = vmatpush1.bf16.msra.mxu1 %v7198_v31  ;;  %5740 = vmatprep.mubr.bf16.mxu1 %v4898_v51  ;;  %v4698_v51 = vmul.f32 %v9662_v1, %v9662_v1 }
 0xd87   : > { %5714 = vmatprep.subr.bf16.mxu1 %v7203_v62  ;;  %v601_v62 = vld [vmem:[%s9779_s7 + $0x10] sm:$0xff] }
 0xd88   : > { %v4722_v33 = vmul.f32 %v4698_v51, %v9662_v1 }
 0xd8a   : > { %5715 = vmatpush1.bf16.msra.mxu1 %v7201_v20  ;;  %v4746_v8 = vmul.f32 0.044715, %v4722_v33  ;;  %v602_v20 = vld [vmem:[%s9779_s7 + $0x18] sm:$0xff] }
 0xd8b   : > { %5716 = vmatprep.subr.bf16.mxu1 %v7206_v56  ;;  %v4910_v56 = vrot.slane %v601_v62, %v7839_v11  ;;  %v4914_v17 = vrot.slane %v602_v20, %v7839_v11 }
 0xd8c   : > { %v4770_v13 = vadd.f32 %v4746_v8, %v9662_v1 }
 0xd8e   : > { %5717 = vmatpush1.bf16.msra.mxu1 %v7204_v53  ;;  %v4794_v27 = vmul.f32 0.7978846, %v4770_v13 }
 0xd8f   : > { %5718 = vmatprep.subr.bf16.mxu1 %v7209_v26 }
 0xd90   : > { %7386 = vtanh.f32 %v4794_v27 }
 0xd91   : > { %7388 = vtanh.f32 %v4793_v30 }
 0xd92   : > { %5719 = vmatpush1.bf16.msra.mxu1 %v7207_v14 }
 0xd93   : > { %5720 = vmatprep.subr.bf16.mxu1 %v7212_v63 }
 0xd96   : > { %5721 = vmatpush1.bf16.msra.mxu1 %v7210_v50 }
 0xd97   : > { %5722 = vmatprep.subr.bf16.mxu1 %v7215_v2 }
 0xd9a   : > { %5723 = vmatpush1.bf16.msra.mxu1 %v7213_v37  ;;  %v7387_v45 = vpop.eup %7386 }
 0xd9b   : > { %5724 = vmatprep.subr.bf16.mxu1 %v7218_v9  ;;  %v4842_v35 = vadd.f32 1.0, %v7387_v45  ;;  %v7389_v41 = vpop.eup %7388 }
 0xd9c   : > { %v4841_v19 = vadd.f32 1.0, %v7389_v41 }
 0xd9d   : > { %v4866_v39 = vmul.f32 0.5, %v4842_v35 }
 0xd9e   : > { %5725 = vmatpush1.bf16.msra.mxu1 %v7216_v36  ;;  %v4865_v57 = vmul.f32 0.5, %v4841_v19 }
 0xd9f   : > { %5726 = vmatprep.subr.bf16.mxu1 %v7221_v29  ;;  %v4890_v55 = vmul.f32 %v4866_v39, %v9662_v1 }
 0xda0   : > { %v4889_v46 = vmul.f32 %v4865_v57, %v4669_v7 }
 0xda1   : > { %v4906_v44 = vpack.c.bf16 %v4890_v55, %v4890_v55 }
 0xda2   : > { %5727 = vmatpush1.bf16.msra.mxu1 %v7219_v42  ;;  %v4905_v12 = vpack.c.bf16 %v4889_v46, %v4889_v46 }
 0xda3   : > { %5728 = vmatprep.subr.bf16.mxu1 %v7224_v52 }
 0xda6   : > { %5729 = vmatpush1.bf16.msra.mxu1 %v7222_v59 }
 0xda7   : > { %5730 = vmatprep.subr.bf16.mxu1 %v7227_v61 }
 0xdaa   : > { %5731 = vmatpush1.bf16.msra.mxu1 %v7225_v18 }
 0xdab   : > { %5732 = vmatprep.subr.bf16.mxu1 %v7230_v23 }
 0xdae   : > { %5733 = vmatpush1.bf16.msra.mxu1 %v7228_v4 }
 0xdaf   : > { %5734 = vmatprep.subr.bf16.mxu1 %v7233_v6 }
 0xdb2   : > { %5735 = vmatpush1.bf16.msra.mxu1 %v7231_v25 }
 0xdb3   : > { %5736 = vmatprep.subr.bf16.mxu1 %v7236_v5 }
 0xdb6   : > { %5737 = vmatpush1.bf16.msra.mxu1 %v7234_v60 }
 0xdb7   : > { %5738 = vmatprep.subr.bf16.mxu1 %v7239_v32 }
 0xdba   : > { %5739 = vmatpush1.bf16.msra.mxu1 %v7237_v28 }
 0xdbd   : > { %5741 = vmatmul.mubr.bf16.vlgmr.msra.gmra.mrb[64].mxu1 %v4897_v21 }
 0xdbe   : > { %5750 = vmatprep.mubr.bf16.mxu1 %v4906_v44 }
 0xdc5   : > { %5751 = vmatmul.mubr.bf16.gmra.mrb[80].mxu1 %v4905_v12 }
 0xe08   : > { %v5599_v0 = vpop.f32.mrb[68].mxu1 }
 0xe09   : > { %v5601_v16 = vpop.f32.mrb[69].mxu1  ;;  %v5600_v54 = vadd.f32 %v5599_v0, %v4910_v56 }
 0xe0a   : > { %v5603_v31 = vpop.f32.mrb[70].mxu1  ;;  %v5602_v21 = vadd.f32 %v5601_v16, %v4914_v17 }
 0xe0b   : > { %v5604_v24 = vpop.f32.mrb[71].mxu1 }
 0xe18   : > { %v5650_v53 = vpop.f32.mrb[72].mxu1 }
 0xe19   : > { %v5651_v1 = vadd.f32 %v5650_v53, %v5600_v54  ;;  %v5652_v26 = vpop.f32.mrb[73].mxu1 }
 0xe1a   : > { %v5653_v14 = vadd.f32 %v5652_v26, %v5602_v21  ;;  %v5654_v51 = vpop.f32.mrb[74].mxu1 }
 0xe1b   : > { %v5655_v63 = vpop.f32.mrb[75].mxu1 }
 0xe1c   : > { %v7399_v63 = vld [vmem:[%s9779_s7 + $0x8] sm:$0xff] }
 0xe58   : > { %v5701_v7 = vpop.f32.mrb[76].mxu1 }
 0xe59   : > { %v5702_v50 = vadd.f32 %v5701_v7, %v5651_v1  ;;  %v5703_v33 = vpop.f32.mrb[77].mxu1  ;;  %v5820_v7 = vrot.slane %v7399_v63, %v9370_v10 }
 0xe5a   : > { %v5704_v2 = vadd.f32 %v5703_v33, %v5653_v14  ;;  %v5705_v3 = vpop.f32.mrb[78].mxu1  ;;  %v7398_v14 = vld [vmem:[%s9779_s7] sm:$0xff] }
 0xe5b   : > { %v5706_v37 = vpop.f32.mrb[79].mxu1  ;;  %v5816_v51 = vrot.slane %v7398_v14, %v9370_v10  ;;  %v5830_v33 = vrot.slane %v7398_v14, %v9379_v40 }
 0xe90   : > { %v5742_v8 = vpop.f32.mrb[64].mxu1 }
 0xe91   : > { %v6762_v9 = vadd.f32 %v5742_v8, %v4910_v56  ;;  %v5744_v22 = vpop.f32.mrb[65].mxu1 }
 0xe92   : > { %v6763_v36 = vadd.f32 %v5744_v22, %v4914_v17  ;;  %v5746_v13 = vpop.f32.mrb[66].mxu1 }
 0xe93   : > { %v5759_v11 = vadd.f32 %v6762_v9, %v8859_v48  ;;  %v6764_v29 = vadd.f32 %v5746_v13, %v4910_v56  ;;  %v5748_v43 = vpop.f32.mrb[67].mxu1 }
 0xe94   : > { %v5760_v42 = vadd.f32 %v6763_v36, %v8853_v34  ;;  %v6765_v27 = vadd.f32 %v5748_v43, %v4914_v17 }
 0xe95   : > { %v5761_v52 = vadd.f32 %v6764_v29, %v8862_v49 }
 0xe96   : > { %v5762_v15 = vadd.f32 %v6765_v27, %v8856_v38  ;;  %v5765_v59 = vadd.f32 %v5760_v42, %v5759_v11 }
 0xe98   : > { %v5752_v61 = vpop.f32.mrb[80].mxu1  ;;  %5766 = vadd.xlane.f32.xlu1 %v5765_v59  ;;  %v5768_v30 = vadd.f32 %v5762_v15, %v5761_v52 }
 0xe99   : > { %v5753_v18 = vadd.f32 %v5752_v61, %v5702_v50  ;;  %v5754_v23 = vpop.f32.mrb[81].mxu1 }
 0xe9a   : > { %v5755_v4 = vadd.f32 %v5754_v23, %v5704_v2  ;;  %v5756_v6 = vpop.f32.mrb[82].mxu1  ;;  %5769 = vadd.xlane.f32.xlu0 %v5768_v30  ;;  %v5834_v2 = vrot.slane %v7399_v63, %v9379_v40 }
 0xe9b   : > { %v5763_v48 = vadd.f32 %v5753_v18, %v9064_v47  ;;  %v5757_v45 = vpop.f32.mrb[83].mxu1 }
 0xe9c   : > { %v5764_v25 = vadd.f32 %v5755_v4, %v9061_v58 }
 0xe9e   : > { %v5771_v34 = vadd.f32 %v5764_v25, %v5763_v48 }
 0xea0   : > { %5772 = vadd.xlane.f32.xlu1 %v5771_v34 }
 0xf25   : > { %v5767_v5 = vpop.xlane.xlu1 %5766 }
 0xf26   : > { %v5774_v49 = vmul.f32 0.00390625, %v5767_v5 }
 0xf27   : > { %v5770_v35 = vpop.xlane.xlu0 %5769 }
 0xf28   : > { %v5777_v38 = vsub.f32 %v5759_v11, %v5774_v49  ;;  %v5778_v60 = vsub.f32 %v5760_v42, %v5774_v49  ;;  %v5775_v32 = vmul.f32 0.00390625, %v5770_v35 }
 0xf2a   : > { %v5783_v41 = vmul.f32 %v5777_v38, %v5777_v38  ;;  %v5784_v39 = vmul.f32 %v5778_v60, %v5778_v60  ;;  %v5779_v28 = vsub.f32 %v5761_v52, %v5775_v32  ;;  %v5780_v19 = vsub.f32 %v5762_v15, %v5775_v32 }
 0xf2c   : > { %v5789_v55 = vadd.f32 %v5784_v39, %v5783_v41  ;;  %v5785_v57 = vmul.f32 %v5779_v28, %v5779_v28  ;;  %v5786_v44 = vmul.f32 %v5780_v19, %v5780_v19 }
 0xf2d   : > { %v5773_v46 = vpop.xlane.xlu1 %5772 }
 0xf2e   : > { %v5776_v47 = vmul.f32 0.00390625, %v5773_v46  ;;  %5790 = vadd.xlane.f32.xlu0 %v5789_v55  ;;  %v5792_v12 = vadd.f32 %v5786_v44, %v5785_v57 }
 0xf30   : > { %v5781_v58 = vsub.f32 %v5763_v48, %v5776_v47  ;;  %v5782_v0 = vsub.f32 %v5764_v25, %v5776_v47  ;;  %5793 = vadd.xlane.f32.xlu1 %v5792_v12 }
 0xf32   : > { %v5787_v16 = vmul.f32 %v5781_v58, %v5781_v58  ;;  %v5788_v31 = vmul.f32 %v5782_v0, %v5782_v0 }
 0xf34   : > { %v5795_v24 = vadd.f32 %v5788_v31, %v5787_v16 }
 0xf36   : > { %5796 = vadd.xlane.f32.xlu0 %v5795_v24 }
 0xfbb   : > { %v5791_v62 = vpop.xlane.xlu0 %5790 }
 0xfbc   : > { %v5798_v20 = vmul.f32 0.00390625, %v5791_v62 }
 0xfbd   : > { %v5794_v56 = vpop.xlane.xlu1 %5793 }
 0xfbe   : > { %v5801_v17 = vadd.f32 1e-05, %v5798_v20  ;;  %v5799_v54 = vmul.f32 0.00390625, %v5794_v56 }
 0xfc0   : > { %7390 = vrsqrt.f32 %v5801_v17  ;;  %v5802_v21 = vadd.f32 1e-05, %v5799_v54 }
 0xfc2   : > { %7392 = vrsqrt.f32 %v5802_v21 }
 0xfc3   : > { %v5797_v53 = vpop.xlane.xlu0 %5796 }
 0xfc4   : > { %v5800_v1 = vmul.f32 0.00390625, %v5797_v53 }
 0xfc6   : > { %v5803_v26 = vadd.f32 1e-05, %v5800_v1 }
 0xfc8   : > { %7394 = vrsqrt.f32 %v5803_v26 }
 0xfca   : > { %v7391_v50 = vpop.eup %7390 }
 0xfcb   : > { %v5807_v3 = vmul.f32 %v7391_v50, %v5777_v38  ;;  %v5808_v37 = vmul.f32 %v7391_v50, %v5778_v60 }
 0xfcc   : > { %v7393_v8 = vpop.eup %7392 }
 0xfcd   : > { %v5821_v9 = vmul.f32 %v5816_v51, %v5807_v3  ;;  %v5822_v22 = vmul.f32 %v5820_v7, %v5808_v37  ;;  %v5809_v36 = vmul.f32 %v7393_v8, %v5779_v28  ;;  %v5810_v13 = vmul.f32 %v7393_v8, %v5780_v19 }
 0xfcf   : > { %v5835_v11 = vadd.f32 %v5830_v33, %v5821_v9  ;;  %v5836_v29 = vadd.f32 %v5834_v2, %v5822_v22  ;;  %v5823_v10 = vmul.f32 %v5816_v51, %v5809_v36  ;;  %v5824_v43 = vmul.f32 %v5820_v7, %v5810_v13 }
 0xfd1   : > { %5841 = vst [vmem:[%s446_s29] sm:$0xff] %v5835_v11  ;;  %5842 = vst [vmem:[%s446_s29 + $0x8] sm:$0xff] %v5836_v29  ;;  %v5837_v42 = vadd.f32 %v5830_v33, %v5823_v10  ;;  %v5838_v40 = vadd.f32 %v5834_v2, %v5824_v43 }
 0xfd2   : > { %v7395_v27 = vpop.eup %7394 }
 0xfd3   : > { %5843 = vst [vmem:[%s446_s29 + $0x10] sm:$0xff] %v5837_v42  ;;  %5844 = vst [vmem:[%s446_s29 + $0x18] sm:$0xff] %v5838_v40  ;;  %v5811_v52 = vmul.f32 %v7395_v27, %v5781_v58  ;;  %v5812_v15 = vmul.f32 %v7395_v27, %v5782_v0 }
 0xfd5   : > { %v5825_v59 = vmul.f32 %v5816_v51, %v5811_v52  ;;  %v5826_v61 = vmul.f32 %v5820_v7, %v5812_v15 }
 0xfd7   : > { %v5839_v30 = vadd.f32 %v5830_v33, %v5825_v59  ;;  %v5840_v18 = vadd.f32 %v5834_v2, %v5826_v61 }
 0xfd9   : > { %5845 = vst [vmem:[%s446_s29 + $0x20] sm:$0xff] %v5839_v30  ;;  %5846 = vst [vmem:[%s446_s29 + $0x28] sm:$0xff] %v5840_v18 }
 0xfda PF: > { %s21_s17 = sadd.s32 1, %s7406_s17  }
 0xfdb   : > { %p18_p4 = scmp.ge.s32.totalorder %s21_s17, 4  }
 0xfdd   :  { %20 = sbr.rel (!%p18_p4) target bundleno = 1 (0x1), region = 103 }

</bundles_post_ra>
